<compile_context>
chip_gen: v6e
topology: v6e:2x2x1
jax: 0.10.0
libtpu: 0.0.40
codegen_flags: <defaults>
</compile_context>

<pallas_src>
import math

import jax
import jax.numpy as jnp
from jax.experimental import pallas as pl
from jax.experimental.pallas import tpu as pltpu

LEAKY_SLOPE = 0.01        # nn.LeakyReLU default negative_slope
BN_EPS = 1e-5             # nn.BatchNorm3d default eps

TILE_R_MAX = 1024         # max lane tile over rows R = B*Do*Ho*Wo (bf16 patches)
TILE_K_MAX = 1024         # max contraction chunk over K*Cin
ACT_DTYPE = jnp.bfloat16  # inter-layer activation dtype


def _round_up(n, m):
    return ((n + m - 1) // m) * m


# ----------------------------------------------------------------------------
# Pallas kernels: K-chunked GEMM + shift (+residual) + LeakyReLU epilogue
#   grid = (R_blocks [parallel], K_blocks [arbitrary])
#   w: (Cp, tile_k) bf16, p: (tile_k, tile_r) bf16, t: (Cp, 1) f32
#   acc scratch: (Cp, tile_r) f32 (persists across the K axis)
# ----------------------------------------------------------------------------
def _conv_gemm_kernel(w_ref, p_ref, t_ref, o_ref, acc_ref):
    @pl.when(pl.program_id(1) == 0)
    def _():
        acc_ref[...] = jnp.zeros_like(acc_ref)

    acc_ref[...] += jnp.dot(w_ref[...], p_ref[...],
                            preferred_element_type=jnp.float32)

    @pl.when(pl.program_id(1) == pl.num_programs(1) - 1)
    def _():
        acc = acc_ref[...] + t_ref[...]
        acc = jnp.where(acc > 0, acc, LEAKY_SLOPE * acc)
        o_ref[...] = acc.astype(o_ref.dtype)


def _conv_gemm_residual_kernel(w_ref, p_ref, t_ref, r_ref, o_ref, acc_ref):
    @pl.when(pl.program_id(1) == 0)
    def _():
        acc_ref[...] = jnp.zeros_like(acc_ref)

    acc_ref[...] += jnp.dot(w_ref[...], p_ref[...],
                            preferred_element_type=jnp.float32)

    @pl.when(pl.program_id(1) == pl.num_programs(1) - 1)
    def _():
        acc = acc_ref[...] + t_ref[...]
        acc = acc + r_ref[...].astype(jnp.float32)     # _ResBlock: out += residual
        acc = jnp.where(acc > 0, acc, LEAKY_SLOPE * acc)
        o_ref[...] = acc.astype(o_ref.dtype)


# ----------------------------------------------------------------------------
# Wrapper glue (pure XLA data movement, channel-major layout)
# ----------------------------------------------------------------------------
def _extract_patches_cm(x, ksize, stride, padding):
    """x: (C, B, D, H, W) channel-major -> im2col (K*C, R), R = B*Do*Ho*Wo.

    Row order of the result is (kd, kh, kw, c) outer-to-inner, matching the
    weight reshape in _Conv3dLayer.  Pure strided-slice / stack / reshape data
    movement — no lane<->sublane transposes.
    """
    C, B, D, H, W = x.shape
    kd, kh, kw = ksize
    sd, sh, sw = stride
    pd, ph, pw = padding
    xp = jnp.pad(x, ((0, 0), (0, 0), (pd, pd), (ph, ph), (pw, pw)))
    Do = (D + 2 * pd - kd) // sd + 1
    Ho = (H + 2 * ph - kh) // sh + 1
    Wo = (W + 2 * pw - kw) // sw + 1
    taps = []
    for a in range(kd):
        for b in range(kh):
            for c in range(kw):
                sl = jax.lax.slice(
                    xp,
                    (0, 0, a, b, c),
                    (C, B, a + (Do - 1) * sd + 1, b + (Ho - 1) * sh + 1,
                     c + (Wo - 1) * sw + 1),
                    (1, 1, sd, sh, sw))
                taps.append(sl)                       # (C, B, Do, Ho, Wo)
    patches = jnp.stack(taps, axis=0)                 # (K, C, B, Do, Ho, Wo)
    patches = patches.reshape(kd * kh * kw * C, B * Do * Ho * Wo)
    return patches, (Do, Ho, Wo)


def _choose_tile_r(R):
    """Row tile: multiple of 128, aiming for >=2 grid blocks (v7x megacore)."""
    r128 = _round_up(R, 128)
    half = _round_up(max(128, -(-r128 // 2)), 128)
    return min(TILE_R_MAX, half)


def conv3d_bn_act(x_cm, w_p, t_p, cout, ksize, stride, padding,
                  tile_k, n_k, residual_cm=None):
    """Fused Conv3d + (folded BN scale) + shift + (residual) + LeakyReLU.

    x_cm: (Cin, B, D, H, W) bf16;  w_p: (Cp, KCp) bf16 (scale folded in);
    t_p: (Cp, 1) f32;  residual_cm: (Cout, B, Do, Ho, Wo) bf16 or None.
    Returns (Cout, B, Do, Ho, Wo) bf16 (channel-major).
    """
    _, B = x_cm.shape[0], x_cm.shape[1]
    Cp, KCp = w_p.shape
    patches, (Do, Ho, Wo) = _extract_patches_cm(x_cm, ksize, stride, padding)
    KC, R = patches.shape

    tile_r = _choose_tile_r(R)
    Rp = _round_up(R, tile_r)

    # Pad to TPU-friendly shapes; zero-padded columns/rows contribute 0 to the dot.
    p_pad = jnp.pad(patches, ((0, KCp - KC), (0, Rp - R))).astype(ACT_DTYPE)

    operands = [w_p, p_pad, t_p]
    in_specs = [
        pl.BlockSpec((Cp, tile_k), lambda i, k: (0, k)),
        pl.BlockSpec((tile_k, tile_r), lambda i, k: (k, i)),
        pl.BlockSpec((Cp, 1), lambda i, k: (0, 0)),
    ]
    if residual_cm is not None:
        res = residual_cm.reshape(cout, R)
        res_pad = jnp.pad(res, ((0, Cp - cout), (0, Rp - R))).astype(ACT_DTYPE)
        operands.append(res_pad)
        in_specs.append(pl.BlockSpec((Cp, tile_r), lambda i, k: (0, i)))
        kernel = _conv_gemm_residual_kernel
    else:
        kernel = _conv_gemm_kernel

    # Explicit scoped-VMEM budget: double-buffered inputs/outputs + f32 acc,
    # clamped so it stays safe on v7x's 64 MiB per-TC VMEM.
    est = 2 * (Cp * tile_k * 2 + tile_k * tile_r * 2 + Cp * 4 + Cp * tile_r * 2)
    if residual_cm is not None:
        est += 2 * Cp * tile_r * 2
    est += Cp * tile_r * 4
    vmem_limit = min(max(4 * est, 32 * 1024 * 1024), 48 * 1024 * 1024)

    out = pl.pallas_call(
        kernel,
        out_shape=jax.ShapeDtypeStruct((Cp, Rp), ACT_DTYPE),
        grid=(Rp // tile_r, n_k),
        in_specs=in_specs,
        out_specs=pl.BlockSpec((Cp, tile_r), lambda i, k: (0, i)),
        scratch_shapes=[pltpu.VMEM((Cp, tile_r), jnp.float32)],
        compiler_params=pltpu.CompilerParams(
            dimension_semantics=("parallel", "arbitrary"),
            vmem_limit_bytes=vmem_limit),
    )(*operands)

    # Channel-major output: no transpose, just slice + reshape.
    out = out[:cout, :R].reshape(cout, B, Do, Ho, Wo)
    return out


def upsample_nearest(x, scale):
    """nn.Upsample(scale_factor, mode='nearest') on channel-major (C,B,D,H,W)."""
    sd, sh, sw = scale
    x = jnp.repeat(x, sd, axis=2)
    x = jnp.repeat(x, sh, axis=3)
    x = jnp.repeat(x, sw, axis=4)
    return x


# ----------------------------------------------------------------------------
# Layers / model
# ----------------------------------------------------------------------------
def _init_conv(key, cin, cout, ksize):
    kd, kh, kw = ksize
    fan_in = cin * kd * kh * kw
    bound = 1.0 / math.sqrt(fan_in)            # PyTorch default conv init range
    kw_, kb_ = jax.random.split(key)
    w = jax.random.uniform(kw_, (cout, cin, kd, kh, kw), jnp.float32, -bound, bound)
    b = jax.random.uniform(kb_, (cout,), jnp.float32, -bound, bound)
    return w, b


class _Conv3dLayer:
    """Conv3d + bias (+ eval-mode BatchNorm3d) + LeakyReLU, one Pallas kernel."""

    def __init__(self, key, cin, cout, ksize, stride, padding, batch_norm=False):
        self.cout = cout
        self.ksize, self.stride, self.padding = ksize, stride, padding
        w, b = _init_conv(key, cin, cout, ksize)
        # (Cout, Cin, KD, KH, KW) -> (Cout, KD, KH, KW, Cin) -> (Cout, K*Cin)
        # matching the (kd, kh, kw, cin) im2col row order.
        w2d = jnp.transpose(w, (0, 2, 3, 4, 1)).reshape(cout, -1)
        if batch_norm:
            gamma = jnp.ones((cout,), jnp.float32)
            beta = jnp.zeros((cout,), jnp.float32)
            mean = jnp.zeros((cout,), jnp.float32)
            var = jnp.ones((cout,), jnp.float32)
            s = gamma / jnp.sqrt(var + BN_EPS)
            shift = (b - mean) * s + beta
        else:
            s = jnp.ones((cout,), jnp.float32)
            shift = b
        # Fold the BN scale into the weights: scale*(W@p)+shift == (scale*W)@p+shift.
        w_scaled = w2d * s[:, None]

        KC = w2d.shape[1]
        KC16 = _round_up(KC, 16)
        if KC16 <= TILE_K_MAX:
            self.n_k, self.tile_k = 1, KC16
        else:
            self.n_k = -(-KC16 // TILE_K_MAX)
            self.tile_k = _round_up(-(-KC16 // self.n_k), 128)
        KCp = self.tile_k * self.n_k
        Cp = _round_up(cout, 16)               # bf16 sublane-pair friendly

        self.w_p = jnp.pad(w_scaled, ((0, Cp - cout), (0, KCp - KC))).astype(ACT_DTYPE)
        self.t_p = jnp.pad(shift, (0, Cp - cout)).reshape(Cp, 1).astype(jnp.float32)

    def __call__(self, x_cm, residual=None):
        return conv3d_bn_act(x_cm, self.w_p, self.t_p, self.cout,
                             self.ksize, self.stride, self.padding,
                             self.tile_k, self.n_k, residual_cm=residual)


class _ResBlockPallas:
    """conv(3x3x3) + LeakyReLU + conv(3x3x3) + residual-add + LeakyReLU.

    The residual add + final activation are fused into the second conv kernel.
    """

    def __init__(self, key, channels):
        k1, k2 = jax.random.split(key)
        c = channels
        self.conv1 = _Conv3dLayer(k1, c, c, (3, 3, 3), (1, 1, 1), (1, 1, 1))
        self.conv2 = _Conv3dLayer(k2, c, c, (3, 3, 3), (1, 1, 1), (1, 1, 1))

    def __call__(self, x):
        h = self.conv1(x)
        return self.conv2(h, residual=x)


class ConvolutionalAutoencoder3DPallas:
    """Forward pass of ConvolutionalAutoencoder3D with Pallas conv kernels.

    Activations are kept channel-major bf16: (C, B, D, H, W), where D is the
    spectral axis (== PyTorch's (B, 1, D, H, W) after unsqueeze(1)).
    """

    def __init__(self, key, src_channels=12, latent_channels=16):
        self.src_channels = src_channels
        self.latent_channels = latent_channels
        keys = jax.random.split(key, 16)
        # ---- encoder ----
        self.e1 = _Conv3dLayer(keys[0], 1, 16, (2, 5, 5), (1, 2, 2), (0, 2, 2),
                               batch_norm=True)
        self.e2 = _Conv3dLayer(keys[1], 16, 32, (5, 5, 5), (2, 2, 2), (2, 2, 2),
                               batch_norm=True)
        self.e_res = [_ResBlockPallas(keys[2 + i], 32) for i in range(3)]
        self.e3 = _Conv3dLayer(keys[5], 32, latent_channels,
                               (5, 5, 5), (2, 2, 2), (2, 2, 2), batch_norm=True)
        # ---- decoder ----
        self.d1 = _Conv3dLayer(keys[6], latent_channels, 32,
                               (5, 5, 5), (2, 2, 2), (2, 2, 2))
        self.d_res = [_ResBlockPallas(keys[7 + i], 32) for i in range(3)]
        self.d2 = _Conv3dLayer(keys[10], 32, 16, (5, 3, 3), (2, 1, 1), (2, 1, 1))
        self.d3 = _Conv3dLayer(keys[11], 16, 1, (2, 3, 3), (2, 1, 1), (0, 1, 1))

    def encoder(self, h):
        h = self.e1(h)
        h = self.e2(h)
        for rb in self.e_res:
            h = rb(h)
        h = self.e3(h)
        return h

    def decoder(self, h):
        h = upsample_nearest(h, (2, 4, 4))
        h = self.d1(h)
        for rb in self.d_res:
            h = rb(h)
        h = upsample_nearest(h, (4, 2, 2))
        h = self.d2(h)
        h = upsample_nearest(h, (4, 2, 2))
        h = self.d3(h)
        return h

    def __call__(self, x):
        # x: (B, src_channels, H, W)  ==  PyTorch input before unsqueeze(1)
        h = x.astype(ACT_DTYPE)[None, ...]     # channel-major (C=1, B, D, H, W)
        y = self.encoder(h)
        x_hat = self.decoder(y)
        return x_hat[0].astype(jnp.float32)    # drop channel dim, back to f32


if __name__ == "__main__":
    key = jax.random.PRNGKey(0)
    k_params, k_data = jax.random.split(key)

    BATCH, SRC_CHANNELS, HEIGHT, WIDTH = 2, 12, 16, 16
    model = ConvolutionalAutoencoder3DPallas(
        k_params, src_channels=SRC_CHANNELS, latent_channels=16)

    x = jax.random.uniform(
        k_data, (BATCH, SRC_CHANNELS, HEIGHT, WIDTH), jnp.float32)

    fwd = jax.jit(model.__call__)              # whole forward = one executable
    x_hat = jax.block_until_ready(fwd(x))

    assert x_hat.shape == (BATCH, SRC_CHANNELS, HEIGHT, WIDTH), x_hat.shape
    assert x_hat.dtype == jnp.float32
    assert bool(jnp.all(jnp.isfinite(x_hat)))
    print("KERNEL_OK")
</pallas_src>

<mosaic_0001>
module attributes {stable_mosaic.version = 11 : i64} {
  func.func @_conv_gemm_kernel(%arg0: i32, %arg1: i32, %arg2: memref<16x64xbf16, #tpu.memory_space<vmem>>, %arg3: memref<64x768xbf16, #tpu.memory_space<vmem>>, %arg4: memref<16x1xf32, #tpu.memory_space<vmem>>, %arg5: memref<16x768xbf16, #tpu.memory_space<vmem>>, %arg6: memref<16x768xf32, #tpu.memory_space<vmem>>) attributes {dimension_semantics = [#tpu.dimension_semantics<parallel>, #tpu.dimension_semantics<arbitrary>], iteration_bounds = array<i64: 2, 1>, scalar_prefetch = 0 : i64, scratch_operands = 1 : i64, tpu.core_type = #tpu.core_type<tc>, window_params = [{transform_indices = @transform_0, window_bounds = array<i64: 16, 64>}, {transform_indices = @transform_1, window_bounds = array<i64: 64, 768>}, {pipeline_mode = #tpu.pipeline_mode<synchronous>, transform_indices = @transform_2, window_bounds = array<i64: 16, 1>}, {transform_indices = @transform_3, window_bounds = array<i64: 16, 768>}]} {
    %c0_i32 = arith.constant 0 : i32
    %0 = arith.cmpi eq, %arg1, %c0_i32 : i32
    %1 = arith.extui %0 : i1 to i32
    %c0_i32_0 = arith.constant 0 : i32
    %2 = arith.cmpi ne, %1, %c0_i32_0 : i32
    scf.if %2 {
      %cst_10 = arith.constant 0.000000e+00 : f32
      %12 = vector.broadcast %cst_10 : f32 to vector<16x768xf32>
      %c0_11 = arith.constant 0 : index
      %c0_12 = arith.constant 0 : index
      %13 = vector.load %arg6[%c0_11, %c0_12] : memref<16x768xf32, #tpu.memory_space<vmem>>, vector<16x768xf32>
      tpu.vector_store %arg6[%c0_11, %c0_12], %12 {strides = array<i32>} : memref<16x768xf32, #tpu.memory_space<vmem>>, vector<16x768xf32>,
    } else {
    }
    %c0 = arith.constant 0 : index
    %c0_1 = arith.constant 0 : index
    %3 = vector.load %arg6[%c0, %c0_1] : memref<16x768xf32, #tpu.memory_space<vmem>>, vector<16x768xf32>
    %c0_2 = arith.constant 0 : index
    %c0_3 = arith.constant 0 : index
    %4 = vector.load %arg2[%c0_2, %c0_3] : memref<16x64xbf16, #tpu.memory_space<vmem>>, vector<16x64xbf16>
    %c0_4 = arith.constant 0 : index
    %c0_5 = arith.constant 0 : index
    %5 = vector.load %arg3[%c0_4, %c0_5] : memref<64x768xbf16, #tpu.memory_space<vmem>>, vector<64x768xbf16>
    %cst = arith.constant dense<0.000000e+00> : vector<16x768xf32>
    %6 = tpu.matmul %4, %5, %cst {dimension_numbers = #tpu.dot_dimension_numbers<[1], [0], [0], [1], [0, 0, 1, 1], [], []>} : vector<16x64xbf16>, vector<64x768xbf16>, vector<16x768xf32> -> vector<16x768xf32>
    %7 = arith.addf %3, %6 : vector<16x768xf32>
    %c0_6 = arith.constant 0 : index
    %c0_7 = arith.constant 0 : index
    %8 = vector.load %arg6[%c0_6, %c0_7] : memref<16x768xf32, #tpu.memory_space<vmem>>, vector<16x768xf32>
    tpu.vector_store %arg6[%c0_6, %c0_7], %7 {strides = array<i32>} : memref<16x768xf32, #tpu.memory_space<vmem>>, vector<16x768xf32>,
    %c0_i32_8 = arith.constant 0 : i32
    %9 = arith.cmpi eq, %arg1, %c0_i32_8 : i32
    %10 = arith.extui %9 : i1 to i32
    %c0_i32_9 = arith.constant 0 : i32
    %11 = arith.cmpi ne, %10, %c0_i32_9 : i32
    scf.if %11 {
      %c0_10 = arith.constant 0 : index
      %c0_11 = arith.constant 0 : index
      %12 = vector.load %arg6[%c0_10, %c0_11] : memref<16x768xf32, #tpu.memory_space<vmem>>, vector<16x768xf32>
      %c0_12 = arith.constant 0 : index
      %c0_13 = arith.constant 0 : index
      %13 = vector.load %arg4[%c0_12, %c0_13] : memref<16x1xf32, #tpu.memory_space<vmem>>, vector<16x1xf32>
      %14 = vector.broadcast %13 : vector<16x1xf32> to vector<16x768xf32>
      %15 = arith.addf %12, %14 : vector<16x768xf32>
      %cst_14 = arith.constant 0.000000e+00 : f32
      %16 = vector.broadcast %cst_14 : f32 to vector<16x768xf32>
      %17 = arith.cmpf ogt, %15, %16 : vector<16x768xf32>
      %cst_15 = arith.constant 0.00999999977 : f32
      %18 = vector.broadcast %cst_15 : f32 to vector<16x768xf32>
      %19 = arith.mulf %18, %15 : vector<16x768xf32>
      %20 = arith.select %17, %15, %19 : vector<16x768xi1>, vector<16x768xf32>
      %21 = arith.truncf %20 : vector<16x768xf32> to vector<16x768xbf16>
      %c0_16 = arith.constant 0 : index
      %c0_17 = arith.constant 0 : index
      %22 = vector.load %arg5[%c0_16, %c0_17] : memref<16x768xbf16, #tpu.memory_space<vmem>>, vector<16x768xbf16>
      tpu.vector_store %arg5[%c0_16, %c0_17], %21 {strides = array<i32>} : memref<16x768xbf16, #tpu.memory_space<vmem>>, vector<16x768xbf16>,
    } else {
    }
    return
  }
  func.func @transform_0(%arg0: i32, %arg1: i32) -> (i32, i32) {
    %c0_i32 = arith.constant 0 : i32
    %c0_i32_0 = arith.constant 0 : i32
    return %c0_i32, %arg1 : i32, i32
  }
  func.func @transform_1(%arg0: i32, %arg1: i32) -> (i32, i32) {
    %c0_i32 = arith.constant 0 : i32
    return %arg1, %arg0 : i32, i32
  }
  func.func @transform_2(%arg0: i32, %arg1: i32) -> (i32, i32) {
    %c0_i32 = arith.constant 0 : i32
    %c0_i32_0 = arith.constant 0 : i32
    %c0_i32_1 = arith.constant 0 : i32
    return %c0_i32, %c0_i32_0 : i32, i32
  }
  func.func @transform_3(%arg0: i32, %arg1: i32) -> (i32, i32) {
    %c0_i32 = arith.constant 0 : i32
    %c0_i32_0 = arith.constant 0 : i32
    return %c0_i32, %arg0 : i32, i32
  }
}

module attributes {stable_mosaic.version = 11 : i64} {
  func.func @_conv_gemm_kernel(%arg0: i32, %arg1: i32, %arg2: memref<32x1024xbf16, #tpu.memory_space<vmem>>, %arg3: memref<1024x128xbf16, #tpu.memory_space<vmem>>, %arg4: memref<32x1xf32, #tpu.memory_space<vmem>>, %arg5: memref<32x128xbf16, #tpu.memory_space<vmem>>, %arg6: memref<32x128xf32, #tpu.memory_space<vmem>>) attributes {dimension_semantics = [#tpu.dimension_semantics<parallel>, #tpu.dimension_semantics<arbitrary>], iteration_bounds = array<i64: 2, 2>, scalar_prefetch = 0 : i64, scratch_operands = 1 : i64, tpu.core_type = #tpu.core_type<tc>, window_params = [{transform_indices = @transform_0, window_bounds = array<i64: 32, 1024>}, {transform_indices = @transform_1, window_bounds = array<i64: 1024, 128>}, {pipeline_mode = #tpu.pipeline_mode<synchronous>, transform_indices = @transform_2, window_bounds = array<i64: 32, 1>}, {transform_indices = @transform_3, window_bounds = array<i64: 32, 128>}]} {
    %c0_i32 = arith.constant 0 : i32
    %0 = arith.cmpi eq, %arg1, %c0_i32 : i32
    %1 = arith.extui %0 : i1 to i32
    %c0_i32_0 = arith.constant 0 : i32
    %2 = arith.cmpi ne, %1, %c0_i32_0 : i32
    scf.if %2 {
      %cst_9 = arith.constant 0.000000e+00 : f32
      %12 = vector.broadcast %cst_9 : f32 to vector<32x128xf32>
      %c0_10 = arith.constant 0 : index
      %c0_11 = arith.constant 0 : index
      %13 = vector.load %arg6[%c0_10, %c0_11] : memref<32x128xf32, #tpu.memory_space<vmem>>, vector<32x128xf32>
      tpu.vector_store %arg6[%c0_10, %c0_11], %12 {strides = array<i32>} : memref<32x128xf32, #tpu.memory_space<vmem>>, vector<32x128xf32>,
    } else {
    }
    %c0 = arith.constant 0 : index
    %c0_1 = arith.constant 0 : index
    %3 = vector.load %arg6[%c0, %c0_1] : memref<32x128xf32, #tpu.memory_space<vmem>>, vector<32x128xf32>
    %c0_2 = arith.constant 0 : index
    %c0_3 = arith.constant 0 : index
    %4 = vector.load %arg2[%c0_2, %c0_3] : memref<32x1024xbf16, #tpu.memory_space<vmem>>, vector<32x1024xbf16>
    %c0_4 = arith.constant 0 : index
    %c0_5 = arith.constant 0 : index
    %5 = vector.load %arg3[%c0_4, %c0_5] : memref<1024x128xbf16, #tpu.memory_space<vmem>>, vector<1024x128xbf16>
    %cst = arith.constant dense<0.000000e+00> : vector<32x128xf32>
    %6 = tpu.matmul %4, %5, %cst {dimension_numbers = #tpu.dot_dimension_numbers<[1], [0], [0], [1], [0, 0, 1, 1], [], []>} : vector<32x1024xbf16>, vector<1024x128xbf16>, vector<32x128xf32> -> vector<32x128xf32>
    %7 = arith.addf %3, %6 : vector<32x128xf32>
    %c0_6 = arith.constant 0 : index
    %c0_7 = arith.constant 0 : index
    %8 = vector.load %arg6[%c0_6, %c0_7] : memref<32x128xf32, #tpu.memory_space<vmem>>, vector<32x128xf32>
    tpu.vector_store %arg6[%c0_6, %c0_7], %7 {strides = array<i32>} : memref<32x128xf32, #tpu.memory_space<vmem>>, vector<32x128xf32>,
    %c1_i32 = arith.constant 1 : i32
    %9 = arith.cmpi eq, %arg1, %c1_i32 : i32
    %10 = arith.extui %9 : i1 to i32
    %c0_i32_8 = arith.constant 0 : i32
    %11 = arith.cmpi ne, %10, %c0_i32_8 : i32
    scf.if %11 {
      %c0_9 = arith.constant 0 : index
      %c0_10 = arith.constant 0 : index
      %12 = vector.load %arg6[%c0_9, %c0_10] : memref<32x128xf32, #tpu.memory_space<vmem>>, vector<32x128xf32>
      %c0_11 = arith.constant 0 : index
      %c0_12 = arith.constant 0 : index
      %13 = vector.load %arg4[%c0_11, %c0_12] : memref<32x1xf32, #tpu.memory_space<vmem>>, vector<32x1xf32>
      %14 = vector.broadcast %13 : vector<32x1xf32> to vector<32x128xf32>
      %15 = arith.addf %12, %14 : vector<32x128xf32>
      %cst_13 = arith.constant 0.000000e+00 : f32
      %16 = vector.broadcast %cst_13 : f32 to vector<32x128xf32>
      %17 = arith.cmpf ogt, %15, %16 : vector<32x128xf32>
      %cst_14 = arith.constant 0.00999999977 : f32
      %18 = vector.broadcast %cst_14 : f32 to vector<32x128xf32>
      %19 = arith.mulf %18, %15 : vector<32x128xf32>
      %20 = arith.select %17, %15, %19 : vector<32x128xi1>, vector<32x128xf32>
      %21 = arith.truncf %20 : vector<32x128xf32> to vector<32x128xbf16>
      %c0_15 = arith.constant 0 : index
      %c0_16 = arith.constant 0 : index
      %22 = vector.load %arg5[%c0_15, %c0_16] : memref<32x128xbf16, #tpu.memory_space<vmem>>, vector<32x128xbf16>
      tpu.vector_store %arg5[%c0_15, %c0_16], %21 {strides = array<i32>} : memref<32x128xbf16, #tpu.memory_space<vmem>>, vector<32x128xbf16>,
    } else {
    }
    return
  }
  func.func @transform_0(%arg0: i32, %arg1: i32) -> (i32, i32) {
    %c0_i32 = arith.constant 0 : i32
    %c0_i32_0 = arith.constant 0 : i32
    return %c0_i32, %arg1 : i32, i32
  }
  func.func @transform_1(%arg0: i32, %arg1: i32) -> (i32, i32) {
    %c0_i32 = arith.constant 0 : i32
    return %arg1, %arg0 : i32, i32
  }
  func.func @transform_2(%arg0: i32, %arg1: i32) -> (i32, i32) {
    %c0_i32 = arith.constant 0 : i32
    %c0_i32_0 = arith.constant 0 : i32
    %c0_i32_1 = arith.constant 0 : i32
    return %c0_i32, %c0_i32_0 : i32, i32
  }
  func.func @transform_3(%arg0: i32, %arg1: i32) -> (i32, i32) {
    %c0_i32 = arith.constant 0 : i32
    %c0_i32_0 = arith.constant 0 : i32
    return %c0_i32, %arg0 : i32, i32
  }
}

module attributes {stable_mosaic.version = 11 : i64} {
  func.func @_conv_gemm_kernel(%arg0: i32, %arg1: i32, %arg2: memref<32x864xbf16, #tpu.memory_space<vmem>>, %arg3: memref<864x128xbf16, #tpu.memory_space<vmem>>, %arg4: memref<32x1xf32, #tpu.memory_space<vmem>>, %arg5: memref<32x128xbf16, #tpu.memory_space<vmem>>, %arg6: memref<32x128xf32, #tpu.memory_space<vmem>>) attributes {dimension_semantics = [#tpu.dimension_semantics<parallel>, #tpu.dimension_semantics<arbitrary>], iteration_bounds = array<i64: 2, 1>, scalar_prefetch = 0 : i64, scratch_operands = 1 : i64, tpu.core_type = #tpu.core_type<tc>, window_params = [{transform_indices = @transform_0, window_bounds = array<i64: 32, 864>}, {transform_indices = @transform_1, window_bounds = array<i64: 864, 128>}, {pipeline_mode = #tpu.pipeline_mode<synchronous>, transform_indices = @transform_2, window_bounds = array<i64: 32, 1>}, {transform_indices = @transform_3, window_bounds = array<i64: 32, 128>}]} {
    %c0_i32 = arith.constant 0 : i32
    %0 = arith.cmpi eq, %arg1, %c0_i32 : i32
    %1 = arith.extui %0 : i1 to i32
    %c0_i32_0 = arith.constant 0 : i32
    %2 = arith.cmpi ne, %1, %c0_i32_0 : i32
    scf.if %2 {
      %cst_10 = arith.constant 0.000000e+00 : f32
      %12 = vector.broadcast %cst_10 : f32 to vector<32x128xf32>
      %c0_11 = arith.constant 0 : index
      %c0_12 = arith.constant 0 : index
      %13 = vector.load %arg6[%c0_11, %c0_12] : memref<32x128xf32, #tpu.memory_space<vmem>>, vector<32x128xf32>
      tpu.vector_store %arg6[%c0_11, %c0_12], %12 {strides = array<i32>} : memref<32x128xf32, #tpu.memory_space<vmem>>, vector<32x128xf32>,
    } else {
    }
    %c0 = arith.constant 0 : index
    %c0_1 = arith.constant 0 : index
    %3 = vector.load %arg6[%c0, %c0_1] : memref<32x128xf32, #tpu.memory_space<vmem>>, vector<32x128xf32>
    %c0_2 = arith.constant 0 : index
    %c0_3 = arith.constant 0 : index
    %4 = vector.load %arg2[%c0_2, %c0_3] : memref<32x864xbf16, #tpu.memory_space<vmem>>, vector<32x864xbf16>
    %c0_4 = arith.constant 0 : index
    %c0_5 = arith.constant 0 : index
    %5 = vector.load %arg3[%c0_4, %c0_5] : memref<864x128xbf16, #tpu.memory_space<vmem>>, vector<864x128xbf16>
    %cst = arith.constant dense<0.000000e+00> : vector<32x128xf32>
    %6 = tpu.matmul %4, %5, %cst {dimension_numbers = #tpu.dot_dimension_numbers<[1], [0], [0], [1], [0, 0, 1, 1], [], []>} : vector<32x864xbf16>, vector<864x128xbf16>, vector<32x128xf32> -> vector<32x128xf32>
    %7 = arith.addf %3, %6 : vector<32x128xf32>
    %c0_6 = arith.constant 0 : index
    %c0_7 = arith.constant 0 : index
    %8 = vector.load %arg6[%c0_6, %c0_7] : memref<32x128xf32, #tpu.memory_space<vmem>>, vector<32x128xf32>
    tpu.vector_store %arg6[%c0_6, %c0_7], %7 {strides = array<i32>} : memref<32x128xf32, #tpu.memory_space<vmem>>, vector<32x128xf32>,
    %c0_i32_8 = arith.constant 0 : i32
    %9 = arith.cmpi eq, %arg1, %c0_i32_8 : i32
    %10 = arith.extui %9 : i1 to i32
    %c0_i32_9 = arith.constant 0 : i32
    %11 = arith.cmpi ne, %10, %c0_i32_9 : i32
    scf.if %11 {
      %c0_10 = arith.constant 0 : index
      %c0_11 = arith.constant 0 : index
      %12 = vector.load %arg6[%c0_10, %c0_11] : memref<32x128xf32, #tpu.memory_space<vmem>>, vector<32x128xf32>
      %c0_12 = arith.constant 0 : index
      %c0_13 = arith.constant 0 : index
      %13 = vector.load %arg4[%c0_12, %c0_13] : memref<32x1xf32, #tpu.memory_space<vmem>>, vector<32x1xf32>
      %14 = vector.broadcast %13 : vector<32x1xf32> to vector<32x128xf32>
      %15 = arith.addf %12, %14 : vector<32x128xf32>
      %cst_14 = arith.constant 0.000000e+00 : f32
      %16 = vector.broadcast %cst_14 : f32 to vector<32x128xf32>
      %17 = arith.cmpf ogt, %15, %16 : vector<32x128xf32>
      %cst_15 = arith.constant 0.00999999977 : f32
      %18 = vector.broadcast %cst_15 : f32 to vector<32x128xf32>
      %19 = arith.mulf %18, %15 : vector<32x128xf32>
      %20 = arith.select %17, %15, %19 : vector<32x128xi1>, vector<32x128xf32>
      %21 = arith.truncf %20 : vector<32x128xf32> to vector<32x128xbf16>
      %c0_16 = arith.constant 0 : index
      %c0_17 = arith.constant 0 : index
      %22 = vector.load %arg5[%c0_16, %c0_17] : memref<32x128xbf16, #tpu.memory_space<vmem>>, vector<32x128xbf16>
      tpu.vector_store %arg5[%c0_16, %c0_17], %21 {strides = array<i32>} : memref<32x128xbf16, #tpu.memory_space<vmem>>, vector<32x128xbf16>,
    } else {
    }
    return
  }
  func.func @transform_0(%arg0: i32, %arg1: i32) -> (i32, i32) {
    %c0_i32 = arith.constant 0 : i32
    %c0_i32_0 = arith.constant 0 : i32
    return %c0_i32, %arg1 : i32, i32
  }
  func.func @transform_1(%arg0: i32, %arg1: i32) -> (i32, i32) {
    %c0_i32 = arith.constant 0 : i32
    return %arg1, %arg0 : i32, i32
  }
  func.func @transform_2(%arg0: i32, %arg1: i32) -> (i32, i32) {
    %c0_i32 = arith.constant 0 : i32
    %c0_i32_0 = arith.constant 0 : i32
    %c0_i32_1 = arith.constant 0 : i32
    return %c0_i32, %c0_i32_0 : i32, i32
  }
  func.func @transform_3(%arg0: i32, %arg1: i32) -> (i32, i32) {
    %c0_i32 = arith.constant 0 : i32
    %c0_i32_0 = arith.constant 0 : i32
    return %c0_i32, %arg0 : i32, i32
  }
}

module attributes {stable_mosaic.version = 11 : i64} {
  func.func @_conv_gemm_residual_kernel(%arg0: i32, %arg1: i32, %arg2: memref<32x864xbf16, #tpu.memory_space<vmem>>, %arg3: memref<864x128xbf16, #tpu.memory_space<vmem>>, %arg4: memref<32x1xf32, #tpu.memory_space<vmem>>, %arg5: memref<32x128xbf16, #tpu.memory_space<vmem>>, %arg6: memref<32x128xbf16, #tpu.memory_space<vmem>>, %arg7: memref<32x128xf32, #tpu.memory_space<vmem>>) attributes {dimension_semantics = [#tpu.dimension_semantics<parallel>, #tpu.dimension_semantics<arbitrary>], iteration_bounds = array<i64: 2, 1>, scalar_prefetch = 0 : i64, scratch_operands = 1 : i64, tpu.core_type = #tpu.core_type<tc>, window_params = [{transform_indices = @transform_0, window_bounds = array<i64: 32, 864>}, {transform_indices = @transform_1, window_bounds = array<i64: 864, 128>}, {pipeline_mode = #tpu.pipeline_mode<synchronous>, transform_indices = @transform_2, window_bounds = array<i64: 32, 1>}, {transform_indices = @transform_3, window_bounds = array<i64: 32, 128>}, {transform_indices = @transform_4, window_bounds = array<i64: 32, 128>}]} {
    %c0_i32 = arith.constant 0 : i32
    %0 = arith.cmpi eq, %arg1, %c0_i32 : i32
    %1 = arith.extui %0 : i1 to i32
    %c0_i32_0 = arith.constant 0 : i32
    %2 = arith.cmpi ne, %1, %c0_i32_0 : i32
    scf.if %2 {
      %cst_10 = arith.constant 0.000000e+00 : f32
      %12 = vector.broadcast %cst_10 : f32 to vector<32x128xf32>
      %c0_11 = arith.constant 0 : index
      %c0_12 = arith.constant 0 : index
      %13 = vector.load %arg7[%c0_11, %c0_12] : memref<32x128xf32, #tpu.memory_space<vmem>>, vector<32x128xf32>
      tpu.vector_store %arg7[%c0_11, %c0_12], %12 {strides = array<i32>} : memref<32x128xf32, #tpu.memory_space<vmem>>, vector<32x128xf32>,
    } else {
    }
    %c0 = arith.constant 0 : index
    %c0_1 = arith.constant 0 : index
    %3 = vector.load %arg7[%c0, %c0_1] : memref<32x128xf32, #tpu.memory_space<vmem>>, vector<32x128xf32>
    %c0_2 = arith.constant 0 : index
    %c0_3 = arith.constant 0 : index
    %4 = vector.load %arg2[%c0_2, %c0_3] : memref<32x864xbf16, #tpu.memory_space<vmem>>, vector<32x864xbf16>
    %c0_4 = arith.constant 0 : index
    %c0_5 = arith.constant 0 : index
    %5 = vector.load %arg3[%c0_4, %c0_5] : memref<864x128xbf16, #tpu.memory_space<vmem>>, vector<864x128xbf16>
    %cst = arith.constant dense<0.000000e+00> : vector<32x128xf32>
    %6 = tpu.matmul %4, %5, %cst {dimension_numbers = #tpu.dot_dimension_numbers<[1], [0], [0], [1], [0, 0, 1, 1], [], []>} : vector<32x864xbf16>, vector<864x128xbf16>, vector<32x128xf32> -> vector<32x128xf32>
    %7 = arith.addf %3, %6 : vector<32x128xf32>
    %c0_6 = arith.constant 0 : index
    %c0_7 = arith.constant 0 : index
    %8 = vector.load %arg7[%c0_6, %c0_7] : memref<32x128xf32, #tpu.memory_space<vmem>>, vector<32x128xf32>
    tpu.vector_store %arg7[%c0_6, %c0_7], %7 {strides = array<i32>} : memref<32x128xf32, #tpu.memory_space<vmem>>, vector<32x128xf32>,
    %c0_i32_8 = arith.constant 0 : i32
    %9 = arith.cmpi eq, %arg1, %c0_i32_8 : i32
    %10 = arith.extui %9 : i1 to i32
    %c0_i32_9 = arith.constant 0 : i32
    %11 = arith.cmpi ne, %10, %c0_i32_9 : i32
    scf.if %11 {
      %c0_10 = arith.constant 0 : index
      %c0_11 = arith.constant 0 : index
      %12 = vector.load %arg7[%c0_10, %c0_11] : memref<32x128xf32, #tpu.memory_space<vmem>>, vector<32x128xf32>
      %c0_12 = arith.constant 0 : index
      %c0_13 = arith.constant 0 : index
      %13 = vector.load %arg4[%c0_12, %c0_13] : memref<32x1xf32, #tpu.memory_space<vmem>>, vector<32x1xf32>
      %14 = vector.broadcast %13 : vector<32x1xf32> to vector<32x128xf32>
      %15 = arith.addf %12, %14 : vector<32x128xf32>
      %c0_14 = arith.constant 0 : index
      %c0_15 = arith.constant 0 : index
      %16 = vector.load %arg5[%c0_14, %c0_15] : memref<32x128xbf16, #tpu.memory_space<vmem>>, vector<32x128xbf16>
      %17 = arith.extf %16 : vector<32x128xbf16> to vector<32x128xf32>
      %18 = arith.addf %15, %17 : vector<32x128xf32>
      %cst_16 = arith.constant 0.000000e+00 : f32
      %19 = vector.broadcast %cst_16 : f32 to vector<32x128xf32>
      %20 = arith.cmpf ogt, %18, %19 : vector<32x128xf32>
      %cst_17 = arith.constant 0.00999999977 : f32
      %21 = vector.broadcast %cst_17 : f32 to vector<32x128xf32>
      %22 = arith.mulf %21, %18 : vector<32x128xf32>
      %23 = arith.select %20, %18, %22 : vector<32x128xi1>, vector<32x128xf32>
      %24 = arith.truncf %23 : vector<32x128xf32> to vector<32x128xbf16>
      %c0_18 = arith.constant 0 : index
      %c0_19 = arith.constant 0 : index
      %25 = vector.load %arg6[%c0_18, %c0_19] : memref<32x128xbf16, #tpu.memory_space<vmem>>, vector<32x128xbf16>
      tpu.vector_store %arg6[%c0_18, %c0_19], %24 {strides = array<i32>} : memref<32x128xbf16, #tpu.memory_space<vmem>>, vector<32x128xbf16>,
    } else {
    }
    return
  }
  func.func @transform_0(%arg0: i32, %arg1: i32) -> (i32, i32) {
    %c0_i32 = arith.constant 0 : i32
    %c0_i32_0 = arith.constant 0 : i32
    return %c0_i32, %arg1 : i32, i32
  }
  func.func @transform_1(%arg0: i32, %arg1: i32) -> (i32, i32) {
    %c0_i32 = arith.constant 0 : i32
    return %arg1, %arg0 : i32, i32
  }
  func.func @transform_2(%arg0: i32, %arg1: i32) -> (i32, i32) {
    %c0_i32 = arith.constant 0 : i32
    %c0_i32_0 = arith.constant 0 : i32
    %c0_i32_1 = arith.constant 0 : i32
    return %c0_i32, %c0_i32_0 : i32, i32
  }
  func.func @transform_3(%arg0: i32, %arg1: i32) -> (i32, i32) {
    %c0_i32 = arith.constant 0 : i32
    %c0_i32_0 = arith.constant 0 : i32
    return %c0_i32, %arg0 : i32, i32
  }
  func.func @transform_4(%arg0: i32, %arg1: i32) -> (i32, i32) {
    %c0_i32 = arith.constant 0 : i32
    %c0_i32_0 = arith.constant 0 : i32
    return %c0_i32, %arg0 : i32, i32
  }
}

module attributes {stable_mosaic.version = 11 : i64} {
  func.func @_conv_gemm_kernel(%arg0: i32, %arg1: i32, %arg2: memref<16x1024xbf16, #tpu.memory_space<vmem>>, %arg3: memref<1024x128xbf16, #tpu.memory_space<vmem>>, %arg4: memref<16x1xf32, #tpu.memory_space<vmem>>, %arg5: memref<16x128xbf16, #tpu.memory_space<vmem>>, %arg6: memref<16x128xf32, #tpu.memory_space<vmem>>) attributes {dimension_semantics = [#tpu.dimension_semantics<parallel>, #tpu.dimension_semantics<arbitrary>], iteration_bounds = array<i64: 1, 4>, scalar_prefetch = 0 : i64, scratch_operands = 1 : i64, tpu.core_type = #tpu.core_type<tc>, window_params = [{transform_indices = @transform_0, window_bounds = array<i64: 16, 1024>}, {transform_indices = @transform_1, window_bounds = array<i64: 1024, 128>}, {pipeline_mode = #tpu.pipeline_mode<synchronous>, transform_indices = @transform_2, window_bounds = array<i64: 16, 1>}, {transform_indices = @transform_3, window_bounds = array<i64: 16, 128>}]} {
    %c0_i32 = arith.constant 0 : i32
    %0 = arith.cmpi eq, %arg1, %c0_i32 : i32
    %1 = arith.extui %0 : i1 to i32
    %c0_i32_0 = arith.constant 0 : i32
    %2 = arith.cmpi ne, %1, %c0_i32_0 : i32
    scf.if %2 {
      %cst_9 = arith.constant 0.000000e+00 : f32
      %12 = vector.broadcast %cst_9 : f32 to vector<16x128xf32>
      %c0_10 = arith.constant 0 : index
      %c0_11 = arith.constant 0 : index
      %13 = vector.load %arg6[%c0_10, %c0_11] : memref<16x128xf32, #tpu.memory_space<vmem>>, vector<16x128xf32>
      tpu.vector_store %arg6[%c0_10, %c0_11], %12 {strides = array<i32>} : memref<16x128xf32, #tpu.memory_space<vmem>>, vector<16x128xf32>,
    } else {
    }
    %c0 = arith.constant 0 : index
    %c0_1 = arith.constant 0 : index
    %3 = vector.load %arg6[%c0, %c0_1] : memref<16x128xf32, #tpu.memory_space<vmem>>, vector<16x128xf32>
    %c0_2 = arith.constant 0 : index
    %c0_3 = arith.constant 0 : index
    %4 = vector.load %arg2[%c0_2, %c0_3] : memref<16x1024xbf16, #tpu.memory_space<vmem>>, vector<16x1024xbf16>
    %c0_4 = arith.constant 0 : index
    %c0_5 = arith.constant 0 : index
    %5 = vector.load %arg3[%c0_4, %c0_5] : memref<1024x128xbf16, #tpu.memory_space<vmem>>, vector<1024x128xbf16>
    %cst = arith.constant dense<0.000000e+00> : vector<16x128xf32>
    %6 = tpu.matmul %4, %5, %cst {dimension_numbers = #tpu.dot_dimension_numbers<[1], [0], [0], [1], [0, 0, 1, 1], [], []>} : vector<16x1024xbf16>, vector<1024x128xbf16>, vector<16x128xf32> -> vector<16x128xf32>
    %7 = arith.addf %3, %6 : vector<16x128xf32>
    %c0_6 = arith.constant 0 : index
    %c0_7 = arith.constant 0 : index
    %8 = vector.load %arg6[%c0_6, %c0_7] : memref<16x128xf32, #tpu.memory_space<vmem>>, vector<16x128xf32>
    tpu.vector_store %arg6[%c0_6, %c0_7], %7 {strides = array<i32>} : memref<16x128xf32, #tpu.memory_space<vmem>>, vector<16x128xf32>,
    %c3_i32 = arith.constant 3 : i32
    %9 = arith.cmpi eq, %arg1, %c3_i32 : i32
    %10 = arith.extui %9 : i1 to i32
    %c0_i32_8 = arith.constant 0 : i32
    %11 = arith.cmpi ne, %10, %c0_i32_8 : i32
    scf.if %11 {
      %c0_9 = arith.constant 0 : index
      %c0_10 = arith.constant 0 : index
      %12 = vector.load %arg6[%c0_9, %c0_10] : memref<16x128xf32, #tpu.memory_space<vmem>>, vector<16x128xf32>
      %c0_11 = arith.constant 0 : index
      %c0_12 = arith.constant 0 : index
      %13 = vector.load %arg4[%c0_11, %c0_12] : memref<16x1xf32, #tpu.memory_space<vmem>>, vector<16x1xf32>
      %14 = vector.broadcast %13 : vector<16x1xf32> to vector<16x128xf32>
      %15 = arith.addf %12, %14 : vector<16x128xf32>
      %cst_13 = arith.constant 0.000000e+00 : f32
      %16 = vector.broadcast %cst_13 : f32 to vector<16x128xf32>
      %17 = arith.cmpf ogt, %15, %16 : vector<16x128xf32>
      %cst_14 = arith.constant 0.00999999977 : f32
      %18 = vector.broadcast %cst_14 : f32 to vector<16x128xf32>
      %19 = arith.mulf %18, %15 : vector<16x128xf32>
      %20 = arith.select %17, %15, %19 : vector<16x128xi1>, vector<16x128xf32>
      %21 = arith.truncf %20 : vector<16x128xf32> to vector<16x128xbf16>
      %c0_15 = arith.constant 0 : index
      %c0_16 = arith.constant 0 : index
      %22 = vector.load %arg5[%c0_15, %c0_16] : memref<16x128xbf16, #tpu.memory_space<vmem>>, vector<16x128xbf16>
      tpu.vector_store %arg5[%c0_15, %c0_16], %21 {strides = array<i32>} : memref<16x128xbf16, #tpu.memory_space<vmem>>, vector<16x128xbf16>,
    } else {
    }
    return
  }
  func.func @transform_0(%arg0: i32, %arg1: i32) -> (i32, i32) {
    %c0_i32 = arith.constant 0 : i32
    %c0_i32_0 = arith.constant 0 : i32
    return %c0_i32, %arg1 : i32, i32
  }
  func.func @transform_1(%arg0: i32, %arg1: i32) -> (i32, i32) {
    %c0_i32 = arith.constant 0 : i32
    return %arg1, %arg0 : i32, i32
  }
  func.func @transform_2(%arg0: i32, %arg1: i32) -> (i32, i32) {
    %c0_i32 = arith.constant 0 : i32
    %c0_i32_0 = arith.constant 0 : i32
    %c0_i32_1 = arith.constant 0 : i32
    return %c0_i32, %c0_i32_0 : i32, i32
  }
  func.func @transform_3(%arg0: i32, %arg1: i32) -> (i32, i32) {
    %c0_i32 = arith.constant 0 : i32
    %c0_i32_0 = arith.constant 0 : i32
    return %c0_i32, %arg0 : i32, i32
  }
}

module attributes {stable_mosaic.version = 11 : i64} {
  func.func @_conv_gemm_kernel(%arg0: i32, %arg1: i32, %arg2: memref<32x1024xbf16, #tpu.memory_space<vmem>>, %arg3: memref<1024x128xbf16, #tpu.memory_space<vmem>>, %arg4: memref<32x1xf32, #tpu.memory_space<vmem>>, %arg5: memref<32x128xbf16, #tpu.memory_space<vmem>>, %arg6: memref<32x128xf32, #tpu.memory_space<vmem>>) attributes {dimension_semantics = [#tpu.dimension_semantics<parallel>, #tpu.dimension_semantics<arbitrary>], iteration_bounds = array<i64: 1, 2>, scalar_prefetch = 0 : i64, scratch_operands = 1 : i64, tpu.core_type = #tpu.core_type<tc>, window_params = [{transform_indices = @transform_0, window_bounds = array<i64: 32, 1024>}, {transform_indices = @transform_1, window_bounds = array<i64: 1024, 128>}, {pipeline_mode = #tpu.pipeline_mode<synchronous>, transform_indices = @transform_2, window_bounds = array<i64: 32, 1>}, {transform_indices = @transform_3, window_bounds = array<i64: 32, 128>}]} {
    %c0_i32 = arith.constant 0 : i32
    %0 = arith.cmpi eq, %arg1, %c0_i32 : i32
    %1 = arith.extui %0 : i1 to i32
    %c0_i32_0 = arith.constant 0 : i32
    %2 = arith.cmpi ne, %1, %c0_i32_0 : i32
    scf.if %2 {
      %cst_9 = arith.constant 0.000000e+00 : f32
      %12 = vector.broadcast %cst_9 : f32 to vector<32x128xf32>
      %c0_10 = arith.constant 0 : index
      %c0_11 = arith.constant 0 : index
      %13 = vector.load %arg6[%c0_10, %c0_11] : memref<32x128xf32, #tpu.memory_space<vmem>>, vector<32x128xf32>
      tpu.vector_store %arg6[%c0_10, %c0_11], %12 {strides = array<i32>} : memref<32x128xf32, #tpu.memory_space<vmem>>, vector<32x128xf32>,
    } else {
    }
    %c0 = arith.constant 0 : index
    %c0_1 = arith.constant 0 : index
    %3 = vector.load %arg6[%c0, %c0_1] : memref<32x128xf32, #tpu.memory_space<vmem>>, vector<32x128xf32>
    %c0_2 = arith.constant 0 : index
    %c0_3 = arith.constant 0 : index
    %4 = vector.load %arg2[%c0_2, %c0_3] : memref<32x1024xbf16, #tpu.memory_space<vmem>>, vector<32x1024xbf16>
    %c0_4 = arith.constant 0 : index
    %c0_5 = arith.constant 0 : index
    %5 = vector.load %arg3[%c0_4, %c0_5] : memref<1024x128xbf16, #tpu.memory_space<vmem>>, vector<1024x128xbf16>
    %cst = arith.constant dense<0.000000e+00> : vector<32x128xf32>
    %6 = tpu.matmul %4, %5, %cst {dimension_numbers = #tpu.dot_dimension_numbers<[1], [0], [0], [1], [0, 0, 1, 1], [], []>} : vector<32x1024xbf16>, vector<1024x128xbf16>, vector<32x128xf32> -> vector<32x128xf32>
    %7 = arith.addf %3, %6 : vector<32x128xf32>
    %c0_6 = arith.constant 0 : index
    %c0_7 = arith.constant 0 : index
    %8 = vector.load %arg6[%c0_6, %c0_7] : memref<32x128xf32, #tpu.memory_space<vmem>>, vector<32x128xf32>
    tpu.vector_store %arg6[%c0_6, %c0_7], %7 {strides = array<i32>} : memref<32x128xf32, #tpu.memory_space<vmem>>, vector<32x128xf32>,
    %c1_i32 = arith.constant 1 : i32
    %9 = arith.cmpi eq, %arg1, %c1_i32 : i32
    %10 = arith.extui %9 : i1 to i32
    %c0_i32_8 = arith.constant 0 : i32
    %11 = arith.cmpi ne, %10, %c0_i32_8 : i32
    scf.if %11 {
      %c0_9 = arith.constant 0 : index
      %c0_10 = arith.constant 0 : index
      %12 = vector.load %arg6[%c0_9, %c0_10] : memref<32x128xf32, #tpu.memory_space<vmem>>, vector<32x128xf32>
      %c0_11 = arith.constant 0 : index
      %c0_12 = arith.constant 0 : index
      %13 = vector.load %arg4[%c0_11, %c0_12] : memref<32x1xf32, #tpu.memory_space<vmem>>, vector<32x1xf32>
      %14 = vector.broadcast %13 : vector<32x1xf32> to vector<32x128xf32>
      %15 = arith.addf %12, %14 : vector<32x128xf32>
      %cst_13 = arith.constant 0.000000e+00 : f32
      %16 = vector.broadcast %cst_13 : f32 to vector<32x128xf32>
      %17 = arith.cmpf ogt, %15, %16 : vector<32x128xf32>
      %cst_14 = arith.constant 0.00999999977 : f32
      %18 = vector.broadcast %cst_14 : f32 to vector<32x128xf32>
      %19 = arith.mulf %18, %15 : vector<32x128xf32>
      %20 = arith.select %17, %15, %19 : vector<32x128xi1>, vector<32x128xf32>
      %21 = arith.truncf %20 : vector<32x128xf32> to vector<32x128xbf16>
      %c0_15 = arith.constant 0 : index
      %c0_16 = arith.constant 0 : index
      %22 = vector.load %arg5[%c0_15, %c0_16] : memref<32x128xbf16, #tpu.memory_space<vmem>>, vector<32x128xbf16>
      tpu.vector_store %arg5[%c0_15, %c0_16], %21 {strides = array<i32>} : memref<32x128xbf16, #tpu.memory_space<vmem>>, vector<32x128xbf16>,
    } else {
    }
    return
  }
  func.func @transform_0(%arg0: i32, %arg1: i32) -> (i32, i32) {
    %c0_i32 = arith.constant 0 : i32
    %c0_i32_0 = arith.constant 0 : i32
    return %c0_i32, %arg1 : i32, i32
  }
  func.func @transform_1(%arg0: i32, %arg1: i32) -> (i32, i32) {
    %c0_i32 = arith.constant 0 : i32
    return %arg1, %arg0 : i32, i32
  }
  func.func @transform_2(%arg0: i32, %arg1: i32) -> (i32, i32) {
    %c0_i32 = arith.constant 0 : i32
    %c0_i32_0 = arith.constant 0 : i32
    %c0_i32_1 = arith.constant 0 : i32
    return %c0_i32, %c0_i32_0 : i32, i32
  }
  func.func @transform_3(%arg0: i32, %arg1: i32) -> (i32, i32) {
    %c0_i32 = arith.constant 0 : i32
    %c0_i32_0 = arith.constant 0 : i32
    return %c0_i32, %arg0 : i32, i32
  }
}

module attributes {stable_mosaic.version = 11 : i64} {
  func.func @_conv_gemm_kernel(%arg0: i32, %arg1: i32, %arg2: memref<32x864xbf16, #tpu.memory_space<vmem>>, %arg3: memref<864x128xbf16, #tpu.memory_space<vmem>>, %arg4: memref<32x1xf32, #tpu.memory_space<vmem>>, %arg5: memref<32x128xbf16, #tpu.memory_space<vmem>>, %arg6: memref<32x128xf32, #tpu.memory_space<vmem>>) attributes {dimension_semantics = [#tpu.dimension_semantics<parallel>, #tpu.dimension_semantics<arbitrary>], iteration_bounds = array<i64: 1, 1>, scalar_prefetch = 0 : i64, scratch_operands = 1 : i64, tpu.core_type = #tpu.core_type<tc>, window_params = [{transform_indices = @transform_0, window_bounds = array<i64: 32, 864>}, {transform_indices = @transform_1, window_bounds = array<i64: 864, 128>}, {pipeline_mode = #tpu.pipeline_mode<synchronous>, transform_indices = @transform_2, window_bounds = array<i64: 32, 1>}, {transform_indices = @transform_3, window_bounds = array<i64: 32, 128>}]} {
    %c0_i32 = arith.constant 0 : i32
    %0 = arith.cmpi eq, %arg1, %c0_i32 : i32
    %1 = arith.extui %0 : i1 to i32
    %c0_i32_0 = arith.constant 0 : i32
    %2 = arith.cmpi ne, %1, %c0_i32_0 : i32
    scf.if %2 {
      %cst_10 = arith.constant 0.000000e+00 : f32
      %12 = vector.broadcast %cst_10 : f32 to vector<32x128xf32>
      %c0_11 = arith.constant 0 : index
      %c0_12 = arith.constant 0 : index
      %13 = vector.load %arg6[%c0_11, %c0_12] : memref<32x128xf32, #tpu.memory_space<vmem>>, vector<32x128xf32>
      tpu.vector_store %arg6[%c0_11, %c0_12], %12 {strides = array<i32>} : memref<32x128xf32, #tpu.memory_space<vmem>>, vector<32x128xf32>,
    } else {
    }
    %c0 = arith.constant 0 : index
    %c0_1 = arith.constant 0 : index
    %3 = vector.load %arg6[%c0, %c0_1] : memref<32x128xf32, #tpu.memory_space<vmem>>, vector<32x128xf32>
    %c0_2 = arith.constant 0 : index
    %c0_3 = arith.constant 0 : index
    %4 = vector.load %arg2[%c0_2, %c0_3] : memref<32x864xbf16, #tpu.memory_space<vmem>>, vector<32x864xbf16>
    %c0_4 = arith.constant 0 : index
    %c0_5 = arith.constant 0 : index
    %5 = vector.load %arg3[%c0_4, %c0_5] : memref<864x128xbf16, #tpu.memory_space<vmem>>, vector<864x128xbf16>
    %cst = arith.constant dense<0.000000e+00> : vector<32x128xf32>
    %6 = tpu.matmul %4, %5, %cst {dimension_numbers = #tpu.dot_dimension_numbers<[1], [0], [0], [1], [0, 0, 1, 1], [], []>} : vector<32x864xbf16>, vector<864x128xbf16>, vector<32x128xf32> -> vector<32x128xf32>
    %7 = arith.addf %3, %6 : vector<32x128xf32>
    %c0_6 = arith.constant 0 : index
    %c0_7 = arith.constant 0 : index
    %8 = vector.load %arg6[%c0_6, %c0_7] : memref<32x128xf32, #tpu.memory_space<vmem>>, vector<32x128xf32>
    tpu.vector_store %arg6[%c0_6, %c0_7], %7 {strides = array<i32>} : memref<32x128xf32, #tpu.memory_space<vmem>>, vector<32x128xf32>,
    %c0_i32_8 = arith.constant 0 : i32
    %9 = arith.cmpi eq, %arg1, %c0_i32_8 : i32
    %10 = arith.extui %9 : i1 to i32
    %c0_i32_9 = arith.constant 0 : i32
    %11 = arith.cmpi ne, %10, %c0_i32_9 : i32
    scf.if %11 {
      %c0_10 = arith.constant 0 : index
      %c0_11 = arith.constant 0 : index
      %12 = vector.load %arg6[%c0_10, %c0_11] : memref<32x128xf32, #tpu.memory_space<vmem>>, vector<32x128xf32>
      %c0_12 = arith.constant 0 : index
      %c0_13 = arith.constant 0 : index
      %13 = vector.load %arg4[%c0_12, %c0_13] : memref<32x1xf32, #tpu.memory_space<vmem>>, vector<32x1xf32>
      %14 = vector.broadcast %13 : vector<32x1xf32> to vector<32x128xf32>
      %15 = arith.addf %12, %14 : vector<32x128xf32>
      %cst_14 = arith.constant 0.000000e+00 : f32
      %16 = vector.broadcast %cst_14 : f32 to vector<32x128xf32>
      %17 = arith.cmpf ogt, %15, %16 : vector<32x128xf32>
      %cst_15 = arith.constant 0.00999999977 : f32
      %18 = vector.broadcast %cst_15 : f32 to vector<32x128xf32>
      %19 = arith.mulf %18, %15 : vector<32x128xf32>
      %20 = arith.select %17, %15, %19 : vector<32x128xi1>, vector<32x128xf32>
      %21 = arith.truncf %20 : vector<32x128xf32> to vector<32x128xbf16>
      %c0_16 = arith.constant 0 : index
      %c0_17 = arith.constant 0 : index
      %22 = vector.load %arg5[%c0_16, %c0_17] : memref<32x128xbf16, #tpu.memory_space<vmem>>, vector<32x128xbf16>
      tpu.vector_store %arg5[%c0_16, %c0_17], %21 {strides = array<i32>} : memref<32x128xbf16, #tpu.memory_space<vmem>>, vector<32x128xbf16>,
    } else {
    }
    return
  }
  func.func @transform_0(%arg0: i32, %arg1: i32) -> (i32, i32) {
    %c0_i32 = arith.constant 0 : i32
    %c0_i32_0 = arith.constant 0 : i32
    return %c0_i32, %arg1 : i32, i32
  }
  func.func @transform_1(%arg0: i32, %arg1: i32) -> (i32, i32) {
    %c0_i32 = arith.constant 0 : i32
    return %arg1, %arg0 : i32, i32
  }
  func.func @transform_2(%arg0: i32, %arg1: i32) -> (i32, i32) {
    %c0_i32 = arith.constant 0 : i32
    %c0_i32_0 = arith.constant 0 : i32
    %c0_i32_1 = arith.constant 0 : i32
    return %c0_i32, %c0_i32_0 : i32, i32
  }
  func.func @transform_3(%arg0: i32, %arg1: i32) -> (i32, i32) {
    %c0_i32 = arith.constant 0 : i32
    %c0_i32_0 = arith.constant 0 : i32
    return %c0_i32, %arg0 : i32, i32
  }
}

module attributes {stable_mosaic.version = 11 : i64} {
  func.func @_conv_gemm_residual_kernel(%arg0: i32, %arg1: i32, %arg2: memref<32x864xbf16, #tpu.memory_space<vmem>>, %arg3: memref<864x128xbf16, #tpu.memory_space<vmem>>, %arg4: memref<32x1xf32, #tpu.memory_space<vmem>>, %arg5: memref<32x128xbf16, #tpu.memory_space<vmem>>, %arg6: memref<32x128xbf16, #tpu.memory_space<vmem>>, %arg7: memref<32x128xf32, #tpu.memory_space<vmem>>) attributes {dimension_semantics = [#tpu.dimension_semantics<parallel>, #tpu.dimension_semantics<arbitrary>], iteration_bounds = array<i64: 1, 1>, scalar_prefetch = 0 : i64, scratch_operands = 1 : i64, tpu.core_type = #tpu.core_type<tc>, window_params = [{transform_indices = @transform_0, window_bounds = array<i64: 32, 864>}, {transform_indices = @transform_1, window_bounds = array<i64: 864, 128>}, {pipeline_mode = #tpu.pipeline_mode<synchronous>, transform_indices = @transform_2, window_bounds = array<i64: 32, 1>}, {transform_indices = @transform_3, window_bounds = array<i64: 32, 128>}, {transform_indices = @transform_4, window_bounds = array<i64: 32, 128>}]} {
    %c0_i32 = arith.constant 0 : i32
    %0 = arith.cmpi eq, %arg1, %c0_i32 : i32
    %1 = arith.extui %0 : i1 to i32
    %c0_i32_0 = arith.constant 0 : i32
    %2 = arith.cmpi ne, %1, %c0_i32_0 : i32
    scf.if %2 {
      %cst_10 = arith.constant 0.000000e+00 : f32
      %12 = vector.broadcast %cst_10 : f32 to vector<32x128xf32>
      %c0_11 = arith.constant 0 : index
      %c0_12 = arith.constant 0 : index
      %13 = vector.load %arg7[%c0_11, %c0_12] : memref<32x128xf32, #tpu.memory_space<vmem>>, vector<32x128xf32>
      tpu.vector_store %arg7[%c0_11, %c0_12], %12 {strides = array<i32>} : memref<32x128xf32, #tpu.memory_space<vmem>>, vector<32x128xf32>,
    } else {
    }
    %c0 = arith.constant 0 : index
    %c0_1 = arith.constant 0 : index
    %3 = vector.load %arg7[%c0, %c0_1] : memref<32x128xf32, #tpu.memory_space<vmem>>, vector<32x128xf32>
    %c0_2 = arith.constant 0 : index
    %c0_3 = arith.constant 0 : index
    %4 = vector.load %arg2[%c0_2, %c0_3] : memref<32x864xbf16, #tpu.memory_space<vmem>>, vector<32x864xbf16>
    %c0_4 = arith.constant 0 : index
    %c0_5 = arith.constant 0 : index
    %5 = vector.load %arg3[%c0_4, %c0_5] : memref<864x128xbf16, #tpu.memory_space<vmem>>, vector<864x128xbf16>
    %cst = arith.constant dense<0.000000e+00> : vector<32x128xf32>
    %6 = tpu.matmul %4, %5, %cst {dimension_numbers = #tpu.dot_dimension_numbers<[1], [0], [0], [1], [0, 0, 1, 1], [], []>} : vector<32x864xbf16>, vector<864x128xbf16>, vector<32x128xf32> -> vector<32x128xf32>
    %7 = arith.addf %3, %6 : vector<32x128xf32>
    %c0_6 = arith.constant 0 : index
    %c0_7 = arith.constant 0 : index
    %8 = vector.load %arg7[%c0_6, %c0_7] : memref<32x128xf32, #tpu.memory_space<vmem>>, vector<32x128xf32>
    tpu.vector_store %arg7[%c0_6, %c0_7], %7 {strides = array<i32>} : memref<32x128xf32, #tpu.memory_space<vmem>>, vector<32x128xf32>,
    %c0_i32_8 = arith.constant 0 : i32
    %9 = arith.cmpi eq, %arg1, %c0_i32_8 : i32
    %10 = arith.extui %9 : i1 to i32
    %c0_i32_9 = arith.constant 0 : i32
    %11 = arith.cmpi ne, %10, %c0_i32_9 : i32
    scf.if %11 {
      %c0_10 = arith.constant 0 : index
      %c0_11 = arith.constant 0 : index
      %12 = vector.load %arg7[%c0_10, %c0_11] : memref<32x128xf32, #tpu.memory_space<vmem>>, vector<32x128xf32>
      %c0_12 = arith.constant 0 : index
      %c0_13 = arith.constant 0 : index
      %13 = vector.load %arg4[%c0_12, %c0_13] : memref<32x1xf32, #tpu.memory_space<vmem>>, vector<32x1xf32>
      %14 = vector.broadcast %13 : vector<32x1xf32> to vector<32x128xf32>
      %15 = arith.addf %12, %14 : vector<32x128xf32>
      %c0_14 = arith.constant 0 : index
      %c0_15 = arith.constant 0 : index
      %16 = vector.load %arg5[%c0_14, %c0_15] : memref<32x128xbf16, #tpu.memory_space<vmem>>, vector<32x128xbf16>
      %17 = arith.extf %16 : vector<32x128xbf16> to vector<32x128xf32>
      %18 = arith.addf %15, %17 : vector<32x128xf32>
      %cst_16 = arith.constant 0.000000e+00 : f32
      %19 = vector.broadcast %cst_16 : f32 to vector<32x128xf32>
      %20 = arith.cmpf ogt, %18, %19 : vector<32x128xf32>
      %cst_17 = arith.constant 0.00999999977 : f32
      %21 = vector.broadcast %cst_17 : f32 to vector<32x128xf32>
      %22 = arith.mulf %21, %18 : vector<32x128xf32>
      %23 = arith.select %20, %18, %22 : vector<32x128xi1>, vector<32x128xf32>
      %24 = arith.truncf %23 : vector<32x128xf32> to vector<32x128xbf16>
      %c0_18 = arith.constant 0 : index
      %c0_19 = arith.constant 0 : index
      %25 = vector.load %arg6[%c0_18, %c0_19] : memref<32x128xbf16, #tpu.memory_space<vmem>>, vector<32x128xbf16>
      tpu.vector_store %arg6[%c0_18, %c0_19], %24 {strides = array<i32>} : memref<32x128xbf16, #tpu.memory_space<vmem>>, vector<32x128xbf16>,
    } else {
    }
    return
  }
  func.func @transform_0(%arg0: i32, %arg1: i32) -> (i32, i32) {
    %c0_i32 = arith.constant 0 : i32
    %c0_i32_0 = arith.constant 0 : i32
    return %c0_i32, %arg1 : i32, i32
  }
  func.func @transform_1(%arg0: i32, %arg1: i32) -> (i32, i32) {
    %c0_i32 = arith.constant 0 : i32
    return %arg1, %arg0 : i32, i32
  }
  func.func @transform_2(%arg0: i32, %arg1: i32) -> (i32, i32) {
    %c0_i32 = arith.constant 0 : i32
    %c0_i32_0 = arith.constant 0 : i32
    %c0_i32_1 = arith.constant 0 : i32
    return %c0_i32, %c0_i32_0 : i32, i32
  }
  func.func @transform_3(%arg0: i32, %arg1: i32) -> (i32, i32) {
    %c0_i32 = arith.constant 0 : i32
    %c0_i32_0 = arith.constant 0 : i32
    return %c0_i32, %arg0 : i32, i32
  }
  func.func @transform_4(%arg0: i32, %arg1: i32) -> (i32, i32) {
    %c0_i32 = arith.constant 0 : i32
    %c0_i32_0 = arith.constant 0 : i32
    return %c0_i32, %arg0 : i32, i32
  }
}

module attributes {stable_mosaic.version = 11 : i64} {
  func.func @_conv_gemm_kernel(%arg0: i32, %arg1: i32, %arg2: memref<16x768xbf16, #tpu.memory_space<vmem>>, %arg3: memref<768x384xbf16, #tpu.memory_space<vmem>>, %arg4: memref<16x1xf32, #tpu.memory_space<vmem>>, %arg5: memref<16x384xbf16, #tpu.memory_space<vmem>>, %arg6: memref<16x384xf32, #tpu.memory_space<vmem>>) attributes {dimension_semantics = [#tpu.dimension_semantics<parallel>, #tpu.dimension_semantics<arbitrary>], iteration_bounds = array<i64: 2, 2>, scalar_prefetch = 0 : i64, scratch_operands = 1 : i64, tpu.core_type = #tpu.core_type<tc>, window_params = [{transform_indices = @transform_0, window_bounds = array<i64: 16, 768>}, {transform_indices = @transform_1, window_bounds = array<i64: 768, 384>}, {pipeline_mode = #tpu.pipeline_mode<synchronous>, transform_indices = @transform_2, window_bounds = array<i64: 16, 1>}, {transform_indices = @transform_3, window_bounds = array<i64: 16, 384>}]} {
    %c0_i32 = arith.constant 0 : i32
    %0 = arith.cmpi eq, %arg1, %c0_i32 : i32
    %1 = arith.extui %0 : i1 to i32
    %c0_i32_0 = arith.constant 0 : i32
    %2 = arith.cmpi ne, %1, %c0_i32_0 : i32
    scf.if %2 {
      %cst_9 = arith.constant 0.000000e+00 : f32
      %12 = vector.broadcast %cst_9 : f32 to vector<16x384xf32>
      %c0_10 = arith.constant 0 : index
      %c0_11 = arith.constant 0 : index
      %13 = vector.load %arg6[%c0_10, %c0_11] : memref<16x384xf32, #tpu.memory_space<vmem>>, vector<16x384xf32>
      tpu.vector_store %arg6[%c0_10, %c0_11], %12 {strides = array<i32>} : memref<16x384xf32, #tpu.memory_space<vmem>>, vector<16x384xf32>,
    } else {
    }
    %c0 = arith.constant 0 : index
    %c0_1 = arith.constant 0 : index
    %3 = vector.load %arg6[%c0, %c0_1] : memref<16x384xf32, #tpu.memory_space<vmem>>, vector<16x384xf32>
    %c0_2 = arith.constant 0 : index
    %c0_3 = arith.constant 0 : index
    %4 = vector.load %arg2[%c0_2, %c0_3] : memref<16x768xbf16, #tpu.memory_space<vmem>>, vector<16x768xbf16>
    %c0_4 = arith.constant 0 : index
    %c0_5 = arith.constant 0 : index
    %5 = vector.load %arg3[%c0_4, %c0_5] : memref<768x384xbf16, #tpu.memory_space<vmem>>, vector<768x384xbf16>
    %cst = arith.constant dense<0.000000e+00> : vector<16x384xf32>
    %6 = tpu.matmul %4, %5, %cst {dimension_numbers = #tpu.dot_dimension_numbers<[1], [0], [0], [1], [0, 0, 1, 1], [], []>} : vector<16x768xbf16>, vector<768x384xbf16>, vector<16x384xf32> -> vector<16x384xf32>
    %7 = arith.addf %3, %6 : vector<16x384xf32>
    %c0_6 = arith.constant 0 : index
    %c0_7 = arith.constant 0 : index
    %8 = vector.load %arg6[%c0_6, %c0_7] : memref<16x384xf32, #tpu.memory_space<vmem>>, vector<16x384xf32>
    tpu.vector_store %arg6[%c0_6, %c0_7], %7 {strides = array<i32>} : memref<16x384xf32, #tpu.memory_space<vmem>>, vector<16x384xf32>,
    %c1_i32 = arith.constant 1 : i32
    %9 = arith.cmpi eq, %arg1, %c1_i32 : i32
    %10 = arith.extui %9 : i1 to i32
    %c0_i32_8 = arith.constant 0 : i32
    %11 = arith.cmpi ne, %10, %c0_i32_8 : i32
    scf.if %11 {
      %c0_9 = arith.constant 0 : index
      %c0_10 = arith.constant 0 : index
      %12 = vector.load %arg6[%c0_9, %c0_10] : memref<16x384xf32, #tpu.memory_space<vmem>>, vector<16x384xf32>
      %c0_11 = arith.constant 0 : index
      %c0_12 = arith.constant 0 : index
      %13 = vector.load %arg4[%c0_11, %c0_12] : memref<16x1xf32, #tpu.memory_space<vmem>>, vector<16x1xf32>
      %14 = vector.broadcast %13 : vector<16x1xf32> to vector<16x384xf32>
      %15 = arith.addf %12, %14 : vector<16x384xf32>
      %cst_13 = arith.constant 0.000000e+00 : f32
      %16 = vector.broadcast %cst_13 : f32 to vector<16x384xf32>
      %17 = arith.cmpf ogt, %15, %16 : vector<16x384xf32>
      %cst_14 = arith.constant 0.00999999977 : f32
      %18 = vector.broadcast %cst_14 : f32 to vector<16x384xf32>
      %19 = arith.mulf %18, %15 : vector<16x384xf32>
      %20 = arith.select %17, %15, %19 : vector<16x384xi1>, vector<16x384xf32>
      %21 = arith.truncf %20 : vector<16x384xf32> to vector<16x384xbf16>
      %c0_15 = arith.constant 0 : index
      %c0_16 = arith.constant 0 : index
      %22 = vector.load %arg5[%c0_15, %c0_16] : memref<16x384xbf16, #tpu.memory_space<vmem>>, vector<16x384xbf16>
      tpu.vector_store %arg5[%c0_15, %c0_16], %21 {strides = array<i32>} : memref<16x384xbf16, #tpu.memory_space<vmem>>, vector<16x384xbf16>,
    } else {
    }
    return
  }
  func.func @transform_0(%arg0: i32, %arg1: i32) -> (i32, i32) {
    %c0_i32 = arith.constant 0 : i32
    %c0_i32_0 = arith.constant 0 : i32
    return %c0_i32, %arg1 : i32, i32
  }
  func.func @transform_1(%arg0: i32, %arg1: i32) -> (i32, i32) {
    %c0_i32 = arith.constant 0 : i32
    return %arg1, %arg0 : i32, i32
  }
  func.func @transform_2(%arg0: i32, %arg1: i32) -> (i32, i32) {
    %c0_i32 = arith.constant 0 : i32
    %c0_i32_0 = arith.constant 0 : i32
    %c0_i32_1 = arith.constant 0 : i32
    return %c0_i32, %c0_i32_0 : i32, i32
  }
  func.func @transform_3(%arg0: i32, %arg1: i32) -> (i32, i32) {
    %c0_i32 = arith.constant 0 : i32
    %c0_i32_0 = arith.constant 0 : i32
    return %c0_i32, %arg0 : i32, i32
  }
}

module attributes {stable_mosaic.version = 11 : i64} {
  func.func @_conv_gemm_kernel(%arg0: i32, %arg1: i32, %arg2: memref<16x288xbf16, #tpu.memory_space<vmem>>, %arg3: memref<288x1024xbf16, #tpu.memory_space<vmem>>, %arg4: memref<16x1xf32, #tpu.memory_space<vmem>>, %arg5: memref<16x1024xbf16, #tpu.memory_space<vmem>>, %arg6: memref<16x1024xf32, #tpu.memory_space<vmem>>) attributes {dimension_semantics = [#tpu.dimension_semantics<parallel>, #tpu.dimension_semantics<arbitrary>], iteration_bounds = array<i64: 6, 1>, scalar_prefetch = 0 : i64, scratch_operands = 1 : i64, tpu.core_type = #tpu.core_type<tc>, window_params = [{transform_indices = @transform_0, window_bounds = array<i64: 16, 288>}, {transform_indices = @transform_1, window_bounds = array<i64: 288, 1024>}, {pipeline_mode = #tpu.pipeline_mode<synchronous>, transform_indices = @transform_2, window_bounds = array<i64: 16, 1>}, {transform_indices = @transform_3, window_bounds = array<i64: 16, 1024>}]} {
    %c0_i32 = arith.constant 0 : i32
    %0 = arith.cmpi eq, %arg1, %c0_i32 : i32
    %1 = arith.extui %0 : i1 to i32
    %c0_i32_0 = arith.constant 0 : i32
    %2 = arith.cmpi ne, %1, %c0_i32_0 : i32
    scf.if %2 {
      %cst_10 = arith.constant 0.000000e+00 : f32
      %12 = vector.broadcast %cst_10 : f32 to vector<16x1024xf32>
      %c0_11 = arith.constant 0 : index
      %c0_12 = arith.constant 0 : index
      %13 = vector.load %arg6[%c0_11, %c0_12] : memref<16x1024xf32, #tpu.memory_space<vmem>>, vector<16x1024xf32>
      tpu.vector_store %arg6[%c0_11, %c0_12], %12 {strides = array<i32>} : memref<16x1024xf32, #tpu.memory_space<vmem>>, vector<16x1024xf32>,
    } else {
    }
    %c0 = arith.constant 0 : index
    %c0_1 = arith.constant 0 : index
    %3 = vector.load %arg6[%c0, %c0_1] : memref<16x1024xf32, #tpu.memory_space<vmem>>, vector<16x1024xf32>
    %c0_2 = arith.constant 0 : index
    %c0_3 = arith.constant 0 : index
    %4 = vector.load %arg2[%c0_2, %c0_3] : memref<16x288xbf16, #tpu.memory_space<vmem>>, vector<16x288xbf16>
    %c0_4 = arith.constant 0 : index
    %c0_5 = arith.constant 0 : index
    %5 = vector.load %arg3[%c0_4, %c0_5] : memref<288x1024xbf16, #tpu.memory_space<vmem>>, vector<288x1024xbf16>
    %cst = arith.constant dense<0.000000e+00> : vector<16x1024xf32>
    %6 = tpu.matmul %4, %5, %cst {dimension_numbers = #tpu.dot_dimension_numbers<[1], [0], [0], [1], [0, 0, 1, 1], [], []>} : vector<16x288xbf16>, vector<288x1024xbf16>, vector<16x1024xf32> -> vector<16x1024xf32>
    %7 = arith.addf %3, %6 : vector<16x1024xf32>
    %c0_6 = arith.constant 0 : index
    %c0_7 = arith.constant 0 : index
    %8 = vector.load %arg6[%c0_6, %c0_7] : memref<16x1024xf32, #tpu.memory_space<vmem>>, vector<16x1024xf32>
    tpu.vector_store %arg6[%c0_6, %c0_7], %7 {strides = array<i32>} : memref<16x1024xf32, #tpu.memory_space<vmem>>, vector<16x1024xf32>,
    %c0_i32_8 = arith.constant 0 : i32
    %9 = arith.cmpi eq, %arg1, %c0_i32_8 : i32
    %10 = arith.extui %9 : i1 to i32
    %c0_i32_9 = arith.constant 0 : i32
    %11 = arith.cmpi ne, %10, %c0_i32_9 : i32
    scf.if %11 {
      %c0_10 = arith.constant 0 : index
      %c0_11 = arith.constant 0 : index
      %12 = vector.load %arg6[%c0_10, %c0_11] : memref<16x1024xf32, #tpu.memory_space<vmem>>, vector<16x1024xf32>
      %c0_12 = arith.constant 0 : index
      %c0_13 = arith.constant 0 : index
      %13 = vector.load %arg4[%c0_12, %c0_13] : memref<16x1xf32, #tpu.memory_space<vmem>>, vector<16x1xf32>
      %14 = vector.broadcast %13 : vector<16x1xf32> to vector<16x1024xf32>
      %15 = arith.addf %12, %14 : vector<16x1024xf32>
      %cst_14 = arith.constant 0.000000e+00 : f32
      %16 = vector.broadcast %cst_14 : f32 to vector<16x1024xf32>
      %17 = arith.cmpf ogt, %15, %16 : vector<16x1024xf32>
      %cst_15 = arith.constant 0.00999999977 : f32
      %18 = vector.broadcast %cst_15 : f32 to vector<16x1024xf32>
      %19 = arith.mulf %18, %15 : vector<16x1024xf32>
      %20 = arith.select %17, %15, %19 : vector<16x1024xi1>, vector<16x1024xf32>
      %21 = arith.truncf %20 : vector<16x1024xf32> to vector<16x1024xbf16>
      %c0_16 = arith.constant 0 : index
      %c0_17 = arith.constant 0 : index
      %22 = vector.load %arg5[%c0_16, %c0_17] : memref<16x1024xbf16, #tpu.memory_space<vmem>>, vector<16x1024xbf16>
      tpu.vector_store %arg5[%c0_16, %c0_17], %21 {strides = array<i32>} : memref<16x1024xbf16, #tpu.memory_space<vmem>>, vector<16x1024xbf16>,
    } else {
    }
    return
  }
  func.func @transform_0(%arg0: i32, %arg1: i32) -> (i32, i32) {
    %c0_i32 = arith.constant 0 : i32
    %c0_i32_0 = arith.constant 0 : i32
    return %c0_i32, %arg1 : i32, i32
  }
  func.func @transform_1(%arg0: i32, %arg1: i32) -> (i32, i32) {
    %c0_i32 = arith.constant 0 : i32
    return %arg1, %arg0 : i32, i32
  }
  func.func @transform_2(%arg0: i32, %arg1: i32) -> (i32, i32) {
    %c0_i32 = arith.constant 0 : i32
    %c0_i32_0 = arith.constant 0 : i32
    %c0_i32_1 = arith.constant 0 : i32
    return %c0_i32, %c0_i32_0 : i32, i32
  }
  func.func @transform_3(%arg0: i32, %arg1: i32) -> (i32, i32) {
    %c0_i32 = arith.constant 0 : i32
    %c0_i32_0 = arith.constant 0 : i32
    return %c0_i32, %arg0 : i32, i32
  }
}

</mosaic_0001>

<bundles_post_ra>
// kernel: a_call__.18
= control target key start
LH: loop header
LB: loop body
LE: loop exit
PB: predicated region body
PF: predicated region fallthrough
CT: control target
= control target key end

     0   :  { %s1037_s12 = smov 0   ;;  %s1039_s13 = smov 0   ;;  %s1217_s0 = inlined_call_operand.vmem [shape: bf16[16,64], index: 0, kind: input, shape index: {}]   ;;  %s1218_s1 = inlined_call_operand.vmem [shape: bf16[64,1536], index: 1, kind: input, shape index: {}]   ;;  %s1219_s2 = inlined_call_operand.vmem [shape: f32[16,1], index: 2, kind: input, shape index: {}]   ;;  %s1220_s3 = inlined_call_operand.vmem [shape: bf16[16,1536], index: 3, kind: output, shape index: {}]  }
   0x1   :  { %s1041_s14 = smov 0   ;;  %s1043_s15 = smov 0  }
   0x2   :  { %s1045_s16 = smov 0  }
   0x3 LB: > { %s25_s17 = sadd.s32 1, %s1010_s15  ;;  %s842_s18 = sadd.s32 4294967295, %s1014_s16   ;;  %s1014_s16 = sphi %s1045_s16, %s13_s16   ;;  %s1010_s15 = sphi %s1043_s15, %s1225_s15   ;;  %s1006_s14 = sphi %s1041_s14, %s1224_s14   ;;  %s1002_s13 = sphi %s1039_s13, %s1223_s13   ;;  %s998_s12 = sphi %s1037_s12, %s1222_s12  }
   0x4   : > { %p27_p0 = scmp.ge.s32.totalorder %s25_s17, 2  ;;  %p67_p1 = scmp.ne.s32.totalorder %s1002_s13, %s998_s12 }
   0x5   : > { %p68_p2 = scmp.eq.s32.totalorder %s1014_s16, 0  ;;  %p118_p4 = scmp.eq.s32.totalorder %s842_s18, 1 }
   0x6   : > { %s1227_s17 = smov (%p27_p0, %s25_s17), 0  ;;  %s60_s20 = sadd.s32 1, %s1002_s13 }
   0x7   : > { %p69_p3 = por %p68_p2, %p67_p1  ;;  %s56_s19 = ssub.s32 %s1010_s15, %s1227_s17 }
   0x8   : > { %p58_p5 = scmp.eq.s32.totalorder %s56_s19, 0  ;;  %p1072_p6 = por %p118_p4, %p67_p1 }
   0x9   : > { %p846_p7 = scmp.ge.s32.totalorder %s1014_s16, 2 }
   0xa   : > { %s1077_s22 = scalar_select %p58_p5, %s1002_s13, %s60_s20  }
   0xb   : > { %150 = sbr.rel (%p846_p7) target bundleno = 33 (0x21), region = 24 }
  0x10   : > { %153 = sbr.rel (!%p69_p3) target bundleno = 33 (0x21), region = 28  ;;  %s155_s23 = sand.u32 (%p69_p3), 1, %s1002_s13  }
  0x11   : > { %s886_s24 = smul.u32 (%p69_p3), 24, %s1010_s15 }
  0x12   : > { %s894_s25 = smul.u32 (%p69_p3), 192, %s155_s23 }
  0x13   : > { %s1085_s28 = scalar_lea.vmem (%p69_p3), %s1218_s1, %s886_s24 }
  0x14   : > { %v176_v0 = vld [vmem:[%s1085_s28] sm:$0xff] (%p69_p3)  ;;  %v178_v1 = vld [vmem:[%s1085_s28 + $0x8] sm:$0xff] (%p69_p3)  ;;  %v180_v2 = vld [vmem:[%s1085_s28 + $0x10] sm:$0xff] (%p69_p3)  ;;  %s1090_s29 = scalar_lea.vmem (%p69_p3), [#allocation3], %s894_s25 }
  0x15   : > { %177 = vst [vmem:[%s1090_s29] sm:$0xff] %v176_v0  ;;  %179 = vst [vmem:[%s1090_s29 + $0x8] sm:$0xff] %v178_v1  ;;  %v182_v3 = vld [vmem:[%s1085_s28 + $0x30] sm:$0xff]  ;;  %v184_v4 = vld [vmem:[%s1085_s28 + $0x38] sm:$0xff] }
  0x16   : > { %181 = vst [vmem:[%s1090_s29 + $0x10] sm:$0xff] %v180_v2  ;;  %v186_v5 = vld [vmem:[%s1085_s28 + $0x40] sm:$0xff]  ;;  %183 = vst [vmem:[%s1090_s29 + $0x18] sm:$0xff] %v182_v3  ;;  %v190_v7 = vld [vmem:[%s1085_s28 + $0x68] sm:$0xff] }
  0x17   : > { %185 = vst [vmem:[%s1090_s29 + $0x20] sm:$0xff] %v184_v4  ;;  %187 = vst [vmem:[%s1090_s29 + $0x28] sm:$0xff] %v186_v5  ;;  %v188_v6 = vld [vmem:[%s1085_s28 + $0x60] sm:$0xff]  ;;  %v192_v8 = vld [vmem:[%s1085_s28 + $0x70] sm:$0xff] }
  0x18   : > { %189 = vst [vmem:[%s1090_s29 + $0x30] sm:$0xff] %v188_v6  ;;  %191 = vst [vmem:[%s1090_s29 + $0x38] sm:$0xff] %v190_v7  ;;  %v194_v9 = vld [vmem:[%s1085_s28 + $0x90] sm:$0xff]  ;;  %v196_v10 = vld [vmem:[%s1085_s28 + $0x98] sm:$0xff] }
  0x19   : > { %193 = vst [vmem:[%s1090_s29 + $0x40] sm:$0xff] %v192_v8  ;;  %v198_v11 = vld [vmem:[%s1085_s28 + $0xa0] sm:$0xff]  ;;  %195 = vst [vmem:[%s1090_s29 + $0x48] sm:$0xff] %v194_v9  ;;  %v202_v13 = vld [vmem:[%s1085_s28 + $0xc8] sm:$0xff] }
  0x1a   : > { %197 = vst [vmem:[%s1090_s29 + $0x50] sm:$0xff] %v196_v10  ;;  %199 = vst [vmem:[%s1090_s29 + $0x58] sm:$0xff] %v198_v11  ;;  %v200_v12 = vld [vmem:[%s1085_s28 + $0xc0] sm:$0xff]  ;;  %v204_v14 = vld [vmem:[%s1085_s28 + $0xd0] sm:$0xff] }
  0x1b   : > { %201 = vst [vmem:[%s1090_s29 + $0x60] sm:$0xff] %v200_v12  ;;  %203 = vst [vmem:[%s1090_s29 + $0x68] sm:$0xff] %v202_v13  ;;  %v206_v15 = vld [vmem:[%s1085_s28 + $0xf0] sm:$0xff]  ;;  %v208_v16 = vld [vmem:[%s1085_s28 + $0xf8] sm:$0xff] }
  0x1c   : > { %205 = vst [vmem:[%s1090_s29 + $0x70] sm:$0xff] %v204_v14  ;;  %v210_v17 = vld [vmem:[%s1085_s28 + $0x100] sm:$0xff]  ;;  %207 = vst [vmem:[%s1090_s29 + $0x78] sm:$0xff] %v206_v15  ;;  %v214_v19 = vld [vmem:[%s1085_s28 + $0x128] sm:$0xff] }
  0x1d   : > { %209 = vst [vmem:[%s1090_s29 + $0x80] sm:$0xff] %v208_v16  ;;  %211 = vst [vmem:[%s1090_s29 + $0x88] sm:$0xff] %v210_v17  ;;  %v212_v18 = vld [vmem:[%s1085_s28 + $0x120] sm:$0xff]  ;;  %v216_v20 = vld [vmem:[%s1085_s28 + $0x130] sm:$0xff] }
  0x1e   : > { %213 = vst [vmem:[%s1090_s29 + $0x90] sm:$0xff] %v212_v18  ;;  %215 = vst [vmem:[%s1090_s29 + $0x98] sm:$0xff] %v214_v19  ;;  %v218_v21 = vld [vmem:[%s1085_s28 + $0x150] sm:$0xff]  ;;  %v220_v22 = vld [vmem:[%s1085_s28 + $0x158] sm:$0xff] }
  0x1f   : > { %217 = vst [vmem:[%s1090_s29 + $0xa0] sm:$0xff] %v216_v20  ;;  %v222_v23 = vld [vmem:[%s1085_s28 + $0x160] sm:$0xff]  ;;  %219 = vst [vmem:[%s1090_s29 + $0xa8] sm:$0xff] %v218_v21 }
  0x20   : > { %221 = vst [vmem:[%s1090_s29 + $0xb0] sm:$0xff] %v220_v22  ;;  %223 = vst [vmem:[%s1090_s29 + $0xb8] sm:$0xff] %v222_v23 }
  0x21 PF: > { %p848_p8 = scmp.ge.s32.totalorder %s1014_s16, 1  ;;  %p228_p9 = scmp.lt.s32.totalorder %s1014_s16, 3 }
  0x23   : > { %p229_p10 = pnand %p848_p8, %p228_p9 }
  0x24   : > { %s235_s30 = sand.u32 (!%p229_p10), 1, %s998_s12  }
  0x25   : > { %232 = sbr.rel (%p229_p10) target bundleno = 291 (0x123), region = 51 }
  0x26   : > { %s895_s4 = smul.u32 (!%p229_p10), 192, %s235_s30 }
  0x27   : > { %s896_s18 = smul.u32 (!%p229_p10), 48, %s235_s30 }
  0x28   : > { %s1148_s9 = scalar_lea.vmem (!%p229_p10), [#allocation3], %s895_s4 }
  0x29   : > { %s1182_s12 = scalar_lea.vmem (!%p229_p10), [#allocation4], %s896_s18 }
  0x2a   : > { %v1016_v24 = vmov 0   ;;  %v620_v25 = vld [vmem:[%s1219_s2] sm:$0xff]  ;;  %v621_v26 = vld [vmem:[%s1219_s2 + $0x8] sm:$0xff]  ;;  %v947_v32 = vld [vmem:[%s1148_s9 + $0x9c] ss:$24 sps:$4 sm:$0xff]   ;;  %vm448_vm0 = vcmask 523264  }
  0x2b   : > { %484 = vmatprep.mubr.bf16.mxu0 %v1016_v24  ;;  %527 = vmatprep.mubr.bf16.mxu1 %v1016_v24  ;;  %v939_v27 = vld [vmem:[%s1148_s9 + $0x94] ss:$24 sps:$4 sm:$0xff]   ;;  %v941_v28 = vld [vmem:[%s1148_s9 + $0x90] ss:$24 sps:$4 sm:$0xff]   ;;  %v942_v29 = vld [vmem:[%s1148_s9 + $0x64] ss:$24 sps:$4 sm:$0xff]  }
  0x2c   : > { %938 = vset.pattern.permute.xlu0 %v1016_v24  ;;  %460 = vmatprep.subr.bf16.mxu0 %v939_v27  ;;  %v944_v30 = vld [vmem:[%s1148_s9 + $0x60] ss:$24 sps:$4 sm:$0xff]   ;;  %v945_v31 = vld [vmem:[%s1148_s9 + $0x34] ss:$24 sps:$4 sm:$0xff]   ;;  %v949_v34 = vld [vmem:[%s1148_s9 + $0x30] ss:$24 sps:$4 sm:$0xff]  }
  0x2d   : > { %624 = vperm.xlu0 %938, %v620_v25   ;;  %461 = vmatpush1.bf16.msra.mxu0 %v941_v28  ;;  %v950_v33 = vld [vmem:[%s1148_s9 + $0x98] ss:$24 sps:$4 sm:$0xff]   ;;  %v951_v35 = vld [vmem:[%s1148_s9 + $0x4] ss:$24 sps:$4 sm:$0xff]   ;;  %v956_v37 = vld [vmem:[%s1148_s9 + $0x68] ss:$24 sps:$4 sm:$0xff]  }
  0x2e   : > { %462 = vmatprep.subr.bf16.mxu0 %v942_v29  ;;  %503 = vmatprep.subr.bf16.mxu1 %v947_v32  ;;  %v953_v36 = vld [vmem:[%s1148_s9 + $0x6c] ss:$24 sps:$4 sm:$0xff]   ;;  %v958_v38 = vld [vmem:[%s1148_s9 + $0x3c] ss:$24 sps:$4 sm:$0xff]   ;;  %v955_v39 = vld [vmem:[%s1148_s9] ss:$24 sps:$4 sm:$0xff]  }
  0x2f   : > { %504 = vmatpush1.bf16.msra.mxu1 %v950_v33  ;;  %v963_v40 = vld [vmem:[%s1148_s9 + $0x38] ss:$24 sps:$4 sm:$0xff]   ;;  %v962_v41 = vld [vmem:[%s1148_s9 + $0xa4] ss:$24 sps:$4 sm:$0xff]   ;;  %v969_v45 = vld [vmem:[%s1148_s9 + $0x8] ss:$24 sps:$4 sm:$0xff]  }
  0x30   : > { %505 = vmatprep.subr.bf16.mxu1 %v953_v36  ;;  %v964_v42 = vld [vmem:[%s1148_s9 + $0xc] ss:$24 sps:$4 sm:$0xff]   ;;  %v960_v44 = vld [vmem:[%s1148_s9 + $0xa0] ss:$24 sps:$4 sm:$0xff]   ;;  %v966_v47 = vld [vmem:[%s1148_s9 + $0x70] ss:$24 sps:$4 sm:$0xff]  }
  0x31   : > { %629 = vperm.xlu0 %938, %v621_v26   ;;  %463 = vmatpush1.bf16.msra.mxu0 %v944_v30  ;;  %v957_v43 = vld [vmem:[%s1217_s0] sm:$0xff]   ;;  %v968_v46 = vld [vmem:[%s1148_s9 + $0x74] ss:$24 sps:$4 sm:$0xff]   ;;  %v973_v51 = vld [vmem:[%s1148_s9 + $0x10] ss:$24 sps:$4 sm:$0xff]   ;;  %s893_s19 = smul.u32 (%p1072_p6), 24, %s1006_s14 }
  0x32   : > { %464 = vmatprep.subr.bf16.mxu0 %v945_v31  ;;  %v972_v48 = vld [vmem:[%s1148_s9 + $0x44] ss:$24 sps:$4 sm:$0xff]   ;;  %v970_v49 = vld [vmem:[%s1148_s9 + $0x40] ss:$24 sps:$4 sm:$0xff]   ;;  %v975_v50 = vld [vmem:[%s1148_s9 + $0x14] ss:$24 sps:$4 sm:$0xff]  }
  0x33   : > { %506 = vmatpush1.bf16.msra.mxu1 %v956_v37  ;;  %s731_s24 = scalar_lea.vmem (%p1072_p6), %s1220_s3, %s893_s19 }
  0x34   : > { %507 = vmatprep.subr.bf16.mxu1 %v958_v38 }
  0x35   : > { %465 = vmatpush1.bf16.msra.mxu0 %v949_v34 }
  0x36   : > { %466 = vmatprep.subr.bf16.mxu0 %v951_v35 }
  0x37   : > { %508 = vmatpush1.bf16.msra.mxu1 %v963_v40 }
  0x38   : > { %509 = vmatprep.subr.bf16.mxu1 %v964_v42 }
  0x39   : > { %467 = vmatpush1.bf16.msra.mxu0 %v955_v39 }
  0x3a   : > { %546 = vmatprep.subr.bf16.mxu0 %v962_v41 }
  0x3b   : > { %510 = vmatpush1.bf16.msra.mxu1 %v969_v45 }
  0x3c   : > { %874 = vmatmul.mubr.msk.bf16.vlgmr.msra.gmra.mxu0 %vm448_vm0, %v957_v43 }
  0x3d   : > { %547 = vmatpush1.bf16.msra.mxu0 %v960_v44  ;;  %570 = vmatprep.mubr.bf16.mxu0 %v1016_v24 }
  0x3e   : > { %548 = vmatprep.subr.bf16.mxu0 %v968_v46  ;;  %875 = vmatmul.mubr.msk.bf16.vlgmr.msra.gmra.mxu1 %vm448_vm0, %v957_v43 }
  0x41   : > { %549 = vmatpush1.bf16.msra.mxu0 %v966_v47 }
  0x42   : > { %550 = vmatprep.subr.bf16.mxu0 %v972_v48 }
  0x45   : > { %551 = vmatpush1.bf16.msra.mxu0 %v970_v49 }
  0x46   : > { %552 = vmatprep.subr.bf16.mxu0 %v975_v50 }
  0x49   : > { %553 = vmatpush1.bf16.msra.mxu0 %v973_v51 }
  0x4c   : > { %876 = vmatmul.mubr.msk.bf16.vlgmr.msra.gmra.mxu0 %vm448_vm0, %v957_v43 }
  0xa8   : > { %v625_v52 = vpop.permute.xlu0 %624 }
  0xac   : > { %v630_v56 = vpop.permute.xlu0 %629 }
  0xfc   : > { %v486_v53 = vpop.f32.mrf.mxu0 }
  0xfd   : > { %v632_v54 = vadd.f32 %v625_v52, %v486_v53 }
  0xfe   : > { %v488_v55 = vpop.f32.mrf.mxu0  ;;  %v529_v60 = vpop.f32.mrf.mxu1 }
  0xff   : > { %vm644_vm1 = vcmp.gt.f32.partialorder %v632_v54, 0.0  ;;  %v656_v57 = vmul.f32 0.01, %v632_v54  ;;  %v633_v58 = vadd.f32 %v625_v52, %v488_v55  ;;  %v634_v1 = vadd.f32 %v625_v52, %v529_v60 }
 0x100   : > { %v490_v59 = vpop.f32.mrf.mxu0  ;;  %v531_v2 = vpop.f32.mrf.mxu1 }
 0x101   : > { %vm645_vm2 = vcmp.gt.f32.partialorder %v633_v58, 0.0  ;;  %v657_v61 = vmul.f32 0.01, %v633_v58  ;;  %v638_v62 = vadd.f32 %v630_v56, %v490_v59  ;;  %v668_v63 = vsel %vm644_vm1, %v632_v54, %v656_v57 }
 0x102   : > { %v492_v0 = vpop.f32.mrf.mxu0  ;;  %vm646_vm4 = vcmp.gt.f32.partialorder %v634_v1, 0.0  ;;  %v658_v7 = vmul.f32 0.01, %v634_v1  ;;  %v635_v8 = vadd.f32 %v625_v52, %v531_v2  ;;  %v533_v9 = vpop.f32.mrf.mxu1 }
 0x103   : > { %v669_v3 = vsel %vm645_vm2, %v633_v58, %v657_v61  ;;  %vm650_vm3 = vcmp.gt.f32.partialorder %v638_v62, 0.0  ;;  %v662_v4 = vmul.f32 0.01, %v638_v62  ;;  %v639_v5 = vadd.f32 %v630_v56, %v492_v0 }
 0x104   : > { %v887_v6 = vpack.c.bf16 %v669_v3, %v668_v63  ;;  %v640_v11 = vadd.f32 %v630_v56, %v533_v9  ;;  %v670_v13 = vsel %vm646_vm4, %v634_v1, %v658_v7  ;;  %vm647_vm6 = vcmp.gt.f32.partialorder %v635_v8, 0.0  ;;  %v535_v15 = vpop.f32.mrf.mxu1 }
 0x105   : > { %vm651_vm5 = vcmp.gt.f32.partialorder %v639_v5, 0.0  ;;  %v663_v10 = vmul.f32 0.01, %v639_v5  ;;  %v674_v12 = vsel %vm650_vm3, %v638_v62, %v662_v4  ;;  %v659_v14 = vmul.f32 0.01, %v635_v8 }
 0x106   : > { %716 = vst [vmem:[%s1182_s12] sm:$0xff] %v887_v6  ;;  %vm652_vm7 = vcmp.gt.f32.partialorder %v640_v11, 0.0  ;;  %v664_v17 = vmul.f32 0.01, %v640_v11  ;;  %v641_v18 = vadd.f32 %v630_v56, %v535_v15 }
 0x107   : > { %v675_v16 = vsel %vm651_vm5, %v639_v5, %v663_v10  ;;  %v671_v20 = vsel %vm647_vm6, %v635_v8, %v659_v14 }
 0x108   : > { %v890_v19 = vpack.c.bf16 %v675_v16, %v674_v12  ;;  %v888_v21 = vpack.c.bf16 %v671_v20, %v670_v13  ;;  %v676_v22 = vsel %vm652_vm7, %v640_v11, %v664_v17  ;;  %vm653_vm8 = vcmp.gt.f32.partialorder %v641_v18, 0.0 }
 0x109   : > { %v665_v23 = vmul.f32 0.01, %v641_v18 }
 0x10a   : > { %719 = vst [vmem:[%s1182_s12 + $0x18] sm:$0xff] %v890_v19  ;;  %717 = vst [vmem:[%s1182_s12 + $0x8] sm:$0xff] %v888_v21 }
 0x10b   : > { %v677_v24 = vsel %vm653_vm8, %v641_v18, %v665_v23 }
 0x10c   : > { %v891_v25 = vpack.c.bf16 %v677_v24, %v676_v22  ;;  %v572_v26 = vpop.f32.mrf.mxu0 }
 0x10d   : > { %v636_v27 = vadd.f32 %v625_v52, %v572_v26  ;;  %v744_v44 = vld [vmem:[%s1182_s12] sm:$0xff] (%p1072_p6) }
 0x10e   : > { %720 = vst [vmem:[%s1182_s12 + $0x20] sm:$0xff] %v891_v25  ;;  %v574_v28 = vpop.f32.mrf.mxu0  ;;  %745 = vst [vmem:[%s731_s24] sm:$0xff] (%p1072_p6), %v744_v44 }
 0x10f   : > { %v660_v29 = vmul.f32 0.01, %v636_v27  ;;  %v637_v30 = vadd.f32 %v625_v52, %v574_v28  ;;  %vm648_vm9 = vcmp.gt.f32.partialorder %v636_v27, 0.0 }
 0x110   : > { %v576_v31 = vpop.f32.mrf.mxu0 }
 0x111   : > { %vm649_vm10 = vcmp.gt.f32.partialorder %v637_v30, 0.0  ;;  %v661_v32 = vmul.f32 0.01, %v637_v30  ;;  %v642_v33 = vadd.f32 %v630_v56, %v576_v31  ;;  %v672_v35 = vsel %vm648_vm9, %v636_v27, %v660_v29  ;;  %v746_v45 = vld [vmem:[%s1182_s12 + $0x8] sm:$0xff] (%p1072_p6)  ;;  %v750_v47 = vld [vmem:[%s1182_s12 + $0x18] sm:$0xff] (%p1072_p6) }
 0x112   : > { %v578_v34 = vpop.f32.mrf.mxu0  ;;  %747 = vst [vmem:[%s731_s24 + $0x8] sm:$0xff] (%p1072_p6), %v746_v45  ;;  %751 = vst [vmem:[%s731_s24 + $0x30] sm:$0xff] (%p1072_p6), %v750_v47 }
 0x113   : > { %v673_v36 = vsel %vm649_vm10, %v637_v30, %v661_v32  ;;  %v666_v37 = vmul.f32 0.01, %v642_v33  ;;  %v643_v38 = vadd.f32 %v630_v56, %v578_v34  ;;  %vm654_vm11 = vcmp.gt.f32.partialorder %v642_v33, 0.0 }
 0x114   : > { %v889_v39 = vpack.c.bf16 %v673_v36, %v672_v35 }
 0x115   : > { %vm655_vm12 = vcmp.gt.f32.partialorder %v643_v38, 0.0  ;;  %v667_v40 = vmul.f32 0.01, %v643_v38  ;;  %v678_v41 = vsel %vm654_vm11, %v642_v33, %v666_v37  ;;  %v752_v48 = vld [vmem:[%s1182_s12 + $0x20] sm:$0xff] (%p1072_p6) }
 0x116   : > { %718 = vst [vmem:[%s1182_s12 + $0x10] sm:$0xff] %v889_v39  ;;  %728 = sbr.rel (!%p1072_p6) target bundleno = 291 (0x123), region = 67  ;;  %753 = vst [vmem:[%s731_s24 + $0x38] sm:$0xff] (%p1072_p6), %v752_v48 }
 0x117   : > { %v679_v42 = vsel %vm655_vm12, %v643_v38, %v667_v40 }
 0x118   : > { %v892_v43 = vpack.c.bf16 %v679_v42, %v678_v41 }
 0x11a   : > { %721 = vst [vmem:[%s1182_s12 + $0x28] sm:$0xff] %v892_v43 }
 0x11d   : > { %v748_v46 = vld [vmem:[%s1182_s12 + $0x10] sm:$0xff] }
 0x11e   : > { %749 = vst [vmem:[%s731_s24 + $0x10] sm:$0xff] %v748_v46 }
 0x121   : > { %v754_v49 = vld [vmem:[%s1182_s12 + $0x28] sm:$0xff] }
 0x122   : > { %755 = vst [vmem:[%s731_s24 + $0x40] sm:$0xff] %v754_v49 }
 0x123 PF: > { %s13_s16 = sadd.s32 1, %s1014_s16   ;;  %s1222_s12 = smov %s1002_s13 }
 0x124   : > { %p10_p11 = scmp.ge.s32.totalorder %s13_s16, 4   ;;  %s1223_s13 = smov %s1077_s22 }
 0x125   : > { %s1224_s14 = smov %s1010_s15  ;;  %s1225_s15 = smov %s1227_s17 }
 0x126   :  { %12 = sbr.rel (!%p10_p11) target bundleno = 3 (0x3), region = 124 }

// kernel: a_call__.19
= control target key start
LH: loop header
LB: loop body
LE: loop exit
PB: predicated region body
PF: predicated region fallthrough
CT: control target
= control target key end

     0   :  { %s2890_s0 = inlined_call_operand.vmem [shape: bf16[32,2048], index: 0, kind: input, shape index: {}]   ;;  %s2891_s1 = inlined_call_operand.vmem [shape: bf16[2048,256], index: 1, kind: input, shape index: {}]   ;;  %s2892_s2 = inlined_call_operand.vmem [shape: f32[32,1], index: 2, kind: input, shape index: {}]   ;;  %s2893_s3 = inlined_call_operand.vmem [shape: bf16[32,256], index: 3, kind: output, shape index: {}]  }
   0x1   :  { %2894 = sst [smem:[#allocation6_spill]] %s2890_s0 }
   0x2   :  { %s2348_s12 = smov 0   ;;  %s2350_s13 = smov 0  }
   0x3   :  { %s2352_s14 = smov 0   ;;  %s2354_s15 = smov 0  }
   0x4   :  { %s2356_s16 = smov 0   ;;  %s2358_s17 = smov 0  }
   0x5   :  { %s2360_s18 = smov 0   ;;  %s2362_s19 = smov 0  }
   0x6   :  { %s2364_s20 = smov 0   ;;  %s2366_s21 = smov 0  }
   0x7   :  { %s2368_s22 = smov 0  }
   0x8 LB: > { %s1848_s23 = sadd.s32 4294967295, %s2324_s22   ;;  %s22_s24 = sadd.s32 1, %s2316_s20  ;;  %s2324_s22 = sphi %s2368_s22, %s13_s22   ;;  %s2320_s21 = sphi %s2366_s21, %s2908_s21   ;;  %s2316_s20 = sphi %s2364_s20, %s2907_s20   ;;  %s2312_s19 = sphi %s2362_s19, %s2906_s19   ;;  %s2308_s18 = sphi %s2360_s18, %s2905_s18   ;;  %s2304_s17 = sphi %s2358_s17, %s2904_s17   ;;  %s2300_s16 = sphi %s2356_s16, %s2903_s16   ;;  %s2296_s15 = sphi %s2354_s15, %s2902_s15   ;;  %s2292_s14 = sphi %s2352_s14, %s2901_s14   ;;  %s2288_s13 = sphi %s2350_s13, %s2900_s13   ;;  %s2284_s12 = sphi %s2348_s12, %s2899_s12  }
   0x9   : > { %p23_p0 = scmp.ge.s32.totalorder %s22_s24, 2  ;;  %s25_s25 = sadd.s32 1, %s2320_s21 }
   0xa   : > { %s32_s26 = sadd.s32 1, %s2304_s17  ;;  %p39_p1 = scmp.ne.s32.totalorder %s2304_s17, %s2300_s16 }
   0xb   : > { %s2910_s24 = smov (%p23_p0, %s22_s24), 0  ;;  %s2912_s25 = smov (!%p23_p0, %s25_s25), %s2320_s21 }
   0xc   : > { %s29_s27 = ssub.s32 %s2316_s20, %s2910_s24  ;;  %p40_p2 = scmp.eq.s32.totalorder %s2324_s22, 0 }
   0xd   : > { %p27_p3 = scmp.ge.s32.totalorder %s2912_s25, 2  ;;  %p30_p4 = scmp.eq.s32.totalorder %s29_s27, 0 }
   0xe   : > { %p2415_p5 = por %p40_p2, %p39_p1  ;;  %s60_s29 = sadd.s32 1, %s2296_s15 }
   0xf   : > { %s2914_s25 = smov (%p27_p3, %s2912_s25), 0  ;;  %p67_p6 = scmp.ne.s32.totalorder %s2296_s15, %s2292_s14 }
  0x10   : > { %s2423_s30 = scalar_select %p30_p4, %s2304_s17, %s32_s26  }
  0x11   : > { %s56_s4 = ssub.s32 %s2320_s21, %s2914_s25  ;;  %p2429_p9 = por %p67_p6, %p40_p2 }
  0x12   : > { %s57_s5 = sor.u32 %s56_s4, %s29_s27  ;;  %p105_p7 = scmp.eq.s32.totalorder %s56_s4, 0 }
  0x13   : > { %p58_p8 = scmp.eq.s32.totalorder %s57_s5, 0  ;;  %s107_s7 = sadd.s32 1, %s2288_s13 }
  0x14   : > { %p117_p10 = scmp.ne.s32.totalorder %s2288_s13, %s2284_s12  ;;  %p118_p11 = scmp.eq.s32.totalorder %s1848_s23, 3 }
  0x15   : > { %s2437_s8 = scalar_select %p58_p8, %s2296_s15, %s60_s29  }
  0x16   : > { %s2440_s9 = scalar_select %p105_p7, %s2288_s13, %s107_s7  }
  0x17   : > { %p2442_p12 = por %p118_p11, %p117_p10  ;;  %p1851_p13 = scmp.ge.s32.totalorder %s2324_s22, 4 }
  0x19   : > { %143 = sbr.rel (%p1851_p13) target bundleno = 139 (0x8b), region = 20 }
  0x1e   : > { %146 = sbr.rel (!%p2415_p5) target bundleno = 48 (0x30), region = 24  ;;  %s148_s11 = sand.u32 (%p2415_p5), 1, %s2304_s17  }
  0x1f   : > { %s1953_s26 = sshll.u32 (%p2415_p5), %s2316_s20, 5  ;;  %s1852_s27 = sshll.u32 (%p2415_p5), %s148_s11, 7 }
  0x20   : > { %s2898_s0 = sld [smem:[#allocation6_spill]] (%p2415_p5)  ;;  %s150_s23 = scalar_lea.vmem (%p2415_p5), [#allocation3], %s1852_s27 }
  0x26   : > { %s2454_s5 = scalar_lea.vmem %s2898_s0, %s1953_s26 }
  0x27   : > { %v166_v0 = vld [vmem:[%s2454_s5] sm:$0xff]  ;;  %v168_v1 = vld [vmem:[%s2454_s5 + $0x8] sm:$0xff]  ;;  %v170_v2 = vld [vmem:[%s2454_s5 + $0x10] sm:$0xff] }
  0x28   : > { %167 = vst [vmem:[%s150_s23] sm:$0xff] %v166_v0  ;;  %169 = vst [vmem:[%s150_s23 + $0x8] sm:$0xff] %v168_v1  ;;  %v172_v3 = vld [vmem:[%s2454_s5 + $0x18] sm:$0xff]  ;;  %v174_v4 = vld [vmem:[%s2454_s5 + $0x40] sm:$0xff] }
  0x29   : > { %171 = vst [vmem:[%s150_s23 + $0x10] sm:$0xff] %v170_v2  ;;  %v176_v5 = vld [vmem:[%s2454_s5 + $0x48] sm:$0xff]  ;;  %173 = vst [vmem:[%s150_s23 + $0x18] sm:$0xff] %v172_v3  ;;  %v178_v6 = vld [vmem:[%s2454_s5 + $0x50] sm:$0xff] }
  0x2a   : > { %175 = vst [vmem:[%s150_s23 + $0x20] sm:$0xff] %v174_v4  ;;  %177 = vst [vmem:[%s150_s23 + $0x28] sm:$0xff] %v176_v5  ;;  %v180_v7 = vld [vmem:[%s2454_s5 + $0x58] sm:$0xff]  ;;  %v182_v8 = vld [vmem:[%s2454_s5 + $0x80] sm:$0xff] }
  0x2b   : > { %179 = vst [vmem:[%s150_s23 + $0x30] sm:$0xff] %v178_v6  ;;  %181 = vst [vmem:[%s150_s23 + $0x38] sm:$0xff] %v180_v7  ;;  %v184_v9 = vld [vmem:[%s2454_s5 + $0x88] sm:$0xff]  ;;  %v186_v10 = vld [vmem:[%s2454_s5 + $0x90] sm:$0xff] }
  0x2c   : > { %183 = vst [vmem:[%s150_s23 + $0x40] sm:$0xff] %v182_v8  ;;  %v188_v11 = vld [vmem:[%s2454_s5 + $0x98] sm:$0xff]  ;;  %185 = vst [vmem:[%s150_s23 + $0x48] sm:$0xff] %v184_v9  ;;  %v190_v12 = vld [vmem:[%s2454_s5 + $0xc0] sm:$0xff] }
  0x2d   : > { %187 = vst [vmem:[%s150_s23 + $0x50] sm:$0xff] %v186_v10  ;;  %189 = vst [vmem:[%s150_s23 + $0x58] sm:$0xff] %v188_v11  ;;  %v192_v13 = vld [vmem:[%s2454_s5 + $0xc8] sm:$0xff]  ;;  %v194_v14 = vld [vmem:[%s2454_s5 + $0xd0] sm:$0xff] }
  0x2e   : > { %191 = vst [vmem:[%s150_s23 + $0x60] sm:$0xff] %v190_v12  ;;  %193 = vst [vmem:[%s150_s23 + $0x68] sm:$0xff] %v192_v13  ;;  %v196_v15 = vld [vmem:[%s2454_s5 + $0xd8] sm:$0xff] }
  0x2f   : > { %195 = vst [vmem:[%s150_s23 + $0x70] sm:$0xff] %v194_v14  ;;  %197 = vst [vmem:[%s150_s23 + $0x78] sm:$0xff] %v196_v15 }
  0x30 PF: > { %203 = sbr.rel (!%p2429_p9) target bundleno = 139 (0x8b), region = 47  ;;  %s205_s28 = sand.u32 (%p2429_p9), 1, %s2296_s15  }
  0x31   : > { %s1954_s7 = sshll.u32 (%p2429_p9), %s2316_s20, 8  ;;  %s1855_s11 = sshll.u32 (%p2429_p9), %s205_s28, 9 }
  0x32   : > { %s210_s26 = sadd.s32 (%p2429_p9), %s2320_s21, %s1954_s7  ;;  %s2485_s6 = scalar_lea.vmem (%p2429_p9), [#allocation4], %s1855_s11 }
  0x33   : > { %s1858_s27 = sshll.u32 (%p2429_p9), %s210_s26, 2 }
  0x34   : > { %s2480_s0 = scalar_lea.vmem (%p2429_p9), %s2891_s1, %s1858_s27 }
  0x35   : > { %v229_v16 = vld [vmem:[%s2480_s0] sm:$0xf]  ;;  %v231_v17 = vld [vmem:[%s2480_s0 + $0x8] sm:$0xf]  ;;  %v233_v18 = vld [vmem:[%s2480_s0 + $0x10] sm:$0xf] }
  0x36   : > { %230 = vst [vmem:[%s2485_s6] sm:$0xf] %v229_v16  ;;  %232 = vst [vmem:[%s2485_s6 + $0x4] sm:$0xf] %v231_v17  ;;  %v235_v19 = vld [vmem:[%s2480_s0 + $0x18] sm:$0xf] }
  0x37   : > { %234 = vst [vmem:[%s2485_s6 + $0x8] sm:$0xf] %v233_v18  ;;  %v237_v20 = vld [vmem:[%s2480_s0 + $0x20] sm:$0xf]  ;;  %v239_v21 = vld [vmem:[%s2480_s0 + $0x28] sm:$0xf] }
  0x38   : > { %236 = vst [vmem:[%s2485_s6 + $0xc] sm:$0xf] %v235_v19  ;;  %238 = vst [vmem:[%s2485_s6 + $0x10] sm:$0xf] %v237_v20  ;;  %v241_v22 = vld [vmem:[%s2480_s0 + $0x30] sm:$0xf] }
  0x39   : > { %240 = vst [vmem:[%s2485_s6 + $0x14] sm:$0xf] %v239_v21  ;;  %v243_v23 = vld [vmem:[%s2480_s0 + $0x38] sm:$0xf]  ;;  %v245_v24 = vld [vmem:[%s2480_s0 + $0x40] sm:$0xf] }
  0x3a   : > { %242 = vst [vmem:[%s2485_s6 + $0x18] sm:$0xf] %v241_v22  ;;  %244 = vst [vmem:[%s2485_s6 + $0x1c] sm:$0xf] %v243_v23  ;;  %v247_v25 = vld [vmem:[%s2480_s0 + $0x48] sm:$0xf] }
  0x3b   : > { %246 = vst [vmem:[%s2485_s6 + $0x20] sm:$0xf] %v245_v24  ;;  %v249_v26 = vld [vmem:[%s2480_s0 + $0x50] sm:$0xf]  ;;  %v251_v27 = vld [vmem:[%s2480_s0 + $0x58] sm:$0xf] }
  0x3c   : > { %248 = vst [vmem:[%s2485_s6 + $0x24] sm:$0xf] %v247_v25  ;;  %250 = vst [vmem:[%s2485_s6 + $0x28] sm:$0xf] %v249_v26  ;;  %v253_v28 = vld [vmem:[%s2480_s0 + $0x60] sm:$0xf] }
  0x3d   : > { %252 = vst [vmem:[%s2485_s6 + $0x2c] sm:$0xf] %v251_v27  ;;  %v255_v29 = vld [vmem:[%s2480_s0 + $0x68] sm:$0xf]  ;;  %v257_v30 = vld [vmem:[%s2480_s0 + $0x70] sm:$0xf] }
  0x3e   : > { %254 = vst [vmem:[%s2485_s6 + $0x30] sm:$0xf] %v253_v28  ;;  %256 = vst [vmem:[%s2485_s6 + $0x34] sm:$0xf] %v255_v29  ;;  %v259_v31 = vld [vmem:[%s2480_s0 + $0x78] sm:$0xf] }
  0x3f   : > { %258 = vst [vmem:[%s2485_s6 + $0x38] sm:$0xf] %v257_v30  ;;  %v261_v32 = vld [vmem:[%s2480_s0 + $0x80] sm:$0xf]  ;;  %v263_v33 = vld [vmem:[%s2480_s0 + $0x88] sm:$0xf] }
  0x40   : > { %260 = vst [vmem:[%s2485_s6 + $0x3c] sm:$0xf] %v259_v31  ;;  %262 = vst [vmem:[%s2485_s6 + $0x40] sm:$0xf] %v261_v32  ;;  %v265_v34 = vld [vmem:[%s2480_s0 + $0x90] sm:$0xf] }
  0x41   : > { %264 = vst [vmem:[%s2485_s6 + $0x44] sm:$0xf] %v263_v33  ;;  %v267_v35 = vld [vmem:[%s2480_s0 + $0x98] sm:$0xf]  ;;  %v269_v36 = vld [vmem:[%s2480_s0 + $0xa0] sm:$0xf] }
  0x42   : > { %266 = vst [vmem:[%s2485_s6 + $0x48] sm:$0xf] %v265_v34  ;;  %268 = vst [vmem:[%s2485_s6 + $0x4c] sm:$0xf] %v267_v35  ;;  %v271_v37 = vld [vmem:[%s2480_s0 + $0xa8] sm:$0xf] }
  0x43   : > { %270 = vst [vmem:[%s2485_s6 + $0x50] sm:$0xf] %v269_v36  ;;  %v273_v38 = vld [vmem:[%s2480_s0 + $0xb0] sm:$0xf]  ;;  %v275_v39 = vld [vmem:[%s2480_s0 + $0xb8] sm:$0xf] }
  0x44   : > { %272 = vst [vmem:[%s2485_s6 + $0x54] sm:$0xf] %v271_v37  ;;  %274 = vst [vmem:[%s2485_s6 + $0x58] sm:$0xf] %v273_v38  ;;  %v277_v40 = vld [vmem:[%s2480_s0 + $0xc0] sm:$0xf] }
  0x45   : > { %276 = vst [vmem:[%s2485_s6 + $0x5c] sm:$0xf] %v275_v39  ;;  %v279_v41 = vld [vmem:[%s2480_s0 + $0xc8] sm:$0xf]  ;;  %v281_v42 = vld [vmem:[%s2480_s0 + $0xd0] sm:$0xf] }
  0x46   : > { %278 = vst [vmem:[%s2485_s6 + $0x60] sm:$0xf] %v277_v40  ;;  %280 = vst [vmem:[%s2485_s6 + $0x64] sm:$0xf] %v279_v41  ;;  %v283_v43 = vld [vmem:[%s2480_s0 + $0xd8] sm:$0xf] }
  0x47   : > { %282 = vst [vmem:[%s2485_s6 + $0x68] sm:$0xf] %v281_v42  ;;  %v285_v44 = vld [vmem:[%s2480_s0 + $0xe0] sm:$0xf]  ;;  %v287_v45 = vld [vmem:[%s2480_s0 + $0xe8] sm:$0xf] }
  0x48   : > { %284 = vst [vmem:[%s2485_s6 + $0x6c] sm:$0xf] %v283_v43  ;;  %286 = vst [vmem:[%s2485_s6 + $0x70] sm:$0xf] %v285_v44  ;;  %v289_v46 = vld [vmem:[%s2480_s0 + $0xf0] sm:$0xf] }
  0x49   : > { %288 = vst [vmem:[%s2485_s6 + $0x74] sm:$0xf] %v287_v45  ;;  %v291_v47 = vld [vmem:[%s2480_s0 + $0xf8] sm:$0xf]  ;;  %v293_v48 = vld [vmem:[%s2480_s0 + $0x100] sm:$0xf] }
  0x4a   : > { %290 = vst [vmem:[%s2485_s6 + $0x78] sm:$0xf] %v289_v46  ;;  %292 = vst [vmem:[%s2485_s6 + $0x7c] sm:$0xf] %v291_v47  ;;  %v295_v49 = vld [vmem:[%s2480_s0 + $0x108] sm:$0xf] }
  0x4b   : > { %294 = vst [vmem:[%s2485_s6 + $0x80] sm:$0xf] %v293_v48  ;;  %v297_v50 = vld [vmem:[%s2480_s0 + $0x110] sm:$0xf]  ;;  %v299_v51 = vld [vmem:[%s2480_s0 + $0x118] sm:$0xf] }
  0x4c   : > { %296 = vst [vmem:[%s2485_s6 + $0x84] sm:$0xf] %v295_v49  ;;  %298 = vst [vmem:[%s2485_s6 + $0x88] sm:$0xf] %v297_v50  ;;  %v301_v52 = vld [vmem:[%s2480_s0 + $0x120] sm:$0xf] }
  0x4d   : > { %300 = vst [vmem:[%s2485_s6 + $0x8c] sm:$0xf] %v299_v51  ;;  %v303_v53 = vld [vmem:[%s2480_s0 + $0x128] sm:$0xf]  ;;  %v305_v54 = vld [vmem:[%s2480_s0 + $0x130] sm:$0xf] }
  0x4e   : > { %302 = vst [vmem:[%s2485_s6 + $0x90] sm:$0xf] %v301_v52  ;;  %304 = vst [vmem:[%s2485_s6 + $0x94] sm:$0xf] %v303_v53  ;;  %v307_v55 = vld [vmem:[%s2480_s0 + $0x138] sm:$0xf] }
  0x4f   : > { %306 = vst [vmem:[%s2485_s6 + $0x98] sm:$0xf] %v305_v54  ;;  %v309_v56 = vld [vmem:[%s2480_s0 + $0x140] sm:$0xf]  ;;  %v311_v57 = vld [vmem:[%s2480_s0 + $0x148] sm:$0xf] }
  0x50   : > { %308 = vst [vmem:[%s2485_s6 + $0x9c] sm:$0xf] %v307_v55  ;;  %310 = vst [vmem:[%s2485_s6 + $0xa0] sm:$0xf] %v309_v56  ;;  %v313_v58 = vld [vmem:[%s2480_s0 + $0x150] sm:$0xf] }
  0x51   : > { %312 = vst [vmem:[%s2485_s6 + $0xa4] sm:$0xf] %v311_v57  ;;  %v315_v59 = vld [vmem:[%s2480_s0 + $0x158] sm:$0xf]  ;;  %v317_v60 = vld [vmem:[%s2480_s0 + $0x160] sm:$0xf] }
  0x52   : > { %314 = vst [vmem:[%s2485_s6 + $0xa8] sm:$0xf] %v313_v58  ;;  %316 = vst [vmem:[%s2485_s6 + $0xac] sm:$0xf] %v315_v59  ;;  %v319_v61 = vld [vmem:[%s2480_s0 + $0x168] sm:$0xf] }
  0x53   : > { %318 = vst [vmem:[%s2485_s6 + $0xb0] sm:$0xf] %v317_v60  ;;  %v321_v62 = vld [vmem:[%s2480_s0 + $0x170] sm:$0xf]  ;;  %v323_v63 = vld [vmem:[%s2480_s0 + $0x178] sm:$0xf] }
  0x54   : > { %320 = vst [vmem:[%s2485_s6 + $0xb4] sm:$0xf] %v319_v61  ;;  %322 = vst [vmem:[%s2485_s6 + $0xb8] sm:$0xf] %v321_v62  ;;  %v325_v0 = vld [vmem:[%s2480_s0 + $0x180] sm:$0xf] }
  0x55   : > { %324 = vst [vmem:[%s2485_s6 + $0xbc] sm:$0xf] %v323_v63  ;;  %v327_v1 = vld [vmem:[%s2480_s0 + $0x188] sm:$0xf]  ;;  %v329_v2 = vld [vmem:[%s2480_s0 + $0x190] sm:$0xf] }
  0x56   : > { %326 = vst [vmem:[%s2485_s6 + $0xc0] sm:$0xf] %v325_v0  ;;  %328 = vst [vmem:[%s2485_s6 + $0xc4] sm:$0xf] %v327_v1  ;;  %v331_v3 = vld [vmem:[%s2480_s0 + $0x198] sm:$0xf] }
  0x57   : > { %330 = vst [vmem:[%s2485_s6 + $0xc8] sm:$0xf] %v329_v2  ;;  %v333_v4 = vld [vmem:[%s2480_s0 + $0x1a0] sm:$0xf]  ;;  %v335_v5 = vld [vmem:[%s2480_s0 + $0x1a8] sm:$0xf] }
  0x58   : > { %332 = vst [vmem:[%s2485_s6 + $0xcc] sm:$0xf] %v331_v3  ;;  %334 = vst [vmem:[%s2485_s6 + $0xd0] sm:$0xf] %v333_v4  ;;  %v337_v6 = vld [vmem:[%s2480_s0 + $0x1b0] sm:$0xf] }
  0x59   : > { %336 = vst [vmem:[%s2485_s6 + $0xd4] sm:$0xf] %v335_v5  ;;  %v339_v7 = vld [vmem:[%s2480_s0 + $0x1b8] sm:$0xf]  ;;  %v341_v8 = vld [vmem:[%s2480_s0 + $0x1c0] sm:$0xf] }
  0x5a   : > { %338 = vst [vmem:[%s2485_s6 + $0xd8] sm:$0xf] %v337_v6  ;;  %340 = vst [vmem:[%s2485_s6 + $0xdc] sm:$0xf] %v339_v7  ;;  %v343_v9 = vld [vmem:[%s2480_s0 + $0x1c8] sm:$0xf] }
  0x5b   : > { %342 = vst [vmem:[%s2485_s6 + $0xe0] sm:$0xf] %v341_v8  ;;  %v345_v10 = vld [vmem:[%s2480_s0 + $0x1d0] sm:$0xf]  ;;  %v347_v11 = vld [vmem:[%s2480_s0 + $0x1d8] sm:$0xf] }
  0x5c   : > { %344 = vst [vmem:[%s2485_s6 + $0xe4] sm:$0xf] %v343_v9  ;;  %346 = vst [vmem:[%s2485_s6 + $0xe8] sm:$0xf] %v345_v10  ;;  %v349_v12 = vld [vmem:[%s2480_s0 + $0x1e0] sm:$0xf] }
  0x5d   : > { %348 = vst [vmem:[%s2485_s6 + $0xec] sm:$0xf] %v347_v11  ;;  %v351_v13 = vld [vmem:[%s2480_s0 + $0x1e8] sm:$0xf]  ;;  %v353_v14 = vld [vmem:[%s2480_s0 + $0x1f0] sm:$0xf] }
  0x5e   : > { %350 = vst [vmem:[%s2485_s6 + $0xf0] sm:$0xf] %v349_v12  ;;  %352 = vst [vmem:[%s2485_s6 + $0xf4] sm:$0xf] %v351_v13  ;;  %v355_v15 = vld [vmem:[%s2480_s0 + $0x1f8] sm:$0xf] }
  0x5f   : > { %354 = vst [vmem:[%s2485_s6 + $0xf8] sm:$0xf] %v353_v14  ;;  %v357_v16 = vld [vmem:[%s2480_s0 + $0x200] sm:$0xf]  ;;  %v359_v17 = vld [vmem:[%s2480_s0 + $0x208] sm:$0xf] }
  0x60   : > { %356 = vst [vmem:[%s2485_s6 + $0xfc] sm:$0xf] %v355_v15  ;;  %358 = vst [vmem:[%s2485_s6 + $0x100] sm:$0xf] %v357_v16  ;;  %v361_v18 = vld [vmem:[%s2480_s0 + $0x210] sm:$0xf] }
  0x61   : > { %360 = vst [vmem:[%s2485_s6 + $0x104] sm:$0xf] %v359_v17  ;;  %v363_v19 = vld [vmem:[%s2480_s0 + $0x218] sm:$0xf]  ;;  %v365_v20 = vld [vmem:[%s2480_s0 + $0x220] sm:$0xf] }
  0x62   : > { %362 = vst [vmem:[%s2485_s6 + $0x108] sm:$0xf] %v361_v18  ;;  %364 = vst [vmem:[%s2485_s6 + $0x10c] sm:$0xf] %v363_v19  ;;  %v367_v21 = vld [vmem:[%s2480_s0 + $0x228] sm:$0xf] }
  0x63   : > { %366 = vst [vmem:[%s2485_s6 + $0x110] sm:$0xf] %v365_v20  ;;  %v369_v22 = vld [vmem:[%s2480_s0 + $0x230] sm:$0xf]  ;;  %v371_v23 = vld [vmem:[%s2480_s0 + $0x238] sm:$0xf] }
  0x64   : > { %368 = vst [vmem:[%s2485_s6 + $0x114] sm:$0xf] %v367_v21  ;;  %370 = vst [vmem:[%s2485_s6 + $0x118] sm:$0xf] %v369_v22  ;;  %v373_v24 = vld [vmem:[%s2480_s0 + $0x240] sm:$0xf] }
  0x65   : > { %372 = vst [vmem:[%s2485_s6 + $0x11c] sm:$0xf] %v371_v23  ;;  %v375_v25 = vld [vmem:[%s2480_s0 + $0x248] sm:$0xf]  ;;  %v377_v26 = vld [vmem:[%s2480_s0 + $0x250] sm:$0xf] }
  0x66   : > { %374 = vst [vmem:[%s2485_s6 + $0x120] sm:$0xf] %v373_v24  ;;  %376 = vst [vmem:[%s2485_s6 + $0x124] sm:$0xf] %v375_v25  ;;  %v379_v27 = vld [vmem:[%s2480_s0 + $0x258] sm:$0xf] }
  0x67   : > { %378 = vst [vmem:[%s2485_s6 + $0x128] sm:$0xf] %v377_v26  ;;  %v381_v28 = vld [vmem:[%s2480_s0 + $0x260] sm:$0xf]  ;;  %v383_v29 = vld [vmem:[%s2480_s0 + $0x268] sm:$0xf] }
  0x68   : > { %380 = vst [vmem:[%s2485_s6 + $0x12c] sm:$0xf] %v379_v27  ;;  %382 = vst [vmem:[%s2485_s6 + $0x130] sm:$0xf] %v381_v28  ;;  %v385_v30 = vld [vmem:[%s2480_s0 + $0x270] sm:$0xf] }
  0x69   : > { %384 = vst [vmem:[%s2485_s6 + $0x134] sm:$0xf] %v383_v29  ;;  %v387_v31 = vld [vmem:[%s2480_s0 + $0x278] sm:$0xf]  ;;  %v389_v32 = vld [vmem:[%s2480_s0 + $0x280] sm:$0xf] }
  0x6a   : > { %386 = vst [vmem:[%s2485_s6 + $0x138] sm:$0xf] %v385_v30  ;;  %388 = vst [vmem:[%s2485_s6 + $0x13c] sm:$0xf] %v387_v31  ;;  %v391_v33 = vld [vmem:[%s2480_s0 + $0x288] sm:$0xf] }
  0x6b   : > { %390 = vst [vmem:[%s2485_s6 + $0x140] sm:$0xf] %v389_v32  ;;  %v393_v34 = vld [vmem:[%s2480_s0 + $0x290] sm:$0xf]  ;;  %v395_v35 = vld [vmem:[%s2480_s0 + $0x298] sm:$0xf] }
  0x6c   : > { %392 = vst [vmem:[%s2485_s6 + $0x144] sm:$0xf] %v391_v33  ;;  %394 = vst [vmem:[%s2485_s6 + $0x148] sm:$0xf] %v393_v34  ;;  %v397_v36 = vld [vmem:[%s2480_s0 + $0x2a0] sm:$0xf] }
  0x6d   : > { %396 = vst [vmem:[%s2485_s6 + $0x14c] sm:$0xf] %v395_v35  ;;  %v399_v37 = vld [vmem:[%s2480_s0 + $0x2a8] sm:$0xf]  ;;  %v401_v38 = vld [vmem:[%s2480_s0 + $0x2b0] sm:$0xf] }
  0x6e   : > { %398 = vst [vmem:[%s2485_s6 + $0x150] sm:$0xf] %v397_v36  ;;  %400 = vst [vmem:[%s2485_s6 + $0x154] sm:$0xf] %v399_v37  ;;  %v403_v39 = vld [vmem:[%s2480_s0 + $0x2b8] sm:$0xf] }
  0x6f   : > { %402 = vst [vmem:[%s2485_s6 + $0x158] sm:$0xf] %v401_v38  ;;  %v405_v40 = vld [vmem:[%s2480_s0 + $0x2c0] sm:$0xf]  ;;  %v407_v41 = vld [vmem:[%s2480_s0 + $0x2c8] sm:$0xf] }
  0x70   : > { %404 = vst [vmem:[%s2485_s6 + $0x15c] sm:$0xf] %v403_v39  ;;  %406 = vst [vmem:[%s2485_s6 + $0x160] sm:$0xf] %v405_v40  ;;  %v409_v42 = vld [vmem:[%s2480_s0 + $0x2d0] sm:$0xf] }
  0x71   : > { %408 = vst [vmem:[%s2485_s6 + $0x164] sm:$0xf] %v407_v41  ;;  %v411_v43 = vld [vmem:[%s2480_s0 + $0x2d8] sm:$0xf]  ;;  %v413_v44 = vld [vmem:[%s2480_s0 + $0x2e0] sm:$0xf] }
  0x72   : > { %410 = vst [vmem:[%s2485_s6 + $0x168] sm:$0xf] %v409_v42  ;;  %412 = vst [vmem:[%s2485_s6 + $0x16c] sm:$0xf] %v411_v43  ;;  %v415_v45 = vld [vmem:[%s2480_s0 + $0x2e8] sm:$0xf] }
  0x73   : > { %414 = vst [vmem:[%s2485_s6 + $0x170] sm:$0xf] %v413_v44  ;;  %v417_v46 = vld [vmem:[%s2480_s0 + $0x2f0] sm:$0xf]  ;;  %v419_v47 = vld [vmem:[%s2480_s0 + $0x2f8] sm:$0xf] }
  0x74   : > { %416 = vst [vmem:[%s2485_s6 + $0x174] sm:$0xf] %v415_v45  ;;  %418 = vst [vmem:[%s2485_s6 + $0x178] sm:$0xf] %v417_v46  ;;  %v421_v48 = vld [vmem:[%s2480_s0 + $0x300] sm:$0xf] }
  0x75   : > { %420 = vst [vmem:[%s2485_s6 + $0x17c] sm:$0xf] %v419_v47  ;;  %v423_v49 = vld [vmem:[%s2480_s0 + $0x308] sm:$0xf]  ;;  %v425_v50 = vld [vmem:[%s2480_s0 + $0x310] sm:$0xf] }
  0x76   : > { %422 = vst [vmem:[%s2485_s6 + $0x180] sm:$0xf] %v421_v48  ;;  %424 = vst [vmem:[%s2485_s6 + $0x184] sm:$0xf] %v423_v49  ;;  %v427_v51 = vld [vmem:[%s2480_s0 + $0x318] sm:$0xf] }
  0x77   : > { %426 = vst [vmem:[%s2485_s6 + $0x188] sm:$0xf] %v425_v50  ;;  %v429_v52 = vld [vmem:[%s2480_s0 + $0x320] sm:$0xf]  ;;  %v431_v53 = vld [vmem:[%s2480_s0 + $0x328] sm:$0xf] }
  0x78   : > { %428 = vst [vmem:[%s2485_s6 + $0x18c] sm:$0xf] %v427_v51  ;;  %430 = vst [vmem:[%s2485_s6 + $0x190] sm:$0xf] %v429_v52  ;;  %v433_v54 = vld [vmem:[%s2480_s0 + $0x330] sm:$0xf] }
  0x79   : > { %432 = vst [vmem:[%s2485_s6 + $0x194] sm:$0xf] %v431_v53  ;;  %v435_v55 = vld [vmem:[%s2480_s0 + $0x338] sm:$0xf]  ;;  %v437_v56 = vld [vmem:[%s2480_s0 + $0x340] sm:$0xf] }
  0x7a   : > { %434 = vst [vmem:[%s2485_s6 + $0x198] sm:$0xf] %v433_v54  ;;  %436 = vst [vmem:[%s2485_s6 + $0x19c] sm:$0xf] %v435_v55  ;;  %v439_v57 = vld [vmem:[%s2480_s0 + $0x348] sm:$0xf] }
  0x7b   : > { %438 = vst [vmem:[%s2485_s6 + $0x1a0] sm:$0xf] %v437_v56  ;;  %v441_v58 = vld [vmem:[%s2480_s0 + $0x350] sm:$0xf]  ;;  %v443_v59 = vld [vmem:[%s2480_s0 + $0x358] sm:$0xf] }
  0x7c   : > { %440 = vst [vmem:[%s2485_s6 + $0x1a4] sm:$0xf] %v439_v57  ;;  %442 = vst [vmem:[%s2485_s6 + $0x1a8] sm:$0xf] %v441_v58  ;;  %v445_v60 = vld [vmem:[%s2480_s0 + $0x360] sm:$0xf] }
  0x7d   : > { %444 = vst [vmem:[%s2485_s6 + $0x1ac] sm:$0xf] %v443_v59  ;;  %v447_v61 = vld [vmem:[%s2480_s0 + $0x368] sm:$0xf]  ;;  %v449_v62 = vld [vmem:[%s2480_s0 + $0x370] sm:$0xf] }
  0x7e   : > { %446 = vst [vmem:[%s2485_s6 + $0x1b0] sm:$0xf] %v445_v60  ;;  %448 = vst [vmem:[%s2485_s6 + $0x1b4] sm:$0xf] %v447_v61  ;;  %v451_v63 = vld [vmem:[%s2480_s0 + $0x378] sm:$0xf] }
  0x7f   : > { %450 = vst [vmem:[%s2485_s6 + $0x1b8] sm:$0xf] %v449_v62  ;;  %v453_v0 = vld [vmem:[%s2480_s0 + $0x380] sm:$0xf]  ;;  %v455_v1 = vld [vmem:[%s2480_s0 + $0x388] sm:$0xf] }
  0x80   : > { %452 = vst [vmem:[%s2485_s6 + $0x1bc] sm:$0xf] %v451_v63  ;;  %454 = vst [vmem:[%s2485_s6 + $0x1c0] sm:$0xf] %v453_v0  ;;  %v457_v2 = vld [vmem:[%s2480_s0 + $0x390] sm:$0xf] }
  0x81   : > { %456 = vst [vmem:[%s2485_s6 + $0x1c4] sm:$0xf] %v455_v1  ;;  %v459_v3 = vld [vmem:[%s2480_s0 + $0x398] sm:$0xf]  ;;  %v461_v4 = vld [vmem:[%s2480_s0 + $0x3a0] sm:$0xf] }
  0x82   : > { %458 = vst [vmem:[%s2485_s6 + $0x1c8] sm:$0xf] %v457_v2  ;;  %460 = vst [vmem:[%s2485_s6 + $0x1cc] sm:$0xf] %v459_v3  ;;  %v463_v5 = vld [vmem:[%s2480_s0 + $0x3a8] sm:$0xf] }
  0x83   : > { %462 = vst [vmem:[%s2485_s6 + $0x1d0] sm:$0xf] %v461_v4  ;;  %v465_v6 = vld [vmem:[%s2480_s0 + $0x3b0] sm:$0xf]  ;;  %v467_v7 = vld [vmem:[%s2480_s0 + $0x3b8] sm:$0xf] }
  0x84   : > { %464 = vst [vmem:[%s2485_s6 + $0x1d4] sm:$0xf] %v463_v5  ;;  %466 = vst [vmem:[%s2485_s6 + $0x1d8] sm:$0xf] %v465_v6  ;;  %v469_v8 = vld [vmem:[%s2480_s0 + $0x3c0] sm:$0xf] }
  0x85   : > { %468 = vst [vmem:[%s2485_s6 + $0x1dc] sm:$0xf] %v467_v7  ;;  %v471_v9 = vld [vmem:[%s2480_s0 + $0x3c8] sm:$0xf]  ;;  %v473_v10 = vld [vmem:[%s2480_s0 + $0x3d0] sm:$0xf] }
  0x86   : > { %470 = vst [vmem:[%s2485_s6 + $0x1e0] sm:$0xf] %v469_v8  ;;  %472 = vst [vmem:[%s2485_s6 + $0x1e4] sm:$0xf] %v471_v9  ;;  %v475_v11 = vld [vmem:[%s2480_s0 + $0x3d8] sm:$0xf] }
  0x87   : > { %474 = vst [vmem:[%s2485_s6 + $0x1e8] sm:$0xf] %v473_v10  ;;  %v477_v12 = vld [vmem:[%s2480_s0 + $0x3e0] sm:$0xf]  ;;  %v479_v13 = vld [vmem:[%s2480_s0 + $0x3e8] sm:$0xf] }
  0x88   : > { %476 = vst [vmem:[%s2485_s6 + $0x1ec] sm:$0xf] %v475_v11  ;;  %478 = vst [vmem:[%s2485_s6 + $0x1f0] sm:$0xf] %v477_v12  ;;  %v481_v14 = vld [vmem:[%s2480_s0 + $0x3f0] sm:$0xf] }
  0x89   : > { %480 = vst [vmem:[%s2485_s6 + $0x1f4] sm:$0xf] %v479_v13  ;;  %v483_v15 = vld [vmem:[%s2480_s0 + $0x3f8] sm:$0xf]  ;;  %482 = vst [vmem:[%s2485_s6 + $0x1f8] sm:$0xf] %v481_v14 }
  0x8a   : > { %484 = vst [vmem:[%s2485_s6 + $0x1fc] sm:$0xf] %v483_v15 }
  0x8b PF: > { %p1859_p0 = scmp.ge.s32.totalorder %s2324_s22, 1  ;;  %p763_p1 = scmp.lt.s32.totalorder %s2324_s22, 5 }
  0x8d   : > { %p764_p2 = pnand %p1859_p0, %p763_p1 }
  0x8e   : > { %s770_s5 = sand.u32 (!%p764_p2), 1, %s2300_s16   ;;  %s777_s23 = sand.u32 (!%p764_p2), 1, %s2292_s14  }
  0x8f   : > { %767 = sbr.rel (%p764_p2) target bundleno = 586 (0x24a), region = 88  ;;  %s1860_s28 = sshll.u32 (!%p764_p2), %s770_s5, 7 }
  0x90   : > { %s1861_s7 = sshll.u32 (!%p764_p2), %s777_s23, 9  ;;  %s800_s11 = sand.u32 (!%p764_p2), 1, %s2284_s12  }
  0x91   : > { %s1862_s26 = sshll.u32 (!%p764_p2), %s800_s11, 4  ;;  %s2745_s0 = scalar_lea.vmem (!%p764_p2), [#allocation3], %s1860_s28 }
  0x92   : > { %s2747_s27 = scalar_lea.vmem (!%p764_p2), [#allocation4], %s1861_s7  ;;  %s2749_s29 = scalar_lea.vmem (!%p764_p2), [#allocation5], %s1862_s26 }
  0x93   : > { %p1863_p3 = scmp.ne.s32.totalorder (!%p764_p2), %s2308_s18, 0 }
  0x95   : > { %809 = sbr.rel (%p1863_p3) target bundleno = 157 (0x9d), region = 100 }
  0x9a   : > { %v2326_v16 = vmov 0.0  }
  0x9b   : > { %810 = vst [vmem:[#allocation2 + $0x10] sm:$0xff] %v2326_v16  ;;  %811 = vst [vmem:[#allocation2] sm:$0xff] %v2326_v16 }
  0x9c   : > { %812 = vst [vmem:[#allocation2 + $0x18] sm:$0xff] %v2326_v16  ;;  %813 = vst [vmem:[#allocation2 + $0x8] sm:$0xff] %v2326_v16 }
  0x9d PF: > { %v2172_v17 = vld [vmem:[%s2747_s27 + $0x78] sm:$0xff]   ;;  %v2176_v21 = vld [vmem:[%s2747_s27 + $0x70] sm:$0xff]   ;;  %v2180_v25 = vld [vmem:[%s2747_s27 + $0x68] sm:$0xff]   ;;  %p1944_p4 = scmp.ne.s32.totalorder %s2308_s18, 1 }
  0x9e   : > { %v2173_v18 = vld [vmem:[%s2747_s27 + $0xf8] sm:$0xff]   ;;  %1970 = vmatprep.subr.bf16.mxu0 %v2172_v17  ;;  %v2177_v22 = vld [vmem:[%s2747_s27 + $0xf0] sm:$0xff]   ;;  %v2181_v26 = vld [vmem:[%s2747_s27 + $0xe8] sm:$0xff]  }
  0x9f   : > { %v2174_v19 = vld [vmem:[%s2747_s27 + $0x38] sm:$0xff]   ;;  %1998 = vmatprep.subr.bf16.mxu1 %v2173_v18  ;;  %v2178_v23 = vld [vmem:[%s2747_s27 + $0x30] sm:$0xff]   ;;  %v2182_v27 = vld [vmem:[%s2747_s27 + $0x28] sm:$0xff]  }
  0xa0   : > { %v2175_v20 = vld [vmem:[%s2747_s27 + $0xb8] sm:$0xff]   ;;  %1971 = vmatpush3.bf16.msra.mxu0 %v2174_v19  ;;  %v2179_v24 = vld [vmem:[%s2747_s27 + $0xb0] sm:$0xff]   ;;  %v2183_v28 = vld [vmem:[%s2747_s27 + $0xa8] sm:$0xff]  }
  0xa1   : > { %1999 = vmatpush3.bf16.msra.mxu1 %v2175_v20  ;;  %1972 = vmatprep.subr.bf16.mxu0 %v2176_v21  ;;  %v2184_v29 = vld [vmem:[%s2747_s27 + $0x60] sm:$0xff]   ;;  %v2188_v33 = vld [vmem:[%s2747_s27 + $0x58] sm:$0xff]   ;;  %v2192_v37 = vld [vmem:[%s2747_s27 + $0x50] sm:$0xff]  }
  0xa2   : > { %2000 = vmatprep.subr.bf16.mxu1 %v2177_v22  ;;  %v2185_v30 = vld [vmem:[%s2747_s27 + $0xe0] sm:$0xff]   ;;  %v2189_v34 = vld [vmem:[%s2747_s27 + $0xd8] sm:$0xff]   ;;  %v2193_v38 = vld [vmem:[%s2747_s27 + $0xd0] sm:$0xff]  }
  0xa3   : > { %v2186_v31 = vld [vmem:[%s2747_s27 + $0x20] sm:$0xff]   ;;  %v2190_v35 = vld [vmem:[%s2747_s27 + $0x18] sm:$0xff]   ;;  %v2194_v39 = vld [vmem:[%s2747_s27 + $0x10] sm:$0xff]  }
  0xa4   : > { %1973 = vmatpush3.bf16.msra.mxu0 %v2178_v23  ;;  %v2187_v32 = vld [vmem:[%s2747_s27 + $0xa0] sm:$0xff]   ;;  %v2191_v36 = vld [vmem:[%s2747_s27 + $0x98] sm:$0xff]   ;;  %v2195_v40 = vld [vmem:[%s2747_s27 + $0x90] sm:$0xff]  }
  0xa5   : > { %2001 = vmatpush3.bf16.msra.mxu1 %v2179_v24  ;;  %1974 = vmatprep.subr.bf16.mxu0 %v2180_v25  ;;  %v2196_v41 = vld [vmem:[%s2747_s27 + $0x48] sm:$0xff]   ;;  %v2200_v45 = vld [vmem:[%s2747_s27 + $0x40] sm:$0xff]   ;;  %v2204_v57 = vld [vmem:[%s2747_s27 + $0x178] sm:$0xff]  }
  0xa6   : > { %2002 = vmatprep.subr.bf16.mxu1 %v2181_v26  ;;  %v2197_v42 = vld [vmem:[%s2747_s27 + $0xc8] sm:$0xff]   ;;  %v2201_v46 = vld [vmem:[%s2747_s27 + $0xc0] sm:$0xff]   ;;  %v2205_v58 = vld [vmem:[%s2747_s27 + $0x1f8] sm:$0xff]  }
  0xa7   : > { %v2198_v43 = vld [vmem:[%s2747_s27 + $0x8] sm:$0xff]   ;;  %v2202_v47 = vld [vmem:[%s2747_s27] sm:$0xff]   ;;  %v2206_v59 = vld [vmem:[%s2747_s27 + $0x138] sm:$0xff]  }
  0xa8   : > { %1975 = vmatpush3.bf16.msra.mxu0 %v2182_v27  ;;  %v2199_v44 = vld [vmem:[%s2747_s27 + $0x88] sm:$0xff]   ;;  %v2203_v48 = vld [vmem:[%s2747_s27 + $0x80] sm:$0xff]   ;;  %v2207_v60 = vld [vmem:[%s2747_s27 + $0x1b8] sm:$0xff]  }
  0xa9   : > { %2003 = vmatpush3.bf16.msra.mxu1 %v2183_v28  ;;  %1976 = vmatprep.subr.bf16.mxu0 %v2184_v29  ;;  %v818_v49 = vld [vmem:[%s2745_s0] sm:$0xff]  ;;  %v819_v51 = vld [vmem:[%s2745_s0 + $0x8] sm:$0xff]  ;;  %v2208_v61 = vld [vmem:[%s2747_s27 + $0x170] sm:$0xff]  }
  0xaa   : > { %2004 = vmatprep.subr.bf16.mxu1 %v2185_v30  ;;  %v822_v50 = vld [vmem:[%s2745_s0 + $0x20] sm:$0xff]  ;;  %v823_v54 = vld [vmem:[%s2745_s0 + $0x28] sm:$0xff]  ;;  %v2209_v62 = vld [vmem:[%s2747_s27 + $0x1f0] sm:$0xff]  }
  0xab   : > { %v1864_v52 = vcombine.low %v818_v49, %v822_v50  ;;  %v1865_v53 = vcombine.high %v818_v49, %v822_v50  ;;  %v1866_v55 = vcombine.low %v819_v51, %v823_v54  ;;  %v1867_v56 = vcombine.high %v819_v51, %v823_v54  ;;  %v2210_v63 = vld [vmem:[%s2747_s27 + $0x130] sm:$0xff]   ;;  %v2212_v1 = vld [vmem:[%s2747_s27 + $0x168] sm:$0xff]   ;;  %v2216_v5 = vld [vmem:[%s2747_s27 + $0x160] sm:$0xff]  }
  0xac   : > { %1977 = vmatpush3.bf16.msra.mxu0 %v2186_v31  ;;  %v2211_v0 = vld [vmem:[%s2747_s27 + $0x1b0] sm:$0xff]   ;;  %v2213_v2 = vld [vmem:[%s2747_s27 + $0x1e8] sm:$0xff]   ;;  %v2217_v6 = vld [vmem:[%s2747_s27 + $0x1e0] sm:$0xff]  }
  0xad   : > { %2005 = vmatpush3.bf16.msra.mxu1 %v2187_v32  ;;  %1978 = vmatprep.subr.bf16.mxu0 %v2188_v33  ;;  %v2214_v3 = vld [vmem:[%s2747_s27 + $0x128] sm:$0xff]   ;;  %v2218_v7 = vld [vmem:[%s2747_s27 + $0x120] sm:$0xff]   ;;  %v2220_v9 = vld [vmem:[%s2747_s27 + $0x158] sm:$0xff]  }
  0xae   : > { %2006 = vmatprep.subr.bf16.mxu1 %v2189_v34  ;;  %1458 = vmatprep.mubr.bf16.mxu0 %v1865_v53  ;;  %v2215_v4 = vld [vmem:[%s2747_s27 + $0x1a8] sm:$0xff]   ;;  %v2219_v8 = vld [vmem:[%s2747_s27 + $0x1a0] sm:$0xff]   ;;  %v2221_v10 = vld [vmem:[%s2747_s27 + $0x1d8] sm:$0xff]  }
  0xaf   : > { %1507 = vmatprep.mubr.bf16.mxu1 %v1867_v56  ;;  %v826_v11 = vld [vmem:[%s2745_s0 + $0x40] sm:$0xff]  ;;  %v827_v14 = vld [vmem:[%s2745_s0 + $0x48] sm:$0xff]  ;;  %v2222_v18 = vld [vmem:[%s2747_s27 + $0x118] sm:$0xff]  }
  0xb0   : > { %1979 = vmatpush3.bf16.msra.mxu0 %v2190_v35  ;;  %v830_v12 = vld [vmem:[%s2745_s0 + $0x60] sm:$0xff]  ;;  %v831_v15 = vld [vmem:[%s2745_s0 + $0x68] sm:$0xff]  ;;  %v2223_v20 = vld [vmem:[%s2747_s27 + $0x198] sm:$0xff]  }
  0xb1   : > { %2007 = vmatpush3.bf16.msra.mxu1 %v2191_v36  ;;  %1980 = vmatprep.subr.bf16.mxu0 %v2192_v37  ;;  %v1873_v13 = vcombine.high %v826_v11, %v830_v12  ;;  %v1872_v16 = vcombine.low %v826_v11, %v830_v12  ;;  %v1875_v17 = vcombine.high %v827_v14, %v831_v15  ;;  %v2224_v21 = vld [vmem:[%s2747_s27 + $0x150] sm:$0xff]   ;;  %v2228_v25 = vld [vmem:[%s2747_s27 + $0x148] sm:$0xff]   ;;  %v2232_v29 = vld [vmem:[%s2747_s27 + $0x140] sm:$0xff]  }
  0xb2   : > { %2008 = vmatprep.subr.bf16.mxu1 %v2193_v38  ;;  %v1874_v19 = vcombine.low %v827_v14, %v831_v15  ;;  %v2225_v22 = vld [vmem:[%s2747_s27 + $0x1d0] sm:$0xff]   ;;  %v2229_v26 = vld [vmem:[%s2747_s27 + $0x1c8] sm:$0xff]   ;;  %v2233_v30 = vld [vmem:[%s2747_s27 + $0x1c0] sm:$0xff]  }
  0xb3   : > { %v2226_v23 = vld [vmem:[%s2747_s27 + $0x110] sm:$0xff]   ;;  %v2230_v27 = vld [vmem:[%s2747_s27 + $0x108] sm:$0xff]   ;;  %v2234_v31 = vld [vmem:[%s2747_s27 + $0x100] sm:$0xff]  }
  0xb4   : > { %1981 = vmatpush3.bf16.msra.mxu0 %v2194_v39  ;;  %v2227_v24 = vld [vmem:[%s2747_s27 + $0x190] sm:$0xff]   ;;  %v2231_v28 = vld [vmem:[%s2747_s27 + $0x188] sm:$0xff]   ;;  %v2235_v32 = vld [vmem:[%s2747_s27 + $0x180] sm:$0xff]  }
  0xb5   : > { %2009 = vmatpush3.bf16.msra.mxu1 %v2195_v40  ;;  %1982 = vmatprep.subr.bf16.mxu0 %v2196_v41  ;;  %v820_v33 = vld [vmem:[%s2745_s0 + $0x10] sm:$0xff]  ;;  %v821_v35 = vld [vmem:[%s2745_s0 + $0x18] sm:$0xff] }
  0xb6   : > { %2010 = vmatprep.subr.bf16.mxu1 %v2197_v42  ;;  %v824_v34 = vld [vmem:[%s2745_s0 + $0x30] sm:$0xff]  ;;  %v825_v36 = vld [vmem:[%s2745_s0 + $0x38] sm:$0xff] }
  0xb7   : > { %v1868_v37 = vcombine.low %v820_v33, %v824_v34  ;;  %v1869_v38 = vcombine.high %v820_v33, %v824_v34  ;;  %v1870_v39 = vcombine.low %v821_v35, %v825_v36  ;;  %v1871_v40 = vcombine.high %v821_v35, %v825_v36  ;;  %v828_v41 = vld [vmem:[%s2745_s0 + $0x50] sm:$0xff] }
  0xb8   : > { %1983 = vmatpush3.bf16.msra.mxu0 %v2198_v43  ;;  %v832_v42 = vld [vmem:[%s2745_s0 + $0x70] sm:$0xff]  ;;  %v829_v43 = vld [vmem:[%s2745_s0 + $0x58] sm:$0xff] }
  0xb9   : > { %2011 = vmatpush3.bf16.msra.mxu1 %v2199_v44  ;;  %1984 = vmatprep.subr.bf16.mxu0 %v2200_v45  ;;  %v1877_v44 = vcombine.high %v828_v41, %v832_v42  ;;  %v833_v45 = vld [vmem:[%s2745_s0 + $0x78] sm:$0xff] }
  0xba   : > { %2012 = vmatprep.subr.bf16.mxu1 %v2201_v46  ;;  %v1879_v46 = vcombine.high %v829_v43, %v833_v45 }
  0xbc   : > { %1985 = vmatpush3.bf16.msra.mxu0 %v2202_v47  ;;  %v1876_v47 = vcombine.low %v828_v41, %v832_v42  ;;  %v816_v41 = vld [vmem:[#allocation2 + $0x18] sm:$0xff] }
  0xbd   : > { %2013 = vmatpush3.bf16.msra.mxu1 %v2203_v48  ;;  %2026 = vmatprep.subr.bf16.mxu0 %v2204_v57  ;;  %v1878_v48 = vcombine.low %v829_v43, %v833_v45 }
  0xbe   : > { %2054 = vmatprep.subr.bf16.mxu1 %v2205_v58 }
  0xbf   : > { %1459 = vmatmul.mubr.bf16.vlgmr.msra.gmra.mxu0 %v1864_v52 }
  0xc0   : > { %1508 = vmatmul.mubr.bf16.vlgmr.msra.gmra.mxu1 %v1866_v55  ;;  %2027 = vmatpush3.bf16.msra.mxu0 %v2206_v59 }
  0xc1   : > { %2055 = vmatpush3.bf16.msra.mxu1 %v2207_v60  ;;  %2028 = vmatprep.subr.bf16.mxu0 %v2208_v61 }
  0xc2   : > { %2056 = vmatprep.subr.bf16.mxu1 %v2209_v62  ;;  %1466 = vmatprep.mubr.bf16.mxu0 %v1873_v13 }
  0xc3   : > { %1515 = vmatprep.mubr.bf16.mxu1 %v1875_v17  ;;  %v814_v17 = vld [vmem:[#allocation2 + $0x10] sm:$0xff] }
  0xc4   : > { %2029 = vmatpush3.bf16.msra.mxu0 %v2210_v63 }
  0xc5   : > { %2057 = vmatpush3.bf16.msra.mxu1 %v2211_v0  ;;  %2030 = vmatprep.subr.bf16.mxu0 %v2212_v1 }
  0xc6   : > { %2058 = vmatprep.subr.bf16.mxu1 %v2213_v2 }
  0xc7   : > { %1467 = vmatmul.mubr.bf16.gmra.mxu0 %v1872_v16 }
  0xc8   : > { %2031 = vmatpush3.bf16.msra.mxu0 %v2214_v3  ;;  %1516 = vmatmul.mubr.bf16.gmra.mxu1 %v1874_v19 }
  0xc9   : > { %2059 = vmatpush3.bf16.msra.mxu1 %v2215_v4  ;;  %2032 = vmatprep.subr.bf16.mxu0 %v2216_v5 }
  0xca   : > { %2060 = vmatprep.subr.bf16.mxu1 %v2217_v6  ;;  %1556 = vmatprep.mubr.bf16.mxu0 %v1869_v38 }
  0xcb   : > { %1605 = vmatprep.mubr.bf16.mxu1 %v1871_v40 }
  0xcc   : > { %2033 = vmatpush3.bf16.msra.mxu0 %v2218_v7 }
  0xcd   : > { %2061 = vmatpush3.bf16.msra.mxu1 %v2219_v8  ;;  %2034 = vmatprep.subr.bf16.mxu0 %v2220_v9 }
  0xce   : > { %2062 = vmatprep.subr.bf16.mxu1 %v2221_v10 }
  0xd0   : > { %2035 = vmatpush3.bf16.msra.mxu0 %v2222_v18 }
  0xd1   : > { %2063 = vmatpush3.bf16.msra.mxu1 %v2223_v20  ;;  %2036 = vmatprep.subr.bf16.mxu0 %v2224_v21 }
  0xd2   : > { %2064 = vmatprep.subr.bf16.mxu1 %v2225_v22 }
  0xd4   : > { %2037 = vmatpush3.bf16.msra.mxu0 %v2226_v23 }
  0xd5   : > { %2065 = vmatpush3.bf16.msra.mxu1 %v2227_v24  ;;  %2038 = vmatprep.subr.bf16.mxu0 %v2228_v25 }
  0xd6   : > { %2066 = vmatprep.subr.bf16.mxu1 %v2229_v26 }
  0xd8   : > { %2039 = vmatpush3.bf16.msra.mxu0 %v2230_v27 }
  0xd9   : > { %2067 = vmatpush3.bf16.msra.mxu1 %v2231_v28  ;;  %2040 = vmatprep.subr.bf16.mxu0 %v2232_v29  ;;  %v815_v29 = vld [vmem:[#allocation2] sm:$0xff] }
  0xda   : > { %2068 = vmatprep.subr.bf16.mxu1 %v2233_v30 }
  0xdc   : > { %2041 = vmatpush3.bf16.msra.mxu0 %v2234_v31 }
  0xdd   : > { %2069 = vmatpush3.bf16.msra.mxu1 %v2235_v32 }
  0xdf   : > { %1557 = vmatmul.mubr.bf16.vlgmr.msra.gmra.mxu0 %v1868_v37 }
  0xe0   : > { %1606 = vmatmul.mubr.bf16.vlgmr.msra.gmra.mxu1 %v1870_v39  ;;  %1564 = vmatprep.mubr.bf16.mxu0 %v1877_v44 }
  0xe1   : > { %1613 = vmatprep.mubr.bf16.mxu1 %v1879_v46 }
  0xe7   : > { %1565 = vmatmul.mubr.bf16.gmra.mxu0 %v1876_v47 }
  0xe8   : > { %1614 = vmatmul.mubr.bf16.gmra.mxu1 %v1878_v48 }
 0x17f   : > { %v1986_v49 = vpop.f32.mrf.mxu0 }
 0x180   : > { %v2014_v50 = vpop.f32.mrf.mxu1 }
 0x181   : > { %v1987_v51 = vpop.f32.mrf.mxu0 }
 0x182   : > { %v2015_v52 = vpop.f32.mrf.mxu1  ;;  %v1988_v1 = vadd.f32 %v1987_v51, %v1986_v49 }
 0x183   : > { %v1989_v53 = vpop.f32.mrf.mxu0  ;;  %v2016_v2 = vadd.f32 %v2015_v52, %v2014_v50  ;;  %v817_v50 = vld [vmem:[#allocation2 + $0x8] sm:$0xff] }
 0x184   : > { %v2017_v54 = vpop.f32.mrf.mxu1 }
 0x185   : > { %v1990_v55 = vpop.f32.mrf.mxu0  ;;  %v1510_v7 = vadd.f32 %v2016_v2, %v1988_v1 }
 0x186   : > { %v2018_v56 = vpop.f32.mrf.mxu1  ;;  %v1991_v8 = vadd.f32 %v1990_v55, %v1989_v53 }
 0x187   : > { %v1992_v57 = vpop.f32.mrf.mxu0  ;;  %v2019_v9 = vadd.f32 %v2018_v56, %v2017_v54 }
 0x188   : > { %v2020_v58 = vpop.f32.mrf.mxu1 }
 0x189   : > { %v1993_v59 = vpop.f32.mrf.mxu0  ;;  %v1513_v20 = vadd.f32 %v2019_v9, %v1991_v8 }
 0x18a   : > { %v2021_v60 = vpop.f32.mrf.mxu1  ;;  %v1994_v15 = vadd.f32 %v1993_v59, %v1992_v57 }
 0x18b   : > { %v1995_v61 = vpop.f32.mrf.mxu0  ;;  %v2022_v16 = vadd.f32 %v2021_v60, %v2020_v58 }
 0x18c   : > { %v2023_v62 = vpop.f32.mrf.mxu1 }
 0x18d   : > { %v1996_v63 = vpop.f32.mrf.mxu0  ;;  %v1518_v28 = vadd.f32 %v2022_v16, %v1994_v15 }
 0x18e   : > { %v2024_v0 = vpop.f32.mrf.mxu1  ;;  %v1997_v32 = vadd.f32 %v1996_v63, %v1995_v61 }
 0x18f   : > { %v2025_v33 = vadd.f32 %v2024_v0, %v2023_v62 }
 0x191   : > { %v1521_v44 = vadd.f32 %v2025_v33, %v1997_v32 }
 0x19f   : > { %v2042_v3 = vpop.f32.mrf.mxu0 }
 0x1a0   : > { %v2070_v4 = vpop.f32.mrf.mxu1 }
 0x1a1   : > { %v2043_v5 = vpop.f32.mrf.mxu0 }
 0x1a2   : > { %v2071_v6 = vpop.f32.mrf.mxu1  ;;  %v2044_v10 = vadd.f32 %v2043_v5, %v2042_v3 }
 0x1a3   : > { %v2045_v11 = vpop.f32.mrf.mxu0  ;;  %v2072_v14 = vadd.f32 %v2071_v6, %v2070_v4 }
 0x1a4   : > { %v2073_v12 = vpop.f32.mrf.mxu1  ;;  %v1559_v13 = vadd.f32 %v2044_v10, %v1510_v7 }
 0x1a5   : > { %v2046_v18 = vpop.f32.mrf.mxu0 }
 0x1a6   : > { %v2074_v19 = vpop.f32.mrf.mxu1  ;;  %v1608_v21 = vadd.f32 %v2072_v14, %v1559_v13  ;;  %v2047_v22 = vadd.f32 %v2046_v18, %v2045_v11 }
 0x1a7   : > { %v2048_v23 = vpop.f32.mrf.mxu0  ;;  %v2075_v27 = vadd.f32 %v2074_v19, %v2073_v12 }
 0x1a8   : > { %v2076_v24 = vpop.f32.mrf.mxu1  ;;  %v1622_v25 = vadd.f32 %v1608_v21, %v814_v17  ;;  %v1562_v26 = vadd.f32 %v2047_v22, %v1513_v20 }
 0x1a9   : > { %v2049_v30 = vpop.f32.mrf.mxu0 }
 0x1aa   : > { %v2077_v31 = vpop.f32.mrf.mxu1  ;;  %1626 = vst [vmem:[#allocation2 + $0x10] sm:$0xff] %v1622_v25  ;;  %v1611_v34 = vadd.f32 %v2075_v27, %v1562_v26  ;;  %v2050_v35 = vadd.f32 %v2049_v30, %v2048_v23 }
 0x1ab   : > { %v2051_v36 = vpop.f32.mrf.mxu0  ;;  %v2078_v40 = vadd.f32 %v2077_v31, %v2076_v24 }
 0x1ac   : > { %v2079_v37 = vpop.f32.mrf.mxu1  ;;  %v1623_v38 = vadd.f32 %v1611_v34, %v815_v29  ;;  %v1567_v39 = vadd.f32 %v2050_v35, %v1518_v28 }
 0x1ad   : > { %v2052_v42 = vpop.f32.mrf.mxu0 }
 0x1ae   : > { %v2080_v43 = vpop.f32.mrf.mxu1  ;;  %1627 = vst [vmem:[#allocation2] sm:$0xff] %v1623_v38  ;;  %v1616_v45 = vadd.f32 %v2078_v40, %v1567_v39  ;;  %v2053_v46 = vadd.f32 %v2052_v42, %v2051_v36 }
 0x1af   : > { %v2081_v49 = vadd.f32 %v2080_v43, %v2079_v37 }
 0x1b0   : > { %v1624_v47 = vadd.f32 %v1616_v45, %v816_v41  ;;  %v1570_v48 = vadd.f32 %v2053_v46, %v1521_v44 }
 0x1b2   : > { %1628 = vst [vmem:[#allocation2 + $0x18] sm:$0xff] %v1624_v47  ;;  %v1619_v51 = vadd.f32 %v2081_v49, %v1570_v48  ;;  %1633 = sbr.rel (%p1944_p4) target bundleno = 577 (0x241), region = 104 }
 0x1b4   : > { %v1625_v52 = vadd.f32 %v1619_v51, %v817_v50 }
 0x1b6   : > { %1629 = vst [vmem:[#allocation2 + $0x8] sm:$0xff] %v1625_v52 }
 0x1b7   : > { %v1640_v53 = vld [vmem:[%s2892_s2 + $0x10] sm:$0xff]  ;;  %v1638_v54 = vld [vmem:[%s2892_s2] sm:$0xff]  ;;  %v2327_v55 = vmov 0   ;;  %v1641_v56 = vld [vmem:[%s2892_s2 + $0x18] sm:$0xff] }
 0x1b8   : > { %2237 = vset.pattern.permute.xlu1 %v2327_v55  ;;  %2236 = vset.pattern.permute.xlu0 %v2327_v55  ;;  %v1639_v57 = vld [vmem:[%s2892_s2 + $0x8] sm:$0xff]  ;;  %v1634_v59 = vld [vmem:[#allocation2 + $0x10] sm:$0xff]  ;;  %v1635_v1 = vld [vmem:[#allocation2] sm:$0xff] }
 0x1b9   : > { %1654 = vperm.xlu1 %2237, %v1640_v53   ;;  %1644 = vperm.xlu0 %2236, %v1638_v54   ;;  %v1636_v58 = vld [vmem:[#allocation2 + $0x18] sm:$0xff] }
 0x1bd   : > { %1659 = vperm.xlu1 %2237, %v1641_v56   ;;  %1649 = vperm.xlu0 %2236, %v1639_v57   ;;  %v1637_v0 = vld [vmem:[#allocation2 + $0x8] sm:$0xff] }
 0x234   : > { %v1655_v60 = vpop.permute.xlu1 %1654  ;;  %v1645_v61 = vpop.permute.xlu0 %1644 }
 0x235   : > { %v1664_v62 = vadd.f32 %v1655_v60, %v1636_v58  ;;  %v1662_v63 = vadd.f32 %v1645_v61, %v1634_v59 }
 0x237   : > { %v1672_v4 = vmul.f32 0.01, %v1664_v62  ;;  %v1670_v5 = vmul.f32 0.01, %v1662_v63  ;;  %vm1668_vm0 = vcmp.gt.f32.partialorder %v1664_v62, 0.0  ;;  %vm1666_vm1 = vcmp.gt.f32.partialorder %v1662_v63, 0.0 }
 0x238   : > { %v1660_v2 = vpop.permute.xlu1 %1659  ;;  %v1650_v3 = vpop.permute.xlu0 %1649 }
 0x239   : > { %v1665_v6 = vadd.f32 %v1660_v2, %v1637_v0  ;;  %v1663_v7 = vadd.f32 %v1650_v3, %v1635_v1  ;;  %v1676_v10 = vsel %vm1668_vm0, %v1664_v62, %v1672_v4  ;;  %v1674_v11 = vsel %vm1666_vm1, %v1662_v63, %v1670_v5 }
 0x23b   : > { %vm1669_vm2 = vcmp.gt.f32.partialorder %v1665_v6, 0.0  ;;  %v1673_v8 = vmul.f32 0.01, %v1665_v6  ;;  %vm1667_vm3 = vcmp.gt.f32.partialorder %v1663_v7, 0.0  ;;  %v1671_v9 = vmul.f32 0.01, %v1663_v7 }
 0x23d   : > { %v1677_v12 = vsel %vm1669_vm2, %v1665_v6, %v1673_v8  ;;  %v1675_v13 = vsel %vm1667_vm3, %v1663_v7, %v1671_v9 }
 0x23e   : > { %v1967_v14 = vpack.c.bf16 %v1677_v12, %v1676_v10  ;;  %v1962_v15 = vpack.c.bf16 %v1675_v13, %v1674_v11 }
 0x240   : > { %1969 = vst [vmem:[%s2749_s29 + $0x8] sm:$0xff] %v1967_v14   ;;  %1963 = vst [vmem:[%s2749_s29] sm:$0xff] %v1962_v15  }
 0x241 PF: > { %1704 = sbr.rel (!%p2442_p12) target bundleno = 586 (0x24a), region = 108  ;;  %s1950_s28 = sshll.u32 (%p2442_p12), %s2312_s19, 2 }
 0x242   : > { %s1706_s26 = scalar_lea.vmem (%p2442_p12), %s2893_s3, %s1950_s28 }
 0x247   : > { %v1723_v16 = vld [vmem:[%s2749_s29] sm:$0xf]  ;;  %v1725_v17 = vld [vmem:[%s2749_s29 + $0x4] sm:$0xf]  ;;  %v1727_v18 = vld [vmem:[%s2749_s29 + $0x8] sm:$0xf] }
 0x248   : > { %v1729_v19 = vld [vmem:[%s2749_s29 + $0xc] sm:$0xf]  ;;  %1724 = vst [vmem:[%s1706_s26] sm:$0xf] %v1723_v16  ;;  %1726 = vst [vmem:[%s1706_s26 + $0x8] sm:$0xf] %v1725_v17 }
 0x249   : > { %1728 = vst [vmem:[%s1706_s26 + $0x10] sm:$0xf] %v1727_v18  ;;  %1730 = vst [vmem:[%s1706_s26 + $0x18] sm:$0xf] %v1729_v19 }
 0x24a PF: > { %s13_s22 = sadd.s32 1, %s2324_s22   ;;  %s2899_s12 = smov %s2288_s13 }
 0x24b   : > { %p10_p5 = scmp.ge.s32.totalorder %s13_s22, 6   ;;  %s2900_s13 = smov %s2440_s9 }
 0x24c   : > { %s2901_s14 = smov %s2296_s15  ;;  %s2902_s15 = smov %s2437_s8 }
 0x24d   : > { %s2903_s16 = smov %s2304_s17  ;;  %s2904_s17 = smov %s2423_s30 }
 0x24e   : > { %s2905_s18 = smov %s2316_s20  ;;  %s2906_s19 = smov %s2320_s21 }
 0x24f   : > { %s2907_s20 = smov %s2910_s24  ;;  %s2908_s21 = smov %s2914_s25 }
 0x250   :  { %12 = sbr.rel (!%p10_p5) target bundleno = 8 (0x8), region = 188 }

// kernel: a_call__.20
= control target key start
LH: loop header
LB: loop body
LE: loop exit
PB: predicated region body
PF: predicated region fallthrough
CT: control target
= control target key end

     0   :  { %s2018_s12 = smov 0   ;;  %s2020_s13 = smov 0   ;;  %s2426_s0 = inlined_call_operand.vmem [shape: bf16[32,864], index: 0, kind: input, shape index: {}]   ;;  %s2427_s1 = inlined_call_operand.vmem [shape: bf16[864,256], index: 1, kind: input, shape index: {}]   ;;  %s2428_s2 = inlined_call_operand.vmem [shape: f32[32,1], index: 2, kind: input, shape index: {}]   ;;  %s2429_s3 = inlined_call_operand.vmem [shape: bf16[32,256], index: 3, kind: output, shape index: {}]  }
   0x1   :  { %s2022_s14 = smov 0   ;;  %s2024_s15 = smov 0  }
   0x2   :  { %s2026_s16 = smov 0  }
   0x3 LB: > { %s25_s17 = sadd.s32 1, %s1991_s15  ;;  %s1629_s18 = sadd.s32 4294967295, %s1995_s16   ;;  %s1995_s16 = sphi %s2026_s16, %s13_s16   ;;  %s1991_s15 = sphi %s2024_s15, %s2434_s15   ;;  %s1987_s14 = sphi %s2022_s14, %s2433_s14   ;;  %s1983_s13 = sphi %s2020_s13, %s2432_s13   ;;  %s1979_s12 = sphi %s2018_s12, %s2431_s12  }
   0x4   : > { %p27_p0 = scmp.ge.s32.totalorder %s25_s17, 2  ;;  %p67_p1 = scmp.ne.s32.totalorder %s1983_s13, %s1979_s12 }
   0x5   : > { %p68_p2 = scmp.eq.s32.totalorder %s1995_s16, 0  ;;  %p118_p4 = scmp.eq.s32.totalorder %s1629_s18, 1 }
   0x6   : > { %s2436_s17 = smov (%p27_p0, %s25_s17), 0  ;;  %s60_s20 = sadd.s32 1, %s1983_s13 }
   0x7   : > { %p69_p3 = por %p68_p2, %p67_p1  ;;  %s56_s19 = ssub.s32 %s1991_s15, %s2436_s17 }
   0x8   : > { %p58_p5 = scmp.eq.s32.totalorder %s56_s19, 0  ;;  %p2053_p6 = por %p118_p4, %p67_p1 }
   0x9   : > { %p1633_p7 = scmp.ge.s32.totalorder %s1995_s16, 2 }
   0xa   : > { %s2058_s22 = scalar_select %p58_p5, %s1983_s13, %s60_s20  }
   0xb   : > { %152 = sbr.rel (%p1633_p7) target bundleno = 92 (0x5c), region = 24 }
  0x10   : > { %155 = sbr.rel (!%p69_p3) target bundleno = 92 (0x5c), region = 28  ;;  %s157_s23 = sand.u32 (%p69_p3), 1, %s1983_s13  }
  0x11   : > { %s1634_s24 = sshll.u32 (%p69_p3), %s1991_s15, 2  ;;  %s1838_s25 = smul.u32 (%p69_p3), 432, %s157_s23 }
  0x12   : > { %s2066_s28 = scalar_lea.vmem (%p69_p3), %s2427_s1, %s1634_s24 }
  0x13   : > { %v181_v0 = vld [vmem:[%s2066_s28] sm:$0xf] (%p69_p3)  ;;  %v183_v1 = vld [vmem:[%s2066_s28 + $0x8] sm:$0xf] (%p69_p3)  ;;  %v185_v2 = vld [vmem:[%s2066_s28 + $0x10] sm:$0xf] (%p69_p3) }
  0x14   : > { %v187_v3 = vld [vmem:[%s2066_s28 + $0x18] sm:$0xf] (%p69_p3)  ;;  %v189_v4 = vld [vmem:[%s2066_s28 + $0x20] sm:$0xf] (%p69_p3)  ;;  %s2073_s29 = scalar_lea.vmem (%p69_p3), [#allocation3], %s1838_s25 }
  0x15   : > { %182 = vst [vmem:[%s2073_s29] sm:$0xf] %v181_v0  ;;  %184 = vst [vmem:[%s2073_s29 + $0x4] sm:$0xf] %v183_v1  ;;  %v191_v5 = vld [vmem:[%s2066_s28 + $0x28] sm:$0xf] }
  0x16   : > { %186 = vst [vmem:[%s2073_s29 + $0x8] sm:$0xf] %v185_v2  ;;  %188 = vst [vmem:[%s2073_s29 + $0xc] sm:$0xf] %v187_v3  ;;  %v193_v6 = vld [vmem:[%s2066_s28 + $0x30] sm:$0xf] }
  0x17   : > { %190 = vst [vmem:[%s2073_s29 + $0x10] sm:$0xf] %v189_v4  ;;  %v195_v7 = vld [vmem:[%s2066_s28 + $0x38] sm:$0xf]  ;;  %192 = vst [vmem:[%s2073_s29 + $0x14] sm:$0xf] %v191_v5 }
  0x18   : > { %194 = vst [vmem:[%s2073_s29 + $0x18] sm:$0xf] %v193_v6  ;;  %196 = vst [vmem:[%s2073_s29 + $0x1c] sm:$0xf] %v195_v7  ;;  %v197_v8 = vld [vmem:[%s2066_s28 + $0x40] sm:$0xf] }
  0x19   : > { %v199_v9 = vld [vmem:[%s2066_s28 + $0x48] sm:$0xf]  ;;  %v201_v10 = vld [vmem:[%s2066_s28 + $0x50] sm:$0xf]  ;;  %198 = vst [vmem:[%s2073_s29 + $0x20] sm:$0xf] %v197_v8 }
  0x1a   : > { %200 = vst [vmem:[%s2073_s29 + $0x24] sm:$0xf] %v199_v9  ;;  %202 = vst [vmem:[%s2073_s29 + $0x28] sm:$0xf] %v201_v10  ;;  %v203_v11 = vld [vmem:[%s2066_s28 + $0x58] sm:$0xf] }
  0x1b   : > { %v205_v12 = vld [vmem:[%s2066_s28 + $0x60] sm:$0xf]  ;;  %v207_v13 = vld [vmem:[%s2066_s28 + $0x68] sm:$0xf]  ;;  %204 = vst [vmem:[%s2073_s29 + $0x2c] sm:$0xf] %v203_v11 }
  0x1c   : > { %206 = vst [vmem:[%s2073_s29 + $0x30] sm:$0xf] %v205_v12  ;;  %208 = vst [vmem:[%s2073_s29 + $0x34] sm:$0xf] %v207_v13  ;;  %v209_v14 = vld [vmem:[%s2066_s28 + $0x70] sm:$0xf] }
  0x1d   : > { %v211_v15 = vld [vmem:[%s2066_s28 + $0x78] sm:$0xf]  ;;  %v213_v16 = vld [vmem:[%s2066_s28 + $0x80] sm:$0xf]  ;;  %210 = vst [vmem:[%s2073_s29 + $0x38] sm:$0xf] %v209_v14 }
  0x1e   : > { %212 = vst [vmem:[%s2073_s29 + $0x3c] sm:$0xf] %v211_v15  ;;  %214 = vst [vmem:[%s2073_s29 + $0x40] sm:$0xf] %v213_v16  ;;  %v215_v17 = vld [vmem:[%s2066_s28 + $0x88] sm:$0xf] }
  0x1f   : > { %v217_v18 = vld [vmem:[%s2066_s28 + $0x90] sm:$0xf]  ;;  %v219_v19 = vld [vmem:[%s2066_s28 + $0x98] sm:$0xf]  ;;  %216 = vst [vmem:[%s2073_s29 + $0x44] sm:$0xf] %v215_v17 }
  0x20   : > { %218 = vst [vmem:[%s2073_s29 + $0x48] sm:$0xf] %v217_v18  ;;  %220 = vst [vmem:[%s2073_s29 + $0x4c] sm:$0xf] %v219_v19  ;;  %v221_v20 = vld [vmem:[%s2066_s28 + $0xa0] sm:$0xf] }
  0x21   : > { %v223_v21 = vld [vmem:[%s2066_s28 + $0xa8] sm:$0xf]  ;;  %v225_v22 = vld [vmem:[%s2066_s28 + $0xb0] sm:$0xf]  ;;  %222 = vst [vmem:[%s2073_s29 + $0x50] sm:$0xf] %v221_v20 }
  0x22   : > { %224 = vst [vmem:[%s2073_s29 + $0x54] sm:$0xf] %v223_v21  ;;  %226 = vst [vmem:[%s2073_s29 + $0x58] sm:$0xf] %v225_v22  ;;  %v227_v23 = vld [vmem:[%s2066_s28 + $0xb8] sm:$0xf] }
  0x23   : > { %v229_v24 = vld [vmem:[%s2066_s28 + $0xc0] sm:$0xf]  ;;  %v231_v25 = vld [vmem:[%s2066_s28 + $0xc8] sm:$0xf]  ;;  %228 = vst [vmem:[%s2073_s29 + $0x5c] sm:$0xf] %v227_v23 }
  0x24   : > { %230 = vst [vmem:[%s2073_s29 + $0x60] sm:$0xf] %v229_v24  ;;  %232 = vst [vmem:[%s2073_s29 + $0x64] sm:$0xf] %v231_v25  ;;  %v233_v26 = vld [vmem:[%s2066_s28 + $0xd0] sm:$0xf] }
  0x25   : > { %v235_v27 = vld [vmem:[%s2066_s28 + $0xd8] sm:$0xf]  ;;  %v237_v28 = vld [vmem:[%s2066_s28 + $0xe0] sm:$0xf]  ;;  %234 = vst [vmem:[%s2073_s29 + $0x68] sm:$0xf] %v233_v26 }
  0x26   : > { %236 = vst [vmem:[%s2073_s29 + $0x6c] sm:$0xf] %v235_v27  ;;  %238 = vst [vmem:[%s2073_s29 + $0x70] sm:$0xf] %v237_v28  ;;  %v239_v29 = vld [vmem:[%s2066_s28 + $0xe8] sm:$0xf] }
  0x27   : > { %v241_v30 = vld [vmem:[%s2066_s28 + $0xf0] sm:$0xf]  ;;  %v243_v31 = vld [vmem:[%s2066_s28 + $0xf8] sm:$0xf]  ;;  %240 = vst [vmem:[%s2073_s29 + $0x74] sm:$0xf] %v239_v29 }
  0x28   : > { %242 = vst [vmem:[%s2073_s29 + $0x78] sm:$0xf] %v241_v30  ;;  %244 = vst [vmem:[%s2073_s29 + $0x7c] sm:$0xf] %v243_v31  ;;  %v245_v32 = vld [vmem:[%s2066_s28 + $0x100] sm:$0xf] }
  0x29   : > { %v247_v33 = vld [vmem:[%s2066_s28 + $0x108] sm:$0xf]  ;;  %v249_v34 = vld [vmem:[%s2066_s28 + $0x110] sm:$0xf]  ;;  %246 = vst [vmem:[%s2073_s29 + $0x80] sm:$0xf] %v245_v32 }
  0x2a   : > { %248 = vst [vmem:[%s2073_s29 + $0x84] sm:$0xf] %v247_v33  ;;  %250 = vst [vmem:[%s2073_s29 + $0x88] sm:$0xf] %v249_v34  ;;  %v251_v35 = vld [vmem:[%s2066_s28 + $0x118] sm:$0xf] }
  0x2b   : > { %v253_v36 = vld [vmem:[%s2066_s28 + $0x120] sm:$0xf]  ;;  %v255_v37 = vld [vmem:[%s2066_s28 + $0x128] sm:$0xf]  ;;  %252 = vst [vmem:[%s2073_s29 + $0x8c] sm:$0xf] %v251_v35 }
  0x2c   : > { %254 = vst [vmem:[%s2073_s29 + $0x90] sm:$0xf] %v253_v36  ;;  %256 = vst [vmem:[%s2073_s29 + $0x94] sm:$0xf] %v255_v37  ;;  %v257_v38 = vld [vmem:[%s2066_s28 + $0x130] sm:$0xf] }
  0x2d   : > { %v259_v39 = vld [vmem:[%s2066_s28 + $0x138] sm:$0xf]  ;;  %v261_v40 = vld [vmem:[%s2066_s28 + $0x140] sm:$0xf]  ;;  %258 = vst [vmem:[%s2073_s29 + $0x98] sm:$0xf] %v257_v38 }
  0x2e   : > { %260 = vst [vmem:[%s2073_s29 + $0x9c] sm:$0xf] %v259_v39  ;;  %262 = vst [vmem:[%s2073_s29 + $0xa0] sm:$0xf] %v261_v40  ;;  %v263_v41 = vld [vmem:[%s2066_s28 + $0x148] sm:$0xf] }
  0x2f   : > { %v265_v42 = vld [vmem:[%s2066_s28 + $0x150] sm:$0xf]  ;;  %v267_v43 = vld [vmem:[%s2066_s28 + $0x158] sm:$0xf]  ;;  %264 = vst [vmem:[%s2073_s29 + $0xa4] sm:$0xf] %v263_v41 }
  0x30   : > { %266 = vst [vmem:[%s2073_s29 + $0xa8] sm:$0xf] %v265_v42  ;;  %268 = vst [vmem:[%s2073_s29 + $0xac] sm:$0xf] %v267_v43  ;;  %v269_v44 = vld [vmem:[%s2066_s28 + $0x160] sm:$0xf] }
  0x31   : > { %v271_v45 = vld [vmem:[%s2066_s28 + $0x168] sm:$0xf]  ;;  %v273_v46 = vld [vmem:[%s2066_s28 + $0x170] sm:$0xf]  ;;  %270 = vst [vmem:[%s2073_s29 + $0xb0] sm:$0xf] %v269_v44 }
  0x32   : > { %272 = vst [vmem:[%s2073_s29 + $0xb4] sm:$0xf] %v271_v45  ;;  %274 = vst [vmem:[%s2073_s29 + $0xb8] sm:$0xf] %v273_v46  ;;  %v275_v47 = vld [vmem:[%s2066_s28 + $0x178] sm:$0xf] }
  0x33   : > { %v277_v48 = vld [vmem:[%s2066_s28 + $0x180] sm:$0xf]  ;;  %v279_v49 = vld [vmem:[%s2066_s28 + $0x188] sm:$0xf]  ;;  %276 = vst [vmem:[%s2073_s29 + $0xbc] sm:$0xf] %v275_v47 }
  0x34   : > { %278 = vst [vmem:[%s2073_s29 + $0xc0] sm:$0xf] %v277_v48  ;;  %280 = vst [vmem:[%s2073_s29 + $0xc4] sm:$0xf] %v279_v49  ;;  %v281_v50 = vld [vmem:[%s2066_s28 + $0x190] sm:$0xf] }
  0x35   : > { %v283_v51 = vld [vmem:[%s2066_s28 + $0x198] sm:$0xf]  ;;  %v285_v52 = vld [vmem:[%s2066_s28 + $0x1a0] sm:$0xf]  ;;  %282 = vst [vmem:[%s2073_s29 + $0xc8] sm:$0xf] %v281_v50 }
  0x36   : > { %284 = vst [vmem:[%s2073_s29 + $0xcc] sm:$0xf] %v283_v51  ;;  %286 = vst [vmem:[%s2073_s29 + $0xd0] sm:$0xf] %v285_v52  ;;  %v287_v53 = vld [vmem:[%s2066_s28 + $0x1a8] sm:$0xf] }
  0x37   : > { %v289_v54 = vld [vmem:[%s2066_s28 + $0x1b0] sm:$0xf]  ;;  %v291_v55 = vld [vmem:[%s2066_s28 + $0x1b8] sm:$0xf]  ;;  %288 = vst [vmem:[%s2073_s29 + $0xd4] sm:$0xf] %v287_v53 }
  0x38   : > { %290 = vst [vmem:[%s2073_s29 + $0xd8] sm:$0xf] %v289_v54  ;;  %292 = vst [vmem:[%s2073_s29 + $0xdc] sm:$0xf] %v291_v55  ;;  %v293_v56 = vld [vmem:[%s2066_s28 + $0x1c0] sm:$0xf] }
  0x39   : > { %v295_v57 = vld [vmem:[%s2066_s28 + $0x1c8] sm:$0xf]  ;;  %v297_v58 = vld [vmem:[%s2066_s28 + $0x1d0] sm:$0xf]  ;;  %294 = vst [vmem:[%s2073_s29 + $0xe0] sm:$0xf] %v293_v56 }
  0x3a   : > { %296 = vst [vmem:[%s2073_s29 + $0xe4] sm:$0xf] %v295_v57  ;;  %298 = vst [vmem:[%s2073_s29 + $0xe8] sm:$0xf] %v297_v58  ;;  %v299_v59 = vld [vmem:[%s2066_s28 + $0x1d8] sm:$0xf] }
  0x3b   : > { %v301_v60 = vld [vmem:[%s2066_s28 + $0x1e0] sm:$0xf]  ;;  %v303_v61 = vld [vmem:[%s2066_s28 + $0x1e8] sm:$0xf]  ;;  %300 = vst [vmem:[%s2073_s29 + $0xec] sm:$0xf] %v299_v59 }
  0x3c   : > { %302 = vst [vmem:[%s2073_s29 + $0xf0] sm:$0xf] %v301_v60  ;;  %304 = vst [vmem:[%s2073_s29 + $0xf4] sm:$0xf] %v303_v61  ;;  %v305_v62 = vld [vmem:[%s2066_s28 + $0x1f0] sm:$0xf] }
  0x3d   : > { %v307_v63 = vld [vmem:[%s2066_s28 + $0x1f8] sm:$0xf]  ;;  %v309_v0 = vld [vmem:[%s2066_s28 + $0x200] sm:$0xf]  ;;  %306 = vst [vmem:[%s2073_s29 + $0xf8] sm:$0xf] %v305_v62 }
  0x3e   : > { %308 = vst [vmem:[%s2073_s29 + $0xfc] sm:$0xf] %v307_v63  ;;  %310 = vst [vmem:[%s2073_s29 + $0x100] sm:$0xf] %v309_v0  ;;  %v311_v1 = vld [vmem:[%s2066_s28 + $0x208] sm:$0xf] }
  0x3f   : > { %v313_v2 = vld [vmem:[%s2066_s28 + $0x210] sm:$0xf]  ;;  %v315_v3 = vld [vmem:[%s2066_s28 + $0x218] sm:$0xf]  ;;  %312 = vst [vmem:[%s2073_s29 + $0x104] sm:$0xf] %v311_v1 }
  0x40   : > { %314 = vst [vmem:[%s2073_s29 + $0x108] sm:$0xf] %v313_v2  ;;  %316 = vst [vmem:[%s2073_s29 + $0x10c] sm:$0xf] %v315_v3  ;;  %v317_v4 = vld [vmem:[%s2066_s28 + $0x220] sm:$0xf] }
  0x41   : > { %v319_v5 = vld [vmem:[%s2066_s28 + $0x228] sm:$0xf]  ;;  %v321_v6 = vld [vmem:[%s2066_s28 + $0x230] sm:$0xf]  ;;  %318 = vst [vmem:[%s2073_s29 + $0x110] sm:$0xf] %v317_v4 }
  0x42   : > { %320 = vst [vmem:[%s2073_s29 + $0x114] sm:$0xf] %v319_v5  ;;  %322 = vst [vmem:[%s2073_s29 + $0x118] sm:$0xf] %v321_v6  ;;  %v323_v7 = vld [vmem:[%s2066_s28 + $0x238] sm:$0xf] }
  0x43   : > { %v325_v8 = vld [vmem:[%s2066_s28 + $0x240] sm:$0xf]  ;;  %v327_v9 = vld [vmem:[%s2066_s28 + $0x248] sm:$0xf]  ;;  %324 = vst [vmem:[%s2073_s29 + $0x11c] sm:$0xf] %v323_v7 }
  0x44   : > { %326 = vst [vmem:[%s2073_s29 + $0x120] sm:$0xf] %v325_v8  ;;  %328 = vst [vmem:[%s2073_s29 + $0x124] sm:$0xf] %v327_v9  ;;  %v329_v10 = vld [vmem:[%s2066_s28 + $0x250] sm:$0xf] }
  0x45   : > { %v331_v11 = vld [vmem:[%s2066_s28 + $0x258] sm:$0xf]  ;;  %v333_v12 = vld [vmem:[%s2066_s28 + $0x260] sm:$0xf]  ;;  %330 = vst [vmem:[%s2073_s29 + $0x128] sm:$0xf] %v329_v10 }
  0x46   : > { %332 = vst [vmem:[%s2073_s29 + $0x12c] sm:$0xf] %v331_v11  ;;  %334 = vst [vmem:[%s2073_s29 + $0x130] sm:$0xf] %v333_v12  ;;  %v335_v13 = vld [vmem:[%s2066_s28 + $0x268] sm:$0xf] }
  0x47   : > { %v337_v14 = vld [vmem:[%s2066_s28 + $0x270] sm:$0xf]  ;;  %v339_v15 = vld [vmem:[%s2066_s28 + $0x278] sm:$0xf]  ;;  %336 = vst [vmem:[%s2073_s29 + $0x134] sm:$0xf] %v335_v13 }
  0x48   : > { %338 = vst [vmem:[%s2073_s29 + $0x138] sm:$0xf] %v337_v14  ;;  %340 = vst [vmem:[%s2073_s29 + $0x13c] sm:$0xf] %v339_v15  ;;  %v341_v16 = vld [vmem:[%s2066_s28 + $0x280] sm:$0xf] }
  0x49   : > { %v343_v17 = vld [vmem:[%s2066_s28 + $0x288] sm:$0xf]  ;;  %v345_v18 = vld [vmem:[%s2066_s28 + $0x290] sm:$0xf]  ;;  %342 = vst [vmem:[%s2073_s29 + $0x140] sm:$0xf] %v341_v16 }
  0x4a   : > { %344 = vst [vmem:[%s2073_s29 + $0x144] sm:$0xf] %v343_v17  ;;  %346 = vst [vmem:[%s2073_s29 + $0x148] sm:$0xf] %v345_v18  ;;  %v347_v19 = vld [vmem:[%s2066_s28 + $0x298] sm:$0xf] }
  0x4b   : > { %v349_v20 = vld [vmem:[%s2066_s28 + $0x2a0] sm:$0xf]  ;;  %v351_v21 = vld [vmem:[%s2066_s28 + $0x2a8] sm:$0xf]  ;;  %348 = vst [vmem:[%s2073_s29 + $0x14c] sm:$0xf] %v347_v19 }
  0x4c   : > { %350 = vst [vmem:[%s2073_s29 + $0x150] sm:$0xf] %v349_v20  ;;  %352 = vst [vmem:[%s2073_s29 + $0x154] sm:$0xf] %v351_v21  ;;  %v353_v22 = vld [vmem:[%s2066_s28 + $0x2b0] sm:$0xf] }
  0x4d   : > { %v355_v23 = vld [vmem:[%s2066_s28 + $0x2b8] sm:$0xf]  ;;  %v357_v24 = vld [vmem:[%s2066_s28 + $0x2c0] sm:$0xf]  ;;  %354 = vst [vmem:[%s2073_s29 + $0x158] sm:$0xf] %v353_v22 }
  0x4e   : > { %356 = vst [vmem:[%s2073_s29 + $0x15c] sm:$0xf] %v355_v23  ;;  %358 = vst [vmem:[%s2073_s29 + $0x160] sm:$0xf] %v357_v24  ;;  %v359_v25 = vld [vmem:[%s2066_s28 + $0x2c8] sm:$0xf] }
  0x4f   : > { %v361_v26 = vld [vmem:[%s2066_s28 + $0x2d0] sm:$0xf]  ;;  %v363_v27 = vld [vmem:[%s2066_s28 + $0x2d8] sm:$0xf]  ;;  %360 = vst [vmem:[%s2073_s29 + $0x164] sm:$0xf] %v359_v25 }
  0x50   : > { %362 = vst [vmem:[%s2073_s29 + $0x168] sm:$0xf] %v361_v26  ;;  %364 = vst [vmem:[%s2073_s29 + $0x16c] sm:$0xf] %v363_v27  ;;  %v365_v28 = vld [vmem:[%s2066_s28 + $0x2e0] sm:$0xf] }
  0x51   : > { %v367_v29 = vld [vmem:[%s2066_s28 + $0x2e8] sm:$0xf]  ;;  %v369_v30 = vld [vmem:[%s2066_s28 + $0x2f0] sm:$0xf]  ;;  %366 = vst [vmem:[%s2073_s29 + $0x170] sm:$0xf] %v365_v28 }
  0x52   : > { %368 = vst [vmem:[%s2073_s29 + $0x174] sm:$0xf] %v367_v29  ;;  %370 = vst [vmem:[%s2073_s29 + $0x178] sm:$0xf] %v369_v30  ;;  %v371_v31 = vld [vmem:[%s2066_s28 + $0x2f8] sm:$0xf] }
  0x53   : > { %v373_v32 = vld [vmem:[%s2066_s28 + $0x300] sm:$0xf]  ;;  %v375_v33 = vld [vmem:[%s2066_s28 + $0x308] sm:$0xf]  ;;  %372 = vst [vmem:[%s2073_s29 + $0x17c] sm:$0xf] %v371_v31 }
  0x54   : > { %374 = vst [vmem:[%s2073_s29 + $0x180] sm:$0xf] %v373_v32  ;;  %376 = vst [vmem:[%s2073_s29 + $0x184] sm:$0xf] %v375_v33  ;;  %v377_v34 = vld [vmem:[%s2066_s28 + $0x310] sm:$0xf] }
  0x55   : > { %v379_v35 = vld [vmem:[%s2066_s28 + $0x318] sm:$0xf]  ;;  %v381_v36 = vld [vmem:[%s2066_s28 + $0x320] sm:$0xf]  ;;  %378 = vst [vmem:[%s2073_s29 + $0x188] sm:$0xf] %v377_v34 }
  0x56   : > { %380 = vst [vmem:[%s2073_s29 + $0x18c] sm:$0xf] %v379_v35  ;;  %382 = vst [vmem:[%s2073_s29 + $0x190] sm:$0xf] %v381_v36  ;;  %v383_v37 = vld [vmem:[%s2066_s28 + $0x328] sm:$0xf] }
  0x57   : > { %v385_v38 = vld [vmem:[%s2066_s28 + $0x330] sm:$0xf]  ;;  %v387_v39 = vld [vmem:[%s2066_s28 + $0x338] sm:$0xf]  ;;  %384 = vst [vmem:[%s2073_s29 + $0x194] sm:$0xf] %v383_v37 }
  0x58   : > { %386 = vst [vmem:[%s2073_s29 + $0x198] sm:$0xf] %v385_v38  ;;  %388 = vst [vmem:[%s2073_s29 + $0x19c] sm:$0xf] %v387_v39  ;;  %v389_v40 = vld [vmem:[%s2066_s28 + $0x340] sm:$0xf] }
  0x59   : > { %v391_v41 = vld [vmem:[%s2066_s28 + $0x348] sm:$0xf]  ;;  %v393_v42 = vld [vmem:[%s2066_s28 + $0x350] sm:$0xf]  ;;  %390 = vst [vmem:[%s2073_s29 + $0x1a0] sm:$0xf] %v389_v40 }
  0x5a   : > { %392 = vst [vmem:[%s2073_s29 + $0x1a4] sm:$0xf] %v391_v41  ;;  %394 = vst [vmem:[%s2073_s29 + $0x1a8] sm:$0xf] %v393_v42  ;;  %v395_v43 = vld [vmem:[%s2066_s28 + $0x358] sm:$0xf] }
  0x5b   : > { %396 = vst [vmem:[%s2073_s29 + $0x1ac] sm:$0xf] %v395_v43 }
  0x5c PF: > { %p1635_p8 = scmp.ge.s32.totalorder %s1995_s16, 1  ;;  %p635_p9 = scmp.lt.s32.totalorder %s1995_s16, 3 }
  0x5e   : > { %p636_p10 = pnand %p1635_p8, %p635_p9 }
  0x5f   : > { %s642_s30 = sand.u32 (!%p636_p10), 1, %s1979_s12  }
  0x60   : > { %639 = sbr.rel (%p636_p10) target bundleno = 397 (0x18d), region = 69  ;;  %s1636_s6 = sshll.u32 (!%p636_p10), %s642_s30, 4 }
  0x61   : > { %s1839_s4 = smul.u32 (!%p636_p10), 432, %s642_s30  ;;  %s668_s7 = scalar_lea.vmem (!%p636_p10), [#allocation4], %s1636_s6 }
  0x63   : > { %s2297_s9 = scalar_lea.vmem (!%p636_p10), [#allocation3], %s1839_s4 }
  0x65   : > { %v1917_v44 = vld [vmem:[%s2426_s0 + $0x4] ss:$28 sps:$4 sm:$0xff]   ;;  %v1920_v45 = vld [vmem:[%s2426_s0 + $0xc] ss:$28 sps:$4 sm:$0xff]   ;;  %v1997_v46 = vmov 0   ;;  %vm1207_vm0 = vcmask 785408  }
  0x66   : > { %1881 = vset.pattern.permute.xlu0 %v1997_v46  ;;  %1882 = vset.pattern.permute.xlu1 %v1997_v46  ;;  %v1883_v47 = vld [vmem:[%s2297_s9 + $0x78] sm:$0xff]   ;;  %v1887_v51 = vld [vmem:[%s2297_s9 + $0x70] sm:$0xff]   ;;  %v1891_v55 = vld [vmem:[%s2297_s9 + $0x68] sm:$0xff]   ;;  %s1712_s12 = sshll.u32 (%p2053_p6), %s1987_s14, 2 }
  0x67   : > { %1246 = vmatprep.mubr.bf16.mxu0 %v1917_v44  ;;  %1295 = vmatprep.mubr.bf16.mxu1 %v1920_v45  ;;  %v1884_v48 = vld [vmem:[%s2297_s9 + $0xf8] sm:$0xff]   ;;  %v1888_v52 = vld [vmem:[%s2297_s9 + $0xf0] sm:$0xff]   ;;  %v1892_v56 = vld [vmem:[%s2297_s9 + $0xe8] sm:$0xff]   ;;  %s1493_s10 = scalar_lea.vmem (%p2053_p6), %s2429_s3, %s1712_s12 }
  0x68   : > { %1730 = vmatprep.subr.bf16.mxu0 %v1883_v47  ;;  %v1885_v49 = vld [vmem:[%s2297_s9 + $0x38] sm:$0xff]   ;;  %1758 = vmatprep.subr.bf16.mxu1 %v1884_v48  ;;  %v1889_v53 = vld [vmem:[%s2297_s9 + $0x30] sm:$0xff]   ;;  %v1893_v57 = vld [vmem:[%s2297_s9 + $0x28] sm:$0xff]  }
  0x69   : > { %v1886_v50 = vld [vmem:[%s2297_s9 + $0xb8] sm:$0xff]   ;;  %1731 = vmatpush3.bf16.msra.mxu0 %v1885_v49  ;;  %v1890_v54 = vld [vmem:[%s2297_s9 + $0xb0] sm:$0xff]   ;;  %v1894_v58 = vld [vmem:[%s2297_s9 + $0xa8] sm:$0xff]  }
  0x6a   : > { %1759 = vmatpush3.bf16.msra.mxu1 %v1886_v50  ;;  %1732 = vmatprep.subr.bf16.mxu0 %v1887_v51  ;;  %v1895_v59 = vld [vmem:[%s2297_s9 + $0x60] sm:$0xff]   ;;  %v1899_v63 = vld [vmem:[%s2297_s9 + $0x58] sm:$0xff]   ;;  %v1903_v3 = vld [vmem:[%s2297_s9 + $0x50] sm:$0xff]  }
  0x6b   : > { %1760 = vmatprep.subr.bf16.mxu1 %v1888_v52  ;;  %v1896_v60 = vld [vmem:[%s2297_s9 + $0xe0] sm:$0xff]   ;;  %v1900_v0 = vld [vmem:[%s2297_s9 + $0xd8] sm:$0xff]   ;;  %v1904_v4 = vld [vmem:[%s2297_s9 + $0xd0] sm:$0xff]  }
  0x6c   : > { %v1897_v61 = vld [vmem:[%s2297_s9 + $0x20] sm:$0xff]   ;;  %v1901_v1 = vld [vmem:[%s2297_s9 + $0x18] sm:$0xff]   ;;  %v1905_v5 = vld [vmem:[%s2297_s9 + $0x10] sm:$0xff]  }
  0x6d   : > { %1733 = vmatpush3.bf16.msra.mxu0 %v1889_v53  ;;  %v1898_v62 = vld [vmem:[%s2297_s9 + $0xa0] sm:$0xff]   ;;  %v1902_v2 = vld [vmem:[%s2297_s9 + $0x98] sm:$0xff]   ;;  %v1906_v6 = vld [vmem:[%s2297_s9 + $0x90] sm:$0xff]  }
  0x6e   : > { %1761 = vmatpush3.bf16.msra.mxu1 %v1890_v54  ;;  %1734 = vmatprep.subr.bf16.mxu0 %v1891_v55  ;;  %v1907_v7 = vld [vmem:[%s2297_s9 + $0x48] sm:$0xff]   ;;  %v1911_v11 = vld [vmem:[%s2297_s9 + $0x40] sm:$0xff]   ;;  %v1921_v18 = vld [vmem:[%s2297_s9 + $0x178] sm:$0xff]  }
  0x6f   : > { %1762 = vmatprep.subr.bf16.mxu1 %v1892_v56  ;;  %v1908_v8 = vld [vmem:[%s2297_s9 + $0xc8] sm:$0xff]   ;;  %v1912_v12 = vld [vmem:[%s2297_s9 + $0xc0] sm:$0xff]   ;;  %v1922_v19 = vld [vmem:[%s2297_s9 + $0x138] sm:$0xff]  }
  0x70   : > { %v1909_v9 = vld [vmem:[%s2297_s9 + $0x8] sm:$0xff]   ;;  %v1913_v14 = vld [vmem:[%s2297_s9] sm:$0xff]   ;;  %v1923_v20 = vld [vmem:[%s2297_s9 + $0x170] sm:$0xff]  }
  0x71   : > { %1735 = vmatpush3.bf16.msra.mxu0 %v1893_v57  ;;  %v1910_v10 = vld [vmem:[%s2297_s9 + $0x88] sm:$0xff]   ;;  %v1914_v16 = vld [vmem:[%s2297_s9 + $0x80] sm:$0xff]   ;;  %v1924_v21 = vld [vmem:[%s2297_s9 + $0x130] sm:$0xff]  }
  0x72   : > { %1763 = vmatpush3.bf16.msra.mxu1 %v1894_v58  ;;  %1736 = vmatprep.subr.bf16.mxu0 %v1895_v59  ;;  %v1915_v13 = vld [vmem:[%s2426_s0] ss:$28 sps:$4 sm:$0xff]   ;;  %v1918_v15 = vld [vmem:[%s2426_s0 + $0x8] ss:$28 sps:$4 sm:$0xff]   ;;  %v1937_v30 = vld [vmem:[%s2426_s0 + $0x38] ss:$28 sps:$4 sm:$0xff]  }
  0x73   : > { %1764 = vmatprep.subr.bf16.mxu1 %v1896_v60  ;;  %v1932_v17 = vld [vmem:[%s2426_s0 + $0x3c] ss:$28 sps:$4 sm:$0xff]   ;;  %v1927_v25 = vld [vmem:[%s2297_s9 + $0x160] sm:$0xff]   ;;  %v1939_v34 = vld [vmem:[%s2297_s9 + $0x150] sm:$0xff]  }
  0x74   : > { %v1925_v22 = vld [vmem:[%s2297_s9 + $0x168] sm:$0xff]   ;;  %v1929_v26 = vld [vmem:[%s2297_s9 + $0x120] sm:$0xff]   ;;  %v1930_v29 = vld [vmem:[%s2297_s9 + $0x158] sm:$0xff]  }
  0x75   : > { %1737 = vmatpush3.bf16.msra.mxu0 %v1897_v61  ;;  %v1928_v23 = vld [vmem:[%s2297_s9 + $0x1a8] sm:$0xff]   ;;  %v1931_v27 = vld [vmem:[%s2297_s9 + $0x1a0] sm:$0xff]   ;;  %v1940_v32 = vld [vmem:[%s2297_s9 + $0x198] sm:$0xff]  }
  0x76   : > { %1765 = vmatpush3.bf16.msra.mxu1 %v1898_v62  ;;  %1738 = vmatprep.subr.bf16.mxu0 %v1899_v63  ;;  %v1926_v24 = vld [vmem:[%s2297_s9 + $0x128] sm:$0xff]   ;;  %v1934_v28 = vld [vmem:[%s2426_s0 + $0x44] ss:$28 sps:$4 sm:$0xff]   ;;  %v1936_v33 = vld [vmem:[%s2297_s9 + $0x118] sm:$0xff]  }
  0x77   : > { %1766 = vmatprep.subr.bf16.mxu1 %v1900_v0  ;;  %v1938_v31 = vld [vmem:[%s2426_s0 + $0x40] ss:$28 sps:$4 sm:$0xff]   ;;  %v1950_v41 = vld [vmem:[%s2426_s0 + $0x14] ss:$28 sps:$4 sm:$0xff]   ;;  %v1426_v48 = vld [vmem:[%s2428_s2 + $0x8] sm:$0xff] }
  0x78   : > { %v1943_v35 = vld [vmem:[%s2297_s9 + $0x190] sm:$0xff]   ;;  %v1942_v37 = vld [vmem:[%s2297_s9 + $0x148] sm:$0xff]   ;;  %v1945_v40 = vld [vmem:[%s2297_s9 + $0x140] sm:$0xff]  }
  0x79   : > { %1739 = vmatpush3.bf16.msra.mxu0 %v1901_v1  ;;  %v1941_v36 = vld [vmem:[%s2297_s9 + $0x110] sm:$0xff]   ;;  %v1946_v38 = vld [vmem:[%s2297_s9 + $0x188] sm:$0xff]   ;;  %v1951_v42 = vld [vmem:[%s2297_s9 + $0x180] sm:$0xff]  }
  0x7a   : > { %1767 = vmatpush3.bf16.msra.mxu1 %v1902_v2  ;;  %1740 = vmatprep.subr.bf16.mxu0 %v1903_v3  ;;  %v1944_v39 = vld [vmem:[%s2297_s9 + $0x108] sm:$0xff]   ;;  %v1947_v44 = vld [vmem:[%s2297_s9 + $0x100] sm:$0xff]  }
  0x7b   : > { %1768 = vmatprep.subr.bf16.mxu1 %v1904_v4  ;;  %v1952_v43 = vld [vmem:[%s2426_s0 + $0x18] ss:$28 sps:$4 sm:$0xff]   ;;  %v1425_v45 = vld [vmem:[%s2428_s2] sm:$0xff]  ;;  %v1953_v47 = vld [vmem:[%s2426_s0 + $0x50] ss:$28 sps:$4 sm:$0xff]  }
  0x7c   : > { %v1427_v46 = vld [vmem:[%s2428_s2 + $0x10] sm:$0xff]  ;;  %1431 = vperm.xlu0 %1881, %v1425_v45   ;;  %v1428_v50 = vld [vmem:[%s2428_s2 + $0x18] sm:$0xff]  ;;  %v1954_v51 = vld [vmem:[%s2426_s0 + $0x4c] ss:$28 sps:$4 sm:$0xff]  }
  0x7d   : > { %1741 = vmatpush3.bf16.msra.mxu0 %v1905_v5  ;;  %1441 = vperm.xlu1 %1882, %v1427_v46   ;;  %v1948_v49 = vld [vmem:[%s2426_s0 + $0x10] ss:$28 sps:$4 sm:$0xff]   ;;  %v1956_v52 = vld [vmem:[%s2426_s0 + $0x48] ss:$28 sps:$4 sm:$0xff]  }
  0x7e   : > { %1769 = vmatpush3.bf16.msra.mxu1 %v1906_v6  ;;  %1742 = vmatprep.subr.bf16.mxu0 %v1907_v7 }
  0x7f   : > { %1770 = vmatprep.subr.bf16.mxu1 %v1908_v8 }
  0x80   : > { %1436 = vperm.xlu0 %1881, %v1426_v48  }
  0x81   : > { %1743 = vmatpush3.bf16.msra.mxu0 %v1909_v9  ;;  %1446 = vperm.xlu1 %1882, %v1428_v50  }
  0x82   : > { %1771 = vmatpush3.bf16.msra.mxu1 %v1910_v10  ;;  %1744 = vmatprep.subr.bf16.mxu0 %v1911_v11 }
  0x83   : > { %1772 = vmatprep.subr.bf16.mxu1 %v1912_v12 }
  0x85   : > { %1745 = vmatpush3.bf16.msra.mxu0 %v1913_v14 }
  0x86   : > { %1773 = vmatpush3.bf16.msra.mxu1 %v1914_v16  ;;  %1786 = vmatprep.subr.bf16.mxu0 %v1921_v18 }
  0x87   : > { %1822 = vmatprep.subr.bf16.mxu1 %v1928_v23 }
  0x88   : > { %1247 = vmatmul.mubr.bf16.vlgmr.msra.gmra.mxu0 %v1915_v13 }
  0x89   : > { %1296 = vmatmul.mubr.bf16.vlgmr.msra.gmra.mxu1 %v1918_v15  ;;  %1787 = vmatpush3.bf16.msra.mxu0 %v1922_v19 }
  0x8a   : > { %1788 = vmatprep.subr.bf16.mxu0 %v1923_v20  ;;  %1254 = vmatprep.mubr.bf16.mxu0 %v1932_v17 }
  0x8b   : > { %1823 = vmatpush3.bf16.msra.mxu1 %v1928_v23  ;;  %1303 = vmatprep.mubr.bf16.mxu1 %v1934_v28 }
  0x8c   : > { %1824 = vmatprep.subr.bf16.mxu1 %v1931_v27 }
  0x8d   : > { %1789 = vmatpush3.bf16.msra.mxu0 %v1924_v21 }
  0x8e   : > { %1790 = vmatprep.subr.bf16.mxu0 %v1925_v22 }
  0x8f   : > { %1825 = vmatpush3.bf16.msra.mxu1 %v1931_v27 }
  0x90   : > { %1255 = vmatmul.mubr.bf16.gmra.mxu0 %v1937_v30  ;;  %1826 = vmatprep.subr.bf16.mxu1 %v1940_v32 }
  0x91   : > { %1791 = vmatpush3.bf16.msra.mxu0 %v1926_v24  ;;  %1304 = vmatmul.mubr.bf16.gmra.mxu1 %v1938_v31 }
  0x92   : > { %1792 = vmatprep.subr.bf16.mxu0 %v1927_v25  ;;  %1344 = vmatprep.mubr.bf16.mxu0 %v1950_v41 }
  0x93   : > { %1827 = vmatpush3.bf16.msra.mxu1 %v1940_v32  ;;  %1834 = vmatprep.mubr.msk.bf16.mxu1 %vm1207_vm0, %v1952_v43 }
  0x94   : > { %1828 = vmatprep.subr.bf16.mxu1 %v1943_v35 }
  0x95   : > { %1793 = vmatpush3.bf16.msra.mxu0 %v1929_v26 }
  0x96   : > { %1794 = vmatprep.subr.bf16.mxu0 %v1930_v29 }
  0x97   : > { %1829 = vmatpush3.bf16.msra.mxu1 %v1943_v35 }
  0x98   : > { %1830 = vmatprep.subr.bf16.mxu1 %v1946_v38 }
  0x99   : > { %1795 = vmatpush3.bf16.msra.mxu0 %v1936_v33 }
  0x9a   : > { %1796 = vmatprep.subr.bf16.mxu0 %v1939_v34 }
  0x9b   : > { %1831 = vmatpush3.bf16.msra.mxu1 %v1946_v38 }
  0x9c   : > { %1832 = vmatprep.subr.bf16.mxu1 %v1951_v42 }
  0x9d   : > { %1797 = vmatpush3.bf16.msra.mxu0 %v1941_v36 }
  0x9e   : > { %1798 = vmatprep.subr.bf16.mxu0 %v1942_v37 }
  0x9f   : > { %1833 = vmatpush3.bf16.msra.mxu1 %v1951_v42 }
  0xa1   : > { %1799 = vmatpush3.bf16.msra.mxu0 %v1944_v39 }
  0xa2   : > { %1800 = vmatprep.subr.bf16.mxu0 %v1945_v40  ;;  %1835 = vmatmul.mubr.msk.bf16.vlgmr.msra.gmra.mxu1 %vm1207_vm0, %v1953_v47 }
  0xa5   : > { %1801 = vmatpush3.bf16.msra.mxu0 %v1947_v44 }
  0xa8   : > { %1345 = vmatmul.mubr.bf16.vlgmr.msra.gmra.mxu0 %v1948_v49 }
  0xa9   : > { %1352 = vmatprep.mubr.bf16.mxu0 %v1954_v51 }
  0xb0   : > { %1353 = vmatmul.mubr.bf16.gmra.mxu0 %v1956_v52 }
  0xf7   : > { %v1432_v15 = vpop.permute.xlu0 %1431 }
  0xf8   : > { %v1442_v41 = vpop.permute.xlu1 %1441 }
  0xfb   : > { %v1437_v32 = vpop.permute.xlu0 %1436 }
  0xfc   : > { %v1447_v52 = vpop.permute.xlu1 %1446 }
 0x148   : > { %v1746_v54 = vpop.f32.mrf.mxu0 }
 0x149   : > { %v1774_v53 = vpop.f32.mrf.mxu1 }
 0x14a   : > { %v1747_v56 = vpop.f32.mrf.mxu0 }
 0x14b   : > { %v1775_v55 = vpop.f32.mrf.mxu1  ;;  %v1748_v6 = vadd.f32 %v1747_v56, %v1746_v54 }
 0x14c   : > { %v1749_v58 = vpop.f32.mrf.mxu0  ;;  %v1776_v7 = vadd.f32 %v1775_v55, %v1774_v53 }
 0x14d   : > { %v1777_v57 = vpop.f32.mrf.mxu1 }
 0x14e   : > { %v1750_v60 = vpop.f32.mrf.mxu0  ;;  %v1298_v13 = vadd.f32 %v1776_v7, %v1748_v6 }
 0x14f   : > { %v1778_v59 = vpop.f32.mrf.mxu1  ;;  %v1751_v10 = vadd.f32 %v1750_v60, %v1749_v58 }
 0x150   : > { %v1752_v62 = vpop.f32.mrf.mxu0  ;;  %v1779_v11 = vadd.f32 %v1778_v59, %v1777_v57 }
 0x151   : > { %v1780_v61 = vpop.f32.mrf.mxu1 }
 0x152   : > { %v1753_v0 = vpop.f32.mrf.mxu0  ;;  %v1301_v19 = vadd.f32 %v1779_v11, %v1751_v10 }
 0x153   : > { %v1781_v63 = vpop.f32.mrf.mxu1  ;;  %v1754_v21 = vadd.f32 %v1753_v0, %v1752_v62 }
 0x154   : > { %v1755_v2 = vpop.f32.mrf.mxu0  ;;  %v1782_v22 = vadd.f32 %v1781_v63, %v1780_v61 }
 0x155   : > { %v1783_v1 = vpop.f32.mrf.mxu1 }
 0x156   : > { %v1756_v4 = vpop.f32.mrf.mxu0  ;;  %v1306_v33 = vadd.f32 %v1782_v22, %v1754_v21 }
 0x157   : > { %v1784_v3 = vpop.f32.mrf.mxu1  ;;  %v1757_v29 = vadd.f32 %v1756_v4, %v1755_v2 }
 0x158   : > { %v1785_v30 = vadd.f32 %v1784_v3, %v1783_v1 }
 0x15a   : > { %v1309_v40 = vadd.f32 %v1785_v30, %v1757_v29 }
 0x162   : > { %v1836_v5 = vpop.f32.mrf.mxu1 }
 0x164   : > { %v1395_v9 = vpop.f32.mrf.mxu1 }
 0x166   : > { %v1837_v17 = vpop.f32.mrf.mxu1 }
 0x168   : > { %v1802_v8 = vpop.f32.mrf.mxu0  ;;  %v1398_v26 = vpop.f32.mrf.mxu1 }
 0x16a   : > { %v1803_v12 = vpop.f32.mrf.mxu0 }
 0x16b   : > { %v1804_v14 = vadd.f32 %v1803_v12, %v1802_v8 }
 0x16c   : > { %v1805_v16 = vpop.f32.mrf.mxu0 }
 0x16d   : > { %v1347_v18 = vadd.f32 %v1804_v14, %v1298_v13 }
 0x16e   : > { %v1806_v20 = vpop.f32.mrf.mxu0 }
 0x16f   : > { %v1807_v23 = vadd.f32 %v1806_v20, %v1805_v16  ;;  %v1396_v24 = vadd.f32 %v1395_v9, %v1347_v18 }
 0x170   : > { %v1808_v25 = vpop.f32.mrf.mxu0 }
 0x171   : > { %v1449_v27 = vadd.f32 %v1432_v15, %v1396_v24  ;;  %v1350_v28 = vadd.f32 %v1807_v23, %v1301_v19 }
 0x172   : > { %v1809_v31 = vpop.f32.mrf.mxu0 }
 0x173   : > { %v1810_v34 = vadd.f32 %v1809_v31, %v1808_v25  ;;  %v1399_v35 = vadd.f32 %v1398_v26, %v1350_v28  ;;  %v1457_v37 = vmul.f32 0.01, %v1449_v27  ;;  %vm1453_vm1 = vcmp.gt.f32.partialorder %v1449_v27, 0.0 }
 0x174   : > { %v1811_v36 = vpop.f32.mrf.mxu0 }
 0x175   : > { %v1355_v38 = vadd.f32 %v1810_v34, %v1306_v33  ;;  %v1450_v39 = vadd.f32 %v1437_v32, %v1399_v35  ;;  %v1461_v46 = vsel %vm1453_vm1, %v1449_v27, %v1457_v37 }
 0x176   : > { %v1812_v42 = vpop.f32.mrf.mxu0 }
 0x177   : > { %v1404_v43 = vadd.f32 %v1836_v5, %v1355_v38  ;;  %vm1454_vm2 = vcmp.gt.f32.partialorder %v1450_v39, 0.0  ;;  %v1458_v44 = vmul.f32 0.01, %v1450_v39  ;;  %v1813_v45 = vadd.f32 %v1812_v42, %v1811_v36 }
 0x179   : > { %v1451_v47 = vadd.f32 %v1442_v41, %v1404_v43  ;;  %v1462_v48 = vsel %vm1454_vm2, %v1450_v39, %v1458_v44  ;;  %v1358_v49 = vadd.f32 %v1813_v45, %v1309_v40 }
 0x17a   : > { %v1722_v50 = vpack.c.bf16 %v1462_v48, %v1461_v46 }
 0x17b   : > { %v1407_v51 = vadd.f32 %v1837_v17, %v1358_v49  ;;  %v1459_v53 = vmul.f32 0.01, %v1451_v47  ;;  %vm1455_vm3 = vcmp.gt.f32.partialorder %v1451_v47, 0.0 }
 0x17c   : > { %1723 = vst [vmem:[%s668_s7] sm:$0xff] %v1722_v50  }
 0x17d   : > { %v1452_v54 = vadd.f32 %v1447_v52, %v1407_v51  ;;  %v1463_v56 = vsel %vm1455_vm3, %v1451_v47, %v1459_v53 }
 0x17f   : > { %vm1456_vm4 = vcmp.gt.f32.partialorder %v1452_v54, 0.0  ;;  %v1460_v55 = vmul.f32 0.01, %v1452_v54 }
 0x180   : > { %1491 = sbr.rel (!%p2053_p6) target bundleno = 397 (0x18d), region = 85 }
 0x181   : > { %v1464_v57 = vsel %vm1456_vm4, %v1452_v54, %v1460_v55 }
 0x182   : > { %v1727_v58 = vpack.c.bf16 %v1464_v57, %v1463_v56 }
 0x183   : > { %v1510_v59 = vld [vmem:[%s668_s7] sm:$0xf] (%p2053_p6)  ;;  %v1512_v60 = vld [vmem:[%s668_s7 + $0x4] sm:$0xf] (%p2053_p6) }
 0x184   : > { %1729 = vst [vmem:[%s668_s7 + $0x8] sm:$0xff] %v1727_v58   ;;  %1511 = vst [vmem:[%s1493_s10] sm:$0xf] (%p2053_p6), %v1510_v59 }
 0x185   : > { %1513 = vst [vmem:[%s1493_s10 + $0x8] sm:$0xf] %v1512_v60 }
 0x18b   : > { %v1514_v61 = vld [vmem:[%s668_s7 + $0x8] sm:$0xf]  ;;  %v1516_v62 = vld [vmem:[%s668_s7 + $0xc] sm:$0xf] }
 0x18c   : > { %1515 = vst [vmem:[%s1493_s10 + $0x10] sm:$0xf] %v1514_v61  ;;  %1517 = vst [vmem:[%s1493_s10 + $0x18] sm:$0xf] %v1516_v62 }
 0x18d PF: > { %s13_s16 = sadd.s32 1, %s1995_s16   ;;  %s2431_s12 = smov %s1983_s13 }
 0x18e   : > { %p10_p11 = scmp.ge.s32.totalorder %s13_s16, 4   ;;  %s2432_s13 = smov %s2058_s22 }
 0x18f   : > { %s2433_s14 = smov %s1991_s15  ;;  %s2434_s15 = smov %s2436_s17 }
 0x190   :  { %12 = sbr.rel (!%p10_p11) target bundleno = 3 (0x3), region = 160 }

// kernel: a_call__.21
= control target key start
LH: loop header
LB: loop body
LE: loop exit
PB: predicated region body
PF: predicated region fallthrough
CT: control target
= control target key end

     0   :  { %s2167_s15 = smov 0   ;;  %s2169_s16 = smov 0   ;;  %s2592_s0 = inlined_call_operand.vmem [shape: bf16[32,864], index: 0, kind: input, shape index: {}]   ;;  %s2593_s1 = inlined_call_operand.vmem [shape: bf16[864,256], index: 1, kind: input, shape index: {}]   ;;  %s2594_s2 = inlined_call_operand.vmem [shape: f32[32,1], index: 2, kind: input, shape index: {}]   ;;  %s2595_s3 = inlined_call_operand.vmem [shape: bf16[32,256], index: 3, kind: input, shape index: {}]   ;;  %s2596_s4 = inlined_call_operand.vmem [shape: bf16[32,256], index: 4, kind: output, shape index: {}]  }
   0x1   :  { %s2171_s17 = smov 0   ;;  %s2173_s18 = smov 0  }
   0x2   :  { %s2175_s19 = smov 0  }
   0x3 LB: > { %s26_s20 = sadd.s32 1, %s2135_s18  ;;  %s1761_s21 = sadd.s32 4294967295, %s2139_s19   ;;  %s2139_s19 = sphi %s2175_s19, %s14_s19   ;;  %s2135_s18 = sphi %s2173_s18, %s2602_s18   ;;  %s2131_s17 = sphi %s2171_s17, %s2601_s17   ;;  %s2127_s16 = sphi %s2169_s16, %s2600_s16   ;;  %s2123_s15 = sphi %s2167_s15, %s2599_s15  }
   0x4   : > { %p28_p0 = scmp.ge.s32.totalorder %s26_s20, 2  ;;  %p68_p1 = scmp.ne.s32.totalorder %s2127_s16, %s2123_s15 }
   0x5   : > { %p69_p2 = scmp.eq.s32.totalorder %s2139_s19, 0  ;;  %p145_p4 = scmp.eq.s32.totalorder %s1761_s21, 1 }
   0x6   : > { %s2604_s20 = smov (%p28_p0, %s26_s20), 0  ;;  %s61_s24 = sadd.s32 1, %s2127_s16 }
   0x7   : > { %p2199_p3 = por %p69_p2, %p68_p1  ;;  %s57_s23 = ssub.s32 %s2135_s18, %s2604_s20 }
   0x8   : > { %p59_p5 = scmp.eq.s32.totalorder %s57_s23, 0  ;;  %p2206_p6 = por %p145_p4, %p68_p1 }
   0x9   : > { %p1765_p7 = scmp.ge.s32.totalorder %s2139_s19, 2 }
   0xa   : > { %s2211_s26 = scalar_select %p59_p5, %s2127_s16, %s61_s24  }
   0xb   : > { %179 = sbr.rel (%p1765_p7) target bundleno = 98 (0x62), region = 24 }
  0x10   : > { %182 = sbr.rel (!%p2199_p3) target bundleno = 92 (0x5c), region = 28  ;;  %s184_s27 = sand.u32 (%p2199_p3), 1, %s2127_s16  }
  0x11   : > { %s1766_s28 = sshll.u32 (%p2199_p3), %s2135_s18, 2  ;;  %s1982_s29 = smul.u32 (%p2199_p3), 432, %s184_s27 }
  0x12   : > { %s2221_s6 = scalar_lea.vmem (%p2199_p3), %s2593_s1, %s1766_s28 }
  0x13   : > { %v208_v0 = vld [vmem:[%s2221_s6] sm:$0xf] (%p2199_p3)  ;;  %v210_v1 = vld [vmem:[%s2221_s6 + $0x8] sm:$0xf] (%p2199_p3)  ;;  %v212_v2 = vld [vmem:[%s2221_s6 + $0x10] sm:$0xf] (%p2199_p3) }
  0x14   : > { %v214_v3 = vld [vmem:[%s2221_s6 + $0x18] sm:$0xf] (%p2199_p3)  ;;  %v216_v4 = vld [vmem:[%s2221_s6 + $0x20] sm:$0xf] (%p2199_p3)  ;;  %s2228_s7 = scalar_lea.vmem (%p2199_p3), [#allocation3], %s1982_s29 }
  0x15   : > { %209 = vst [vmem:[%s2228_s7] sm:$0xf] %v208_v0  ;;  %211 = vst [vmem:[%s2228_s7 + $0x4] sm:$0xf] %v210_v1  ;;  %v218_v5 = vld [vmem:[%s2221_s6 + $0x28] sm:$0xf] }
  0x16   : > { %213 = vst [vmem:[%s2228_s7 + $0x8] sm:$0xf] %v212_v2  ;;  %215 = vst [vmem:[%s2228_s7 + $0xc] sm:$0xf] %v214_v3  ;;  %v220_v6 = vld [vmem:[%s2221_s6 + $0x30] sm:$0xf] }
  0x17   : > { %217 = vst [vmem:[%s2228_s7 + $0x10] sm:$0xf] %v216_v4  ;;  %v222_v7 = vld [vmem:[%s2221_s6 + $0x38] sm:$0xf]  ;;  %219 = vst [vmem:[%s2228_s7 + $0x14] sm:$0xf] %v218_v5 }
  0x18   : > { %221 = vst [vmem:[%s2228_s7 + $0x18] sm:$0xf] %v220_v6  ;;  %223 = vst [vmem:[%s2228_s7 + $0x1c] sm:$0xf] %v222_v7  ;;  %v224_v8 = vld [vmem:[%s2221_s6 + $0x40] sm:$0xf] }
  0x19   : > { %v226_v9 = vld [vmem:[%s2221_s6 + $0x48] sm:$0xf]  ;;  %v228_v10 = vld [vmem:[%s2221_s6 + $0x50] sm:$0xf]  ;;  %225 = vst [vmem:[%s2228_s7 + $0x20] sm:$0xf] %v224_v8 }
  0x1a   : > { %227 = vst [vmem:[%s2228_s7 + $0x24] sm:$0xf] %v226_v9  ;;  %229 = vst [vmem:[%s2228_s7 + $0x28] sm:$0xf] %v228_v10  ;;  %v230_v11 = vld [vmem:[%s2221_s6 + $0x58] sm:$0xf] }
  0x1b   : > { %v232_v12 = vld [vmem:[%s2221_s6 + $0x60] sm:$0xf]  ;;  %v234_v13 = vld [vmem:[%s2221_s6 + $0x68] sm:$0xf]  ;;  %231 = vst [vmem:[%s2228_s7 + $0x2c] sm:$0xf] %v230_v11 }
  0x1c   : > { %233 = vst [vmem:[%s2228_s7 + $0x30] sm:$0xf] %v232_v12  ;;  %235 = vst [vmem:[%s2228_s7 + $0x34] sm:$0xf] %v234_v13  ;;  %v236_v14 = vld [vmem:[%s2221_s6 + $0x70] sm:$0xf] }
  0x1d   : > { %v238_v15 = vld [vmem:[%s2221_s6 + $0x78] sm:$0xf]  ;;  %v240_v16 = vld [vmem:[%s2221_s6 + $0x80] sm:$0xf]  ;;  %237 = vst [vmem:[%s2228_s7 + $0x38] sm:$0xf] %v236_v14 }
  0x1e   : > { %239 = vst [vmem:[%s2228_s7 + $0x3c] sm:$0xf] %v238_v15  ;;  %241 = vst [vmem:[%s2228_s7 + $0x40] sm:$0xf] %v240_v16  ;;  %v242_v17 = vld [vmem:[%s2221_s6 + $0x88] sm:$0xf] }
  0x1f   : > { %v244_v18 = vld [vmem:[%s2221_s6 + $0x90] sm:$0xf]  ;;  %v246_v19 = vld [vmem:[%s2221_s6 + $0x98] sm:$0xf]  ;;  %243 = vst [vmem:[%s2228_s7 + $0x44] sm:$0xf] %v242_v17 }
  0x20   : > { %245 = vst [vmem:[%s2228_s7 + $0x48] sm:$0xf] %v244_v18  ;;  %247 = vst [vmem:[%s2228_s7 + $0x4c] sm:$0xf] %v246_v19  ;;  %v248_v20 = vld [vmem:[%s2221_s6 + $0xa0] sm:$0xf] }
  0x21   : > { %v250_v21 = vld [vmem:[%s2221_s6 + $0xa8] sm:$0xf]  ;;  %v252_v22 = vld [vmem:[%s2221_s6 + $0xb0] sm:$0xf]  ;;  %249 = vst [vmem:[%s2228_s7 + $0x50] sm:$0xf] %v248_v20 }
  0x22   : > { %251 = vst [vmem:[%s2228_s7 + $0x54] sm:$0xf] %v250_v21  ;;  %253 = vst [vmem:[%s2228_s7 + $0x58] sm:$0xf] %v252_v22  ;;  %v254_v23 = vld [vmem:[%s2221_s6 + $0xb8] sm:$0xf] }
  0x23   : > { %v256_v24 = vld [vmem:[%s2221_s6 + $0xc0] sm:$0xf]  ;;  %v258_v25 = vld [vmem:[%s2221_s6 + $0xc8] sm:$0xf]  ;;  %255 = vst [vmem:[%s2228_s7 + $0x5c] sm:$0xf] %v254_v23 }
  0x24   : > { %257 = vst [vmem:[%s2228_s7 + $0x60] sm:$0xf] %v256_v24  ;;  %259 = vst [vmem:[%s2228_s7 + $0x64] sm:$0xf] %v258_v25  ;;  %v260_v26 = vld [vmem:[%s2221_s6 + $0xd0] sm:$0xf] }
  0x25   : > { %v262_v27 = vld [vmem:[%s2221_s6 + $0xd8] sm:$0xf]  ;;  %v264_v28 = vld [vmem:[%s2221_s6 + $0xe0] sm:$0xf]  ;;  %261 = vst [vmem:[%s2228_s7 + $0x68] sm:$0xf] %v260_v26 }
  0x26   : > { %263 = vst [vmem:[%s2228_s7 + $0x6c] sm:$0xf] %v262_v27  ;;  %265 = vst [vmem:[%s2228_s7 + $0x70] sm:$0xf] %v264_v28  ;;  %v266_v29 = vld [vmem:[%s2221_s6 + $0xe8] sm:$0xf] }
  0x27   : > { %v268_v30 = vld [vmem:[%s2221_s6 + $0xf0] sm:$0xf]  ;;  %v270_v31 = vld [vmem:[%s2221_s6 + $0xf8] sm:$0xf]  ;;  %267 = vst [vmem:[%s2228_s7 + $0x74] sm:$0xf] %v266_v29 }
  0x28   : > { %269 = vst [vmem:[%s2228_s7 + $0x78] sm:$0xf] %v268_v30  ;;  %271 = vst [vmem:[%s2228_s7 + $0x7c] sm:$0xf] %v270_v31  ;;  %v272_v32 = vld [vmem:[%s2221_s6 + $0x100] sm:$0xf] }
  0x29   : > { %v274_v33 = vld [vmem:[%s2221_s6 + $0x108] sm:$0xf]  ;;  %v276_v34 = vld [vmem:[%s2221_s6 + $0x110] sm:$0xf]  ;;  %273 = vst [vmem:[%s2228_s7 + $0x80] sm:$0xf] %v272_v32 }
  0x2a   : > { %275 = vst [vmem:[%s2228_s7 + $0x84] sm:$0xf] %v274_v33  ;;  %277 = vst [vmem:[%s2228_s7 + $0x88] sm:$0xf] %v276_v34  ;;  %v278_v35 = vld [vmem:[%s2221_s6 + $0x118] sm:$0xf] }
  0x2b   : > { %v280_v36 = vld [vmem:[%s2221_s6 + $0x120] sm:$0xf]  ;;  %v282_v37 = vld [vmem:[%s2221_s6 + $0x128] sm:$0xf]  ;;  %279 = vst [vmem:[%s2228_s7 + $0x8c] sm:$0xf] %v278_v35 }
  0x2c   : > { %281 = vst [vmem:[%s2228_s7 + $0x90] sm:$0xf] %v280_v36  ;;  %283 = vst [vmem:[%s2228_s7 + $0x94] sm:$0xf] %v282_v37  ;;  %v284_v38 = vld [vmem:[%s2221_s6 + $0x130] sm:$0xf] }
  0x2d   : > { %v286_v39 = vld [vmem:[%s2221_s6 + $0x138] sm:$0xf]  ;;  %v288_v40 = vld [vmem:[%s2221_s6 + $0x140] sm:$0xf]  ;;  %285 = vst [vmem:[%s2228_s7 + $0x98] sm:$0xf] %v284_v38 }
  0x2e   : > { %287 = vst [vmem:[%s2228_s7 + $0x9c] sm:$0xf] %v286_v39  ;;  %289 = vst [vmem:[%s2228_s7 + $0xa0] sm:$0xf] %v288_v40  ;;  %v290_v41 = vld [vmem:[%s2221_s6 + $0x148] sm:$0xf] }
  0x2f   : > { %v292_v42 = vld [vmem:[%s2221_s6 + $0x150] sm:$0xf]  ;;  %v294_v43 = vld [vmem:[%s2221_s6 + $0x158] sm:$0xf]  ;;  %291 = vst [vmem:[%s2228_s7 + $0xa4] sm:$0xf] %v290_v41 }
  0x30   : > { %293 = vst [vmem:[%s2228_s7 + $0xa8] sm:$0xf] %v292_v42  ;;  %295 = vst [vmem:[%s2228_s7 + $0xac] sm:$0xf] %v294_v43  ;;  %v296_v44 = vld [vmem:[%s2221_s6 + $0x160] sm:$0xf] }
  0x31   : > { %v298_v45 = vld [vmem:[%s2221_s6 + $0x168] sm:$0xf]  ;;  %v300_v46 = vld [vmem:[%s2221_s6 + $0x170] sm:$0xf]  ;;  %297 = vst [vmem:[%s2228_s7 + $0xb0] sm:$0xf] %v296_v44 }
  0x32   : > { %299 = vst [vmem:[%s2228_s7 + $0xb4] sm:$0xf] %v298_v45  ;;  %301 = vst [vmem:[%s2228_s7 + $0xb8] sm:$0xf] %v300_v46  ;;  %v302_v47 = vld [vmem:[%s2221_s6 + $0x178] sm:$0xf] }
  0x33   : > { %v304_v48 = vld [vmem:[%s2221_s6 + $0x180] sm:$0xf]  ;;  %v306_v49 = vld [vmem:[%s2221_s6 + $0x188] sm:$0xf]  ;;  %303 = vst [vmem:[%s2228_s7 + $0xbc] sm:$0xf] %v302_v47 }
  0x34   : > { %305 = vst [vmem:[%s2228_s7 + $0xc0] sm:$0xf] %v304_v48  ;;  %307 = vst [vmem:[%s2228_s7 + $0xc4] sm:$0xf] %v306_v49  ;;  %v308_v50 = vld [vmem:[%s2221_s6 + $0x190] sm:$0xf] }
  0x35   : > { %v310_v51 = vld [vmem:[%s2221_s6 + $0x198] sm:$0xf]  ;;  %v312_v52 = vld [vmem:[%s2221_s6 + $0x1a0] sm:$0xf]  ;;  %309 = vst [vmem:[%s2228_s7 + $0xc8] sm:$0xf] %v308_v50 }
  0x36   : > { %311 = vst [vmem:[%s2228_s7 + $0xcc] sm:$0xf] %v310_v51  ;;  %313 = vst [vmem:[%s2228_s7 + $0xd0] sm:$0xf] %v312_v52  ;;  %v314_v53 = vld [vmem:[%s2221_s6 + $0x1a8] sm:$0xf] }
  0x37   : > { %v316_v54 = vld [vmem:[%s2221_s6 + $0x1b0] sm:$0xf]  ;;  %v318_v55 = vld [vmem:[%s2221_s6 + $0x1b8] sm:$0xf]  ;;  %315 = vst [vmem:[%s2228_s7 + $0xd4] sm:$0xf] %v314_v53 }
  0x38   : > { %317 = vst [vmem:[%s2228_s7 + $0xd8] sm:$0xf] %v316_v54  ;;  %319 = vst [vmem:[%s2228_s7 + $0xdc] sm:$0xf] %v318_v55  ;;  %v320_v56 = vld [vmem:[%s2221_s6 + $0x1c0] sm:$0xf] }
  0x39   : > { %v322_v57 = vld [vmem:[%s2221_s6 + $0x1c8] sm:$0xf]  ;;  %v324_v58 = vld [vmem:[%s2221_s6 + $0x1d0] sm:$0xf]  ;;  %321 = vst [vmem:[%s2228_s7 + $0xe0] sm:$0xf] %v320_v56 }
  0x3a   : > { %323 = vst [vmem:[%s2228_s7 + $0xe4] sm:$0xf] %v322_v57  ;;  %325 = vst [vmem:[%s2228_s7 + $0xe8] sm:$0xf] %v324_v58  ;;  %v326_v59 = vld [vmem:[%s2221_s6 + $0x1d8] sm:$0xf] }
  0x3b   : > { %v328_v60 = vld [vmem:[%s2221_s6 + $0x1e0] sm:$0xf]  ;;  %v330_v61 = vld [vmem:[%s2221_s6 + $0x1e8] sm:$0xf]  ;;  %327 = vst [vmem:[%s2228_s7 + $0xec] sm:$0xf] %v326_v59 }
  0x3c   : > { %329 = vst [vmem:[%s2228_s7 + $0xf0] sm:$0xf] %v328_v60  ;;  %331 = vst [vmem:[%s2228_s7 + $0xf4] sm:$0xf] %v330_v61  ;;  %v332_v62 = vld [vmem:[%s2221_s6 + $0x1f0] sm:$0xf] }
  0x3d   : > { %v334_v63 = vld [vmem:[%s2221_s6 + $0x1f8] sm:$0xf]  ;;  %v336_v0 = vld [vmem:[%s2221_s6 + $0x200] sm:$0xf]  ;;  %333 = vst [vmem:[%s2228_s7 + $0xf8] sm:$0xf] %v332_v62 }
  0x3e   : > { %335 = vst [vmem:[%s2228_s7 + $0xfc] sm:$0xf] %v334_v63  ;;  %337 = vst [vmem:[%s2228_s7 + $0x100] sm:$0xf] %v336_v0  ;;  %v338_v1 = vld [vmem:[%s2221_s6 + $0x208] sm:$0xf] }
  0x3f   : > { %v340_v2 = vld [vmem:[%s2221_s6 + $0x210] sm:$0xf]  ;;  %v342_v3 = vld [vmem:[%s2221_s6 + $0x218] sm:$0xf]  ;;  %339 = vst [vmem:[%s2228_s7 + $0x104] sm:$0xf] %v338_v1 }
  0x40   : > { %341 = vst [vmem:[%s2228_s7 + $0x108] sm:$0xf] %v340_v2  ;;  %343 = vst [vmem:[%s2228_s7 + $0x10c] sm:$0xf] %v342_v3  ;;  %v344_v4 = vld [vmem:[%s2221_s6 + $0x220] sm:$0xf] }
  0x41   : > { %v346_v5 = vld [vmem:[%s2221_s6 + $0x228] sm:$0xf]  ;;  %v348_v6 = vld [vmem:[%s2221_s6 + $0x230] sm:$0xf]  ;;  %345 = vst [vmem:[%s2228_s7 + $0x110] sm:$0xf] %v344_v4 }
  0x42   : > { %347 = vst [vmem:[%s2228_s7 + $0x114] sm:$0xf] %v346_v5  ;;  %349 = vst [vmem:[%s2228_s7 + $0x118] sm:$0xf] %v348_v6  ;;  %v350_v7 = vld [vmem:[%s2221_s6 + $0x238] sm:$0xf] }
  0x43   : > { %v352_v8 = vld [vmem:[%s2221_s6 + $0x240] sm:$0xf]  ;;  %v354_v9 = vld [vmem:[%s2221_s6 + $0x248] sm:$0xf]  ;;  %351 = vst [vmem:[%s2228_s7 + $0x11c] sm:$0xf] %v350_v7 }
  0x44   : > { %353 = vst [vmem:[%s2228_s7 + $0x120] sm:$0xf] %v352_v8  ;;  %355 = vst [vmem:[%s2228_s7 + $0x124] sm:$0xf] %v354_v9  ;;  %v356_v10 = vld [vmem:[%s2221_s6 + $0x250] sm:$0xf] }
  0x45   : > { %v358_v11 = vld [vmem:[%s2221_s6 + $0x258] sm:$0xf]  ;;  %v360_v12 = vld [vmem:[%s2221_s6 + $0x260] sm:$0xf]  ;;  %357 = vst [vmem:[%s2228_s7 + $0x128] sm:$0xf] %v356_v10 }
  0x46   : > { %359 = vst [vmem:[%s2228_s7 + $0x12c] sm:$0xf] %v358_v11  ;;  %361 = vst [vmem:[%s2228_s7 + $0x130] sm:$0xf] %v360_v12  ;;  %v362_v13 = vld [vmem:[%s2221_s6 + $0x268] sm:$0xf] }
  0x47   : > { %v364_v14 = vld [vmem:[%s2221_s6 + $0x270] sm:$0xf]  ;;  %v366_v15 = vld [vmem:[%s2221_s6 + $0x278] sm:$0xf]  ;;  %363 = vst [vmem:[%s2228_s7 + $0x134] sm:$0xf] %v362_v13 }
  0x48   : > { %365 = vst [vmem:[%s2228_s7 + $0x138] sm:$0xf] %v364_v14  ;;  %367 = vst [vmem:[%s2228_s7 + $0x13c] sm:$0xf] %v366_v15  ;;  %v368_v16 = vld [vmem:[%s2221_s6 + $0x280] sm:$0xf] }
  0x49   : > { %v370_v17 = vld [vmem:[%s2221_s6 + $0x288] sm:$0xf]  ;;  %v372_v18 = vld [vmem:[%s2221_s6 + $0x290] sm:$0xf]  ;;  %369 = vst [vmem:[%s2228_s7 + $0x140] sm:$0xf] %v368_v16 }
  0x4a   : > { %371 = vst [vmem:[%s2228_s7 + $0x144] sm:$0xf] %v370_v17  ;;  %373 = vst [vmem:[%s2228_s7 + $0x148] sm:$0xf] %v372_v18  ;;  %v374_v19 = vld [vmem:[%s2221_s6 + $0x298] sm:$0xf] }
  0x4b   : > { %v376_v20 = vld [vmem:[%s2221_s6 + $0x2a0] sm:$0xf]  ;;  %v378_v21 = vld [vmem:[%s2221_s6 + $0x2a8] sm:$0xf]  ;;  %375 = vst [vmem:[%s2228_s7 + $0x14c] sm:$0xf] %v374_v19 }
  0x4c   : > { %377 = vst [vmem:[%s2228_s7 + $0x150] sm:$0xf] %v376_v20  ;;  %379 = vst [vmem:[%s2228_s7 + $0x154] sm:$0xf] %v378_v21  ;;  %v380_v22 = vld [vmem:[%s2221_s6 + $0x2b0] sm:$0xf] }
  0x4d   : > { %v382_v23 = vld [vmem:[%s2221_s6 + $0x2b8] sm:$0xf]  ;;  %v384_v24 = vld [vmem:[%s2221_s6 + $0x2c0] sm:$0xf]  ;;  %381 = vst [vmem:[%s2228_s7 + $0x158] sm:$0xf] %v380_v22 }
  0x4e   : > { %383 = vst [vmem:[%s2228_s7 + $0x15c] sm:$0xf] %v382_v23  ;;  %385 = vst [vmem:[%s2228_s7 + $0x160] sm:$0xf] %v384_v24  ;;  %v386_v25 = vld [vmem:[%s2221_s6 + $0x2c8] sm:$0xf] }
  0x4f   : > { %v388_v26 = vld [vmem:[%s2221_s6 + $0x2d0] sm:$0xf]  ;;  %v390_v27 = vld [vmem:[%s2221_s6 + $0x2d8] sm:$0xf]  ;;  %387 = vst [vmem:[%s2228_s7 + $0x164] sm:$0xf] %v386_v25 }
  0x50   : > { %389 = vst [vmem:[%s2228_s7 + $0x168] sm:$0xf] %v388_v26  ;;  %391 = vst [vmem:[%s2228_s7 + $0x16c] sm:$0xf] %v390_v27  ;;  %v392_v28 = vld [vmem:[%s2221_s6 + $0x2e0] sm:$0xf] }
  0x51   : > { %v394_v29 = vld [vmem:[%s2221_s6 + $0x2e8] sm:$0xf]  ;;  %v396_v30 = vld [vmem:[%s2221_s6 + $0x2f0] sm:$0xf]  ;;  %393 = vst [vmem:[%s2228_s7 + $0x170] sm:$0xf] %v392_v28 }
  0x52   : > { %395 = vst [vmem:[%s2228_s7 + $0x174] sm:$0xf] %v394_v29  ;;  %397 = vst [vmem:[%s2228_s7 + $0x178] sm:$0xf] %v396_v30  ;;  %v398_v31 = vld [vmem:[%s2221_s6 + $0x2f8] sm:$0xf] }
  0x53   : > { %v400_v32 = vld [vmem:[%s2221_s6 + $0x300] sm:$0xf]  ;;  %v402_v33 = vld [vmem:[%s2221_s6 + $0x308] sm:$0xf]  ;;  %399 = vst [vmem:[%s2228_s7 + $0x17c] sm:$0xf] %v398_v31 }
  0x54   : > { %401 = vst [vmem:[%s2228_s7 + $0x180] sm:$0xf] %v400_v32  ;;  %403 = vst [vmem:[%s2228_s7 + $0x184] sm:$0xf] %v402_v33  ;;  %v404_v34 = vld [vmem:[%s2221_s6 + $0x310] sm:$0xf] }
  0x55   : > { %v406_v35 = vld [vmem:[%s2221_s6 + $0x318] sm:$0xf]  ;;  %v408_v36 = vld [vmem:[%s2221_s6 + $0x320] sm:$0xf]  ;;  %405 = vst [vmem:[%s2228_s7 + $0x188] sm:$0xf] %v404_v34 }
  0x56   : > { %407 = vst [vmem:[%s2228_s7 + $0x18c] sm:$0xf] %v406_v35  ;;  %409 = vst [vmem:[%s2228_s7 + $0x190] sm:$0xf] %v408_v36  ;;  %v410_v37 = vld [vmem:[%s2221_s6 + $0x328] sm:$0xf] }
  0x57   : > { %v412_v38 = vld [vmem:[%s2221_s6 + $0x330] sm:$0xf]  ;;  %v414_v39 = vld [vmem:[%s2221_s6 + $0x338] sm:$0xf]  ;;  %411 = vst [vmem:[%s2228_s7 + $0x194] sm:$0xf] %v410_v37 }
  0x58   : > { %413 = vst [vmem:[%s2228_s7 + $0x198] sm:$0xf] %v412_v38  ;;  %415 = vst [vmem:[%s2228_s7 + $0x19c] sm:$0xf] %v414_v39  ;;  %v416_v40 = vld [vmem:[%s2221_s6 + $0x340] sm:$0xf] }
  0x59   : > { %v418_v41 = vld [vmem:[%s2221_s6 + $0x348] sm:$0xf]  ;;  %v420_v42 = vld [vmem:[%s2221_s6 + $0x350] sm:$0xf]  ;;  %417 = vst [vmem:[%s2228_s7 + $0x1a0] sm:$0xf] %v416_v40 }
  0x5a   : > { %419 = vst [vmem:[%s2228_s7 + $0x1a4] sm:$0xf] %v418_v41  ;;  %421 = vst [vmem:[%s2228_s7 + $0x1a8] sm:$0xf] %v420_v42  ;;  %v422_v43 = vld [vmem:[%s2221_s6 + $0x358] sm:$0xf] }
  0x5b   : > { %423 = vst [vmem:[%s2228_s7 + $0x1ac] sm:$0xf] %v422_v43 }
  0x5c PF: > { %663 = sbr.rel (!%p2199_p3) target bundleno = 98 (0x62), region = 69  ;;  %s665_s8 = sand.u32 (%p2199_p3), 1, %s2127_s16  }
  0x5d   : > { %s1768_s9 = sshll.u32 (%p2199_p3), %s2135_s18, 2  ;;  %s1767_s10 = sshll.u32 (%p2199_p3), %s665_s8, 4 }
  0x5e   : > { %s669_s13 = scalar_lea.vmem (%p2199_p3), %s2595_s3, %s1768_s9  ;;  %s667_s14 = scalar_lea.vmem (%p2199_p3), [#allocation4], %s1767_s10 }
  0x5f   : > { %v686_v44 = vld [vmem:[%s669_s13] sm:$0xf] (%p2199_p3)  ;;  %v688_v45 = vld [vmem:[%s669_s13 + $0x8] sm:$0xf] (%p2199_p3)  ;;  %v690_v46 = vld [vmem:[%s669_s13 + $0x10] sm:$0xf] (%p2199_p3) }
  0x60   : > { %687 = vst [vmem:[%s667_s14] sm:$0xf] (%p2199_p3), %v686_v44  ;;  %689 = vst [vmem:[%s667_s14 + $0x4] sm:$0xf] (%p2199_p3), %v688_v45  ;;  %v692_v47 = vld [vmem:[%s669_s13 + $0x18] sm:$0xf] (%p2199_p3) }
  0x61   : > { %691 = vst [vmem:[%s667_s14 + $0x8] sm:$0xf] %v690_v46  ;;  %693 = vst [vmem:[%s667_s14 + $0xc] sm:$0xf] %v692_v47 }
  0x62 PF: > { %p1769_p8 = scmp.ge.s32.totalorder %s2139_s19, 1  ;;  %p724_p9 = scmp.lt.s32.totalorder %s2139_s19, 3 }
  0x64   : > { %p725_p10 = pnand %p1769_p8, %p724_p9 }
  0x65   : > { %s731_s21 = sand.u32 (!%p725_p10), 1, %s2123_s15  }
  0x66   : > { %728 = sbr.rel (%p725_p10) target bundleno = 405 (0x195), region = 110  ;;  %s2567_s28 = sshll.u32 (!%p725_p10), %s731_s21, 4 }
  0x67   : > { %s1983_s22 = smul.u32 (!%p725_p10), 432, %s731_s21  ;;  %s740_s30 = scalar_lea.vmem (!%p725_p10), [#allocation4], %s2567_s28 }
  0x68   : > { %s770_s15 = scalar_lea.vmem (!%p725_p10), [#allocation5], %s2567_s28 }
  0x69   : > { %s2459_s29 = scalar_lea.vmem (!%p725_p10), [#allocation3], %s1983_s22 }
  0x6b   : > { %v2061_v48 = vld [vmem:[%s2592_s0 + $0x4] ss:$28 sps:$4 sm:$0xff]   ;;  %v2064_v49 = vld [vmem:[%s2592_s0 + $0xc] ss:$28 sps:$4 sm:$0xff]   ;;  %v2141_v50 = vmov 0   ;;  %vm1309_vm0 = vcmask 785408  }
  0x6c   : > { %2025 = vset.pattern.permute.xlu0 %v2141_v50  ;;  %2026 = vset.pattern.permute.xlu1 %v2141_v50  ;;  %v2027_v51 = vld [vmem:[%s2459_s29 + $0x78] sm:$0xff]   ;;  %v2031_v55 = vld [vmem:[%s2459_s29 + $0x70] sm:$0xff]   ;;  %v2035_v59 = vld [vmem:[%s2459_s29 + $0x68] sm:$0xff]   ;;  %s1847_s21 = sshll.u32 (%p2206_p6), %s2131_s17, 2 }
  0x6d   : > { %1348 = vmatprep.mubr.bf16.mxu0 %v2061_v48  ;;  %1397 = vmatprep.mubr.bf16.mxu1 %v2064_v49  ;;  %v2028_v52 = vld [vmem:[%s2459_s29 + $0xf8] sm:$0xff]   ;;  %v2032_v56 = vld [vmem:[%s2459_s29 + $0xf0] sm:$0xff]   ;;  %v2036_v60 = vld [vmem:[%s2459_s29 + $0xe8] sm:$0xff]   ;;  %s1607_s7 = scalar_lea.vmem (%p2206_p6), %s2596_s4, %s1847_s21 }
  0x6e   : > { %1874 = vmatprep.subr.bf16.mxu0 %v2027_v51  ;;  %v2029_v53 = vld [vmem:[%s2459_s29 + $0x38] sm:$0xff]   ;;  %1902 = vmatprep.subr.bf16.mxu1 %v2028_v52  ;;  %v2033_v57 = vld [vmem:[%s2459_s29 + $0x30] sm:$0xff]   ;;  %v2037_v61 = vld [vmem:[%s2459_s29 + $0x28] sm:$0xff]  }
  0x6f   : > { %v2030_v54 = vld [vmem:[%s2459_s29 + $0xb8] sm:$0xff]   ;;  %1875 = vmatpush3.bf16.msra.mxu0 %v2029_v53  ;;  %v2034_v58 = vld [vmem:[%s2459_s29 + $0xb0] sm:$0xff]   ;;  %v2038_v62 = vld [vmem:[%s2459_s29 + $0xa8] sm:$0xff]  }
  0x70   : > { %1903 = vmatpush3.bf16.msra.mxu1 %v2030_v54  ;;  %1876 = vmatprep.subr.bf16.mxu0 %v2031_v55  ;;  %v2039_v63 = vld [vmem:[%s2459_s29 + $0x60] sm:$0xff]   ;;  %v2043_v3 = vld [vmem:[%s2459_s29 + $0x58] sm:$0xff]   ;;  %v2047_v7 = vld [vmem:[%s2459_s29 + $0x50] sm:$0xff]  }
  0x71   : > { %1904 = vmatprep.subr.bf16.mxu1 %v2032_v56  ;;  %v2040_v0 = vld [vmem:[%s2459_s29 + $0xe0] sm:$0xff]   ;;  %v2044_v4 = vld [vmem:[%s2459_s29 + $0xd8] sm:$0xff]   ;;  %v2048_v8 = vld [vmem:[%s2459_s29 + $0xd0] sm:$0xff]  }
  0x72   : > { %v2041_v1 = vld [vmem:[%s2459_s29 + $0x20] sm:$0xff]   ;;  %v2045_v5 = vld [vmem:[%s2459_s29 + $0x18] sm:$0xff]   ;;  %v2049_v9 = vld [vmem:[%s2459_s29 + $0x10] sm:$0xff]  }
  0x73   : > { %1877 = vmatpush3.bf16.msra.mxu0 %v2033_v57  ;;  %v2042_v2 = vld [vmem:[%s2459_s29 + $0xa0] sm:$0xff]   ;;  %v2046_v6 = vld [vmem:[%s2459_s29 + $0x98] sm:$0xff]   ;;  %v2050_v10 = vld [vmem:[%s2459_s29 + $0x90] sm:$0xff]  }
  0x74   : > { %1905 = vmatpush3.bf16.msra.mxu1 %v2034_v58  ;;  %1878 = vmatprep.subr.bf16.mxu0 %v2035_v59  ;;  %v2051_v11 = vld [vmem:[%s2459_s29 + $0x48] sm:$0xff]   ;;  %v2055_v15 = vld [vmem:[%s2459_s29 + $0x40] sm:$0xff]   ;;  %v2065_v22 = vld [vmem:[%s2459_s29 + $0x178] sm:$0xff]  }
  0x75   : > { %1906 = vmatprep.subr.bf16.mxu1 %v2036_v60  ;;  %v2052_v12 = vld [vmem:[%s2459_s29 + $0xc8] sm:$0xff]   ;;  %v2056_v16 = vld [vmem:[%s2459_s29 + $0xc0] sm:$0xff]   ;;  %v2066_v23 = vld [vmem:[%s2459_s29 + $0x138] sm:$0xff]  }
  0x76   : > { %v2053_v13 = vld [vmem:[%s2459_s29 + $0x8] sm:$0xff]   ;;  %v2057_v18 = vld [vmem:[%s2459_s29] sm:$0xff]   ;;  %v2067_v24 = vld [vmem:[%s2459_s29 + $0x170] sm:$0xff]  }
  0x77   : > { %1879 = vmatpush3.bf16.msra.mxu0 %v2037_v61  ;;  %v2054_v14 = vld [vmem:[%s2459_s29 + $0x88] sm:$0xff]   ;;  %v2058_v20 = vld [vmem:[%s2459_s29 + $0x80] sm:$0xff]   ;;  %v2068_v25 = vld [vmem:[%s2459_s29 + $0x130] sm:$0xff]  }
  0x78   : > { %1907 = vmatpush3.bf16.msra.mxu1 %v2038_v62  ;;  %1880 = vmatprep.subr.bf16.mxu0 %v2039_v63  ;;  %v2059_v17 = vld [vmem:[%s2592_s0] ss:$28 sps:$4 sm:$0xff]   ;;  %v2062_v19 = vld [vmem:[%s2592_s0 + $0x8] ss:$28 sps:$4 sm:$0xff]   ;;  %v2081_v34 = vld [vmem:[%s2592_s0 + $0x38] ss:$28 sps:$4 sm:$0xff]  }
  0x79   : > { %1908 = vmatprep.subr.bf16.mxu1 %v2040_v0  ;;  %v2076_v21 = vld [vmem:[%s2592_s0 + $0x3c] ss:$28 sps:$4 sm:$0xff]   ;;  %v2071_v29 = vld [vmem:[%s2459_s29 + $0x160] sm:$0xff]   ;;  %v2083_v38 = vld [vmem:[%s2459_s29 + $0x150] sm:$0xff]  }
  0x7a   : > { %v2069_v26 = vld [vmem:[%s2459_s29 + $0x168] sm:$0xff]   ;;  %v2073_v30 = vld [vmem:[%s2459_s29 + $0x120] sm:$0xff]   ;;  %v2074_v33 = vld [vmem:[%s2459_s29 + $0x158] sm:$0xff]  }
  0x7b   : > { %1881 = vmatpush3.bf16.msra.mxu0 %v2041_v1  ;;  %v2072_v27 = vld [vmem:[%s2459_s29 + $0x1a8] sm:$0xff]   ;;  %v2075_v31 = vld [vmem:[%s2459_s29 + $0x1a0] sm:$0xff]   ;;  %v2084_v36 = vld [vmem:[%s2459_s29 + $0x198] sm:$0xff]  }
  0x7c   : > { %1909 = vmatpush3.bf16.msra.mxu1 %v2042_v2  ;;  %1882 = vmatprep.subr.bf16.mxu0 %v2043_v3  ;;  %v2070_v28 = vld [vmem:[%s2459_s29 + $0x128] sm:$0xff]   ;;  %v2078_v32 = vld [vmem:[%s2592_s0 + $0x44] ss:$28 sps:$4 sm:$0xff]   ;;  %v2080_v37 = vld [vmem:[%s2459_s29 + $0x118] sm:$0xff]  }
  0x7d   : > { %1910 = vmatprep.subr.bf16.mxu1 %v2044_v4  ;;  %v2082_v35 = vld [vmem:[%s2592_s0 + $0x40] ss:$28 sps:$4 sm:$0xff]   ;;  %v2094_v45 = vld [vmem:[%s2592_s0 + $0x14] ss:$28 sps:$4 sm:$0xff]   ;;  %v1528_v52 = vld [vmem:[%s2594_s2 + $0x8] sm:$0xff] }
  0x7e   : > { %v2087_v39 = vld [vmem:[%s2459_s29 + $0x190] sm:$0xff]   ;;  %v2086_v41 = vld [vmem:[%s2459_s29 + $0x148] sm:$0xff]   ;;  %v2089_v44 = vld [vmem:[%s2459_s29 + $0x140] sm:$0xff]  }
  0x7f   : > { %1883 = vmatpush3.bf16.msra.mxu0 %v2045_v5  ;;  %v2085_v40 = vld [vmem:[%s2459_s29 + $0x110] sm:$0xff]   ;;  %v2090_v42 = vld [vmem:[%s2459_s29 + $0x188] sm:$0xff]   ;;  %v2095_v46 = vld [vmem:[%s2459_s29 + $0x180] sm:$0xff]  }
  0x80   : > { %1911 = vmatpush3.bf16.msra.mxu1 %v2046_v6  ;;  %1884 = vmatprep.subr.bf16.mxu0 %v2047_v7  ;;  %v2088_v43 = vld [vmem:[%s2459_s29 + $0x108] sm:$0xff]   ;;  %v2091_v48 = vld [vmem:[%s2459_s29 + $0x100] sm:$0xff]  }
  0x81   : > { %1912 = vmatprep.subr.bf16.mxu1 %v2048_v8  ;;  %v2096_v47 = vld [vmem:[%s2592_s0 + $0x18] ss:$28 sps:$4 sm:$0xff]   ;;  %v1527_v49 = vld [vmem:[%s2594_s2] sm:$0xff]  ;;  %v2097_v51 = vld [vmem:[%s2592_s0 + $0x50] ss:$28 sps:$4 sm:$0xff]  }
  0x82   : > { %v1529_v50 = vld [vmem:[%s2594_s2 + $0x10] sm:$0xff]  ;;  %1533 = vperm.xlu0 %2025, %v1527_v49   ;;  %v1530_v54 = vld [vmem:[%s2594_s2 + $0x18] sm:$0xff]  ;;  %v2098_v55 = vld [vmem:[%s2592_s0 + $0x4c] ss:$28 sps:$4 sm:$0xff]  }
  0x83   : > { %1885 = vmatpush3.bf16.msra.mxu0 %v2049_v9  ;;  %1543 = vperm.xlu1 %2026, %v1529_v50   ;;  %v2092_v53 = vld [vmem:[%s2592_s0 + $0x10] ss:$28 sps:$4 sm:$0xff]   ;;  %v2100_v56 = vld [vmem:[%s2592_s0 + $0x48] ss:$28 sps:$4 sm:$0xff]  }
  0x84   : > { %1913 = vmatpush3.bf16.msra.mxu1 %v2050_v10  ;;  %1886 = vmatprep.subr.bf16.mxu0 %v2051_v11 }
  0x85   : > { %1914 = vmatprep.subr.bf16.mxu1 %v2052_v12 }
  0x86   : > { %1538 = vperm.xlu0 %2025, %v1528_v52  }
  0x87   : > { %1887 = vmatpush3.bf16.msra.mxu0 %v2053_v13  ;;  %1548 = vperm.xlu1 %2026, %v1530_v54  }
  0x88   : > { %1915 = vmatpush3.bf16.msra.mxu1 %v2054_v14  ;;  %1888 = vmatprep.subr.bf16.mxu0 %v2055_v15 }
  0x89   : > { %1916 = vmatprep.subr.bf16.mxu1 %v2056_v16 }
  0x8b   : > { %1889 = vmatpush3.bf16.msra.mxu0 %v2057_v18 }
  0x8c   : > { %1917 = vmatpush3.bf16.msra.mxu1 %v2058_v20  ;;  %1930 = vmatprep.subr.bf16.mxu0 %v2065_v22  ;;  %v1855_v20 = vld [vmem:[%s740_s30] sm:$0xff]  }
  0x8d   : > { %1966 = vmatprep.subr.bf16.mxu1 %v2072_v27 }
  0x8e   : > { %1349 = vmatmul.mubr.bf16.vlgmr.msra.gmra.mxu0 %v2059_v17 }
  0x8f   : > { %1398 = vmatmul.mubr.bf16.vlgmr.msra.gmra.mxu1 %v2062_v19  ;;  %1931 = vmatpush3.bf16.msra.mxu0 %v2066_v23 }
  0x90   : > { %1932 = vmatprep.subr.bf16.mxu0 %v2067_v24  ;;  %1356 = vmatprep.mubr.bf16.mxu0 %v2076_v21 }
  0x91   : > { %1967 = vmatpush3.bf16.msra.mxu1 %v2072_v27  ;;  %1405 = vmatprep.mubr.bf16.mxu1 %v2078_v32 }
  0x92   : > { %1968 = vmatprep.subr.bf16.mxu1 %v2075_v31 }
  0x93   : > { %1933 = vmatpush3.bf16.msra.mxu0 %v2068_v25 }
  0x94   : > { %1934 = vmatprep.subr.bf16.mxu0 %v2069_v26  ;;  %v1856_v26 = vunpack.c.l.bf16 %v1855_v20 }
  0x95   : > { %1969 = vmatpush3.bf16.msra.mxu1 %v2075_v31 }
  0x96   : > { %1357 = vmatmul.mubr.bf16.gmra.mxu0 %v2081_v34  ;;  %1970 = vmatprep.subr.bf16.mxu1 %v2084_v36 }
  0x97   : > { %1935 = vmatpush3.bf16.msra.mxu0 %v2070_v28  ;;  %1406 = vmatmul.mubr.bf16.gmra.mxu1 %v2082_v35 }
  0x98   : > { %1936 = vmatprep.subr.bf16.mxu0 %v2071_v29  ;;  %1446 = vmatprep.mubr.bf16.mxu0 %v2094_v45 }
  0x99   : > { %1971 = vmatpush3.bf16.msra.mxu1 %v2084_v36  ;;  %1978 = vmatprep.mubr.msk.bf16.mxu1 %vm1309_vm0, %v2096_v47 }
  0x9a   : > { %1972 = vmatprep.subr.bf16.mxu1 %v2087_v39 }
  0x9b   : > { %1937 = vmatpush3.bf16.msra.mxu0 %v2073_v30 }
  0x9c   : > { %1938 = vmatprep.subr.bf16.mxu0 %v2074_v33 }
  0x9d   : > { %1973 = vmatpush3.bf16.msra.mxu1 %v2087_v39  ;;  %v1857_v39 = vunpack.c.h.bf16 %v1855_v20 }
  0x9e   : > { %1974 = vmatprep.subr.bf16.mxu1 %v2090_v42 }
  0x9f   : > { %1939 = vmatpush3.bf16.msra.mxu0 %v2080_v37 }
  0xa0   : > { %1940 = vmatprep.subr.bf16.mxu0 %v2083_v38 }
  0xa1   : > { %1975 = vmatpush3.bf16.msra.mxu1 %v2090_v42 }
  0xa2   : > { %1976 = vmatprep.subr.bf16.mxu1 %v2095_v46 }
  0xa3   : > { %1941 = vmatpush3.bf16.msra.mxu0 %v2085_v40 }
  0xa4   : > { %1942 = vmatprep.subr.bf16.mxu0 %v2086_v41 }
  0xa5   : > { %1977 = vmatpush3.bf16.msra.mxu1 %v2095_v46 }
  0xa7   : > { %1943 = vmatpush3.bf16.msra.mxu0 %v2088_v43 }
  0xa8   : > { %1944 = vmatprep.subr.bf16.mxu0 %v2089_v44  ;;  %1979 = vmatmul.mubr.msk.bf16.vlgmr.msra.gmra.mxu1 %vm1309_vm0, %v2097_v51  ;;  %v1872_v44 = vld [vmem:[%s740_s30 + $0x8] sm:$0xff]  }
  0xa9   : > { %v1860_v50 = vunpack.c.l.bf16 %v1872_v44 }
  0xab   : > { %1945 = vmatpush3.bf16.msra.mxu0 %v2091_v48 }
  0xae   : > { %1447 = vmatmul.mubr.bf16.vlgmr.msra.gmra.mxu0 %v2092_v53 }
  0xaf   : > { %1454 = vmatprep.mubr.bf16.mxu0 %v2098_v55 }
  0xb6   : > { %1455 = vmatmul.mubr.bf16.gmra.mxu0 %v2100_v56 }
  0xfd   : > { %v1534_v19 = vpop.permute.xlu0 %1533 }
  0xfe   : > { %v1544_v49 = vpop.permute.xlu1 %1543 }
 0x101   : > { %v1539_v38 = vpop.permute.xlu0 %1538 }
 0x14e   : > { %v1890_v58 = vpop.f32.mrf.mxu0 }
 0x14f   : > { %v1918_v57 = vpop.f32.mrf.mxu1 }
 0x150   : > { %v1891_v60 = vpop.f32.mrf.mxu0 }
 0x151   : > { %v1919_v59 = vpop.f32.mrf.mxu1  ;;  %v1892_v10 = vadd.f32 %v1891_v60, %v1890_v58 }
 0x152   : > { %v1893_v62 = vpop.f32.mrf.mxu0  ;;  %v1920_v11 = vadd.f32 %v1919_v59, %v1918_v57  ;;  %v1861_v59 = vunpack.c.h.bf16 %v1872_v44 }
 0x153   : > { %v1921_v61 = vpop.f32.mrf.mxu1 }
 0x154   : > { %v1894_v0 = vpop.f32.mrf.mxu0  ;;  %v1400_v17 = vadd.f32 %v1920_v11, %v1892_v10 }
 0x155   : > { %v1922_v63 = vpop.f32.mrf.mxu1  ;;  %v1895_v14 = vadd.f32 %v1894_v0, %v1893_v62 }
 0x156   : > { %v1896_v2 = vpop.f32.mrf.mxu0  ;;  %v1923_v15 = vadd.f32 %v1922_v63, %v1921_v61 }
 0x157   : > { %v1924_v1 = vpop.f32.mrf.mxu1 }
 0x158   : > { %v1897_v4 = vpop.f32.mrf.mxu0  ;;  %v1403_v24 = vadd.f32 %v1923_v15, %v1895_v14 }
 0x159   : > { %v1925_v3 = vpop.f32.mrf.mxu1  ;;  %v1898_v27 = vadd.f32 %v1897_v4, %v1896_v2 }
 0x15a   : > { %v1899_v6 = vpop.f32.mrf.mxu0  ;;  %v1926_v28 = vadd.f32 %v1925_v3, %v1924_v1  ;;  %v1549_v1 = vpop.permute.xlu1 %1548 }
 0x15b   : > { %v1927_v5 = vpop.f32.mrf.mxu1 }
 0x15c   : > { %v1900_v8 = vpop.f32.mrf.mxu0  ;;  %v1408_v40 = vadd.f32 %v1926_v28, %v1898_v27 }
 0x15d   : > { %v1928_v7 = vpop.f32.mrf.mxu1  ;;  %v1901_v35 = vadd.f32 %v1900_v8, %v1899_v6 }
 0x15e   : > { %v1929_v36 = vadd.f32 %v1928_v7, %v1927_v5 }
 0x160   : > { %v1411_v48 = vadd.f32 %v1929_v36, %v1901_v35 }
 0x168   : > { %v1980_v9 = vpop.f32.mrf.mxu1 }
 0x16a   : > { %v1497_v13 = vpop.f32.mrf.mxu1 }
 0x16c   : > { %v1981_v22 = vpop.f32.mrf.mxu1 }
 0x16e   : > { %v1946_v12 = vpop.f32.mrf.mxu0  ;;  %v1500_v32 = vpop.f32.mrf.mxu1 }
 0x170   : > { %v1947_v16 = vpop.f32.mrf.mxu0 }
 0x171   : > { %v1948_v18 = vadd.f32 %v1947_v16, %v1946_v12 }
 0x172   : > { %v1949_v21 = vpop.f32.mrf.mxu0 }
 0x173   : > { %v1449_v23 = vadd.f32 %v1948_v18, %v1400_v17 }
 0x174   : > { %v1950_v25 = vpop.f32.mrf.mxu0 }
 0x175   : > { %v1951_v29 = vadd.f32 %v1950_v25, %v1949_v21  ;;  %v1498_v30 = vadd.f32 %v1497_v13, %v1449_v23 }
 0x176   : > { %v1952_v31 = vpop.f32.mrf.mxu0 }
 0x177   : > { %v1551_v33 = vadd.f32 %v1534_v19, %v1498_v30  ;;  %v1452_v34 = vadd.f32 %v1951_v29, %v1403_v24 }
 0x178   : > { %v1953_v37 = vpop.f32.mrf.mxu0 }
 0x179   : > { %v1563_v41 = vadd.f32 %v1856_v26, %v1551_v33  ;;  %v1954_v42 = vadd.f32 %v1953_v37, %v1952_v31  ;;  %v1501_v43 = vadd.f32 %v1500_v32, %v1452_v34 }
 0x17a   : > { %v1955_v45 = vpop.f32.mrf.mxu0 }
 0x17b   : > { %v1457_v46 = vadd.f32 %v1954_v42, %v1408_v40  ;;  %v1552_v47 = vadd.f32 %v1539_v38, %v1501_v43  ;;  %v1571_v52 = vmul.f32 0.01, %v1563_v41  ;;  %vm1567_vm1 = vcmp.gt.f32.partialorder %v1563_v41, 0.0 }
 0x17c   : > { %v1956_v51 = vpop.f32.mrf.mxu0 }
 0x17d   : > { %v1506_v53 = vadd.f32 %v1980_v9, %v1457_v46  ;;  %v1564_v54 = vadd.f32 %v1857_v39, %v1552_v47  ;;  %v1957_v55 = vadd.f32 %v1956_v51, %v1955_v45  ;;  %v1575_v60 = vsel %vm1567_vm1, %v1563_v41, %v1571_v52 }
 0x17f   : > { %v1553_v56 = vadd.f32 %v1544_v49, %v1506_v53  ;;  %vm1568_vm2 = vcmp.gt.f32.partialorder %v1564_v54, 0.0  ;;  %v1572_v57 = vmul.f32 0.01, %v1564_v54  ;;  %v1460_v58 = vadd.f32 %v1957_v55, %v1411_v48 }
 0x181   : > { %v1565_v61 = vadd.f32 %v1860_v50, %v1553_v56  ;;  %v1576_v62 = vsel %vm1568_vm2, %v1564_v54, %v1572_v57  ;;  %v1509_v63 = vadd.f32 %v1981_v22, %v1460_v58 }
 0x182   : > { %v1865_v0 = vpack.c.bf16 %v1576_v62, %v1575_v60 }
 0x183   : > { %v1554_v2 = vadd.f32 %v1549_v1, %v1509_v63  ;;  %v1573_v3 = vmul.f32 0.01, %v1565_v61  ;;  %vm1569_vm3 = vcmp.gt.f32.partialorder %v1565_v61, 0.0 }
 0x184   : > { %1866 = vst [vmem:[%s770_s15] sm:$0xff] %v1865_v0  }
 0x185   : > { %v1566_v4 = vadd.f32 %v1861_v59, %v1554_v2  ;;  %v1577_v6 = vsel %vm1569_vm3, %v1565_v61, %v1573_v3 }
 0x187   : > { %vm1570_vm4 = vcmp.gt.f32.partialorder %v1566_v4, 0.0  ;;  %v1574_v5 = vmul.f32 0.01, %v1566_v4 }
 0x188   : > { %1605 = sbr.rel (!%p2206_p6) target bundleno = 405 (0x195), region = 130 }
 0x189   : > { %v1578_v7 = vsel %vm1570_vm4, %v1566_v4, %v1574_v5 }
 0x18a   : > { %v1870_v8 = vpack.c.bf16 %v1578_v7, %v1577_v6 }
 0x18b   : > { %v1624_v9 = vld [vmem:[%s770_s15] sm:$0xf] (%p2206_p6)  ;;  %v1626_v10 = vld [vmem:[%s770_s15 + $0x4] sm:$0xf] (%p2206_p6) }
 0x18c   : > { %1873 = vst [vmem:[%s770_s15 + $0x8] sm:$0xff] %v1870_v8   ;;  %1625 = vst [vmem:[%s1607_s7] sm:$0xf] (%p2206_p6), %v1624_v9 }
 0x18d   : > { %1627 = vst [vmem:[%s1607_s7 + $0x8] sm:$0xf] %v1626_v10 }
 0x193   : > { %v1628_v11 = vld [vmem:[%s770_s15 + $0x8] sm:$0xf]  ;;  %v1630_v12 = vld [vmem:[%s770_s15 + $0xc] sm:$0xf] }
 0x194   : > { %1629 = vst [vmem:[%s1607_s7 + $0x10] sm:$0xf] %v1628_v11  ;;  %1631 = vst [vmem:[%s1607_s7 + $0x18] sm:$0xf] %v1630_v12 }
 0x195 PF: > { %s14_s19 = sadd.s32 1, %s2139_s19   ;;  %s2599_s15 = smov %s2127_s16 }
 0x196   : > { %p11_p11 = scmp.ge.s32.totalorder %s14_s19, 4   ;;  %s2600_s16 = smov %s2211_s26 }
 0x197   : > { %s2601_s17 = smov %s2135_s18  ;;  %s2602_s18 = smov %s2604_s20 }
 0x198   :  { %13 = sbr.rel (!%p11_p11) target bundleno = 3 (0x3), region = 213 }

// kernel: a_call__.26
= control target key start
LH: loop header
LB: loop body
LE: loop exit
PB: predicated region body
PF: predicated region fallthrough
CT: control target
= control target key end

     0   :  { %s1456_s12 = smov 0   ;;  %s1458_s13 = smov 0   ;;  %s1608_s0 = inlined_call_operand.vmem [shape: bf16[16,4096], index: 0, kind: input, shape index: {}]   ;;  %s1609_s1 = inlined_call_operand.vmem [shape: bf16[4096,128], index: 1, kind: input, shape index: {}]   ;;  %s1610_s2 = inlined_call_operand.vmem [shape: f32[16,1], index: 2, kind: input, shape index: {}]   ;;  %s1611_s3 = inlined_call_operand.vmem [shape: bf16[16,128], index: 3, kind: output, shape index: {}]  }
   0x1   :  { %s1460_s14 = smov 0   ;;  %s1462_s15 = smov 0  }
   0x2   :  { %s1464_s16 = smov 0  }
   0x3 LB: > { %s22_s17 = sadd.s32 1, %s1428_s15  ;;  %p39_p1 = scmp.ne.s32.totalorder %s1420_s13, %s1416_s12  ;;  %s1432_s16 = sphi %s1464_s16, %s13_s16   ;;  %s1428_s15 = sphi %s1462_s15, %s1615_s15   ;;  %s1424_s14 = sphi %s1460_s14, %s1614_s14   ;;  %s1420_s13 = sphi %s1458_s13, %s1613_s13   ;;  %s1416_s12 = sphi %s1456_s12, %s1612_s12  }
   0x4   : > { %p23_p0 = scmp.ge.s32.totalorder %s22_s17, 4  ;;  %p40_p2 = scmp.eq.s32.totalorder %s1432_s16, 0 }
   0x5   : > { %s32_s19 = sadd.s32 1, %s1420_s13  ;;  %p1104_p5 = scmp.ge.s32.totalorder %s1432_s16, 4 }
   0x6   : > { %s1617_s17 = smov (%p23_p0, %s22_s17), 0  ;;  %p41_p3 = por %p40_p2, %p39_p1 }
   0x7   : > { %s29_s18 = ssub.s32 %s1428_s15, %s1617_s17  ;;  %143 = sbr.rel (%p1104_p5) target bundleno = 20 (0x14), region = 20 }
   0x8   : > { %p30_p4 = scmp.eq.s32.totalorder %s29_s18, 0 }
   0xa   : > { %s1491_s20 = scalar_select %p30_p4, %s1420_s13, %s32_s19  }
   0xc   : > { %146 = sbr.rel (!%p41_p3) target bundleno = 20 (0x14), region = 24  ;;  %s148_s21 = sand.u32 (%p41_p3), 1, %s1420_s13  }
   0xd   : > { %s1191_s22 = sshll.u32 (%p41_p3), %s1428_s15, 5  ;;  %s1105_s23 = sshll.u32 (%p41_p3), %s148_s21, 6 }
   0xe   : > { %s153_s26 = scalar_lea.vmem (%p41_p3), %s1608_s0, %s1191_s22  ;;  %s150_s27 = scalar_lea.vmem (%p41_p3), [#allocation3], %s1105_s23 }
   0xf   : > { %v166_v0 = vld [vmem:[%s153_s26] sm:$0xff] (%p41_p3)  ;;  %v168_v1 = vld [vmem:[%s153_s26 + $0x8] sm:$0xff] (%p41_p3)  ;;  %v170_v2 = vld [vmem:[%s153_s26 + $0x10] sm:$0xff] (%p41_p3) }
  0x10   : > { %167 = vst [vmem:[%s150_s27] sm:$0xff] (%p41_p3), %v166_v0  ;;  %169 = vst [vmem:[%s150_s27 + $0x8] sm:$0xff] (%p41_p3), %v168_v1  ;;  %v172_v3 = vld [vmem:[%s153_s26 + $0x18] sm:$0xff] (%p41_p3)  ;;  %v174_v4 = vld [vmem:[%s153_s26 + $0x80] sm:$0xff] (%p41_p3) }
  0x11   : > { %171 = vst [vmem:[%s150_s27 + $0x10] sm:$0xff] %v170_v2  ;;  %v176_v5 = vld [vmem:[%s153_s26 + $0x88] sm:$0xff]  ;;  %173 = vst [vmem:[%s150_s27 + $0x18] sm:$0xff] %v172_v3  ;;  %v178_v6 = vld [vmem:[%s153_s26 + $0x90] sm:$0xff] }
  0x12   : > { %175 = vst [vmem:[%s150_s27 + $0x20] sm:$0xff] %v174_v4  ;;  %177 = vst [vmem:[%s150_s27 + $0x28] sm:$0xff] %v176_v5  ;;  %v180_v7 = vld [vmem:[%s153_s26 + $0x98] sm:$0xff] }
  0x13   : > { %179 = vst [vmem:[%s150_s27 + $0x30] sm:$0xff] %v178_v6  ;;  %181 = vst [vmem:[%s150_s27 + $0x38] sm:$0xff] %v180_v7 }
  0x14 PF: > { %p1108_p6 = scmp.ge.s32.totalorder %s1432_s16, 1  ;;  %p198_p7 = scmp.lt.s32.totalorder %s1432_s16, 5 }
  0x16   : > { %p199_p8 = pnand %p1108_p6, %p198_p7 }
  0x17   : > { %s205_s28 = sand.u32 (!%p199_p8), 1, %s1416_s12   ;;  %s1110_s29 = sshll.u32 (!%p199_p8), %s1424_s14, 7 }
  0x18   : > { %202 = sbr.rel (%p199_p8) target bundleno = 448 (0x1c0), region = 51  ;;  %s1109_s30 = sshll.u32 (!%p199_p8), %s205_s28, 6 }
  0x19   : > { %p237_p9 = scmp.lt.s32.totalorder (!%p199_p8), %s1110_s29, 511  ;;  %s1508_s8 = scalar_lea.vmem (!%p199_p8), [#allocation3], %s1109_s30 }
  0x1a   : > { %p1112_p10 = scmp.ne.s32.totalorder (!%p199_p8), %s1424_s14, 0 }
  0x1d   : > { %s1619_s29 = smov (!%p237_p9, %s1110_s29), 511  ;;  %253 = sbr.rel (%p1112_p10) target bundleno = 36 (0x24), region = 59 }
  0x1e   : > { %s1111_s4 = sshll.u32 %s1619_s29, 2 }
  0x1f   : > { %s1506_s7 = scalar_lea.vmem %s1609_s1, %s1111_s4 }
  0x22   : > { %v1434_v8 = vmov 0.0  }
  0x23   : > { %254 = vst [vmem:[#allocation2] sm:$0xff] %v1434_v8  ;;  %255 = vst [vmem:[#allocation2 + $0x8] sm:$0xff] %v1434_v8 }
  0x24 PF: > { %v1329_v9 = vld [vmem:[%s1506_s7 + $0x78] sm:$0xff]   ;;  %v1333_v13 = vld [vmem:[%s1506_s7 + $0x70] sm:$0xff]   ;;  %v1337_v17 = vld [vmem:[%s1506_s7 + $0x68] sm:$0xff]   ;;  %p1185_p11 = scmp.ne.s32.totalorder %s1424_s14, 3 }
  0x25   : > { %v1330_v10 = vld [vmem:[%s1506_s7 + $0xf8] sm:$0xff]   ;;  %1199 = vmatprep.subr.bf16.mxu0 %v1329_v9  ;;  %v1334_v14 = vld [vmem:[%s1506_s7 + $0xf0] sm:$0xff]   ;;  %v1338_v18 = vld [vmem:[%s1506_s7 + $0xe8] sm:$0xff]  }
  0x26   : > { %v1331_v11 = vld [vmem:[%s1506_s7 + $0x38] sm:$0xff]   ;;  %1221 = vmatprep.subr.bf16.mxu1 %v1330_v10  ;;  %v1335_v15 = vld [vmem:[%s1506_s7 + $0x30] sm:$0xff]   ;;  %v1339_v19 = vld [vmem:[%s1506_s7 + $0x28] sm:$0xff]  }
  0x27   : > { %v1332_v12 = vld [vmem:[%s1506_s7 + $0xb8] sm:$0xff]   ;;  %1200 = vmatpush3.bf16.msra.mxu0 %v1331_v11  ;;  %v1336_v16 = vld [vmem:[%s1506_s7 + $0xb0] sm:$0xff]   ;;  %v1340_v20 = vld [vmem:[%s1506_s7 + $0xa8] sm:$0xff]  }
  0x28   : > { %1222 = vmatpush3.bf16.msra.mxu1 %v1332_v12  ;;  %1201 = vmatprep.subr.bf16.mxu0 %v1333_v13  ;;  %v1341_v21 = vld [vmem:[%s1506_s7 + $0x60] sm:$0xff]   ;;  %v1345_v25 = vld [vmem:[%s1506_s7 + $0x58] sm:$0xff]   ;;  %v1349_v29 = vld [vmem:[%s1506_s7 + $0x50] sm:$0xff]  }
  0x29   : > { %1223 = vmatprep.subr.bf16.mxu1 %v1334_v14  ;;  %v1342_v22 = vld [vmem:[%s1506_s7 + $0xe0] sm:$0xff]   ;;  %v1346_v26 = vld [vmem:[%s1506_s7 + $0xd8] sm:$0xff]   ;;  %v1350_v30 = vld [vmem:[%s1506_s7 + $0xd0] sm:$0xff]  }
  0x2a   : > { %v1343_v23 = vld [vmem:[%s1506_s7 + $0x20] sm:$0xff]   ;;  %v1347_v27 = vld [vmem:[%s1506_s7 + $0x18] sm:$0xff]   ;;  %v1351_v31 = vld [vmem:[%s1506_s7 + $0x10] sm:$0xff]  }
  0x2b   : > { %1202 = vmatpush3.bf16.msra.mxu0 %v1335_v15  ;;  %v1344_v24 = vld [vmem:[%s1506_s7 + $0xa0] sm:$0xff]   ;;  %v1348_v28 = vld [vmem:[%s1506_s7 + $0x98] sm:$0xff]   ;;  %v1352_v32 = vld [vmem:[%s1506_s7 + $0x90] sm:$0xff]  }
  0x2c   : > { %1224 = vmatpush3.bf16.msra.mxu1 %v1336_v16  ;;  %1203 = vmatprep.subr.bf16.mxu0 %v1337_v17  ;;  %v1353_v33 = vld [vmem:[%s1506_s7 + $0x48] sm:$0xff]   ;;  %v1357_v37 = vld [vmem:[%s1506_s7 + $0x40] sm:$0xff]   ;;  %v258_v41 = vld [vmem:[%s1508_s8] sm:$0xff] }
  0x2d   : > { %1225 = vmatprep.subr.bf16.mxu1 %v1338_v18  ;;  %v1354_v34 = vld [vmem:[%s1506_s7 + $0xc8] sm:$0xff]   ;;  %v1358_v38 = vld [vmem:[%s1506_s7 + $0xc0] sm:$0xff]   ;;  %v262_v42 = vld [vmem:[%s1508_s8 + $0x20] sm:$0xff] }
  0x2e   : > { %v1355_v35 = vld [vmem:[%s1506_s7 + $0x8] sm:$0xff]   ;;  %v1359_v39 = vld [vmem:[%s1506_s7] sm:$0xff]   ;;  %v259_v43 = vld [vmem:[%s1508_s8 + $0x8] sm:$0xff]  ;;  %v1113_v44 = vcombine.low %v258_v41, %v262_v42  ;;  %v1114_v45 = vcombine.high %v258_v41, %v262_v42 }
  0x2f   : > { %1204 = vmatpush3.bf16.msra.mxu0 %v1339_v19  ;;  %v1356_v36 = vld [vmem:[%s1506_s7 + $0x88] sm:$0xff]   ;;  %v1360_v40 = vld [vmem:[%s1506_s7 + $0x80] sm:$0xff]   ;;  %v263_v46 = vld [vmem:[%s1508_s8 + $0x28] sm:$0xff] }
  0x30   : > { %1226 = vmatpush3.bf16.msra.mxu1 %v1340_v20  ;;  %1205 = vmatprep.subr.bf16.mxu0 %v1341_v21  ;;  %v1115_v47 = vcombine.low %v259_v43, %v263_v46  ;;  %v1116_v48 = vcombine.high %v259_v43, %v263_v46  ;;  %v1361_v49 = vld [vmem:[%s1506_s7 + $0x178] sm:$0xff]   ;;  %v1365_v53 = vld [vmem:[%s1506_s7 + $0x170] sm:$0xff]   ;;  %v1369_v57 = vld [vmem:[%s1506_s7 + $0x168] sm:$0xff]  }
  0x31   : > { %1227 = vmatprep.subr.bf16.mxu1 %v1342_v22  ;;  %850 = vmatprep.mubr.bf16.mxu0 %v1114_v45  ;;  %v1362_v50 = vld [vmem:[%s1506_s7 + $0x1f8] sm:$0xff]   ;;  %v1366_v54 = vld [vmem:[%s1506_s7 + $0x1f0] sm:$0xff]   ;;  %v1370_v58 = vld [vmem:[%s1506_s7 + $0x1e8] sm:$0xff]  }
  0x32   : > { %891 = vmatprep.mubr.bf16.mxu1 %v1116_v48  ;;  %v1363_v51 = vld [vmem:[%s1506_s7 + $0x138] sm:$0xff]   ;;  %v1367_v55 = vld [vmem:[%s1506_s7 + $0x130] sm:$0xff]   ;;  %v1371_v59 = vld [vmem:[%s1506_s7 + $0x128] sm:$0xff]  }
  0x33   : > { %1206 = vmatpush3.bf16.msra.mxu0 %v1343_v23  ;;  %v1364_v52 = vld [vmem:[%s1506_s7 + $0x1b8] sm:$0xff]   ;;  %v1368_v56 = vld [vmem:[%s1506_s7 + $0x1b0] sm:$0xff]   ;;  %v1372_v60 = vld [vmem:[%s1506_s7 + $0x1a8] sm:$0xff]  }
  0x34   : > { %1228 = vmatpush3.bf16.msra.mxu1 %v1344_v24  ;;  %1207 = vmatprep.subr.bf16.mxu0 %v1345_v25  ;;  %v1373_v61 = vld [vmem:[%s1506_s7 + $0x160] sm:$0xff]   ;;  %v1377_v1 = vld [vmem:[%s1506_s7 + $0x158] sm:$0xff]   ;;  %v1381_v5 = vld [vmem:[%s1506_s7 + $0x150] sm:$0xff]  }
  0x35   : > { %1229 = vmatprep.subr.bf16.mxu1 %v1346_v26  ;;  %v1374_v62 = vld [vmem:[%s1506_s7 + $0x1e0] sm:$0xff]   ;;  %v1378_v2 = vld [vmem:[%s1506_s7 + $0x1d8] sm:$0xff]   ;;  %v1382_v6 = vld [vmem:[%s1506_s7 + $0x1d0] sm:$0xff]  }
  0x36   : > { %v1375_v63 = vld [vmem:[%s1506_s7 + $0x120] sm:$0xff]   ;;  %v1379_v3 = vld [vmem:[%s1506_s7 + $0x118] sm:$0xff]   ;;  %v1383_v7 = vld [vmem:[%s1506_s7 + $0x110] sm:$0xff]  }
  0x37   : > { %1208 = vmatpush3.bf16.msra.mxu0 %v1347_v27  ;;  %v1376_v0 = vld [vmem:[%s1506_s7 + $0x1a0] sm:$0xff]   ;;  %v1380_v4 = vld [vmem:[%s1506_s7 + $0x198] sm:$0xff]   ;;  %v1384_v8 = vld [vmem:[%s1506_s7 + $0x190] sm:$0xff]  }
  0x38   : > { %1230 = vmatpush3.bf16.msra.mxu1 %v1348_v28  ;;  %1209 = vmatprep.subr.bf16.mxu0 %v1349_v29  ;;  %v1385_v9 = vld [vmem:[%s1506_s7 + $0x148] sm:$0xff]   ;;  %v1389_v13 = vld [vmem:[%s1506_s7 + $0x140] sm:$0xff]  }
  0x39   : > { %1231 = vmatprep.subr.bf16.mxu1 %v1350_v30  ;;  %v1386_v10 = vld [vmem:[%s1506_s7 + $0x1c8] sm:$0xff]   ;;  %v1390_v14 = vld [vmem:[%s1506_s7 + $0x1c0] sm:$0xff]  }
  0x3a   : > { %v1387_v11 = vld [vmem:[%s1506_s7 + $0x108] sm:$0xff]   ;;  %v1391_v15 = vld [vmem:[%s1506_s7 + $0x100] sm:$0xff]  }
  0x3b   : > { %1210 = vmatpush3.bf16.msra.mxu0 %v1351_v31  ;;  %v1388_v12 = vld [vmem:[%s1506_s7 + $0x188] sm:$0xff]   ;;  %v1392_v16 = vld [vmem:[%s1506_s7 + $0x180] sm:$0xff]  }
  0x3c   : > { %1232 = vmatpush3.bf16.msra.mxu1 %v1352_v32  ;;  %1211 = vmatprep.subr.bf16.mxu0 %v1353_v33  ;;  %v260_v17 = vld [vmem:[%s1508_s8 + $0x10] sm:$0xff]  ;;  %v261_v21 = vld [vmem:[%s1508_s8 + $0x18] sm:$0xff] }
  0x3d   : > { %1233 = vmatprep.subr.bf16.mxu1 %v1354_v34  ;;  %v264_v18 = vld [vmem:[%s1508_s8 + $0x30] sm:$0xff]  ;;  %v265_v22 = vld [vmem:[%s1508_s8 + $0x38] sm:$0xff] }
  0x3e   : > { %v1117_v19 = vcombine.low %v260_v17, %v264_v18  ;;  %v1118_v20 = vcombine.high %v260_v17, %v264_v18  ;;  %v1119_v23 = vcombine.low %v261_v21, %v265_v22  ;;  %v1120_v24 = vcombine.high %v261_v21, %v265_v22 }
  0x3f   : > { %1212 = vmatpush3.bf16.msra.mxu0 %v1355_v35 }
  0x40   : > { %1234 = vmatpush3.bf16.msra.mxu1 %v1356_v36  ;;  %1213 = vmatprep.subr.bf16.mxu0 %v1357_v37 }
  0x41   : > { %1235 = vmatprep.subr.bf16.mxu1 %v1358_v38 }
  0x43   : > { %1214 = vmatpush3.bf16.msra.mxu0 %v1359_v39 }
  0x44   : > { %1236 = vmatpush3.bf16.msra.mxu1 %v1360_v40  ;;  %1243 = vmatprep.subr.bf16.mxu0 %v1361_v49 }
  0x45   : > { %1265 = vmatprep.subr.bf16.mxu1 %v1362_v50 }
  0x46   : > { %851 = vmatmul.mubr.bf16.vlgmr.msra.gmra.mxu0 %v1113_v44 }
  0x47   : > { %892 = vmatmul.mubr.bf16.vlgmr.msra.gmra.mxu1 %v1115_v47  ;;  %1244 = vmatpush3.bf16.msra.mxu0 %v1363_v51  ;;  %v256_v47 = vld [vmem:[#allocation2] sm:$0xff] }
  0x48   : > { %1266 = vmatpush3.bf16.msra.mxu1 %v1364_v52  ;;  %1245 = vmatprep.subr.bf16.mxu0 %v1365_v53 }
  0x49   : > { %1267 = vmatprep.subr.bf16.mxu1 %v1366_v54  ;;  %932 = vmatprep.mubr.bf16.mxu0 %v1118_v20 }
  0x4a   : > { %973 = vmatprep.mubr.bf16.mxu1 %v1120_v24 }
  0x4b   : > { %1246 = vmatpush3.bf16.msra.mxu0 %v1367_v55 }
  0x4c   : > { %1268 = vmatpush3.bf16.msra.mxu1 %v1368_v56  ;;  %1247 = vmatprep.subr.bf16.mxu0 %v1369_v57  ;;  %v257_v56 = vld [vmem:[#allocation2 + $0x8] sm:$0xff] }
  0x4d   : > { %1269 = vmatprep.subr.bf16.mxu1 %v1370_v58 }
  0x4f   : > { %1248 = vmatpush3.bf16.msra.mxu0 %v1371_v59 }
  0x50   : > { %1270 = vmatpush3.bf16.msra.mxu1 %v1372_v60  ;;  %1249 = vmatprep.subr.bf16.mxu0 %v1373_v61 }
  0x51   : > { %1271 = vmatprep.subr.bf16.mxu1 %v1374_v62 }
  0x53   : > { %1250 = vmatpush3.bf16.msra.mxu0 %v1375_v63 }
  0x54   : > { %1272 = vmatpush3.bf16.msra.mxu1 %v1376_v0  ;;  %1251 = vmatprep.subr.bf16.mxu0 %v1377_v1 }
  0x55   : > { %1273 = vmatprep.subr.bf16.mxu1 %v1378_v2 }
  0x57   : > { %1252 = vmatpush3.bf16.msra.mxu0 %v1379_v3 }
  0x58   : > { %1274 = vmatpush3.bf16.msra.mxu1 %v1380_v4  ;;  %1253 = vmatprep.subr.bf16.mxu0 %v1381_v5 }
  0x59   : > { %1275 = vmatprep.subr.bf16.mxu1 %v1382_v6 }
  0x5b   : > { %1254 = vmatpush3.bf16.msra.mxu0 %v1383_v7 }
  0x5c   : > { %1276 = vmatpush3.bf16.msra.mxu1 %v1384_v8  ;;  %1255 = vmatprep.subr.bf16.mxu0 %v1385_v9 }
  0x5d   : > { %1277 = vmatprep.subr.bf16.mxu1 %v1386_v10 }
  0x5f   : > { %1256 = vmatpush3.bf16.msra.mxu0 %v1387_v11 }
  0x60   : > { %1278 = vmatpush3.bf16.msra.mxu1 %v1388_v12  ;;  %1257 = vmatprep.subr.bf16.mxu0 %v1389_v13 }
  0x61   : > { %1279 = vmatprep.subr.bf16.mxu1 %v1390_v14 }
  0x63   : > { %1258 = vmatpush3.bf16.msra.mxu0 %v1391_v15 }
  0x64   : > { %1280 = vmatpush3.bf16.msra.mxu1 %v1392_v16 }
  0x66   : > { %933 = vmatmul.mubr.bf16.vlgmr.msra.gmra.mxu0 %v1117_v19 }
  0x67   : > { %974 = vmatmul.mubr.bf16.vlgmr.msra.gmra.mxu1 %v1119_v23 }
 0x106   : > { %v1215_v25 = vpop.f32.mrf.mxu0 }
 0x107   : > { %v1237_v26 = vpop.f32.mrf.mxu1 }
 0x108   : > { %v1216_v27 = vpop.f32.mrf.mxu0 }
 0x109   : > { %v1238_v28 = vpop.f32.mrf.mxu1  ;;  %v1217_v32 = vadd.f32 %v1216_v27, %v1215_v25 }
 0x10a   : > { %v1218_v29 = vpop.f32.mrf.mxu0  ;;  %v1239_v33 = vadd.f32 %v1238_v28, %v1237_v26 }
 0x10b   : > { %v1240_v30 = vpop.f32.mrf.mxu1 }
 0x10c   : > { %v1219_v31 = vpop.f32.mrf.mxu0  ;;  %v894_v38 = vadd.f32 %v1239_v33, %v1217_v32 }
 0x10d   : > { %v1241_v34 = vpop.f32.mrf.mxu1  ;;  %v1220_v39 = vadd.f32 %v1219_v31, %v1218_v29 }
 0x10e   : > { %v1242_v40 = vadd.f32 %v1241_v34, %v1240_v30 }
 0x110   : > { %v897_v49 = vadd.f32 %v1242_v40, %v1220_v39 }
 0x126   : > { %v1259_v35 = vpop.f32.mrf.mxu0 }
 0x127   : > { %v1281_v36 = vpop.f32.mrf.mxu1 }
 0x128   : > { %v1260_v37 = vpop.f32.mrf.mxu0 }
 0x129   : > { %v1261_v41 = vadd.f32 %v1260_v37, %v1259_v35  ;;  %v1282_v42 = vpop.f32.mrf.mxu1 }
 0x12a   : > { %v1262_v43 = vpop.f32.mrf.mxu0  ;;  %v1283_v45 = vadd.f32 %v1282_v42, %v1281_v36 }
 0x12b   : > { %v935_v44 = vadd.f32 %v1261_v41, %v894_v38  ;;  %v1284_v46 = vpop.f32.mrf.mxu1 }
 0x12c   : > { %v1263_v48 = vpop.f32.mrf.mxu0 }
 0x12d   : > { %v976_v50 = vadd.f32 %v1283_v45, %v935_v44  ;;  %v1264_v51 = vadd.f32 %v1263_v48, %v1262_v43  ;;  %v1285_v52 = vpop.f32.mrf.mxu1 }
 0x12e   : > { %v1286_v55 = vadd.f32 %v1285_v52, %v1284_v46 }
 0x12f   : > { %v982_v53 = vadd.f32 %v976_v50, %v256_v47  ;;  %v938_v54 = vadd.f32 %v1264_v51, %v897_v49 }
 0x131   : > { %984 = vst [vmem:[#allocation2] sm:$0xff] %v982_v53  ;;  %v979_v57 = vadd.f32 %v1286_v55, %v938_v54  ;;  %989 = sbr.rel (%p1185_p11) target bundleno = 448 (0x1c0), region = 63 }
 0x133   : > { %v983_v58 = vadd.f32 %v979_v57, %v257_v56 }
 0x135   : > { %985 = vst [vmem:[#allocation2 + $0x8] sm:$0xff] %v983_v58 }
 0x136   : > { %v992_v59 = vld [vmem:[%s1610_s2] sm:$0xff]  ;;  %v1435_v60 = vmov 0   ;;  %v993_v61 = vld [vmem:[%s1610_s2 + $0x8] sm:$0xff] }
 0x137   : > { %1393 = vset.pattern.permute.xlu0 %v1435_v60 }
 0x138   : > { %996 = vperm.xlu0 %1393, %v992_v59   ;;  %v990_v62 = vld [vmem:[#allocation2] sm:$0xff] }
 0x13c   : > { %1001 = vperm.xlu0 %1393, %v993_v61   ;;  %v991_v1 = vld [vmem:[#allocation2 + $0x8] sm:$0xff] }
 0x1b3   : > { %v997_v63 = vpop.permute.xlu0 %996 }
 0x1b4   : > { %v1004_v0 = vadd.f32 %v997_v63, %v990_v62 }
 0x1b6   : > { %v1008_v3 = vmul.f32 0.01, %v1004_v0  ;;  %vm1006_vm0 = vcmp.gt.f32.partialorder %v1004_v0, 0.0 }
 0x1b7   : > { %v1002_v2 = vpop.permute.xlu0 %1001 }
 0x1b8   : > { %v1005_v4 = vadd.f32 %v1002_v2, %v991_v1  ;;  %v1010_v6 = vsel %vm1006_vm0, %v1004_v0, %v1008_v3 }
 0x1ba   : > { %vm1007_vm1 = vcmp.gt.f32.partialorder %v1005_v4, 0.0  ;;  %v1009_v5 = vmul.f32 0.01, %v1005_v4 }
 0x1bc   : > { %v1011_v7 = vsel %vm1007_vm1, %v1005_v4, %v1009_v5 }
 0x1bd   : > { %v1197_v8 = vpack.c.bf16 %v1011_v7, %v1010_v6 }
 0x1bf   : > { %1198 = vst [vmem:[%s1611_s3] sm:$0xff] %v1197_v8  }
 0x1c0 PF: > { %s13_s16 = sadd.s32 1, %s1432_s16   ;;  %s1612_s12 = smov %s1420_s13 }
 0x1c1   : > { %p10_p12 = scmp.ge.s32.totalorder %s13_s16, 6   ;;  %s1613_s13 = smov %s1491_s20 }
 0x1c2   : > { %s1614_s14 = smov %s1428_s15  ;;  %s1615_s15 = smov %s1617_s17 }
 0x1c3   :  { %12 = sbr.rel (!%p10_p12) target bundleno = 3 (0x3), region = 101 }

// kernel: a_call__.27
= control target key start
LH: loop header
LB: loop body
LE: loop exit
PB: predicated region body
PF: predicated region fallthrough
CT: control target
= control target key end

     0   :  { %s1635_s12 = smov 0   ;;  %s1637_s13 = smov 0   ;;  %s1822_s0 = inlined_call_operand.vmem [shape: bf16[32,2048], index: 0, kind: input, shape index: {}]   ;;  %s1823_s1 = inlined_call_operand.vmem [shape: bf16[2048,128], index: 1, kind: input, shape index: {}]   ;;  %s1824_s2 = inlined_call_operand.vmem [shape: f32[32,1], index: 2, kind: input, shape index: {}]   ;;  %s1825_s3 = inlined_call_operand.vmem [shape: bf16[32,128], index: 3, kind: output, shape index: {}]  }
   0x1   :  { %s1639_s14 = smov 0   ;;  %s1641_s15 = smov 0  }
   0x2   :  { %s1643_s16 = smov 0  }
   0x3 LB: > { %s22_s17 = sadd.s32 1, %s1607_s15  ;;  %p39_p1 = scmp.ne.s32.totalorder %s1599_s13, %s1595_s12  ;;  %s1611_s16 = sphi %s1643_s16, %s13_s16   ;;  %s1607_s15 = sphi %s1641_s15, %s1829_s15   ;;  %s1603_s14 = sphi %s1639_s14, %s1828_s14   ;;  %s1599_s13 = sphi %s1637_s13, %s1827_s13   ;;  %s1595_s12 = sphi %s1635_s12, %s1826_s12  }
   0x4   : > { %p23_p0 = scmp.ge.s32.totalorder %s22_s17, 2  ;;  %p40_p2 = scmp.eq.s32.totalorder %s1611_s16, 0 }
   0x5   : > { %s32_s19 = sadd.s32 1, %s1599_s13  ;;  %p1240_p5 = scmp.ge.s32.totalorder %s1611_s16, 2 }
   0x6   : > { %s1831_s17 = smov (%p23_p0, %s22_s17), 0  ;;  %p41_p3 = por %p40_p2, %p39_p1 }
   0x7   : > { %s29_s18 = ssub.s32 %s1607_s15, %s1831_s17  ;;  %143 = sbr.rel (%p1240_p5) target bundleno = 24 (0x18), region = 20 }
   0x8   : > { %p30_p4 = scmp.eq.s32.totalorder %s29_s18, 0 }
   0xa   : > { %s1670_s20 = scalar_select %p30_p4, %s1599_s13, %s32_s19  }
   0xc   : > { %146 = sbr.rel (!%p41_p3) target bundleno = 24 (0x18), region = 24  ;;  %s148_s21 = sand.u32 (%p41_p3), 1, %s1599_s13  }
   0xd   : > { %s1337_s22 = sshll.u32 (%p41_p3), %s1607_s15, 5  ;;  %s1241_s23 = sshll.u32 (%p41_p3), %s148_s21, 7 }
   0xe   : > { %s1678_s26 = scalar_lea.vmem (%p41_p3), %s1822_s0, %s1337_s22  ;;  %s150_s27 = scalar_lea.vmem (%p41_p3), [#allocation3], %s1241_s23 }
   0xf   : > { %v166_v0 = vld [vmem:[%s1678_s26] sm:$0xff] (%p41_p3)  ;;  %v168_v1 = vld [vmem:[%s1678_s26 + $0x8] sm:$0xff] (%p41_p3)  ;;  %v170_v2 = vld [vmem:[%s1678_s26 + $0x10] sm:$0xff] (%p41_p3) }
  0x10   : > { %167 = vst [vmem:[%s150_s27] sm:$0xff] (%p41_p3), %v166_v0  ;;  %169 = vst [vmem:[%s150_s27 + $0x8] sm:$0xff] (%p41_p3), %v168_v1  ;;  %v172_v3 = vld [vmem:[%s1678_s26 + $0x18] sm:$0xff] (%p41_p3)  ;;  %v174_v4 = vld [vmem:[%s1678_s26 + $0x40] sm:$0xff] (%p41_p3) }
  0x11   : > { %171 = vst [vmem:[%s150_s27 + $0x10] sm:$0xff] %v170_v2  ;;  %v176_v5 = vld [vmem:[%s1678_s26 + $0x48] sm:$0xff]  ;;  %173 = vst [vmem:[%s150_s27 + $0x18] sm:$0xff] %v172_v3  ;;  %v178_v6 = vld [vmem:[%s1678_s26 + $0x50] sm:$0xff] }
  0x12   : > { %175 = vst [vmem:[%s150_s27 + $0x20] sm:$0xff] %v174_v4  ;;  %177 = vst [vmem:[%s150_s27 + $0x28] sm:$0xff] %v176_v5  ;;  %v180_v7 = vld [vmem:[%s1678_s26 + $0x58] sm:$0xff]  ;;  %v182_v8 = vld [vmem:[%s1678_s26 + $0x80] sm:$0xff] }
  0x13   : > { %179 = vst [vmem:[%s150_s27 + $0x30] sm:$0xff] %v178_v6  ;;  %181 = vst [vmem:[%s150_s27 + $0x38] sm:$0xff] %v180_v7  ;;  %v184_v9 = vld [vmem:[%s1678_s26 + $0x88] sm:$0xff]  ;;  %v186_v10 = vld [vmem:[%s1678_s26 + $0x90] sm:$0xff] }
  0x14   : > { %183 = vst [vmem:[%s150_s27 + $0x40] sm:$0xff] %v182_v8  ;;  %v188_v11 = vld [vmem:[%s1678_s26 + $0x98] sm:$0xff]  ;;  %185 = vst [vmem:[%s150_s27 + $0x48] sm:$0xff] %v184_v9  ;;  %v190_v12 = vld [vmem:[%s1678_s26 + $0xc0] sm:$0xff] }
  0x15   : > { %187 = vst [vmem:[%s150_s27 + $0x50] sm:$0xff] %v186_v10  ;;  %189 = vst [vmem:[%s150_s27 + $0x58] sm:$0xff] %v188_v11  ;;  %v192_v13 = vld [vmem:[%s1678_s26 + $0xc8] sm:$0xff]  ;;  %v194_v14 = vld [vmem:[%s1678_s26 + $0xd0] sm:$0xff] }
  0x16   : > { %191 = vst [vmem:[%s150_s27 + $0x60] sm:$0xff] %v190_v12  ;;  %193 = vst [vmem:[%s150_s27 + $0x68] sm:$0xff] %v192_v13  ;;  %v196_v15 = vld [vmem:[%s1678_s26 + $0xd8] sm:$0xff] }
  0x17   : > { %195 = vst [vmem:[%s150_s27 + $0x70] sm:$0xff] %v194_v14  ;;  %197 = vst [vmem:[%s150_s27 + $0x78] sm:$0xff] %v196_v15 }
  0x18 PF: > { %p1244_p6 = scmp.ge.s32.totalorder %s1611_s16, 1  ;;  %p214_p7 = scmp.lt.s32.totalorder %s1611_s16, 3 }
  0x1a   : > { %p215_p8 = pnand %p1244_p6, %p214_p7 }
  0x1b   : > { %s221_s28 = sand.u32 (!%p215_p8), 1, %s1595_s12   ;;  %s1246_s29 = sshll.u32 (!%p215_p8), %s1603_s14, 7 }
  0x1c   : > { %218 = sbr.rel (%p215_p8) target bundleno = 461 (0x1cd), region = 51  ;;  %s1245_s30 = sshll.u32 (!%p215_p8), %s221_s28, 7 }
  0x1d   : > { %p253_p9 = scmp.lt.s32.totalorder (!%p215_p8), %s1246_s29, 255  ;;  %s1705_s8 = scalar_lea.vmem (!%p215_p8), [#allocation3], %s1245_s30 }
  0x1e   : > { %p1248_p10 = scmp.ne.s32.totalorder (!%p215_p8), %s1603_s14, 0 }
  0x21   : > { %s1833_s29 = smov (!%p253_p9, %s1246_s29), 255  ;;  %269 = sbr.rel (%p1248_p10) target bundleno = 41 (0x29), region = 59 }
  0x22   : > { %s1247_s4 = sshll.u32 %s1833_s29, 2 }
  0x23   : > { %s1703_s7 = scalar_lea.vmem %s1823_s1, %s1247_s4 }
  0x26   : > { %v1613_v16 = vmov 0.0  }
  0x27   : > { %270 = vst [vmem:[#allocation2 + $0x10] sm:$0xff] %v1613_v16  ;;  %271 = vst [vmem:[#allocation2] sm:$0xff] %v1613_v16 }
  0x28   : > { %272 = vst [vmem:[#allocation2 + $0x18] sm:$0xff] %v1613_v16  ;;  %273 = vst [vmem:[#allocation2 + $0x8] sm:$0xff] %v1613_v16 }
  0x29 PF: > { %v1507_v17 = vld [vmem:[%s1703_s7 + $0x78] sm:$0xff]   ;;  %v1511_v21 = vld [vmem:[%s1703_s7 + $0x70] sm:$0xff]   ;;  %v1515_v25 = vld [vmem:[%s1703_s7 + $0x68] sm:$0xff]   ;;  %p1329_p11 = scmp.ne.s32.totalorder %s1603_s14, 1 }
  0x2a   : > { %v1508_v18 = vld [vmem:[%s1703_s7 + $0xf8] sm:$0xff]   ;;  %1353 = vmatprep.subr.bf16.mxu0 %v1507_v17  ;;  %v1512_v22 = vld [vmem:[%s1703_s7 + $0xf0] sm:$0xff]   ;;  %v1516_v26 = vld [vmem:[%s1703_s7 + $0xe8] sm:$0xff]  }
  0x2b   : > { %v1509_v19 = vld [vmem:[%s1703_s7 + $0x38] sm:$0xff]   ;;  %1381 = vmatprep.subr.bf16.mxu1 %v1508_v18  ;;  %v1513_v23 = vld [vmem:[%s1703_s7 + $0x30] sm:$0xff]   ;;  %v1517_v27 = vld [vmem:[%s1703_s7 + $0x28] sm:$0xff]  }
  0x2c   : > { %v1510_v20 = vld [vmem:[%s1703_s7 + $0xb8] sm:$0xff]   ;;  %1354 = vmatpush3.bf16.msra.mxu0 %v1509_v19  ;;  %v1514_v24 = vld [vmem:[%s1703_s7 + $0xb0] sm:$0xff]   ;;  %v1518_v28 = vld [vmem:[%s1703_s7 + $0xa8] sm:$0xff]  }
  0x2d   : > { %1382 = vmatpush3.bf16.msra.mxu1 %v1510_v20  ;;  %1355 = vmatprep.subr.bf16.mxu0 %v1511_v21  ;;  %v1519_v29 = vld [vmem:[%s1703_s7 + $0x60] sm:$0xff]   ;;  %v1523_v33 = vld [vmem:[%s1703_s7 + $0x58] sm:$0xff]   ;;  %v1527_v37 = vld [vmem:[%s1703_s7 + $0x50] sm:$0xff]  }
  0x2e   : > { %1383 = vmatprep.subr.bf16.mxu1 %v1512_v22  ;;  %v1520_v30 = vld [vmem:[%s1703_s7 + $0xe0] sm:$0xff]   ;;  %v1524_v34 = vld [vmem:[%s1703_s7 + $0xd8] sm:$0xff]   ;;  %v1528_v38 = vld [vmem:[%s1703_s7 + $0xd0] sm:$0xff]  }
  0x2f   : > { %v1521_v31 = vld [vmem:[%s1703_s7 + $0x20] sm:$0xff]   ;;  %v1525_v35 = vld [vmem:[%s1703_s7 + $0x18] sm:$0xff]   ;;  %v1529_v39 = vld [vmem:[%s1703_s7 + $0x10] sm:$0xff]  }
  0x30   : > { %1356 = vmatpush3.bf16.msra.mxu0 %v1513_v23  ;;  %v1522_v32 = vld [vmem:[%s1703_s7 + $0xa0] sm:$0xff]   ;;  %v1526_v36 = vld [vmem:[%s1703_s7 + $0x98] sm:$0xff]   ;;  %v1530_v40 = vld [vmem:[%s1703_s7 + $0x90] sm:$0xff]  }
  0x31   : > { %1384 = vmatpush3.bf16.msra.mxu1 %v1514_v24  ;;  %1357 = vmatprep.subr.bf16.mxu0 %v1515_v25  ;;  %v1531_v41 = vld [vmem:[%s1703_s7 + $0x48] sm:$0xff]   ;;  %v1535_v45 = vld [vmem:[%s1703_s7 + $0x40] sm:$0xff]   ;;  %v1539_v57 = vld [vmem:[%s1703_s7 + $0x178] sm:$0xff]  }
  0x32   : > { %1385 = vmatprep.subr.bf16.mxu1 %v1516_v26  ;;  %v1532_v42 = vld [vmem:[%s1703_s7 + $0xc8] sm:$0xff]   ;;  %v1536_v46 = vld [vmem:[%s1703_s7 + $0xc0] sm:$0xff]   ;;  %v1540_v58 = vld [vmem:[%s1703_s7 + $0x1f8] sm:$0xff]  }
  0x33   : > { %v1533_v43 = vld [vmem:[%s1703_s7 + $0x8] sm:$0xff]   ;;  %v1537_v47 = vld [vmem:[%s1703_s7] sm:$0xff]   ;;  %v1541_v59 = vld [vmem:[%s1703_s7 + $0x138] sm:$0xff]  }
  0x34   : > { %1358 = vmatpush3.bf16.msra.mxu0 %v1517_v27  ;;  %v1534_v44 = vld [vmem:[%s1703_s7 + $0x88] sm:$0xff]   ;;  %v1538_v48 = vld [vmem:[%s1703_s7 + $0x80] sm:$0xff]   ;;  %v1542_v60 = vld [vmem:[%s1703_s7 + $0x1b8] sm:$0xff]  }
  0x35   : > { %1386 = vmatpush3.bf16.msra.mxu1 %v1518_v28  ;;  %1359 = vmatprep.subr.bf16.mxu0 %v1519_v29  ;;  %v278_v49 = vld [vmem:[%s1705_s8] sm:$0xff]  ;;  %v279_v51 = vld [vmem:[%s1705_s8 + $0x8] sm:$0xff]  ;;  %v1543_v61 = vld [vmem:[%s1703_s7 + $0x170] sm:$0xff]  }
  0x36   : > { %1387 = vmatprep.subr.bf16.mxu1 %v1520_v30  ;;  %v282_v50 = vld [vmem:[%s1705_s8 + $0x20] sm:$0xff]  ;;  %v283_v54 = vld [vmem:[%s1705_s8 + $0x28] sm:$0xff]  ;;  %v1544_v62 = vld [vmem:[%s1703_s7 + $0x1f0] sm:$0xff]  }
  0x37   : > { %v1249_v52 = vcombine.low %v278_v49, %v282_v50  ;;  %v1250_v53 = vcombine.high %v278_v49, %v282_v50  ;;  %v1251_v55 = vcombine.low %v279_v51, %v283_v54  ;;  %v1252_v56 = vcombine.high %v279_v51, %v283_v54  ;;  %v1545_v63 = vld [vmem:[%s1703_s7 + $0x130] sm:$0xff]   ;;  %v1547_v1 = vld [vmem:[%s1703_s7 + $0x168] sm:$0xff]   ;;  %v1551_v5 = vld [vmem:[%s1703_s7 + $0x160] sm:$0xff]  }
  0x38   : > { %1360 = vmatpush3.bf16.msra.mxu0 %v1521_v31  ;;  %v1546_v0 = vld [vmem:[%s1703_s7 + $0x1b0] sm:$0xff]   ;;  %v1548_v2 = vld [vmem:[%s1703_s7 + $0x1e8] sm:$0xff]   ;;  %v1552_v6 = vld [vmem:[%s1703_s7 + $0x1e0] sm:$0xff]  }
  0x39   : > { %1388 = vmatpush3.bf16.msra.mxu1 %v1522_v32  ;;  %1361 = vmatprep.subr.bf16.mxu0 %v1523_v33  ;;  %v1549_v3 = vld [vmem:[%s1703_s7 + $0x128] sm:$0xff]   ;;  %v1553_v7 = vld [vmem:[%s1703_s7 + $0x120] sm:$0xff]   ;;  %v1555_v9 = vld [vmem:[%s1703_s7 + $0x158] sm:$0xff]  }
  0x3a   : > { %1389 = vmatprep.subr.bf16.mxu1 %v1524_v34  ;;  %918 = vmatprep.mubr.bf16.mxu0 %v1250_v53  ;;  %v1550_v4 = vld [vmem:[%s1703_s7 + $0x1a8] sm:$0xff]   ;;  %v1554_v8 = vld [vmem:[%s1703_s7 + $0x1a0] sm:$0xff]   ;;  %v1556_v10 = vld [vmem:[%s1703_s7 + $0x1d8] sm:$0xff]  }
  0x3b   : > { %967 = vmatprep.mubr.bf16.mxu1 %v1252_v56  ;;  %v286_v11 = vld [vmem:[%s1705_s8 + $0x40] sm:$0xff]  ;;  %v287_v14 = vld [vmem:[%s1705_s8 + $0x48] sm:$0xff]  ;;  %v1557_v18 = vld [vmem:[%s1703_s7 + $0x118] sm:$0xff]  }
  0x3c   : > { %1362 = vmatpush3.bf16.msra.mxu0 %v1525_v35  ;;  %v290_v12 = vld [vmem:[%s1705_s8 + $0x60] sm:$0xff]  ;;  %v291_v15 = vld [vmem:[%s1705_s8 + $0x68] sm:$0xff]  ;;  %v1558_v20 = vld [vmem:[%s1703_s7 + $0x198] sm:$0xff]  }
  0x3d   : > { %1390 = vmatpush3.bf16.msra.mxu1 %v1526_v36  ;;  %1363 = vmatprep.subr.bf16.mxu0 %v1527_v37  ;;  %v1258_v13 = vcombine.high %v286_v11, %v290_v12  ;;  %v1257_v16 = vcombine.low %v286_v11, %v290_v12  ;;  %v1260_v17 = vcombine.high %v287_v14, %v291_v15  ;;  %v1559_v21 = vld [vmem:[%s1703_s7 + $0x150] sm:$0xff]   ;;  %v1563_v25 = vld [vmem:[%s1703_s7 + $0x148] sm:$0xff]   ;;  %v1567_v29 = vld [vmem:[%s1703_s7 + $0x140] sm:$0xff]  }
  0x3e   : > { %1391 = vmatprep.subr.bf16.mxu1 %v1528_v38  ;;  %v1259_v19 = vcombine.low %v287_v14, %v291_v15  ;;  %v1560_v22 = vld [vmem:[%s1703_s7 + $0x1d0] sm:$0xff]   ;;  %v1564_v26 = vld [vmem:[%s1703_s7 + $0x1c8] sm:$0xff]   ;;  %v1568_v30 = vld [vmem:[%s1703_s7 + $0x1c0] sm:$0xff]  }
  0x3f   : > { %v1561_v23 = vld [vmem:[%s1703_s7 + $0x110] sm:$0xff]   ;;  %v1565_v27 = vld [vmem:[%s1703_s7 + $0x108] sm:$0xff]   ;;  %v1569_v31 = vld [vmem:[%s1703_s7 + $0x100] sm:$0xff]  }
  0x40   : > { %1364 = vmatpush3.bf16.msra.mxu0 %v1529_v39  ;;  %v1562_v24 = vld [vmem:[%s1703_s7 + $0x190] sm:$0xff]   ;;  %v1566_v28 = vld [vmem:[%s1703_s7 + $0x188] sm:$0xff]   ;;  %v1570_v32 = vld [vmem:[%s1703_s7 + $0x180] sm:$0xff]  }
  0x41   : > { %1392 = vmatpush3.bf16.msra.mxu1 %v1530_v40  ;;  %1365 = vmatprep.subr.bf16.mxu0 %v1531_v41  ;;  %v280_v33 = vld [vmem:[%s1705_s8 + $0x10] sm:$0xff]  ;;  %v281_v35 = vld [vmem:[%s1705_s8 + $0x18] sm:$0xff] }
  0x42   : > { %1393 = vmatprep.subr.bf16.mxu1 %v1532_v42  ;;  %v284_v34 = vld [vmem:[%s1705_s8 + $0x30] sm:$0xff]  ;;  %v285_v36 = vld [vmem:[%s1705_s8 + $0x38] sm:$0xff] }
  0x43   : > { %v1253_v37 = vcombine.low %v280_v33, %v284_v34  ;;  %v1254_v38 = vcombine.high %v280_v33, %v284_v34  ;;  %v1255_v39 = vcombine.low %v281_v35, %v285_v36  ;;  %v1256_v40 = vcombine.high %v281_v35, %v285_v36  ;;  %v288_v41 = vld [vmem:[%s1705_s8 + $0x50] sm:$0xff] }
  0x44   : > { %1366 = vmatpush3.bf16.msra.mxu0 %v1533_v43  ;;  %v292_v42 = vld [vmem:[%s1705_s8 + $0x70] sm:$0xff]  ;;  %v289_v43 = vld [vmem:[%s1705_s8 + $0x58] sm:$0xff] }
  0x45   : > { %1394 = vmatpush3.bf16.msra.mxu1 %v1534_v44  ;;  %1367 = vmatprep.subr.bf16.mxu0 %v1535_v45  ;;  %v1262_v44 = vcombine.high %v288_v41, %v292_v42  ;;  %v293_v45 = vld [vmem:[%s1705_s8 + $0x78] sm:$0xff] }
  0x46   : > { %1395 = vmatprep.subr.bf16.mxu1 %v1536_v46  ;;  %v1264_v46 = vcombine.high %v289_v43, %v293_v45 }
  0x48   : > { %1368 = vmatpush3.bf16.msra.mxu0 %v1537_v47  ;;  %v1261_v47 = vcombine.low %v288_v41, %v292_v42  ;;  %v276_v41 = vld [vmem:[#allocation2 + $0x18] sm:$0xff] }
  0x49   : > { %1396 = vmatpush3.bf16.msra.mxu1 %v1538_v48  ;;  %1409 = vmatprep.subr.bf16.mxu0 %v1539_v57  ;;  %v1263_v48 = vcombine.low %v289_v43, %v293_v45 }
  0x4a   : > { %1437 = vmatprep.subr.bf16.mxu1 %v1540_v58 }
  0x4b   : > { %919 = vmatmul.mubr.bf16.vlgmr.msra.gmra.mxu0 %v1249_v52 }
  0x4c   : > { %968 = vmatmul.mubr.bf16.vlgmr.msra.gmra.mxu1 %v1251_v55  ;;  %1410 = vmatpush3.bf16.msra.mxu0 %v1541_v59 }
  0x4d   : > { %1438 = vmatpush3.bf16.msra.mxu1 %v1542_v60  ;;  %1411 = vmatprep.subr.bf16.mxu0 %v1543_v61 }
  0x4e   : > { %1439 = vmatprep.subr.bf16.mxu1 %v1544_v62  ;;  %926 = vmatprep.mubr.bf16.mxu0 %v1258_v13 }
  0x4f   : > { %975 = vmatprep.mubr.bf16.mxu1 %v1260_v17  ;;  %v274_v17 = vld [vmem:[#allocation2 + $0x10] sm:$0xff] }
  0x50   : > { %1412 = vmatpush3.bf16.msra.mxu0 %v1545_v63 }
  0x51   : > { %1440 = vmatpush3.bf16.msra.mxu1 %v1546_v0  ;;  %1413 = vmatprep.subr.bf16.mxu0 %v1547_v1 }
  0x52   : > { %1441 = vmatprep.subr.bf16.mxu1 %v1548_v2 }
  0x53   : > { %927 = vmatmul.mubr.bf16.gmra.mxu0 %v1257_v16 }
  0x54   : > { %1414 = vmatpush3.bf16.msra.mxu0 %v1549_v3  ;;  %976 = vmatmul.mubr.bf16.gmra.mxu1 %v1259_v19 }
  0x55   : > { %1442 = vmatpush3.bf16.msra.mxu1 %v1550_v4  ;;  %1415 = vmatprep.subr.bf16.mxu0 %v1551_v5 }
  0x56   : > { %1443 = vmatprep.subr.bf16.mxu1 %v1552_v6  ;;  %1016 = vmatprep.mubr.bf16.mxu0 %v1254_v38 }
  0x57   : > { %1065 = vmatprep.mubr.bf16.mxu1 %v1256_v40 }
  0x58   : > { %1416 = vmatpush3.bf16.msra.mxu0 %v1553_v7 }
  0x59   : > { %1444 = vmatpush3.bf16.msra.mxu1 %v1554_v8  ;;  %1417 = vmatprep.subr.bf16.mxu0 %v1555_v9 }
  0x5a   : > { %1445 = vmatprep.subr.bf16.mxu1 %v1556_v10 }
  0x5c   : > { %1418 = vmatpush3.bf16.msra.mxu0 %v1557_v18 }
  0x5d   : > { %1446 = vmatpush3.bf16.msra.mxu1 %v1558_v20  ;;  %1419 = vmatprep.subr.bf16.mxu0 %v1559_v21 }
  0x5e   : > { %1447 = vmatprep.subr.bf16.mxu1 %v1560_v22 }
  0x60   : > { %1420 = vmatpush3.bf16.msra.mxu0 %v1561_v23 }
  0x61   : > { %1448 = vmatpush3.bf16.msra.mxu1 %v1562_v24  ;;  %1421 = vmatprep.subr.bf16.mxu0 %v1563_v25 }
  0x62   : > { %1449 = vmatprep.subr.bf16.mxu1 %v1564_v26 }
  0x64   : > { %1422 = vmatpush3.bf16.msra.mxu0 %v1565_v27 }
  0x65   : > { %1450 = vmatpush3.bf16.msra.mxu1 %v1566_v28  ;;  %1423 = vmatprep.subr.bf16.mxu0 %v1567_v29  ;;  %v275_v29 = vld [vmem:[#allocation2] sm:$0xff] }
  0x66   : > { %1451 = vmatprep.subr.bf16.mxu1 %v1568_v30 }
  0x68   : > { %1424 = vmatpush3.bf16.msra.mxu0 %v1569_v31 }
  0x69   : > { %1452 = vmatpush3.bf16.msra.mxu1 %v1570_v32 }
  0x6b   : > { %1017 = vmatmul.mubr.bf16.vlgmr.msra.gmra.mxu0 %v1253_v37 }
  0x6c   : > { %1066 = vmatmul.mubr.bf16.vlgmr.msra.gmra.mxu1 %v1255_v39  ;;  %1024 = vmatprep.mubr.bf16.mxu0 %v1262_v44 }
  0x6d   : > { %1073 = vmatprep.mubr.bf16.mxu1 %v1264_v46 }
  0x73   : > { %1025 = vmatmul.mubr.bf16.gmra.mxu0 %v1261_v47 }
  0x74   : > { %1074 = vmatmul.mubr.bf16.gmra.mxu1 %v1263_v48 }
 0x10b   : > { %v1369_v49 = vpop.f32.mrf.mxu0 }
 0x10c   : > { %v1397_v50 = vpop.f32.mrf.mxu1 }
 0x10d   : > { %v1370_v51 = vpop.f32.mrf.mxu0 }
 0x10e   : > { %v1398_v52 = vpop.f32.mrf.mxu1  ;;  %v1371_v1 = vadd.f32 %v1370_v51, %v1369_v49 }
 0x10f   : > { %v1372_v53 = vpop.f32.mrf.mxu0  ;;  %v1399_v2 = vadd.f32 %v1398_v52, %v1397_v50  ;;  %v277_v50 = vld [vmem:[#allocation2 + $0x8] sm:$0xff] }
 0x110   : > { %v1400_v54 = vpop.f32.mrf.mxu1 }
 0x111   : > { %v1373_v55 = vpop.f32.mrf.mxu0  ;;  %v970_v7 = vadd.f32 %v1399_v2, %v1371_v1 }
 0x112   : > { %v1401_v56 = vpop.f32.mrf.mxu1  ;;  %v1374_v8 = vadd.f32 %v1373_v55, %v1372_v53 }
 0x113   : > { %v1375_v57 = vpop.f32.mrf.mxu0  ;;  %v1402_v9 = vadd.f32 %v1401_v56, %v1400_v54 }
 0x114   : > { %v1403_v58 = vpop.f32.mrf.mxu1 }
 0x115   : > { %v1376_v59 = vpop.f32.mrf.mxu0  ;;  %v973_v20 = vadd.f32 %v1402_v9, %v1374_v8 }
 0x116   : > { %v1404_v60 = vpop.f32.mrf.mxu1  ;;  %v1377_v15 = vadd.f32 %v1376_v59, %v1375_v57 }
 0x117   : > { %v1378_v61 = vpop.f32.mrf.mxu0  ;;  %v1405_v16 = vadd.f32 %v1404_v60, %v1403_v58 }
 0x118   : > { %v1406_v62 = vpop.f32.mrf.mxu1 }
 0x119   : > { %v1379_v63 = vpop.f32.mrf.mxu0  ;;  %v978_v28 = vadd.f32 %v1405_v16, %v1377_v15 }
 0x11a   : > { %v1407_v0 = vpop.f32.mrf.mxu1  ;;  %v1380_v32 = vadd.f32 %v1379_v63, %v1378_v61 }
 0x11b   : > { %v1408_v33 = vadd.f32 %v1407_v0, %v1406_v62 }
 0x11d   : > { %v981_v44 = vadd.f32 %v1408_v33, %v1380_v32 }
 0x12b   : > { %v1425_v3 = vpop.f32.mrf.mxu0 }
 0x12c   : > { %v1453_v4 = vpop.f32.mrf.mxu1 }
 0x12d   : > { %v1426_v5 = vpop.f32.mrf.mxu0 }
 0x12e   : > { %v1454_v6 = vpop.f32.mrf.mxu1  ;;  %v1427_v10 = vadd.f32 %v1426_v5, %v1425_v3 }
 0x12f   : > { %v1428_v11 = vpop.f32.mrf.mxu0  ;;  %v1455_v14 = vadd.f32 %v1454_v6, %v1453_v4 }
 0x130   : > { %v1456_v12 = vpop.f32.mrf.mxu1  ;;  %v1019_v13 = vadd.f32 %v1427_v10, %v970_v7 }
 0x131   : > { %v1429_v18 = vpop.f32.mrf.mxu0 }
 0x132   : > { %v1457_v19 = vpop.f32.mrf.mxu1  ;;  %v1068_v21 = vadd.f32 %v1455_v14, %v1019_v13  ;;  %v1430_v22 = vadd.f32 %v1429_v18, %v1428_v11 }
 0x133   : > { %v1431_v23 = vpop.f32.mrf.mxu0  ;;  %v1458_v27 = vadd.f32 %v1457_v19, %v1456_v12 }
 0x134   : > { %v1459_v24 = vpop.f32.mrf.mxu1  ;;  %v1082_v25 = vadd.f32 %v1068_v21, %v274_v17  ;;  %v1022_v26 = vadd.f32 %v1430_v22, %v973_v20 }
 0x135   : > { %v1432_v30 = vpop.f32.mrf.mxu0 }
 0x136   : > { %v1460_v31 = vpop.f32.mrf.mxu1  ;;  %1086 = vst [vmem:[#allocation2 + $0x10] sm:$0xff] %v1082_v25  ;;  %v1071_v34 = vadd.f32 %v1458_v27, %v1022_v26  ;;  %v1433_v35 = vadd.f32 %v1432_v30, %v1431_v23 }
 0x137   : > { %v1434_v36 = vpop.f32.mrf.mxu0  ;;  %v1461_v40 = vadd.f32 %v1460_v31, %v1459_v24 }
 0x138   : > { %v1462_v37 = vpop.f32.mrf.mxu1  ;;  %v1083_v38 = vadd.f32 %v1071_v34, %v275_v29  ;;  %v1027_v39 = vadd.f32 %v1433_v35, %v978_v28 }
 0x139   : > { %v1435_v42 = vpop.f32.mrf.mxu0 }
 0x13a   : > { %v1463_v43 = vpop.f32.mrf.mxu1  ;;  %1087 = vst [vmem:[#allocation2] sm:$0xff] %v1083_v38  ;;  %v1076_v45 = vadd.f32 %v1461_v40, %v1027_v39  ;;  %v1436_v46 = vadd.f32 %v1435_v42, %v1434_v36 }
 0x13b   : > { %v1464_v49 = vadd.f32 %v1463_v43, %v1462_v37 }
 0x13c   : > { %v1084_v47 = vadd.f32 %v1076_v45, %v276_v41  ;;  %v1030_v48 = vadd.f32 %v1436_v46, %v981_v44 }
 0x13e   : > { %1088 = vst [vmem:[#allocation2 + $0x18] sm:$0xff] %v1084_v47  ;;  %v1079_v51 = vadd.f32 %v1464_v49, %v1030_v48  ;;  %1093 = sbr.rel (%p1329_p11) target bundleno = 461 (0x1cd), region = 63 }
 0x140   : > { %v1085_v52 = vadd.f32 %v1079_v51, %v277_v50 }
 0x142   : > { %1089 = vst [vmem:[#allocation2 + $0x8] sm:$0xff] %v1085_v52 }
 0x143   : > { %v1100_v53 = vld [vmem:[%s1824_s2 + $0x10] sm:$0xff]  ;;  %v1098_v54 = vld [vmem:[%s1824_s2] sm:$0xff]  ;;  %v1614_v55 = vmov 0   ;;  %v1101_v56 = vld [vmem:[%s1824_s2 + $0x18] sm:$0xff] }
 0x144   : > { %1572 = vset.pattern.permute.xlu1 %v1614_v55  ;;  %1571 = vset.pattern.permute.xlu0 %v1614_v55  ;;  %v1099_v57 = vld [vmem:[%s1824_s2 + $0x8] sm:$0xff]  ;;  %v1094_v59 = vld [vmem:[#allocation2 + $0x10] sm:$0xff]  ;;  %v1095_v1 = vld [vmem:[#allocation2] sm:$0xff] }
 0x145   : > { %1114 = vperm.xlu1 %1572, %v1100_v53   ;;  %1104 = vperm.xlu0 %1571, %v1098_v54   ;;  %v1096_v58 = vld [vmem:[#allocation2 + $0x18] sm:$0xff] }
 0x149   : > { %1119 = vperm.xlu1 %1572, %v1101_v56   ;;  %1109 = vperm.xlu0 %1571, %v1099_v57   ;;  %v1097_v0 = vld [vmem:[#allocation2 + $0x8] sm:$0xff] }
 0x1c0   : > { %v1115_v60 = vpop.permute.xlu1 %1114  ;;  %v1105_v61 = vpop.permute.xlu0 %1104 }
 0x1c1   : > { %v1124_v62 = vadd.f32 %v1115_v60, %v1096_v58  ;;  %v1122_v63 = vadd.f32 %v1105_v61, %v1094_v59 }
 0x1c3   : > { %v1132_v4 = vmul.f32 0.01, %v1124_v62  ;;  %v1130_v5 = vmul.f32 0.01, %v1122_v63  ;;  %vm1128_vm0 = vcmp.gt.f32.partialorder %v1124_v62, 0.0  ;;  %vm1126_vm1 = vcmp.gt.f32.partialorder %v1122_v63, 0.0 }
 0x1c4   : > { %v1120_v2 = vpop.permute.xlu1 %1119  ;;  %v1110_v3 = vpop.permute.xlu0 %1109 }
 0x1c5   : > { %v1125_v6 = vadd.f32 %v1120_v2, %v1097_v0  ;;  %v1123_v7 = vadd.f32 %v1110_v3, %v1095_v1  ;;  %v1136_v10 = vsel %vm1128_vm0, %v1124_v62, %v1132_v4  ;;  %v1134_v11 = vsel %vm1126_vm1, %v1122_v63, %v1130_v5 }
 0x1c7   : > { %vm1129_vm2 = vcmp.gt.f32.partialorder %v1125_v6, 0.0  ;;  %v1133_v8 = vmul.f32 0.01, %v1125_v6  ;;  %vm1127_vm3 = vcmp.gt.f32.partialorder %v1123_v7, 0.0  ;;  %v1131_v9 = vmul.f32 0.01, %v1123_v7 }
 0x1c9   : > { %v1137_v12 = vsel %vm1129_vm2, %v1125_v6, %v1133_v8  ;;  %v1135_v13 = vsel %vm1127_vm3, %v1123_v7, %v1131_v9 }
 0x1ca   : > { %v1350_v14 = vpack.c.bf16 %v1137_v12, %v1136_v10  ;;  %v1345_v15 = vpack.c.bf16 %v1135_v13, %v1134_v11 }
 0x1cc   : > { %1352 = vst [vmem:[%s1825_s3 + $0x8] sm:$0xff] %v1350_v14   ;;  %1346 = vst [vmem:[%s1825_s3] sm:$0xff] %v1345_v15  }
 0x1cd PF: > { %s13_s16 = sadd.s32 1, %s1611_s16   ;;  %s1826_s12 = smov %s1599_s13 }
 0x1ce   : > { %p10_p12 = scmp.ge.s32.totalorder %s13_s16, 4   ;;  %s1827_s13 = smov %s1670_s20 }
 0x1cf   : > { %s1828_s14 = smov %s1607_s15  ;;  %s1829_s15 = smov %s1831_s17 }
 0x1d0   :  { %12 = sbr.rel (!%p10_p12) target bundleno = 3 (0x3), region = 101 }

// kernel: a_call__.28
= control target key start
LH: loop header
LB: loop body
LE: loop exit
PB: predicated region body
PF: predicated region fallthrough
CT: control target
= control target key end

     0   :  { %v1101_v1 = vmov 0   ;;  %vm545_vm0 = vcmask 785408   ;;  %s1346_s1 = inlined_call_operand.vmem [shape: bf16[864,128], index: 1, kind: input, shape index: {}]   ;;  %s1347_s0 = inlined_call_operand.vmem [shape: bf16[32,864], index: 0, kind: input, shape index: {}]   ;;  %s1348_s2 = inlined_call_operand.vmem [shape: f32[32,1], index: 2, kind: input, shape index: {}]   ;;  %s1349_s3 = inlined_call_operand.vmem [shape: bf16[32,128], index: 3, kind: output, shape index: {}]  }
   0x1   :  { %v1027_v0 = vld [vmem:[%s1346_s1 + $0x78] sm:$0xff]   ;;  %1025 = vset.pattern.permute.xlu0 %v1101_v1  ;;  %1026 = vset.pattern.permute.xlu1 %v1101_v1  ;;  %v1031_v5 = vld [vmem:[%s1346_s1 + $0x70] sm:$0xff]   ;;  %v1035_v9 = vld [vmem:[%s1346_s1 + $0x68] sm:$0xff]  }
   0x2   :  { %v1028_v2 = vld [vmem:[%s1346_s1 + $0xf8] sm:$0xff]   ;;  %916 = vmatprep.subr.bf16.mxu0 %v1027_v0  ;;  %v1032_v6 = vld [vmem:[%s1346_s1 + $0xf0] sm:$0xff]   ;;  %v1036_v10 = vld [vmem:[%s1346_s1 + $0xe8] sm:$0xff]  }
   0x3   :  { %v1029_v3 = vld [vmem:[%s1346_s1 + $0x38] sm:$0xff]   ;;  %944 = vmatprep.subr.bf16.mxu1 %v1028_v2  ;;  %v1033_v7 = vld [vmem:[%s1346_s1 + $0x30] sm:$0xff]   ;;  %v1037_v11 = vld [vmem:[%s1346_s1 + $0x28] sm:$0xff]  }
   0x4   :  { %v1030_v4 = vld [vmem:[%s1346_s1 + $0xb8] sm:$0xff]   ;;  %917 = vmatpush3.bf16.msra.mxu0 %v1029_v3  ;;  %v1034_v8 = vld [vmem:[%s1346_s1 + $0xb0] sm:$0xff]   ;;  %v1038_v12 = vld [vmem:[%s1346_s1 + $0xa8] sm:$0xff]  }
   0x5   :  { %945 = vmatpush3.bf16.msra.mxu1 %v1030_v4  ;;  %918 = vmatprep.subr.bf16.mxu0 %v1031_v5  ;;  %v1039_v13 = vld [vmem:[%s1346_s1 + $0x60] sm:$0xff]   ;;  %v1043_v17 = vld [vmem:[%s1346_s1 + $0x58] sm:$0xff]   ;;  %v1047_v21 = vld [vmem:[%s1346_s1 + $0x50] sm:$0xff]  }
   0x6   :  { %946 = vmatprep.subr.bf16.mxu1 %v1032_v6  ;;  %v1040_v14 = vld [vmem:[%s1346_s1 + $0xe0] sm:$0xff]   ;;  %v1044_v18 = vld [vmem:[%s1346_s1 + $0xd8] sm:$0xff]   ;;  %v1048_v22 = vld [vmem:[%s1346_s1 + $0xd0] sm:$0xff]  }
   0x7   :  { %v1041_v15 = vld [vmem:[%s1346_s1 + $0x20] sm:$0xff]   ;;  %v1045_v19 = vld [vmem:[%s1346_s1 + $0x18] sm:$0xff]   ;;  %v1049_v23 = vld [vmem:[%s1346_s1 + $0x10] sm:$0xff]  }
   0x8   :  { %919 = vmatpush3.bf16.msra.mxu0 %v1033_v7  ;;  %v1042_v16 = vld [vmem:[%s1346_s1 + $0xa0] sm:$0xff]   ;;  %v1046_v20 = vld [vmem:[%s1346_s1 + $0x98] sm:$0xff]   ;;  %v1050_v24 = vld [vmem:[%s1346_s1 + $0x90] sm:$0xff]  }
   0x9   :  { %947 = vmatpush3.bf16.msra.mxu1 %v1034_v8  ;;  %920 = vmatprep.subr.bf16.mxu0 %v1035_v9  ;;  %v1051_v25 = vld [vmem:[%s1346_s1 + $0x48] sm:$0xff]   ;;  %v1055_v29 = vld [vmem:[%s1346_s1 + $0x40] sm:$0xff]   ;;  %v1065_v37 = vld [vmem:[%s1346_s1 + $0x178] sm:$0xff]  }
   0xa   :  { %948 = vmatprep.subr.bf16.mxu1 %v1036_v10  ;;  %v1052_v26 = vld [vmem:[%s1346_s1 + $0xc8] sm:$0xff]   ;;  %v1056_v30 = vld [vmem:[%s1346_s1 + $0xc0] sm:$0xff]   ;;  %v1066_v38 = vld [vmem:[%s1346_s1 + $0x138] sm:$0xff]  }
   0xb   :  { %v1053_v27 = vld [vmem:[%s1346_s1 + $0x8] sm:$0xff]   ;;  %v1057_v31 = vld [vmem:[%s1346_s1] sm:$0xff]   ;;  %v1067_v39 = vld [vmem:[%s1346_s1 + $0x170] sm:$0xff]  }
   0xc   :  { %921 = vmatpush3.bf16.msra.mxu0 %v1037_v11  ;;  %v1054_v28 = vld [vmem:[%s1346_s1 + $0x88] sm:$0xff]   ;;  %v1058_v32 = vld [vmem:[%s1346_s1 + $0x80] sm:$0xff]   ;;  %v1068_v40 = vld [vmem:[%s1346_s1 + $0x130] sm:$0xff]  }
   0xd   :  { %949 = vmatpush3.bf16.msra.mxu1 %v1038_v12  ;;  %922 = vmatprep.subr.bf16.mxu0 %v1039_v13  ;;  %v1059_v33 = vld [vmem:[%s1347_s0] ss:$28 sps:$4 sm:$0xff]   ;;  %v1062_v35 = vld [vmem:[%s1347_s0 + $0x8] ss:$28 sps:$4 sm:$0xff]   ;;  %v1081_v51 = vld [vmem:[%s1347_s0 + $0x38] ss:$28 sps:$4 sm:$0xff]  }
   0xe   :  { %950 = vmatprep.subr.bf16.mxu1 %v1040_v14  ;;  %v1061_v34 = vld [vmem:[%s1347_s0 + $0x4] ss:$28 sps:$4 sm:$0xff]   ;;  %v1064_v36 = vld [vmem:[%s1347_s0 + $0xc] ss:$28 sps:$4 sm:$0xff]   ;;  %v1074_v46 = vld [vmem:[%s1346_s1 + $0x158] sm:$0xff]  }
   0xf   :  { %584 = vmatprep.mubr.bf16.mxu0 %v1061_v34  ;;  %633 = vmatprep.mubr.bf16.mxu1 %v1064_v36  ;;  %v1069_v41 = vld [vmem:[%s1346_s1 + $0x168] sm:$0xff]   ;;  %v1071_v44 = vld [vmem:[%s1346_s1 + $0x160] sm:$0xff]   ;;  %v1076_v48 = vld [vmem:[%s1347_s0 + $0x3c] ss:$28 sps:$4 sm:$0xff]  }
  0x10   :  { %923 = vmatpush3.bf16.msra.mxu0 %v1041_v15  ;;  %v1070_v42 = vld [vmem:[%s1346_s1 + $0x128] sm:$0xff]   ;;  %v1073_v45 = vld [vmem:[%s1346_s1 + $0x120] sm:$0xff]   ;;  %v1080_v50 = vld [vmem:[%s1346_s1 + $0x118] sm:$0xff]  }
  0x11   :  { %951 = vmatpush3.bf16.msra.mxu1 %v1042_v16  ;;  %924 = vmatprep.subr.bf16.mxu0 %v1043_v17  ;;  %v1072_v43 = vld [vmem:[%s1346_s1 + $0x1a8] sm:$0xff]   ;;  %v1075_v47 = vld [vmem:[%s1346_s1 + $0x1a0] sm:$0xff]   ;;  %v1083_v53 = vld [vmem:[%s1346_s1 + $0x150] sm:$0xff]  }
  0x12   :  { %952 = vmatprep.subr.bf16.mxu1 %v1044_v18  ;;  %v1078_v49 = vld [vmem:[%s1347_s0 + $0x44] ss:$28 sps:$4 sm:$0xff]   ;;  %v1084_v54 = vld [vmem:[%s1346_s1 + $0x198] sm:$0xff]   ;;  %v1085_v55 = vld [vmem:[%s1346_s1 + $0x110] sm:$0xff]  }
  0x13   :  { %v1082_v52 = vld [vmem:[%s1347_s0 + $0x40] ss:$28 sps:$4 sm:$0xff]   ;;  %v1087_v56 = vld [vmem:[%s1346_s1 + $0x190] sm:$0xff]   ;;  %v1086_v57 = vld [vmem:[%s1346_s1 + $0x148] sm:$0xff]  }
  0x14   :  { %925 = vmatpush3.bf16.msra.mxu0 %v1045_v19  ;;  %v1090_v58 = vld [vmem:[%s1346_s1 + $0x188] sm:$0xff]   ;;  %v1089_v60 = vld [vmem:[%s1346_s1 + $0x140] sm:$0xff]   ;;  %v1094_v61 = vld [vmem:[%s1347_s0 + $0x14] ss:$28 sps:$4 sm:$0xff]  }
  0x15   :  { %953 = vmatpush3.bf16.msra.mxu1 %v1046_v20  ;;  %926 = vmatprep.subr.bf16.mxu0 %v1047_v21  ;;  %v1088_v59 = vld [vmem:[%s1346_s1 + $0x108] sm:$0xff]   ;;  %v1095_v62 = vld [vmem:[%s1346_s1 + $0x180] sm:$0xff]   ;;  %v1096_v63 = vld [vmem:[%s1347_s0 + $0x18] ss:$28 sps:$4 sm:$0xff]  }
  0x16   :  { %954 = vmatprep.subr.bf16.mxu1 %v1048_v22  ;;  %v1091_v0 = vld [vmem:[%s1346_s1 + $0x100] sm:$0xff]   ;;  %v765_v2 = vld [vmem:[%s1348_s2 + $0x10] sm:$0xff]  ;;  %v1098_v5 = vld [vmem:[%s1347_s0 + $0x4c] ss:$28 sps:$4 sm:$0xff]  }
  0x17   :  { %v763_v1 = vld [vmem:[%s1348_s2] sm:$0xff]  ;;  %v1092_v3 = vld [vmem:[%s1347_s0 + $0x10] ss:$28 sps:$4 sm:$0xff]   ;;  %779 = vperm.xlu1 %1026, %v765_v2   ;;  %v766_v7 = vld [vmem:[%s1348_s2 + $0x18] sm:$0xff] }
  0x18   :  { %927 = vmatpush3.bf16.msra.mxu0 %v1049_v23  ;;  %v1097_v4 = vld [vmem:[%s1347_s0 + $0x50] ss:$28 sps:$4 sm:$0xff]   ;;  %769 = vperm.xlu0 %1025, %v763_v1   ;;  %v1100_v8 = vld [vmem:[%s1347_s0 + $0x48] ss:$28 sps:$4 sm:$0xff]  }
  0x19   :  { %955 = vmatpush3.bf16.msra.mxu1 %v1050_v24  ;;  %928 = vmatprep.subr.bf16.mxu0 %v1051_v25  ;;  %v764_v6 = vld [vmem:[%s1348_s2 + $0x8] sm:$0xff] }
  0x1a   :  { %956 = vmatprep.subr.bf16.mxu1 %v1052_v26 }
  0x1b   :  { %784 = vperm.xlu1 %1026, %v766_v7  }
  0x1c   :  { %929 = vmatpush3.bf16.msra.mxu0 %v1053_v27  ;;  %774 = vperm.xlu0 %1025, %v764_v6  }
  0x1d   :  { %957 = vmatpush3.bf16.msra.mxu1 %v1054_v28  ;;  %930 = vmatprep.subr.bf16.mxu0 %v1055_v29 }
  0x1e   :  { %958 = vmatprep.subr.bf16.mxu1 %v1056_v30 }
  0x20   :  { %931 = vmatpush3.bf16.msra.mxu0 %v1057_v31 }
  0x21   :  { %959 = vmatpush3.bf16.msra.mxu1 %v1058_v32  ;;  %972 = vmatprep.subr.bf16.mxu0 %v1065_v37 }
  0x22   :  { %1008 = vmatprep.subr.bf16.mxu1 %v1072_v43 }
  0x23   :  { %585 = vmatmul.mubr.bf16.vlgmr.msra.gmra.mxu0 %v1059_v33 }
  0x24   :  { %634 = vmatmul.mubr.bf16.vlgmr.msra.gmra.mxu1 %v1062_v35  ;;  %973 = vmatpush3.bf16.msra.mxu0 %v1066_v38 }
  0x25   :  { %974 = vmatprep.subr.bf16.mxu0 %v1067_v39  ;;  %1009 = vmatpush3.bf16.msra.mxu1 %v1072_v43 }
  0x26   :  { %1010 = vmatprep.subr.bf16.mxu1 %v1075_v47  ;;  %592 = vmatprep.mubr.bf16.mxu0 %v1076_v48 }
  0x27   :  { %641 = vmatprep.mubr.bf16.mxu1 %v1078_v49 }
  0x28   :  { %975 = vmatpush3.bf16.msra.mxu0 %v1068_v40 }
  0x29   :  { %976 = vmatprep.subr.bf16.mxu0 %v1069_v41  ;;  %1011 = vmatpush3.bf16.msra.mxu1 %v1075_v47 }
  0x2a   :  { %1012 = vmatprep.subr.bf16.mxu1 %v1084_v54 }
  0x2b   :  { %593 = vmatmul.mubr.bf16.gmra.mxu0 %v1081_v51 }
  0x2c   :  { %977 = vmatpush3.bf16.msra.mxu0 %v1070_v42  ;;  %642 = vmatmul.mubr.bf16.gmra.mxu1 %v1082_v52 }
  0x2d   :  { %978 = vmatprep.subr.bf16.mxu0 %v1071_v44  ;;  %1013 = vmatpush3.bf16.msra.mxu1 %v1084_v54 }
  0x2e   :  { %1014 = vmatprep.subr.bf16.mxu1 %v1087_v56  ;;  %682 = vmatprep.mubr.bf16.mxu0 %v1094_v61 }
  0x2f   :  { %1020 = vmatprep.mubr.msk.bf16.mxu1 %vm545_vm0, %v1096_v63 }
  0x30   :  { %979 = vmatpush3.bf16.msra.mxu0 %v1073_v45 }
  0x31   :  { %980 = vmatprep.subr.bf16.mxu0 %v1074_v46  ;;  %1015 = vmatpush3.bf16.msra.mxu1 %v1087_v56 }
  0x32   :  { %1016 = vmatprep.subr.bf16.mxu1 %v1090_v58 }
  0x34   :  { %981 = vmatpush3.bf16.msra.mxu0 %v1080_v50 }
  0x35   :  { %982 = vmatprep.subr.bf16.mxu0 %v1083_v53  ;;  %1017 = vmatpush3.bf16.msra.mxu1 %v1090_v58 }
  0x36   :  { %1018 = vmatprep.subr.bf16.mxu1 %v1095_v62 }
  0x38   :  { %983 = vmatpush3.bf16.msra.mxu0 %v1085_v55 }
  0x39   :  { %984 = vmatprep.subr.bf16.mxu0 %v1086_v57  ;;  %1019 = vmatpush3.bf16.msra.mxu1 %v1095_v62 }
  0x3c   :  { %985 = vmatpush3.bf16.msra.mxu0 %v1088_v59  ;;  %1021 = vmatmul.mubr.msk.bf16.vlgmr.msra.gmra.mxu1 %vm545_vm0, %v1097_v4 }
  0x3d   :  { %986 = vmatprep.subr.bf16.mxu0 %v1089_v60 }
  0x40   :  { %987 = vmatpush3.bf16.msra.mxu0 %v1091_v0 }
  0x43   :  { %683 = vmatmul.mubr.bf16.vlgmr.msra.gmra.mxu0 %v1092_v3 }
  0x44   :  { %690 = vmatprep.mubr.bf16.mxu0 %v1098_v5 }
  0x4b   :  { %691 = vmatmul.mubr.bf16.gmra.mxu0 %v1100_v8 }
  0x92   :  { %v780_v61 = vpop.permute.xlu1 %779 }
  0x93   :  { %v770_v35 = vpop.permute.xlu0 %769 }
  0x96   :  { %v785_v8 = vpop.permute.xlu1 %784 }
  0x97   :  { %v775_v52 = vpop.permute.xlu0 %774 }
  0xe3   :  { %v932_v9 = vpop.f32.mrf.mxu0 }
  0xe4   :  { %v960_v10 = vpop.f32.mrf.mxu1 }
  0xe5   :  { %v933_v11 = vpop.f32.mrf.mxu0 }
  0xe6   :  { %v961_v12 = vpop.f32.mrf.mxu1  ;;  %v934_v25 = vadd.f32 %v933_v11, %v932_v9 }
  0xe7   :  { %v935_v13 = vpop.f32.mrf.mxu0  ;;  %v962_v26 = vadd.f32 %v961_v12, %v960_v10 }
  0xe8   :  { %v963_v14 = vpop.f32.mrf.mxu1 }
  0xe9   :  { %v936_v15 = vpop.f32.mrf.mxu0  ;;  %v636_v33 = vadd.f32 %v962_v26, %v934_v25 }
  0xea   :  { %v964_v16 = vpop.f32.mrf.mxu1  ;;  %v937_v29 = vadd.f32 %v936_v15, %v935_v13 }
  0xeb   :  { %v938_v17 = vpop.f32.mrf.mxu0  ;;  %v965_v30 = vadd.f32 %v964_v16, %v963_v14 }
  0xec   :  { %v966_v18 = vpop.f32.mrf.mxu1 }
  0xed   :  { %v939_v19 = vpop.f32.mrf.mxu0  ;;  %v639_v39 = vadd.f32 %v965_v30, %v937_v29 }
  0xee   :  { %v967_v20 = vpop.f32.mrf.mxu1  ;;  %v940_v41 = vadd.f32 %v939_v19, %v938_v17 }
  0xef   :  { %v941_v21 = vpop.f32.mrf.mxu0  ;;  %v968_v42 = vadd.f32 %v967_v20, %v966_v18 }
  0xf0   :  { %v969_v22 = vpop.f32.mrf.mxu1 }
  0xf1   :  { %v942_v23 = vpop.f32.mrf.mxu0  ;;  %v644_v53 = vadd.f32 %v968_v42, %v940_v41 }
  0xf2   :  { %v970_v24 = vpop.f32.mrf.mxu1  ;;  %v943_v49 = vadd.f32 %v942_v23, %v941_v21 }
  0xf3   :  { %v971_v50 = vadd.f32 %v970_v24, %v969_v22 }
  0xf5   :  { %v647_v60 = vadd.f32 %v971_v50, %v943_v49 }
  0xfc   :  { %v1022_v28 = vpop.f32.mrf.mxu1 }
  0xfe   :  { %v733_v32 = vpop.f32.mrf.mxu1 }
 0x100   :  { %v1023_v37 = vpop.f32.mrf.mxu1 }
 0x102   :  { %v736_v46 = vpop.f32.mrf.mxu1 }
 0x103   :  { %v988_v27 = vpop.f32.mrf.mxu0 }
 0x105   :  { %v989_v31 = vpop.f32.mrf.mxu0 }
 0x106   :  { %v990_v34 = vadd.f32 %v989_v31, %v988_v27 }
 0x107   :  { %v991_v36 = vpop.f32.mrf.mxu0 }
 0x108   :  { %v685_v38 = vadd.f32 %v990_v34, %v636_v33 }
 0x109   :  { %v992_v40 = vpop.f32.mrf.mxu0 }
 0x10a   :  { %v993_v43 = vadd.f32 %v992_v40, %v991_v36  ;;  %v734_v44 = vadd.f32 %v733_v32, %v685_v38 }
 0x10b   :  { %v994_v45 = vpop.f32.mrf.mxu0 }
 0x10c   :  { %v787_v47 = vadd.f32 %v770_v35, %v734_v44  ;;  %v688_v48 = vadd.f32 %v993_v43, %v639_v39 }
 0x10d   :  { %v995_v51 = vpop.f32.mrf.mxu0 }
 0x10e   :  { %v996_v54 = vadd.f32 %v995_v51, %v994_v45  ;;  %v737_v55 = vadd.f32 %v736_v46, %v688_v48  ;;  %v795_v57 = vmul.f32 0.01, %v787_v47  ;;  %vm791_vm1 = vcmp.gt.f32.partialorder %v787_v47, 0.0 }
 0x10f   :  { %v997_v56 = vpop.f32.mrf.mxu0 }
 0x110   :  { %v693_v58 = vadd.f32 %v996_v54, %v644_v53  ;;  %v788_v59 = vadd.f32 %v775_v52, %v737_v55  ;;  %v799_v2 = vsel %vm791_vm1, %v787_v47, %v795_v57 }
 0x111   :  { %v998_v62 = vpop.f32.mrf.mxu0 }
 0x112   :  { %v742_v63 = vadd.f32 %v1022_v28, %v693_v58  ;;  %vm792_vm2 = vcmp.gt.f32.partialorder %v788_v59, 0.0  ;;  %v796_v0 = vmul.f32 0.01, %v788_v59  ;;  %v999_v1 = vadd.f32 %v998_v62, %v997_v56 }
 0x114   :  { %v789_v3 = vadd.f32 %v780_v61, %v742_v63  ;;  %v800_v4 = vsel %vm792_vm2, %v788_v59, %v796_v0  ;;  %v696_v5 = vadd.f32 %v999_v1, %v647_v60 }
 0x115   :  { %v908_v6 = vpack.c.bf16 %v800_v4, %v799_v2 }
 0x116   :  { %v745_v7 = vadd.f32 %v1023_v37, %v696_v5  ;;  %v797_v9 = vmul.f32 0.01, %v789_v3  ;;  %vm793_vm3 = vcmp.gt.f32.partialorder %v789_v3, 0.0 }
 0x117   :  { %909 = vst [vmem:[%s1349_s3] sm:$0xff] %v908_v6  }
 0x118   :  { %v790_v10 = vadd.f32 %v785_v8, %v745_v7  ;;  %v801_v12 = vsel %vm793_vm3, %v789_v3, %v797_v9 }
 0x11a   :  { %vm794_vm4 = vcmp.gt.f32.partialorder %v790_v10, 0.0  ;;  %v798_v11 = vmul.f32 0.01, %v790_v10 }
 0x11c   :  { %v802_v13 = vsel %vm794_vm4, %v790_v10, %v798_v11 }
 0x11d   :  { %v913_v14 = vpack.c.bf16 %v802_v13, %v801_v12 }
 0x11f   :  { %915 = vst [vmem:[%s1349_s3 + $0x8] sm:$0xff] %v913_v14  }

// kernel: a_call__.29
= control target key start
LH: loop header
LB: loop body
LE: loop exit
PB: predicated region body
PF: predicated region fallthrough
CT: control target
= control target key end

     0   :  { %v1125_v1 = vmov 0   ;;  %vm548_vm0 = vcmask 785408   ;;  %s1381_s1 = inlined_call_operand.vmem [shape: bf16[864,128], index: 1, kind: input, shape index: {}]   ;;  %s1382_s0 = inlined_call_operand.vmem [shape: bf16[32,864], index: 0, kind: input, shape index: {}]   ;;  %s1383_s2 = inlined_call_operand.vmem [shape: f32[32,1], index: 2, kind: input, shape index: {}]   ;;  %s1384_s3 = inlined_call_operand.vmem [shape: bf16[32,128], index: 3, kind: input, shape index: {}]   ;;  %s1385_s4 = inlined_call_operand.vmem [shape: bf16[32,128], index: 4, kind: output, shape index: {}]  }
   0x1   :  { %v1051_v0 = vld [vmem:[%s1381_s1 + $0x78] sm:$0xff]   ;;  %1049 = vset.pattern.permute.xlu0 %v1125_v1  ;;  %1050 = vset.pattern.permute.xlu1 %v1125_v1  ;;  %v1055_v5 = vld [vmem:[%s1381_s1 + $0x70] sm:$0xff]   ;;  %v1059_v9 = vld [vmem:[%s1381_s1 + $0x68] sm:$0xff]  }
   0x2   :  { %v1052_v2 = vld [vmem:[%s1381_s1 + $0xf8] sm:$0xff]   ;;  %940 = vmatprep.subr.bf16.mxu0 %v1051_v0  ;;  %v1056_v6 = vld [vmem:[%s1381_s1 + $0xf0] sm:$0xff]   ;;  %v1060_v10 = vld [vmem:[%s1381_s1 + $0xe8] sm:$0xff]  }
   0x3   :  { %v1053_v3 = vld [vmem:[%s1381_s1 + $0x38] sm:$0xff]   ;;  %968 = vmatprep.subr.bf16.mxu1 %v1052_v2  ;;  %v1057_v7 = vld [vmem:[%s1381_s1 + $0x30] sm:$0xff]   ;;  %v1061_v11 = vld [vmem:[%s1381_s1 + $0x28] sm:$0xff]  }
   0x4   :  { %v1054_v4 = vld [vmem:[%s1381_s1 + $0xb8] sm:$0xff]   ;;  %941 = vmatpush3.bf16.msra.mxu0 %v1053_v3  ;;  %v1058_v8 = vld [vmem:[%s1381_s1 + $0xb0] sm:$0xff]   ;;  %v1062_v12 = vld [vmem:[%s1381_s1 + $0xa8] sm:$0xff]  }
   0x5   :  { %969 = vmatpush3.bf16.msra.mxu1 %v1054_v4  ;;  %942 = vmatprep.subr.bf16.mxu0 %v1055_v5  ;;  %v1063_v13 = vld [vmem:[%s1381_s1 + $0x60] sm:$0xff]   ;;  %v1067_v17 = vld [vmem:[%s1381_s1 + $0x58] sm:$0xff]   ;;  %v1071_v21 = vld [vmem:[%s1381_s1 + $0x50] sm:$0xff]  }
   0x6   :  { %970 = vmatprep.subr.bf16.mxu1 %v1056_v6  ;;  %v1064_v14 = vld [vmem:[%s1381_s1 + $0xe0] sm:$0xff]   ;;  %v1068_v18 = vld [vmem:[%s1381_s1 + $0xd8] sm:$0xff]   ;;  %v1072_v22 = vld [vmem:[%s1381_s1 + $0xd0] sm:$0xff]  }
   0x7   :  { %v1065_v15 = vld [vmem:[%s1381_s1 + $0x20] sm:$0xff]   ;;  %v1069_v19 = vld [vmem:[%s1381_s1 + $0x18] sm:$0xff]   ;;  %v1073_v23 = vld [vmem:[%s1381_s1 + $0x10] sm:$0xff]  }
   0x8   :  { %943 = vmatpush3.bf16.msra.mxu0 %v1057_v7  ;;  %v1066_v16 = vld [vmem:[%s1381_s1 + $0xa0] sm:$0xff]   ;;  %v1070_v20 = vld [vmem:[%s1381_s1 + $0x98] sm:$0xff]   ;;  %v1074_v24 = vld [vmem:[%s1381_s1 + $0x90] sm:$0xff]  }
   0x9   :  { %971 = vmatpush3.bf16.msra.mxu1 %v1058_v8  ;;  %944 = vmatprep.subr.bf16.mxu0 %v1059_v9  ;;  %v1075_v25 = vld [vmem:[%s1381_s1 + $0x48] sm:$0xff]   ;;  %v1079_v29 = vld [vmem:[%s1381_s1 + $0x40] sm:$0xff]   ;;  %v1089_v37 = vld [vmem:[%s1381_s1 + $0x178] sm:$0xff]  }
   0xa   :  { %972 = vmatprep.subr.bf16.mxu1 %v1060_v10  ;;  %v1076_v26 = vld [vmem:[%s1381_s1 + $0xc8] sm:$0xff]   ;;  %v1080_v30 = vld [vmem:[%s1381_s1 + $0xc0] sm:$0xff]   ;;  %v1090_v38 = vld [vmem:[%s1381_s1 + $0x138] sm:$0xff]  }
   0xb   :  { %v1077_v27 = vld [vmem:[%s1381_s1 + $0x8] sm:$0xff]   ;;  %v1081_v31 = vld [vmem:[%s1381_s1] sm:$0xff]   ;;  %v1091_v39 = vld [vmem:[%s1381_s1 + $0x170] sm:$0xff]  }
   0xc   :  { %945 = vmatpush3.bf16.msra.mxu0 %v1061_v11  ;;  %v1078_v28 = vld [vmem:[%s1381_s1 + $0x88] sm:$0xff]   ;;  %v1082_v32 = vld [vmem:[%s1381_s1 + $0x80] sm:$0xff]   ;;  %v1092_v40 = vld [vmem:[%s1381_s1 + $0x130] sm:$0xff]  }
   0xd   :  { %973 = vmatpush3.bf16.msra.mxu1 %v1062_v12  ;;  %946 = vmatprep.subr.bf16.mxu0 %v1063_v13  ;;  %v1083_v33 = vld [vmem:[%s1382_s0] ss:$28 sps:$4 sm:$0xff]   ;;  %v1086_v35 = vld [vmem:[%s1382_s0 + $0x8] ss:$28 sps:$4 sm:$0xff]   ;;  %v1105_v51 = vld [vmem:[%s1382_s0 + $0x38] ss:$28 sps:$4 sm:$0xff]  }
   0xe   :  { %974 = vmatprep.subr.bf16.mxu1 %v1064_v14  ;;  %v1085_v34 = vld [vmem:[%s1382_s0 + $0x4] ss:$28 sps:$4 sm:$0xff]   ;;  %v1088_v36 = vld [vmem:[%s1382_s0 + $0xc] ss:$28 sps:$4 sm:$0xff]   ;;  %v1098_v46 = vld [vmem:[%s1381_s1 + $0x158] sm:$0xff]  }
   0xf   :  { %587 = vmatprep.mubr.bf16.mxu0 %v1085_v34  ;;  %636 = vmatprep.mubr.bf16.mxu1 %v1088_v36  ;;  %v1093_v41 = vld [vmem:[%s1381_s1 + $0x168] sm:$0xff]   ;;  %v1095_v44 = vld [vmem:[%s1381_s1 + $0x160] sm:$0xff]   ;;  %v1100_v48 = vld [vmem:[%s1382_s0 + $0x3c] ss:$28 sps:$4 sm:$0xff]  }
  0x10   :  { %947 = vmatpush3.bf16.msra.mxu0 %v1065_v15  ;;  %v1094_v42 = vld [vmem:[%s1381_s1 + $0x128] sm:$0xff]   ;;  %v1097_v45 = vld [vmem:[%s1381_s1 + $0x120] sm:$0xff]   ;;  %v1104_v50 = vld [vmem:[%s1381_s1 + $0x118] sm:$0xff]  }
  0x11   :  { %975 = vmatpush3.bf16.msra.mxu1 %v1066_v16  ;;  %948 = vmatprep.subr.bf16.mxu0 %v1067_v17  ;;  %v1096_v43 = vld [vmem:[%s1381_s1 + $0x1a8] sm:$0xff]   ;;  %v1099_v47 = vld [vmem:[%s1381_s1 + $0x1a0] sm:$0xff]   ;;  %v1107_v53 = vld [vmem:[%s1381_s1 + $0x150] sm:$0xff]  }
  0x12   :  { %976 = vmatprep.subr.bf16.mxu1 %v1068_v18  ;;  %v1102_v49 = vld [vmem:[%s1382_s0 + $0x44] ss:$28 sps:$4 sm:$0xff]   ;;  %v1108_v54 = vld [vmem:[%s1381_s1 + $0x198] sm:$0xff]   ;;  %v1109_v55 = vld [vmem:[%s1381_s1 + $0x110] sm:$0xff]  }
  0x13   :  { %v1106_v52 = vld [vmem:[%s1382_s0 + $0x40] ss:$28 sps:$4 sm:$0xff]   ;;  %v1111_v56 = vld [vmem:[%s1381_s1 + $0x190] sm:$0xff]   ;;  %v1110_v57 = vld [vmem:[%s1381_s1 + $0x148] sm:$0xff]  }
  0x14   :  { %949 = vmatpush3.bf16.msra.mxu0 %v1069_v19  ;;  %v1114_v58 = vld [vmem:[%s1381_s1 + $0x188] sm:$0xff]   ;;  %v1113_v60 = vld [vmem:[%s1381_s1 + $0x140] sm:$0xff]   ;;  %v1118_v61 = vld [vmem:[%s1382_s0 + $0x14] ss:$28 sps:$4 sm:$0xff]  }
  0x15   :  { %977 = vmatpush3.bf16.msra.mxu1 %v1070_v20  ;;  %950 = vmatprep.subr.bf16.mxu0 %v1071_v21  ;;  %v1112_v59 = vld [vmem:[%s1381_s1 + $0x108] sm:$0xff]   ;;  %v1119_v62 = vld [vmem:[%s1381_s1 + $0x180] sm:$0xff]   ;;  %v1120_v63 = vld [vmem:[%s1382_s0 + $0x18] ss:$28 sps:$4 sm:$0xff]  }
  0x16   :  { %978 = vmatprep.subr.bf16.mxu1 %v1072_v22  ;;  %v1115_v0 = vld [vmem:[%s1381_s1 + $0x100] sm:$0xff]   ;;  %v768_v2 = vld [vmem:[%s1383_s2 + $0x10] sm:$0xff]  ;;  %v1122_v5 = vld [vmem:[%s1382_s0 + $0x4c] ss:$28 sps:$4 sm:$0xff]  }
  0x17   :  { %v766_v1 = vld [vmem:[%s1383_s2] sm:$0xff]  ;;  %v1116_v3 = vld [vmem:[%s1382_s0 + $0x10] ss:$28 sps:$4 sm:$0xff]   ;;  %782 = vperm.xlu1 %1050, %v768_v2   ;;  %v769_v7 = vld [vmem:[%s1383_s2 + $0x18] sm:$0xff] }
  0x18   :  { %951 = vmatpush3.bf16.msra.mxu0 %v1073_v23  ;;  %v1121_v4 = vld [vmem:[%s1382_s0 + $0x50] ss:$28 sps:$4 sm:$0xff]   ;;  %772 = vperm.xlu0 %1049, %v766_v1   ;;  %v1124_v8 = vld [vmem:[%s1382_s0 + $0x48] ss:$28 sps:$4 sm:$0xff]  }
  0x19   :  { %979 = vmatpush3.bf16.msra.mxu1 %v1074_v24  ;;  %952 = vmatprep.subr.bf16.mxu0 %v1075_v25  ;;  %v767_v6 = vld [vmem:[%s1383_s2 + $0x8] sm:$0xff] }
  0x1a   :  { %980 = vmatprep.subr.bf16.mxu1 %v1076_v26 }
  0x1b   :  { %787 = vperm.xlu1 %1050, %v769_v7  }
  0x1c   :  { %953 = vmatpush3.bf16.msra.mxu0 %v1077_v27  ;;  %777 = vperm.xlu0 %1049, %v767_v6  }
  0x1d   :  { %981 = vmatpush3.bf16.msra.mxu1 %v1078_v28  ;;  %954 = vmatprep.subr.bf16.mxu0 %v1079_v29 }
  0x1e   :  { %982 = vmatprep.subr.bf16.mxu1 %v1080_v30 }
  0x20   :  { %955 = vmatpush3.bf16.msra.mxu0 %v1081_v31 }
  0x21   :  { %983 = vmatpush3.bf16.msra.mxu1 %v1082_v32  ;;  %996 = vmatprep.subr.bf16.mxu0 %v1089_v37 }
  0x22   :  { %1032 = vmatprep.subr.bf16.mxu1 %v1096_v43 }
  0x23   :  { %588 = vmatmul.mubr.bf16.vlgmr.msra.gmra.mxu0 %v1083_v33 }
  0x24   :  { %637 = vmatmul.mubr.bf16.vlgmr.msra.gmra.mxu1 %v1086_v35  ;;  %997 = vmatpush3.bf16.msra.mxu0 %v1090_v38  ;;  %v921_v35 = vld [vmem:[%s1384_s3] sm:$0xff]  }
  0x25   :  { %998 = vmatprep.subr.bf16.mxu0 %v1091_v39  ;;  %1033 = vmatpush3.bf16.msra.mxu1 %v1096_v43 }
  0x26   :  { %1034 = vmatprep.subr.bf16.mxu1 %v1099_v47  ;;  %595 = vmatprep.mubr.bf16.mxu0 %v1100_v48 }
  0x27   :  { %644 = vmatprep.mubr.bf16.mxu1 %v1102_v49 }
  0x28   :  { %999 = vmatpush3.bf16.msra.mxu0 %v1092_v40 }
  0x29   :  { %1000 = vmatprep.subr.bf16.mxu0 %v1093_v41  ;;  %1035 = vmatpush3.bf16.msra.mxu1 %v1099_v47 }
  0x2a   :  { %1036 = vmatprep.subr.bf16.mxu1 %v1108_v54 }
  0x2b   :  { %596 = vmatmul.mubr.bf16.gmra.mxu0 %v1105_v51 }
  0x2c   :  { %1001 = vmatpush3.bf16.msra.mxu0 %v1094_v42  ;;  %645 = vmatmul.mubr.bf16.gmra.mxu1 %v1106_v52  ;;  %v922_v42 = vunpack.c.l.bf16 %v921_v35 }
  0x2d   :  { %1002 = vmatprep.subr.bf16.mxu0 %v1095_v44  ;;  %1037 = vmatpush3.bf16.msra.mxu1 %v1108_v54  ;;  %v923_v54 = vunpack.c.h.bf16 %v921_v35 }
  0x2e   :  { %1038 = vmatprep.subr.bf16.mxu1 %v1111_v56  ;;  %685 = vmatprep.mubr.bf16.mxu0 %v1118_v61 }
  0x2f   :  { %1044 = vmatprep.mubr.msk.bf16.mxu1 %vm548_vm0, %v1120_v63 }
  0x30   :  { %1003 = vmatpush3.bf16.msra.mxu0 %v1097_v45 }
  0x31   :  { %1004 = vmatprep.subr.bf16.mxu0 %v1098_v46  ;;  %1039 = vmatpush3.bf16.msra.mxu1 %v1111_v56 }
  0x32   :  { %1040 = vmatprep.subr.bf16.mxu1 %v1114_v58 }
  0x34   :  { %1005 = vmatpush3.bf16.msra.mxu0 %v1104_v50 }
  0x35   :  { %1006 = vmatprep.subr.bf16.mxu0 %v1107_v53  ;;  %1041 = vmatpush3.bf16.msra.mxu1 %v1114_v58 }
  0x36   :  { %1042 = vmatprep.subr.bf16.mxu1 %v1119_v62 }
  0x38   :  { %1007 = vmatpush3.bf16.msra.mxu0 %v1109_v55 }
  0x39   :  { %1008 = vmatprep.subr.bf16.mxu0 %v1110_v57  ;;  %1043 = vmatpush3.bf16.msra.mxu1 %v1119_v62 }
  0x3c   :  { %1009 = vmatpush3.bf16.msra.mxu0 %v1112_v59  ;;  %1045 = vmatmul.mubr.msk.bf16.vlgmr.msra.gmra.mxu1 %vm548_vm0, %v1121_v4 }
  0x3d   :  { %1010 = vmatprep.subr.bf16.mxu0 %v1113_v60  ;;  %v938_v60 = vld [vmem:[%s1384_s3 + $0x8] sm:$0xff]  }
  0x3e   :  { %v926_v1 = vunpack.c.l.bf16 %v938_v60 }
  0x40   :  { %1011 = vmatpush3.bf16.msra.mxu0 %v1115_v0 }
  0x43   :  { %686 = vmatmul.mubr.bf16.vlgmr.msra.gmra.mxu0 %v1116_v3 }
  0x44   :  { %693 = vmatprep.mubr.bf16.mxu0 %v1122_v5 }
  0x4b   :  { %694 = vmatmul.mubr.bf16.gmra.mxu0 %v1124_v8 }
  0x92   :  { %v783_v2 = vpop.permute.xlu1 %782 }
  0x93   :  { %v773_v36 = vpop.permute.xlu0 %772 }
  0x97   :  { %v778_v55 = vpop.permute.xlu0 %777 }
  0xe3   :  { %v956_v9 = vpop.f32.mrf.mxu0 }
  0xe4   :  { %v984_v10 = vpop.f32.mrf.mxu1 }
  0xe5   :  { %v957_v11 = vpop.f32.mrf.mxu0 }
  0xe6   :  { %v985_v12 = vpop.f32.mrf.mxu1  ;;  %v958_v25 = vadd.f32 %v957_v11, %v956_v9  ;;  %v927_v11 = vunpack.c.h.bf16 %v938_v60 }
  0xe7   :  { %v959_v13 = vpop.f32.mrf.mxu0  ;;  %v986_v26 = vadd.f32 %v985_v12, %v984_v10 }
  0xe8   :  { %v987_v14 = vpop.f32.mrf.mxu1 }
  0xe9   :  { %v960_v15 = vpop.f32.mrf.mxu0  ;;  %v639_v33 = vadd.f32 %v986_v26, %v958_v25 }
  0xea   :  { %v988_v16 = vpop.f32.mrf.mxu1  ;;  %v961_v29 = vadd.f32 %v960_v15, %v959_v13 }
  0xeb   :  { %v962_v17 = vpop.f32.mrf.mxu0  ;;  %v989_v30 = vadd.f32 %v988_v16, %v987_v14 }
  0xec   :  { %v990_v18 = vpop.f32.mrf.mxu1 }
  0xed   :  { %v963_v19 = vpop.f32.mrf.mxu0  ;;  %v642_v40 = vadd.f32 %v989_v30, %v961_v29 }
  0xee   :  { %v991_v20 = vpop.f32.mrf.mxu1  ;;  %v964_v43 = vadd.f32 %v963_v19, %v962_v17  ;;  %v788_v17 = vpop.permute.xlu1 %787 }
  0xef   :  { %v965_v21 = vpop.f32.mrf.mxu0  ;;  %v992_v44 = vadd.f32 %v991_v20, %v990_v18 }
  0xf0   :  { %v993_v22 = vpop.f32.mrf.mxu1 }
  0xf1   :  { %v966_v23 = vpop.f32.mrf.mxu0  ;;  %v647_v56 = vadd.f32 %v992_v44, %v964_v43 }
  0xf2   :  { %v994_v24 = vpop.f32.mrf.mxu1  ;;  %v967_v51 = vadd.f32 %v966_v23, %v965_v21 }
  0xf3   :  { %v995_v52 = vadd.f32 %v994_v24, %v993_v22 }
  0xf5   :  { %v650_v0 = vadd.f32 %v995_v52, %v967_v51 }
  0xfc   :  { %v1046_v28 = vpop.f32.mrf.mxu1 }
  0xfe   :  { %v736_v32 = vpop.f32.mrf.mxu1 }
 0x100   :  { %v1047_v38 = vpop.f32.mrf.mxu1 }
 0x102   :  { %v739_v48 = vpop.f32.mrf.mxu1 }
 0x103   :  { %v1012_v27 = vpop.f32.mrf.mxu0 }
 0x105   :  { %v1013_v31 = vpop.f32.mrf.mxu0 }
 0x106   :  { %v1014_v34 = vadd.f32 %v1013_v31, %v1012_v27 }
 0x107   :  { %v1015_v37 = vpop.f32.mrf.mxu0 }
 0x108   :  { %v688_v39 = vadd.f32 %v1014_v34, %v639_v33 }
 0x109   :  { %v1016_v41 = vpop.f32.mrf.mxu0 }
 0x10a   :  { %v1017_v45 = vadd.f32 %v1016_v41, %v1015_v37  ;;  %v737_v46 = vadd.f32 %v736_v32, %v688_v39 }
 0x10b   :  { %v1018_v47 = vpop.f32.mrf.mxu0 }
 0x10c   :  { %v790_v49 = vadd.f32 %v773_v36, %v737_v46  ;;  %v691_v50 = vadd.f32 %v1017_v45, %v642_v40 }
 0x10d   :  { %v1019_v53 = vpop.f32.mrf.mxu0 }
 0x10e   :  { %v802_v57 = vadd.f32 %v922_v42, %v790_v49  ;;  %v1020_v58 = vadd.f32 %v1019_v53, %v1018_v47  ;;  %v740_v59 = vadd.f32 %v739_v48, %v691_v50 }
 0x10f   :  { %v1021_v61 = vpop.f32.mrf.mxu0 }
 0x110   :  { %v696_v62 = vadd.f32 %v1020_v58, %v647_v56  ;;  %v791_v63 = vadd.f32 %v778_v55, %v740_v59  ;;  %v810_v4 = vmul.f32 0.01, %v802_v57  ;;  %vm806_vm1 = vcmp.gt.f32.partialorder %v802_v57, 0.0 }
 0x111   :  { %v1022_v3 = vpop.f32.mrf.mxu0 }
 0x112   :  { %v745_v5 = vadd.f32 %v1046_v28, %v696_v62  ;;  %v803_v6 = vadd.f32 %v923_v54, %v791_v63  ;;  %v1023_v7 = vadd.f32 %v1022_v3, %v1021_v61  ;;  %v814_v12 = vsel %vm806_vm1, %v802_v57, %v810_v4 }
 0x114   :  { %v792_v8 = vadd.f32 %v783_v2, %v745_v5  ;;  %vm807_vm2 = vcmp.gt.f32.partialorder %v803_v6, 0.0  ;;  %v811_v9 = vmul.f32 0.01, %v803_v6  ;;  %v699_v10 = vadd.f32 %v1023_v7, %v650_v0 }
 0x116   :  { %v804_v13 = vadd.f32 %v926_v1, %v792_v8  ;;  %v815_v14 = vsel %vm807_vm2, %v803_v6, %v811_v9  ;;  %v748_v15 = vadd.f32 %v1047_v38, %v699_v10 }
 0x117   :  { %v931_v16 = vpack.c.bf16 %v815_v14, %v814_v12 }
 0x118   :  { %v793_v18 = vadd.f32 %v788_v17, %v748_v15  ;;  %v812_v19 = vmul.f32 0.01, %v804_v13  ;;  %vm808_vm3 = vcmp.gt.f32.partialorder %v804_v13, 0.0 }
 0x119   :  { %932 = vst [vmem:[%s1385_s4] sm:$0xff] %v931_v16  }
 0x11a   :  { %v805_v20 = vadd.f32 %v927_v11, %v793_v18  ;;  %v816_v22 = vsel %vm808_vm3, %v804_v13, %v812_v19 }
 0x11c   :  { %vm809_vm4 = vcmp.gt.f32.partialorder %v805_v20, 0.0  ;;  %v813_v21 = vmul.f32 0.01, %v805_v20 }
 0x11e   :  { %v817_v23 = vsel %vm809_vm4, %v805_v20, %v813_v21 }
 0x11f   :  { %v936_v24 = vpack.c.bf16 %v817_v23, %v816_v22 }
 0x121   :  { %939 = vst [vmem:[%s1385_s4 + $0x8] sm:$0xff] %v936_v24  }

// kernel: a_call__.34
= control target key start
LH: loop header
LB: loop body
LE: loop exit
PB: predicated region body
PF: predicated region fallthrough
CT: control target
= control target key end

     0   :  { %s3712_s0 = inlined_call_operand.vmem [shape: bf16[16,1536], index: 0, kind: input, shape index: {}]   ;;  %s3713_s1 = inlined_call_operand.vmem [shape: bf16[1536,768], index: 1, kind: input, shape index: {}]   ;;  %s3714_s2 = inlined_call_operand.vmem [shape: f32[16,1], index: 2, kind: input, shape index: {}]   ;;  %s3715_s3 = inlined_call_operand.vmem [shape: bf16[16,768], index: 3, kind: output, shape index: {}]  }
   0x1   :  { %3716 = sst [smem:[#allocation6_spill]] %s3712_s0 }
   0x2   :  { %s2978_s12 = smov 0   ;;  %s2980_s13 = smov 0  }
   0x3   :  { %s2982_s14 = smov 0   ;;  %s2984_s15 = smov 0  }
   0x4   :  { %s2986_s16 = smov 0   ;;  %s2988_s17 = smov 0  }
   0x5   :  { %s2990_s18 = smov 0   ;;  %s2992_s19 = smov 0  }
   0x6   :  { %s2994_s20 = smov 0   ;;  %s2996_s21 = smov 0  }
   0x7   :  { %s2998_s22 = smov 0  }
   0x8 LB: > { %s2135_s23 = sadd.s32 4294967295, %s2954_s22   ;;  %s22_s24 = sadd.s32 1, %s2946_s20  ;;  %s2954_s22 = sphi %s2998_s22, %s13_s22   ;;  %s2950_s21 = sphi %s2996_s21, %s3730_s21   ;;  %s2946_s20 = sphi %s2994_s20, %s3729_s20   ;;  %s2942_s19 = sphi %s2992_s19, %s3728_s19   ;;  %s2938_s18 = sphi %s2990_s18, %s3727_s18   ;;  %s2934_s17 = sphi %s2988_s17, %s3726_s17   ;;  %s2930_s16 = sphi %s2986_s16, %s3725_s16   ;;  %s2926_s15 = sphi %s2984_s15, %s3724_s15   ;;  %s2922_s14 = sphi %s2982_s14, %s3723_s14   ;;  %s2918_s13 = sphi %s2980_s13, %s3722_s13   ;;  %s2914_s12 = sphi %s2978_s12, %s3721_s12  }
   0x9   : > { %p23_p0 = scmp.ge.s32.totalorder %s22_s24, 2  ;;  %s25_s25 = sadd.s32 1, %s2950_s21 }
   0xa   : > { %s32_s26 = sadd.s32 1, %s2934_s17  ;;  %p39_p1 = scmp.ne.s32.totalorder %s2934_s17, %s2930_s16 }
   0xb   : > { %s3732_s24 = smov (%p23_p0, %s22_s24), 0  ;;  %s3734_s25 = smov (!%p23_p0, %s25_s25), %s2950_s21 }
   0xc   : > { %s29_s27 = ssub.s32 %s2946_s20, %s3732_s24  ;;  %p40_p2 = scmp.eq.s32.totalorder %s2954_s22, 0 }
   0xd   : > { %p27_p3 = scmp.ge.s32.totalorder %s3734_s25, 2  ;;  %p30_p4 = scmp.eq.s32.totalorder %s29_s27, 0 }
   0xe   : > { %p3045_p5 = por %p40_p2, %p39_p1  ;;  %s60_s29 = sadd.s32 1, %s2926_s15 }
   0xf   : > { %s3736_s25 = smov (%p27_p3, %s3734_s25), 0  ;;  %p67_p6 = scmp.ne.s32.totalorder %s2926_s15, %s2922_s14 }
  0x10   : > { %s3053_s30 = scalar_select %p30_p4, %s2934_s17, %s32_s26  }
  0x11   : > { %s56_s4 = ssub.s32 %s2950_s21, %s3736_s25  ;;  %p3059_p9 = por %p67_p6, %p40_p2 }
  0x12   : > { %s57_s5 = sor.u32 %s56_s4, %s29_s27  ;;  %p105_p7 = scmp.eq.s32.totalorder %s56_s4, 0 }
  0x13   : > { %p58_p8 = scmp.eq.s32.totalorder %s57_s5, 0  ;;  %s107_s7 = sadd.s32 1, %s2918_s13 }
  0x14   : > { %p117_p10 = scmp.ne.s32.totalorder %s2918_s13, %s2914_s12  ;;  %p118_p11 = scmp.eq.s32.totalorder %s2135_s23, 3 }
  0x15   : > { %s3067_s8 = scalar_select %p58_p8, %s2926_s15, %s60_s29  }
  0x16   : > { %s3070_s9 = scalar_select %p105_p7, %s2918_s13, %s107_s7  }
  0x17   : > { %p3072_p12 = por %p118_p11, %p117_p10  ;;  %p2138_p13 = scmp.ge.s32.totalorder %s2954_s22, 4 }
  0x19   : > { %143 = sbr.rel (%p2138_p13) target bundleno = 163 (0xa3), region = 20 }
  0x1e   : > { %146 = sbr.rel (!%p3045_p5) target bundleno = 42 (0x2a), region = 24  ;;  %s148_s11 = sand.u32 (%p3045_p5), 1, %s2934_s17  }
  0x1f   : > { %s2497_s26 = smul.u32 (%p3045_p5), 24, %s2946_s20  ;;  %s3720_s0 = sld [smem:[#allocation6_spill]] (%p3045_p5) }
  0x20   : > { %s2569_s27 = smul.u32 (%p3045_p5), 48, %s148_s11 }
  0x22   : > { %s150_s23 = scalar_lea.vmem (%p3045_p5), [#allocation3], %s2569_s27 }
  0x25   : > { %s153_s5 = scalar_lea.vmem %s3720_s0, %s2497_s26 }
  0x26   : > { %v166_v0 = vld [vmem:[%s153_s5] sm:$0xff]  ;;  %v168_v1 = vld [vmem:[%s153_s5 + $0x8] sm:$0xff]  ;;  %v170_v2 = vld [vmem:[%s153_s5 + $0x10] sm:$0xff] }
  0x27   : > { %167 = vst [vmem:[%s150_s23] sm:$0xff] %v166_v0  ;;  %169 = vst [vmem:[%s150_s23 + $0x8] sm:$0xff] %v168_v1  ;;  %v172_v3 = vld [vmem:[%s153_s5 + $0x30] sm:$0xff]  ;;  %v174_v4 = vld [vmem:[%s153_s5 + $0x38] sm:$0xff] }
  0x28   : > { %171 = vst [vmem:[%s150_s23 + $0x10] sm:$0xff] %v170_v2  ;;  %v176_v5 = vld [vmem:[%s153_s5 + $0x40] sm:$0xff]  ;;  %173 = vst [vmem:[%s150_s23 + $0x18] sm:$0xff] %v172_v3 }
  0x29   : > { %175 = vst [vmem:[%s150_s23 + $0x20] sm:$0xff] %v174_v4  ;;  %177 = vst [vmem:[%s150_s23 + $0x28] sm:$0xff] %v176_v5 }
  0x2a PF: > { %183 = sbr.rel (!%p3059_p9) target bundleno = 163 (0xa3), region = 47  ;;  %s185_s28 = sand.u32 (%p3059_p9), 1, %s2926_s15  }
  0x2b   : > { %s2570_s7 = smul.u32 (%p3059_p9), 1152, %s185_s28 }
  0x2c   : > { %s189_s11 = smul.u32 (%p3059_p9), 3, %s2950_s21 }
  0x2d   : > { %s2575_s26 = smul.u32 (%p3059_p9), 576, %s2946_s20  ;;  %s3097_s6 = scalar_lea.vmem (%p3059_p9), [#allocation4], %s2570_s7 }
  0x2f   : > { %s191_s27 = sadd.s32 %s2575_s26, %s189_s11 }
  0x30   : > { %s2140_s29 = sshll.u32 %s191_s27, 2 }
  0x31   : > { %s3092_s5 = scalar_lea.vmem %s3713_s1, %s2140_s29 }
  0x32   : > { %v208_v6 = vld [vmem:[%s3092_s5] sm:$0xff]  ;;  %v210_v7 = vld [vmem:[%s3092_s5 + $0x18] sm:$0xff]  ;;  %v212_v8 = vld [vmem:[%s3092_s5 + $0x30] sm:$0xff] }
  0x33   : > { %209 = vst [vmem:[%s3097_s6] sm:$0xff] %v208_v6  ;;  %211 = vst [vmem:[%s3097_s6 + $0xc] sm:$0xff] %v210_v7  ;;  %v214_v9 = vld [vmem:[%s3092_s5 + $0x48] sm:$0xff]  ;;  %v216_v10 = vld [vmem:[%s3092_s5 + $0x60] sm:$0xff] }
  0x34   : > { %213 = vst [vmem:[%s3097_s6 + $0x18] sm:$0xff] %v212_v8  ;;  %v218_v11 = vld [vmem:[%s3092_s5 + $0x78] sm:$0xff]  ;;  %215 = vst [vmem:[%s3097_s6 + $0x24] sm:$0xff] %v214_v9  ;;  %v220_v12 = vld [vmem:[%s3092_s5 + $0x90] sm:$0xff] }
  0x35   : > { %217 = vst [vmem:[%s3097_s6 + $0x30] sm:$0xff] %v216_v10  ;;  %219 = vst [vmem:[%s3097_s6 + $0x3c] sm:$0xff] %v218_v11  ;;  %v222_v13 = vld [vmem:[%s3092_s5 + $0xa8] sm:$0xff]  ;;  %v224_v14 = vld [vmem:[%s3092_s5 + $0xc0] sm:$0xff] }
  0x36   : > { %221 = vst [vmem:[%s3097_s6 + $0x48] sm:$0xff] %v220_v12  ;;  %223 = vst [vmem:[%s3097_s6 + $0x54] sm:$0xff] %v222_v13  ;;  %v226_v15 = vld [vmem:[%s3092_s5 + $0xd8] sm:$0xff]  ;;  %v228_v16 = vld [vmem:[%s3092_s5 + $0xf0] sm:$0xff] }
  0x37   : > { %225 = vst [vmem:[%s3097_s6 + $0x60] sm:$0xff] %v224_v14  ;;  %v230_v17 = vld [vmem:[%s3092_s5 + $0x108] sm:$0xff]  ;;  %227 = vst [vmem:[%s3097_s6 + $0x6c] sm:$0xff] %v226_v15  ;;  %v232_v18 = vld [vmem:[%s3092_s5 + $0x120] sm:$0xff] }
  0x38   : > { %229 = vst [vmem:[%s3097_s6 + $0x78] sm:$0xff] %v228_v16  ;;  %231 = vst [vmem:[%s3097_s6 + $0x84] sm:$0xff] %v230_v17  ;;  %v234_v19 = vld [vmem:[%s3092_s5 + $0x138] sm:$0xff]  ;;  %v236_v20 = vld [vmem:[%s3092_s5 + $0x150] sm:$0xff] }
  0x39   : > { %233 = vst [vmem:[%s3097_s6 + $0x90] sm:$0xff] %v232_v18  ;;  %235 = vst [vmem:[%s3097_s6 + $0x9c] sm:$0xff] %v234_v19  ;;  %v238_v21 = vld [vmem:[%s3092_s5 + $0x168] sm:$0xff]  ;;  %v240_v22 = vld [vmem:[%s3092_s5 + $0x180] sm:$0xff] }
  0x3a   : > { %237 = vst [vmem:[%s3097_s6 + $0xa8] sm:$0xff] %v236_v20  ;;  %v242_v23 = vld [vmem:[%s3092_s5 + $0x198] sm:$0xff]  ;;  %239 = vst [vmem:[%s3097_s6 + $0xb4] sm:$0xff] %v238_v21  ;;  %v244_v24 = vld [vmem:[%s3092_s5 + $0x1b0] sm:$0xff] }
  0x3b   : > { %241 = vst [vmem:[%s3097_s6 + $0xc0] sm:$0xff] %v240_v22  ;;  %243 = vst [vmem:[%s3097_s6 + $0xcc] sm:$0xff] %v242_v23  ;;  %v246_v25 = vld [vmem:[%s3092_s5 + $0x1c8] sm:$0xff]  ;;  %v248_v26 = vld [vmem:[%s3092_s5 + $0x1e0] sm:$0xff] }
  0x3c   : > { %245 = vst [vmem:[%s3097_s6 + $0xd8] sm:$0xff] %v244_v24  ;;  %247 = vst [vmem:[%s3097_s6 + $0xe4] sm:$0xff] %v246_v25  ;;  %v250_v27 = vld [vmem:[%s3092_s5 + $0x1f8] sm:$0xff]  ;;  %v252_v28 = vld [vmem:[%s3092_s5 + $0x210] sm:$0xff] }
  0x3d   : > { %249 = vst [vmem:[%s3097_s6 + $0xf0] sm:$0xff] %v248_v26  ;;  %v254_v29 = vld [vmem:[%s3092_s5 + $0x228] sm:$0xff]  ;;  %251 = vst [vmem:[%s3097_s6 + $0xfc] sm:$0xff] %v250_v27  ;;  %v256_v30 = vld [vmem:[%s3092_s5 + $0x240] sm:$0xff] }
  0x3e   : > { %253 = vst [vmem:[%s3097_s6 + $0x108] sm:$0xff] %v252_v28  ;;  %255 = vst [vmem:[%s3097_s6 + $0x114] sm:$0xff] %v254_v29  ;;  %v258_v31 = vld [vmem:[%s3092_s5 + $0x258] sm:$0xff]  ;;  %v260_v32 = vld [vmem:[%s3092_s5 + $0x270] sm:$0xff] }
  0x3f   : > { %257 = vst [vmem:[%s3097_s6 + $0x120] sm:$0xff] %v256_v30  ;;  %259 = vst [vmem:[%s3097_s6 + $0x12c] sm:$0xff] %v258_v31  ;;  %v262_v33 = vld [vmem:[%s3092_s5 + $0x288] sm:$0xff]  ;;  %v264_v34 = vld [vmem:[%s3092_s5 + $0x2a0] sm:$0xff] }
  0x40   : > { %261 = vst [vmem:[%s3097_s6 + $0x138] sm:$0xff] %v260_v32  ;;  %v266_v35 = vld [vmem:[%s3092_s5 + $0x2b8] sm:$0xff]  ;;  %263 = vst [vmem:[%s3097_s6 + $0x144] sm:$0xff] %v262_v33  ;;  %v268_v36 = vld [vmem:[%s3092_s5 + $0x2d0] sm:$0xff] }
  0x41   : > { %265 = vst [vmem:[%s3097_s6 + $0x150] sm:$0xff] %v264_v34  ;;  %267 = vst [vmem:[%s3097_s6 + $0x15c] sm:$0xff] %v266_v35  ;;  %v270_v37 = vld [vmem:[%s3092_s5 + $0x2e8] sm:$0xff]  ;;  %v272_v38 = vld [vmem:[%s3092_s5 + $0x300] sm:$0xff] }
  0x42   : > { %269 = vst [vmem:[%s3097_s6 + $0x168] sm:$0xff] %v268_v36  ;;  %271 = vst [vmem:[%s3097_s6 + $0x174] sm:$0xff] %v270_v37  ;;  %v274_v39 = vld [vmem:[%s3092_s5 + $0x318] sm:$0xff]  ;;  %v276_v40 = vld [vmem:[%s3092_s5 + $0x330] sm:$0xff] }
  0x43   : > { %273 = vst [vmem:[%s3097_s6 + $0x180] sm:$0xff] %v272_v38  ;;  %v278_v41 = vld [vmem:[%s3092_s5 + $0x348] sm:$0xff]  ;;  %275 = vst [vmem:[%s3097_s6 + $0x18c] sm:$0xff] %v274_v39  ;;  %v280_v42 = vld [vmem:[%s3092_s5 + $0x360] sm:$0xff] }
  0x44   : > { %277 = vst [vmem:[%s3097_s6 + $0x198] sm:$0xff] %v276_v40  ;;  %279 = vst [vmem:[%s3097_s6 + $0x1a4] sm:$0xff] %v278_v41  ;;  %v282_v43 = vld [vmem:[%s3092_s5 + $0x378] sm:$0xff]  ;;  %v284_v44 = vld [vmem:[%s3092_s5 + $0x390] sm:$0xff] }
  0x45   : > { %281 = vst [vmem:[%s3097_s6 + $0x1b0] sm:$0xff] %v280_v42  ;;  %283 = vst [vmem:[%s3097_s6 + $0x1bc] sm:$0xff] %v282_v43  ;;  %v286_v45 = vld [vmem:[%s3092_s5 + $0x3a8] sm:$0xff]  ;;  %v288_v46 = vld [vmem:[%s3092_s5 + $0x3c0] sm:$0xff] }
  0x46   : > { %285 = vst [vmem:[%s3097_s6 + $0x1c8] sm:$0xff] %v284_v44  ;;  %v290_v47 = vld [vmem:[%s3092_s5 + $0x3d8] sm:$0xff]  ;;  %287 = vst [vmem:[%s3097_s6 + $0x1d4] sm:$0xff] %v286_v45  ;;  %v292_v48 = vld [vmem:[%s3092_s5 + $0x3f0] sm:$0xff] }
  0x47   : > { %289 = vst [vmem:[%s3097_s6 + $0x1e0] sm:$0xff] %v288_v46  ;;  %291 = vst [vmem:[%s3097_s6 + $0x1ec] sm:$0xff] %v290_v47  ;;  %v294_v49 = vld [vmem:[%s3092_s5 + $0x408] sm:$0xff]  ;;  %v296_v50 = vld [vmem:[%s3092_s5 + $0x420] sm:$0xff] }
  0x48   : > { %293 = vst [vmem:[%s3097_s6 + $0x1f8] sm:$0xff] %v292_v48  ;;  %295 = vst [vmem:[%s3097_s6 + $0x204] sm:$0xff] %v294_v49  ;;  %v298_v51 = vld [vmem:[%s3092_s5 + $0x438] sm:$0xff]  ;;  %v300_v52 = vld [vmem:[%s3092_s5 + $0x450] sm:$0xff] }
  0x49   : > { %297 = vst [vmem:[%s3097_s6 + $0x210] sm:$0xff] %v296_v50  ;;  %v302_v53 = vld [vmem:[%s3092_s5 + $0x468] sm:$0xff]  ;;  %299 = vst [vmem:[%s3097_s6 + $0x21c] sm:$0xff] %v298_v51  ;;  %v304_v54 = vld [vmem:[%s3092_s5 + $0x480] sm:$0xff] }
  0x4a   : > { %301 = vst [vmem:[%s3097_s6 + $0x228] sm:$0xff] %v300_v52  ;;  %303 = vst [vmem:[%s3097_s6 + $0x234] sm:$0xff] %v302_v53  ;;  %v306_v55 = vld [vmem:[%s3092_s5 + $0x498] sm:$0xff]  ;;  %v308_v56 = vld [vmem:[%s3092_s5 + $0x4b0] sm:$0xff] }
  0x4b   : > { %305 = vst [vmem:[%s3097_s6 + $0x240] sm:$0xff] %v304_v54  ;;  %307 = vst [vmem:[%s3097_s6 + $0x24c] sm:$0xff] %v306_v55  ;;  %v310_v57 = vld [vmem:[%s3092_s5 + $0x4c8] sm:$0xff]  ;;  %v312_v58 = vld [vmem:[%s3092_s5 + $0x4e0] sm:$0xff] }
  0x4c   : > { %309 = vst [vmem:[%s3097_s6 + $0x258] sm:$0xff] %v308_v56  ;;  %v314_v59 = vld [vmem:[%s3092_s5 + $0x4f8] sm:$0xff]  ;;  %311 = vst [vmem:[%s3097_s6 + $0x264] sm:$0xff] %v310_v57  ;;  %v316_v60 = vld [vmem:[%s3092_s5 + $0x510] sm:$0xff] }
  0x4d   : > { %313 = vst [vmem:[%s3097_s6 + $0x270] sm:$0xff] %v312_v58  ;;  %315 = vst [vmem:[%s3097_s6 + $0x27c] sm:$0xff] %v314_v59  ;;  %v318_v61 = vld [vmem:[%s3092_s5 + $0x528] sm:$0xff]  ;;  %v320_v62 = vld [vmem:[%s3092_s5 + $0x540] sm:$0xff] }
  0x4e   : > { %317 = vst [vmem:[%s3097_s6 + $0x288] sm:$0xff] %v316_v60  ;;  %319 = vst [vmem:[%s3097_s6 + $0x294] sm:$0xff] %v318_v61  ;;  %v322_v63 = vld [vmem:[%s3092_s5 + $0x558] sm:$0xff]  ;;  %v324_v0 = vld [vmem:[%s3092_s5 + $0x570] sm:$0xff] }
  0x4f   : > { %321 = vst [vmem:[%s3097_s6 + $0x2a0] sm:$0xff] %v320_v62  ;;  %v326_v1 = vld [vmem:[%s3092_s5 + $0x588] sm:$0xff]  ;;  %323 = vst [vmem:[%s3097_s6 + $0x2ac] sm:$0xff] %v322_v63  ;;  %v328_v2 = vld [vmem:[%s3092_s5 + $0x5a0] sm:$0xff] }
  0x50   : > { %325 = vst [vmem:[%s3097_s6 + $0x2b8] sm:$0xff] %v324_v0  ;;  %327 = vst [vmem:[%s3097_s6 + $0x2c4] sm:$0xff] %v326_v1  ;;  %v330_v3 = vld [vmem:[%s3092_s5 + $0x5b8] sm:$0xff]  ;;  %v332_v4 = vld [vmem:[%s3092_s5 + $0x5d0] sm:$0xff] }
  0x51   : > { %329 = vst [vmem:[%s3097_s6 + $0x2d0] sm:$0xff] %v328_v2  ;;  %331 = vst [vmem:[%s3097_s6 + $0x2dc] sm:$0xff] %v330_v3  ;;  %v334_v5 = vld [vmem:[%s3092_s5 + $0x5e8] sm:$0xff]  ;;  %v336_v6 = vld [vmem:[%s3092_s5 + $0x600] sm:$0xff] }
  0x52   : > { %333 = vst [vmem:[%s3097_s6 + $0x2e8] sm:$0xff] %v332_v4  ;;  %v338_v7 = vld [vmem:[%s3092_s5 + $0x618] sm:$0xff]  ;;  %335 = vst [vmem:[%s3097_s6 + $0x2f4] sm:$0xff] %v334_v5  ;;  %v340_v8 = vld [vmem:[%s3092_s5 + $0x630] sm:$0xff] }
  0x53   : > { %337 = vst [vmem:[%s3097_s6 + $0x300] sm:$0xff] %v336_v6  ;;  %339 = vst [vmem:[%s3097_s6 + $0x30c] sm:$0xff] %v338_v7  ;;  %v342_v9 = vld [vmem:[%s3092_s5 + $0x648] sm:$0xff]  ;;  %v344_v10 = vld [vmem:[%s3092_s5 + $0x660] sm:$0xff] }
  0x54   : > { %341 = vst [vmem:[%s3097_s6 + $0x318] sm:$0xff] %v340_v8  ;;  %343 = vst [vmem:[%s3097_s6 + $0x324] sm:$0xff] %v342_v9  ;;  %v346_v11 = vld [vmem:[%s3092_s5 + $0x678] sm:$0xff]  ;;  %v348_v12 = vld [vmem:[%s3092_s5 + $0x690] sm:$0xff] }
  0x55   : > { %345 = vst [vmem:[%s3097_s6 + $0x330] sm:$0xff] %v344_v10  ;;  %v350_v13 = vld [vmem:[%s3092_s5 + $0x6a8] sm:$0xff]  ;;  %347 = vst [vmem:[%s3097_s6 + $0x33c] sm:$0xff] %v346_v11  ;;  %v352_v14 = vld [vmem:[%s3092_s5 + $0x6c0] sm:$0xff] }
  0x56   : > { %349 = vst [vmem:[%s3097_s6 + $0x348] sm:$0xff] %v348_v12  ;;  %351 = vst [vmem:[%s3097_s6 + $0x354] sm:$0xff] %v350_v13  ;;  %v354_v15 = vld [vmem:[%s3092_s5 + $0x6d8] sm:$0xff]  ;;  %v356_v16 = vld [vmem:[%s3092_s5 + $0x6f0] sm:$0xff] }
  0x57   : > { %353 = vst [vmem:[%s3097_s6 + $0x360] sm:$0xff] %v352_v14  ;;  %355 = vst [vmem:[%s3097_s6 + $0x36c] sm:$0xff] %v354_v15  ;;  %v358_v17 = vld [vmem:[%s3092_s5 + $0x708] sm:$0xff]  ;;  %v360_v18 = vld [vmem:[%s3092_s5 + $0x720] sm:$0xff] }
  0x58   : > { %357 = vst [vmem:[%s3097_s6 + $0x378] sm:$0xff] %v356_v16  ;;  %v362_v19 = vld [vmem:[%s3092_s5 + $0x738] sm:$0xff]  ;;  %359 = vst [vmem:[%s3097_s6 + $0x384] sm:$0xff] %v358_v17  ;;  %v364_v20 = vld [vmem:[%s3092_s5 + $0x750] sm:$0xff] }
  0x59   : > { %361 = vst [vmem:[%s3097_s6 + $0x390] sm:$0xff] %v360_v18  ;;  %363 = vst [vmem:[%s3097_s6 + $0x39c] sm:$0xff] %v362_v19  ;;  %v366_v21 = vld [vmem:[%s3092_s5 + $0x768] sm:$0xff]  ;;  %v368_v22 = vld [vmem:[%s3092_s5 + $0x780] sm:$0xff] }
  0x5a   : > { %365 = vst [vmem:[%s3097_s6 + $0x3a8] sm:$0xff] %v364_v20  ;;  %367 = vst [vmem:[%s3097_s6 + $0x3b4] sm:$0xff] %v366_v21  ;;  %v370_v23 = vld [vmem:[%s3092_s5 + $0x798] sm:$0xff]  ;;  %v372_v24 = vld [vmem:[%s3092_s5 + $0x7b0] sm:$0xff] }
  0x5b   : > { %369 = vst [vmem:[%s3097_s6 + $0x3c0] sm:$0xff] %v368_v22  ;;  %v374_v25 = vld [vmem:[%s3092_s5 + $0x7c8] sm:$0xff]  ;;  %371 = vst [vmem:[%s3097_s6 + $0x3cc] sm:$0xff] %v370_v23  ;;  %v376_v26 = vld [vmem:[%s3092_s5 + $0x7e0] sm:$0xff] }
  0x5c   : > { %373 = vst [vmem:[%s3097_s6 + $0x3d8] sm:$0xff] %v372_v24  ;;  %375 = vst [vmem:[%s3097_s6 + $0x3e4] sm:$0xff] %v374_v25  ;;  %v378_v27 = vld [vmem:[%s3092_s5 + $0x7f8] sm:$0xff]  ;;  %v380_v28 = vld [vmem:[%s3092_s5 + $0x810] sm:$0xff] }
  0x5d   : > { %377 = vst [vmem:[%s3097_s6 + $0x3f0] sm:$0xff] %v376_v26  ;;  %379 = vst [vmem:[%s3097_s6 + $0x3fc] sm:$0xff] %v378_v27  ;;  %v382_v29 = vld [vmem:[%s3092_s5 + $0x828] sm:$0xff]  ;;  %v384_v30 = vld [vmem:[%s3092_s5 + $0x840] sm:$0xff] }
  0x5e   : > { %381 = vst [vmem:[%s3097_s6 + $0x408] sm:$0xff] %v380_v28  ;;  %v386_v31 = vld [vmem:[%s3092_s5 + $0x858] sm:$0xff]  ;;  %383 = vst [vmem:[%s3097_s6 + $0x414] sm:$0xff] %v382_v29  ;;  %v388_v32 = vld [vmem:[%s3092_s5 + $0x870] sm:$0xff] }
  0x5f   : > { %385 = vst [vmem:[%s3097_s6 + $0x420] sm:$0xff] %v384_v30  ;;  %387 = vst [vmem:[%s3097_s6 + $0x42c] sm:$0xff] %v386_v31  ;;  %v390_v33 = vld [vmem:[%s3092_s5 + $0x888] sm:$0xff]  ;;  %v392_v34 = vld [vmem:[%s3092_s5 + $0x8a0] sm:$0xff] }
  0x60   : > { %389 = vst [vmem:[%s3097_s6 + $0x438] sm:$0xff] %v388_v32  ;;  %391 = vst [vmem:[%s3097_s6 + $0x444] sm:$0xff] %v390_v33  ;;  %v394_v35 = vld [vmem:[%s3092_s5 + $0x8b8] sm:$0xff]  ;;  %v396_v36 = vld [vmem:[%s3092_s5 + $0x8d0] sm:$0xff] }
  0x61   : > { %393 = vst [vmem:[%s3097_s6 + $0x450] sm:$0xff] %v392_v34  ;;  %v398_v37 = vld [vmem:[%s3092_s5 + $0x8e8] sm:$0xff]  ;;  %395 = vst [vmem:[%s3097_s6 + $0x45c] sm:$0xff] %v394_v35  ;;  %v2143_v39 = vld [vmem:[%s3092_s5 + $0x20] sm:$0xf] }
  0x62   : > { %397 = vst [vmem:[%s3097_s6 + $0x468] sm:$0xff] %v396_v36  ;;  %399 = vst [vmem:[%s3097_s6 + $0x474] sm:$0xff] %v398_v37  ;;  %v2141_v38 = vld [vmem:[%s3092_s5 + $0x8] sm:$0xf]  ;;  %v2145_v40 = vld [vmem:[%s3092_s5 + $0x38] sm:$0xf] }
  0x63   : > { %2142 = vst [vmem:[%s3097_s6 + $0x8] sm:$0xf] %v2141_v38  ;;  %2144 = vst [vmem:[%s3097_s6 + $0x14] sm:$0xf] %v2143_v39  ;;  %v2147_v41 = vld [vmem:[%s3092_s5 + $0x50] sm:$0xf] }
  0x64   : > { %2146 = vst [vmem:[%s3097_s6 + $0x20] sm:$0xf] %v2145_v40  ;;  %v2149_v42 = vld [vmem:[%s3092_s5 + $0x68] sm:$0xf]  ;;  %v2151_v43 = vld [vmem:[%s3092_s5 + $0x80] sm:$0xf] }
  0x65   : > { %2148 = vst [vmem:[%s3097_s6 + $0x2c] sm:$0xf] %v2147_v41  ;;  %2150 = vst [vmem:[%s3097_s6 + $0x38] sm:$0xf] %v2149_v42  ;;  %v2153_v44 = vld [vmem:[%s3092_s5 + $0x98] sm:$0xf] }
  0x66   : > { %2152 = vst [vmem:[%s3097_s6 + $0x44] sm:$0xf] %v2151_v43  ;;  %v2155_v45 = vld [vmem:[%s3092_s5 + $0xb0] sm:$0xf]  ;;  %v2157_v46 = vld [vmem:[%s3092_s5 + $0xc8] sm:$0xf] }
  0x67   : > { %2154 = vst [vmem:[%s3097_s6 + $0x50] sm:$0xf] %v2153_v44  ;;  %2156 = vst [vmem:[%s3097_s6 + $0x5c] sm:$0xf] %v2155_v45  ;;  %v2159_v47 = vld [vmem:[%s3092_s5 + $0xe0] sm:$0xf] }
  0x68   : > { %2158 = vst [vmem:[%s3097_s6 + $0x68] sm:$0xf] %v2157_v46  ;;  %v2161_v48 = vld [vmem:[%s3092_s5 + $0xf8] sm:$0xf]  ;;  %v2163_v49 = vld [vmem:[%s3092_s5 + $0x110] sm:$0xf] }
  0x69   : > { %2160 = vst [vmem:[%s3097_s6 + $0x74] sm:$0xf] %v2159_v47  ;;  %2162 = vst [vmem:[%s3097_s6 + $0x80] sm:$0xf] %v2161_v48  ;;  %v2165_v50 = vld [vmem:[%s3092_s5 + $0x128] sm:$0xf] }
  0x6a   : > { %2164 = vst [vmem:[%s3097_s6 + $0x8c] sm:$0xf] %v2163_v49  ;;  %v2167_v51 = vld [vmem:[%s3092_s5 + $0x140] sm:$0xf]  ;;  %v2169_v52 = vld [vmem:[%s3092_s5 + $0x158] sm:$0xf] }
  0x6b   : > { %2166 = vst [vmem:[%s3097_s6 + $0x98] sm:$0xf] %v2165_v50  ;;  %2168 = vst [vmem:[%s3097_s6 + $0xa4] sm:$0xf] %v2167_v51  ;;  %v2171_v53 = vld [vmem:[%s3092_s5 + $0x170] sm:$0xf] }
  0x6c   : > { %2170 = vst [vmem:[%s3097_s6 + $0xb0] sm:$0xf] %v2169_v52  ;;  %v2173_v54 = vld [vmem:[%s3092_s5 + $0x188] sm:$0xf]  ;;  %v2175_v55 = vld [vmem:[%s3092_s5 + $0x1a0] sm:$0xf] }
  0x6d   : > { %2172 = vst [vmem:[%s3097_s6 + $0xbc] sm:$0xf] %v2171_v53  ;;  %2174 = vst [vmem:[%s3097_s6 + $0xc8] sm:$0xf] %v2173_v54  ;;  %v2177_v56 = vld [vmem:[%s3092_s5 + $0x1b8] sm:$0xf] }
  0x6e   : > { %2176 = vst [vmem:[%s3097_s6 + $0xd4] sm:$0xf] %v2175_v55  ;;  %v2179_v57 = vld [vmem:[%s3092_s5 + $0x1d0] sm:$0xf]  ;;  %v2181_v58 = vld [vmem:[%s3092_s5 + $0x1e8] sm:$0xf] }
  0x6f   : > { %2178 = vst [vmem:[%s3097_s6 + $0xe0] sm:$0xf] %v2177_v56  ;;  %2180 = vst [vmem:[%s3097_s6 + $0xec] sm:$0xf] %v2179_v57  ;;  %v2183_v59 = vld [vmem:[%s3092_s5 + $0x200] sm:$0xf] }
  0x70   : > { %2182 = vst [vmem:[%s3097_s6 + $0xf8] sm:$0xf] %v2181_v58  ;;  %v2185_v60 = vld [vmem:[%s3092_s5 + $0x218] sm:$0xf]  ;;  %v2187_v61 = vld [vmem:[%s3092_s5 + $0x230] sm:$0xf] }
  0x71   : > { %2184 = vst [vmem:[%s3097_s6 + $0x104] sm:$0xf] %v2183_v59  ;;  %2186 = vst [vmem:[%s3097_s6 + $0x110] sm:$0xf] %v2185_v60  ;;  %v2189_v62 = vld [vmem:[%s3092_s5 + $0x248] sm:$0xf] }
  0x72   : > { %2188 = vst [vmem:[%s3097_s6 + $0x11c] sm:$0xf] %v2187_v61  ;;  %v2191_v63 = vld [vmem:[%s3092_s5 + $0x260] sm:$0xf]  ;;  %v2193_v0 = vld [vmem:[%s3092_s5 + $0x278] sm:$0xf] }
  0x73   : > { %2190 = vst [vmem:[%s3097_s6 + $0x128] sm:$0xf] %v2189_v62  ;;  %2192 = vst [vmem:[%s3097_s6 + $0x134] sm:$0xf] %v2191_v63  ;;  %v2195_v1 = vld [vmem:[%s3092_s5 + $0x290] sm:$0xf] }
  0x74   : > { %2194 = vst [vmem:[%s3097_s6 + $0x140] sm:$0xf] %v2193_v0  ;;  %v2197_v2 = vld [vmem:[%s3092_s5 + $0x2a8] sm:$0xf]  ;;  %v2199_v3 = vld [vmem:[%s3092_s5 + $0x2c0] sm:$0xf] }
  0x75   : > { %2196 = vst [vmem:[%s3097_s6 + $0x14c] sm:$0xf] %v2195_v1  ;;  %2198 = vst [vmem:[%s3097_s6 + $0x158] sm:$0xf] %v2197_v2  ;;  %v2201_v4 = vld [vmem:[%s3092_s5 + $0x2d8] sm:$0xf] }
  0x76   : > { %2200 = vst [vmem:[%s3097_s6 + $0x164] sm:$0xf] %v2199_v3  ;;  %v2203_v5 = vld [vmem:[%s3092_s5 + $0x2f0] sm:$0xf]  ;;  %v2205_v6 = vld [vmem:[%s3092_s5 + $0x308] sm:$0xf] }
  0x77   : > { %2202 = vst [vmem:[%s3097_s6 + $0x170] sm:$0xf] %v2201_v4  ;;  %2204 = vst [vmem:[%s3097_s6 + $0x17c] sm:$0xf] %v2203_v5  ;;  %v2207_v7 = vld [vmem:[%s3092_s5 + $0x320] sm:$0xf] }
  0x78   : > { %2206 = vst [vmem:[%s3097_s6 + $0x188] sm:$0xf] %v2205_v6  ;;  %v2209_v8 = vld [vmem:[%s3092_s5 + $0x338] sm:$0xf]  ;;  %v2211_v9 = vld [vmem:[%s3092_s5 + $0x350] sm:$0xf] }
  0x79   : > { %2208 = vst [vmem:[%s3097_s6 + $0x194] sm:$0xf] %v2207_v7  ;;  %2210 = vst [vmem:[%s3097_s6 + $0x1a0] sm:$0xf] %v2209_v8  ;;  %v2213_v10 = vld [vmem:[%s3092_s5 + $0x368] sm:$0xf] }
  0x7a   : > { %2212 = vst [vmem:[%s3097_s6 + $0x1ac] sm:$0xf] %v2211_v9  ;;  %v2215_v11 = vld [vmem:[%s3092_s5 + $0x380] sm:$0xf]  ;;  %v2217_v12 = vld [vmem:[%s3092_s5 + $0x398] sm:$0xf] }
  0x7b   : > { %2214 = vst [vmem:[%s3097_s6 + $0x1b8] sm:$0xf] %v2213_v10  ;;  %2216 = vst [vmem:[%s3097_s6 + $0x1c4] sm:$0xf] %v2215_v11  ;;  %v2219_v13 = vld [vmem:[%s3092_s5 + $0x3b0] sm:$0xf] }
  0x7c   : > { %2218 = vst [vmem:[%s3097_s6 + $0x1d0] sm:$0xf] %v2217_v12  ;;  %v2221_v14 = vld [vmem:[%s3092_s5 + $0x3c8] sm:$0xf]  ;;  %v2223_v15 = vld [vmem:[%s3092_s5 + $0x3e0] sm:$0xf] }
  0x7d   : > { %2220 = vst [vmem:[%s3097_s6 + $0x1dc] sm:$0xf] %v2219_v13  ;;  %2222 = vst [vmem:[%s3097_s6 + $0x1e8] sm:$0xf] %v2221_v14  ;;  %v2225_v16 = vld [vmem:[%s3092_s5 + $0x3f8] sm:$0xf] }
  0x7e   : > { %2224 = vst [vmem:[%s3097_s6 + $0x1f4] sm:$0xf] %v2223_v15  ;;  %v2227_v17 = vld [vmem:[%s3092_s5 + $0x410] sm:$0xf]  ;;  %v2229_v18 = vld [vmem:[%s3092_s5 + $0x428] sm:$0xf] }
  0x7f   : > { %2226 = vst [vmem:[%s3097_s6 + $0x200] sm:$0xf] %v2225_v16  ;;  %2228 = vst [vmem:[%s3097_s6 + $0x20c] sm:$0xf] %v2227_v17  ;;  %v2231_v19 = vld [vmem:[%s3092_s5 + $0x440] sm:$0xf] }
  0x80   : > { %2230 = vst [vmem:[%s3097_s6 + $0x218] sm:$0xf] %v2229_v18  ;;  %v2233_v20 = vld [vmem:[%s3092_s5 + $0x458] sm:$0xf]  ;;  %v2235_v21 = vld [vmem:[%s3092_s5 + $0x470] sm:$0xf] }
  0x81   : > { %2232 = vst [vmem:[%s3097_s6 + $0x224] sm:$0xf] %v2231_v19  ;;  %2234 = vst [vmem:[%s3097_s6 + $0x230] sm:$0xf] %v2233_v20  ;;  %v2237_v22 = vld [vmem:[%s3092_s5 + $0x488] sm:$0xf] }
  0x82   : > { %2236 = vst [vmem:[%s3097_s6 + $0x23c] sm:$0xf] %v2235_v21  ;;  %v2239_v23 = vld [vmem:[%s3092_s5 + $0x4a0] sm:$0xf]  ;;  %v2241_v24 = vld [vmem:[%s3092_s5 + $0x4b8] sm:$0xf] }
  0x83   : > { %2238 = vst [vmem:[%s3097_s6 + $0x248] sm:$0xf] %v2237_v22  ;;  %2240 = vst [vmem:[%s3097_s6 + $0x254] sm:$0xf] %v2239_v23  ;;  %v2243_v25 = vld [vmem:[%s3092_s5 + $0x4d0] sm:$0xf] }
  0x84   : > { %2242 = vst [vmem:[%s3097_s6 + $0x260] sm:$0xf] %v2241_v24  ;;  %v2245_v26 = vld [vmem:[%s3092_s5 + $0x4e8] sm:$0xf]  ;;  %v2247_v27 = vld [vmem:[%s3092_s5 + $0x500] sm:$0xf] }
  0x85   : > { %2244 = vst [vmem:[%s3097_s6 + $0x26c] sm:$0xf] %v2243_v25  ;;  %2246 = vst [vmem:[%s3097_s6 + $0x278] sm:$0xf] %v2245_v26  ;;  %v2249_v28 = vld [vmem:[%s3092_s5 + $0x518] sm:$0xf] }
  0x86   : > { %2248 = vst [vmem:[%s3097_s6 + $0x284] sm:$0xf] %v2247_v27  ;;  %v2251_v29 = vld [vmem:[%s3092_s5 + $0x530] sm:$0xf]  ;;  %v2253_v30 = vld [vmem:[%s3092_s5 + $0x548] sm:$0xf] }
  0x87   : > { %2250 = vst [vmem:[%s3097_s6 + $0x290] sm:$0xf] %v2249_v28  ;;  %2252 = vst [vmem:[%s3097_s6 + $0x29c] sm:$0xf] %v2251_v29  ;;  %v2255_v31 = vld [vmem:[%s3092_s5 + $0x560] sm:$0xf] }
  0x88   : > { %2254 = vst [vmem:[%s3097_s6 + $0x2a8] sm:$0xf] %v2253_v30  ;;  %v2257_v32 = vld [vmem:[%s3092_s5 + $0x578] sm:$0xf]  ;;  %v2259_v33 = vld [vmem:[%s3092_s5 + $0x590] sm:$0xf] }
  0x89   : > { %2256 = vst [vmem:[%s3097_s6 + $0x2b4] sm:$0xf] %v2255_v31  ;;  %2258 = vst [vmem:[%s3097_s6 + $0x2c0] sm:$0xf] %v2257_v32  ;;  %v2261_v34 = vld [vmem:[%s3092_s5 + $0x5a8] sm:$0xf] }
  0x8a   : > { %2260 = vst [vmem:[%s3097_s6 + $0x2cc] sm:$0xf] %v2259_v33  ;;  %v2263_v35 = vld [vmem:[%s3092_s5 + $0x5c0] sm:$0xf]  ;;  %v2265_v36 = vld [vmem:[%s3092_s5 + $0x5d8] sm:$0xf] }
  0x8b   : > { %2262 = vst [vmem:[%s3097_s6 + $0x2d8] sm:$0xf] %v2261_v34  ;;  %2264 = vst [vmem:[%s3097_s6 + $0x2e4] sm:$0xf] %v2263_v35  ;;  %v2267_v37 = vld [vmem:[%s3092_s5 + $0x5f0] sm:$0xf] }
  0x8c   : > { %2266 = vst [vmem:[%s3097_s6 + $0x2f0] sm:$0xf] %v2265_v36  ;;  %v2269_v38 = vld [vmem:[%s3092_s5 + $0x608] sm:$0xf]  ;;  %v2271_v39 = vld [vmem:[%s3092_s5 + $0x620] sm:$0xf] }
  0x8d   : > { %2268 = vst [vmem:[%s3097_s6 + $0x2fc] sm:$0xf] %v2267_v37  ;;  %2270 = vst [vmem:[%s3097_s6 + $0x308] sm:$0xf] %v2269_v38  ;;  %v2273_v40 = vld [vmem:[%s3092_s5 + $0x638] sm:$0xf] }
  0x8e   : > { %2272 = vst [vmem:[%s3097_s6 + $0x314] sm:$0xf] %v2271_v39  ;;  %v2275_v41 = vld [vmem:[%s3092_s5 + $0x650] sm:$0xf]  ;;  %v2277_v42 = vld [vmem:[%s3092_s5 + $0x668] sm:$0xf] }
  0x8f   : > { %2274 = vst [vmem:[%s3097_s6 + $0x320] sm:$0xf] %v2273_v40  ;;  %2276 = vst [vmem:[%s3097_s6 + $0x32c] sm:$0xf] %v2275_v41  ;;  %v2279_v43 = vld [vmem:[%s3092_s5 + $0x680] sm:$0xf] }
  0x90   : > { %2278 = vst [vmem:[%s3097_s6 + $0x338] sm:$0xf] %v2277_v42  ;;  %v2281_v44 = vld [vmem:[%s3092_s5 + $0x698] sm:$0xf]  ;;  %v2283_v45 = vld [vmem:[%s3092_s5 + $0x6b0] sm:$0xf] }
  0x91   : > { %2280 = vst [vmem:[%s3097_s6 + $0x344] sm:$0xf] %v2279_v43  ;;  %2282 = vst [vmem:[%s3097_s6 + $0x350] sm:$0xf] %v2281_v44  ;;  %v2285_v46 = vld [vmem:[%s3092_s5 + $0x6c8] sm:$0xf] }
  0x92   : > { %2284 = vst [vmem:[%s3097_s6 + $0x35c] sm:$0xf] %v2283_v45  ;;  %v2287_v47 = vld [vmem:[%s3092_s5 + $0x6e0] sm:$0xf]  ;;  %v2289_v48 = vld [vmem:[%s3092_s5 + $0x6f8] sm:$0xf] }
  0x93   : > { %2286 = vst [vmem:[%s3097_s6 + $0x368] sm:$0xf] %v2285_v46  ;;  %2288 = vst [vmem:[%s3097_s6 + $0x374] sm:$0xf] %v2287_v47  ;;  %v2291_v49 = vld [vmem:[%s3092_s5 + $0x710] sm:$0xf] }
  0x94   : > { %2290 = vst [vmem:[%s3097_s6 + $0x380] sm:$0xf] %v2289_v48  ;;  %v2293_v50 = vld [vmem:[%s3092_s5 + $0x728] sm:$0xf]  ;;  %v2295_v51 = vld [vmem:[%s3092_s5 + $0x740] sm:$0xf] }
  0x95   : > { %2292 = vst [vmem:[%s3097_s6 + $0x38c] sm:$0xf] %v2291_v49  ;;  %2294 = vst [vmem:[%s3097_s6 + $0x398] sm:$0xf] %v2293_v50  ;;  %v2297_v52 = vld [vmem:[%s3092_s5 + $0x758] sm:$0xf] }
  0x96   : > { %2296 = vst [vmem:[%s3097_s6 + $0x3a4] sm:$0xf] %v2295_v51  ;;  %v2299_v53 = vld [vmem:[%s3092_s5 + $0x770] sm:$0xf]  ;;  %v2301_v54 = vld [vmem:[%s3092_s5 + $0x788] sm:$0xf] }
  0x97   : > { %2298 = vst [vmem:[%s3097_s6 + $0x3b0] sm:$0xf] %v2297_v52  ;;  %2300 = vst [vmem:[%s3097_s6 + $0x3bc] sm:$0xf] %v2299_v53  ;;  %v2303_v55 = vld [vmem:[%s3092_s5 + $0x7a0] sm:$0xf] }
  0x98   : > { %2302 = vst [vmem:[%s3097_s6 + $0x3c8] sm:$0xf] %v2301_v54  ;;  %v2305_v56 = vld [vmem:[%s3092_s5 + $0x7b8] sm:$0xf]  ;;  %v2307_v57 = vld [vmem:[%s3092_s5 + $0x7d0] sm:$0xf] }
  0x99   : > { %2304 = vst [vmem:[%s3097_s6 + $0x3d4] sm:$0xf] %v2303_v55  ;;  %2306 = vst [vmem:[%s3097_s6 + $0x3e0] sm:$0xf] %v2305_v56  ;;  %v2309_v58 = vld [vmem:[%s3092_s5 + $0x7e8] sm:$0xf] }
  0x9a   : > { %2308 = vst [vmem:[%s3097_s6 + $0x3ec] sm:$0xf] %v2307_v57  ;;  %v2311_v59 = vld [vmem:[%s3092_s5 + $0x800] sm:$0xf]  ;;  %v2313_v60 = vld [vmem:[%s3092_s5 + $0x818] sm:$0xf] }
  0x9b   : > { %2310 = vst [vmem:[%s3097_s6 + $0x3f8] sm:$0xf] %v2309_v58  ;;  %2312 = vst [vmem:[%s3097_s6 + $0x404] sm:$0xf] %v2311_v59  ;;  %v2315_v61 = vld [vmem:[%s3092_s5 + $0x830] sm:$0xf] }
  0x9c   : > { %2314 = vst [vmem:[%s3097_s6 + $0x410] sm:$0xf] %v2313_v60  ;;  %v2317_v62 = vld [vmem:[%s3092_s5 + $0x848] sm:$0xf]  ;;  %v2319_v63 = vld [vmem:[%s3092_s5 + $0x860] sm:$0xf] }
  0x9d   : > { %2316 = vst [vmem:[%s3097_s6 + $0x41c] sm:$0xf] %v2315_v61  ;;  %2318 = vst [vmem:[%s3097_s6 + $0x428] sm:$0xf] %v2317_v62  ;;  %v2321_v0 = vld [vmem:[%s3092_s5 + $0x878] sm:$0xf] }
  0x9e   : > { %2320 = vst [vmem:[%s3097_s6 + $0x434] sm:$0xf] %v2319_v63  ;;  %v2323_v1 = vld [vmem:[%s3092_s5 + $0x890] sm:$0xf]  ;;  %v2325_v2 = vld [vmem:[%s3092_s5 + $0x8a8] sm:$0xf] }
  0x9f   : > { %2322 = vst [vmem:[%s3097_s6 + $0x440] sm:$0xf] %v2321_v0  ;;  %2324 = vst [vmem:[%s3097_s6 + $0x44c] sm:$0xf] %v2323_v1  ;;  %v2327_v3 = vld [vmem:[%s3092_s5 + $0x8c0] sm:$0xf] }
  0xa0   : > { %2326 = vst [vmem:[%s3097_s6 + $0x458] sm:$0xf] %v2325_v2  ;;  %v2329_v4 = vld [vmem:[%s3092_s5 + $0x8d8] sm:$0xf]  ;;  %v2331_v5 = vld [vmem:[%s3092_s5 + $0x8f0] sm:$0xf] }
  0xa1   : > { %2328 = vst [vmem:[%s3097_s6 + $0x464] sm:$0xf] %v2327_v3  ;;  %2330 = vst [vmem:[%s3097_s6 + $0x470] sm:$0xf] %v2329_v4 }
  0xa2   : > { %2332 = vst [vmem:[%s3097_s6 + $0x47c] sm:$0xf] %v2331_v5 }
  0xa3 PF: > { %p2333_p0 = scmp.ge.s32.totalorder %s2954_s22, 1  ;;  %p604_p1 = scmp.lt.s32.totalorder %s2954_s22, 5 }
  0xa5   : > { %p605_p2 = pnand %p2333_p0, %p604_p1 }
  0xa6   : > { %s611_s0 = sand.u32 (!%p605_p2), 1, %s2930_s16   ;;  %s618_s23 = sand.u32 (!%p605_p2), 1, %s2922_s14  }
  0xa7   : > { %608 = sbr.rel (%p605_p2) target bundleno = 696 (0x2b8), region = 73  ;;  %s641_s7 = sand.u32 (!%p605_p2), 1, %s2914_s12  }
  0xa8   : > { %s2572_s28 = smul.u32 (!%p605_p2), 48, %s611_s0  ;;  %p2334_p3 = scmp.ne.s32.totalorder (!%p605_p2), %s2938_s18, 0 }
  0xa9   : > { %s2573_s11 = smul.u32 (!%p605_p2), 1152, %s618_s23 }
  0xaa   : > { %s2574_s26 = smul.u32 (!%p605_p2), 24, %s641_s7  ;;  %s3485_s27 = scalar_lea.vmem (!%p605_p2), [#allocation3], %s2572_s28 }
  0xab   : > { %s3487_s29 = scalar_lea.vmem (!%p605_p2), [#allocation4], %s2573_s11 }
  0xac   : > { %s3489_s4 = scalar_lea.vmem [#allocation5], %s2574_s26  ;;  %652 = sbr.rel (%p2334_p3) target bundleno = 181 (0xb5), region = 85 }
  0xb1   : > { %v2956_v6 = vmov 0.0  }
  0xb2   : > { %653 = vst [vmem:[#allocation2 + $0x28] sm:$0xff] %v2956_v6  ;;  %654 = vst [vmem:[#allocation2 + $0x10] sm:$0xff] %v2956_v6 }
  0xb3   : > { %655 = vst [vmem:[#allocation2 + $0x8] sm:$0xff] %v2956_v6  ;;  %656 = vst [vmem:[#allocation2] sm:$0xff] %v2956_v6 }
  0xb4   : > { %657 = vst [vmem:[#allocation2 + $0x18] sm:$0xff] %v2956_v6  ;;  %658 = vst [vmem:[#allocation2 + $0x20] sm:$0xff] %v2956_v6 }
  0xb5 PF: > { %v2666_v7 = vld [vmem:[%s3487_s29 + $0xac] ss:$12 sps:$4 sm:$0xff]   ;;  %v2670_v9 = vld [vmem:[%s3487_s29 + $0xa8] ss:$12 sps:$4 sm:$0xff]   ;;  %v2676_v13 = vld [vmem:[%s3487_s29 + $0x90] ss:$12 sps:$4 sm:$0xff]  }
  0xb6   : > { %v2668_v8 = vld [vmem:[%s3487_s29 + $0x22c] ss:$12 sps:$4 sm:$0xff]   ;;  %1661 = vmatprep.subr.bf16.mxu0 %v2666_v7  ;;  %v2671_v10 = vld [vmem:[%s3487_s29 + $0x228] ss:$12 sps:$4 sm:$0xff]   ;;  %v2677_v14 = vld [vmem:[%s3487_s29 + $0x210] ss:$12 sps:$4 sm:$0xff]  }
  0xb7   : > { %1704 = vmatprep.subr.bf16.mxu1 %v2668_v8  ;;  %v2672_v11 = vld [vmem:[%s3487_s29 + $0x94] ss:$12 sps:$4 sm:$0xff]   ;;  %1662 = vmatpush1.bf16.msra.mxu0 %v2670_v9  ;;  %v2678_v15 = vld [vmem:[%s3487_s29 + $0x7c] ss:$12 sps:$4 sm:$0xff]   ;;  %v2682_v17 = vld [vmem:[%s3487_s29 + $0x78] ss:$12 sps:$4 sm:$0xff]  }
  0xb8   : > { %1705 = vmatpush1.bf16.msra.mxu1 %v2671_v10  ;;  %v2674_v12 = vld [vmem:[%s3487_s29 + $0x214] ss:$12 sps:$4 sm:$0xff]   ;;  %1663 = vmatprep.subr.bf16.mxu0 %v2672_v11  ;;  %v2680_v16 = vld [vmem:[%s3487_s29 + $0x1fc] ss:$12 sps:$4 sm:$0xff]   ;;  %v2683_v18 = vld [vmem:[%s3487_s29 + $0x1f8] ss:$12 sps:$4 sm:$0xff]  }
  0xb9   : > { %1706 = vmatprep.subr.bf16.mxu1 %v2674_v12  ;;  %v2684_v19 = vld [vmem:[%s3487_s29 + $0x64] ss:$12 sps:$4 sm:$0xff]   ;;  %v2688_v21 = vld [vmem:[%s3487_s29 + $0x60] ss:$12 sps:$4 sm:$0xff]   ;;  %v2694_v25 = vld [vmem:[%s3487_s29 + $0x48] ss:$12 sps:$4 sm:$0xff]  }
  0xba   : > { %v2686_v20 = vld [vmem:[%s3487_s29 + $0x1e4] ss:$12 sps:$4 sm:$0xff]   ;;  %v2689_v22 = vld [vmem:[%s3487_s29 + $0x1e0] ss:$12 sps:$4 sm:$0xff]   ;;  %v2695_v26 = vld [vmem:[%s3487_s29 + $0x1c8] ss:$12 sps:$4 sm:$0xff]  }
  0xbb   : > { %1664 = vmatpush1.bf16.msra.mxu0 %v2676_v13  ;;  %v2690_v23 = vld [vmem:[%s3487_s29 + $0x4c] ss:$12 sps:$4 sm:$0xff]   ;;  %v2696_v27 = vld [vmem:[%s3487_s29 + $0x34] ss:$12 sps:$4 sm:$0xff]   ;;  %v2700_v29 = vld [vmem:[%s3487_s29 + $0x30] ss:$12 sps:$4 sm:$0xff]  }
  0xbc   : > { %1707 = vmatpush1.bf16.msra.mxu1 %v2677_v14  ;;  %1665 = vmatprep.subr.bf16.mxu0 %v2678_v15  ;;  %v2692_v24 = vld [vmem:[%s3487_s29 + $0x1cc] ss:$12 sps:$4 sm:$0xff]   ;;  %v2698_v28 = vld [vmem:[%s3487_s29 + $0x1b4] ss:$12 sps:$4 sm:$0xff]   ;;  %v2701_v30 = vld [vmem:[%s3487_s29 + $0x1b0] ss:$12 sps:$4 sm:$0xff]  }
  0xbd   : > { %1708 = vmatprep.subr.bf16.mxu1 %v2680_v16  ;;  %v2702_v31 = vld [vmem:[%s3487_s29 + $0x1c] ss:$12 sps:$4 sm:$0xff]   ;;  %v2706_v33 = vld [vmem:[%s3487_s29 + $0x18] ss:$12 sps:$4 sm:$0xff]   ;;  %v2712_v37 = vld [vmem:[%s3487_s29] ss:$12 sps:$4 sm:$0xff]  }
  0xbe   : > { %v2704_v32 = vld [vmem:[%s3487_s29 + $0x19c] ss:$12 sps:$4 sm:$0xff]   ;;  %v2707_v34 = vld [vmem:[%s3487_s29 + $0x198] ss:$12 sps:$4 sm:$0xff]   ;;  %v2713_v38 = vld [vmem:[%s3487_s29 + $0x180] ss:$12 sps:$4 sm:$0xff]  }
  0xbf   : > { %1666 = vmatpush1.bf16.msra.mxu0 %v2682_v17  ;;  %v2708_v35 = vld [vmem:[%s3487_s29 + $0x4] ss:$12 sps:$4 sm:$0xff]   ;;  %v2714_v39 = vld [vmem:[%s3487_s29 + $0x16c] ss:$12 sps:$4 sm:$0xff]   ;;  %v2718_v41 = vld [vmem:[%s3487_s29 + $0x168] ss:$12 sps:$4 sm:$0xff]  }
  0xc0   : > { %1709 = vmatpush1.bf16.msra.mxu1 %v2683_v18  ;;  %1667 = vmatprep.subr.bf16.mxu0 %v2684_v19  ;;  %v2710_v36 = vld [vmem:[%s3487_s29 + $0x184] ss:$12 sps:$4 sm:$0xff]   ;;  %v2716_v40 = vld [vmem:[%s3487_s29 + $0x2ec] ss:$12 sps:$4 sm:$0xff]   ;;  %v2719_v42 = vld [vmem:[%s3487_s29 + $0x2e8] ss:$12 sps:$4 sm:$0xff]  }
  0xc1   : > { %1710 = vmatprep.subr.bf16.mxu1 %v2686_v20  ;;  %v2720_v43 = vld [vmem:[%s3487_s29 + $0x154] ss:$12 sps:$4 sm:$0xff]   ;;  %v2724_v45 = vld [vmem:[%s3487_s29 + $0x150] ss:$12 sps:$4 sm:$0xff]   ;;  %v2730_v49 = vld [vmem:[%s3487_s29 + $0x138] ss:$12 sps:$4 sm:$0xff]  }
  0xc2   : > { %v2722_v44 = vld [vmem:[%s3487_s29 + $0x2d4] ss:$12 sps:$4 sm:$0xff]   ;;  %v2725_v46 = vld [vmem:[%s3487_s29 + $0x2d0] ss:$12 sps:$4 sm:$0xff]   ;;  %v2731_v50 = vld [vmem:[%s3487_s29 + $0x2b8] ss:$12 sps:$4 sm:$0xff]  }
  0xc3   : > { %1668 = vmatpush1.bf16.msra.mxu0 %v2688_v21  ;;  %v2726_v47 = vld [vmem:[%s3487_s29 + $0x13c] ss:$12 sps:$4 sm:$0xff]   ;;  %v2732_v51 = vld [vmem:[%s3487_s29 + $0x124] ss:$12 sps:$4 sm:$0xff]   ;;  %v2736_v53 = vld [vmem:[%s3487_s29 + $0x120] ss:$12 sps:$4 sm:$0xff]  }
  0xc4   : > { %1711 = vmatpush1.bf16.msra.mxu1 %v2689_v22  ;;  %1669 = vmatprep.subr.bf16.mxu0 %v2690_v23  ;;  %v2728_v48 = vld [vmem:[%s3487_s29 + $0x2bc] ss:$12 sps:$4 sm:$0xff]   ;;  %v2734_v52 = vld [vmem:[%s3487_s29 + $0x2a4] ss:$12 sps:$4 sm:$0xff]   ;;  %v2737_v54 = vld [vmem:[%s3487_s29 + $0x2a0] ss:$12 sps:$4 sm:$0xff]  }
  0xc5   : > { %1712 = vmatprep.subr.bf16.mxu1 %v2692_v24  ;;  %v2738_v55 = vld [vmem:[%s3487_s29 + $0x10c] ss:$12 sps:$4 sm:$0xff]   ;;  %v2742_v59 = vld [vmem:[%s3487_s29 + $0x108] ss:$12 sps:$4 sm:$0xff]   ;;  %v2748_v63 = vld [vmem:[%s3487_s29 + $0xf0] ss:$12 sps:$4 sm:$0xff]  }
  0xc6   : > { %v2764_v56 = vld [vmem:[%s3485_s27 + $0x4] ss:$24 sps:$4 sm:$0xff]   ;;  %v3563_v10 = vld [vmem:[%s3485_s27] ss:$24 sps:$4 sm:$0xff]   ;;  %p2485_p4 = scmp.ne.s32.totalorder %s2938_s18, 1 }
  0xc7   : > { %1670 = vmatpush1.bf16.msra.mxu0 %v2694_v25  ;;  %v2740_v57 = vld [vmem:[%s3487_s29 + $0x28c] ss:$12 sps:$4 sm:$0xff]   ;;  %1693 = vmatprep.mubr.bf16.mxu0 %v2764_v56  ;;  %v2743_v60 = vld [vmem:[%s3487_s29 + $0x288] ss:$12 sps:$4 sm:$0xff]   ;;  %v2749_v0 = vld [vmem:[%s3487_s29 + $0x270] ss:$12 sps:$4 sm:$0xff]  }
  0xc8   : > { %1713 = vmatpush1.bf16.msra.mxu1 %v2695_v26  ;;  %1671 = vmatprep.subr.bf16.mxu0 %v2696_v27  ;;  %v3544_v58 = vld [vmem:[%s3485_s27 + $0xc] ss:$24 sps:$4 sm:$0xff]   ;;  %v3566_v11 = vld [vmem:[%s3485_s27 + $0x8] ss:$24 sps:$4 sm:$0xff]  }
  0xc9   : > { %1714 = vmatprep.subr.bf16.mxu1 %v2698_v28  ;;  %1736 = vmatprep.mubr.bf16.mxu1 %v3544_v58  ;;  %v2744_v61 = vld [vmem:[%s3487_s29 + $0xf4] ss:$12 sps:$4 sm:$0xff]   ;;  %v2750_v1 = vld [vmem:[%s3487_s29 + $0xdc] ss:$12 sps:$4 sm:$0xff]   ;;  %v2754_v3 = vld [vmem:[%s3487_s29 + $0xd8] ss:$12 sps:$4 sm:$0xff]  }
  0xca   : > { %v2746_v62 = vld [vmem:[%s3487_s29 + $0x274] ss:$12 sps:$4 sm:$0xff]   ;;  %v2752_v2 = vld [vmem:[%s3487_s29 + $0x25c] ss:$12 sps:$4 sm:$0xff]   ;;  %v2755_v4 = vld [vmem:[%s3487_s29 + $0x258] ss:$12 sps:$4 sm:$0xff]  }
  0xcb   : > { %1672 = vmatpush1.bf16.msra.mxu0 %v2700_v29  ;;  %v2756_v5 = vld [vmem:[%s3487_s29 + $0xc4] ss:$12 sps:$4 sm:$0xff]   ;;  %v2760_v7 = vld [vmem:[%s3487_s29 + $0xc0] ss:$12 sps:$4 sm:$0xff]   ;;  %v2768_v13 = vld [vmem:[%s3487_s29 + $0x3a8] ss:$12 sps:$4 sm:$0xff]  }
  0xcc   : > { %1715 = vmatpush1.bf16.msra.mxu1 %v2701_v30  ;;  %1673 = vmatprep.subr.bf16.mxu0 %v2702_v31  ;;  %v2758_v6 = vld [vmem:[%s3487_s29 + $0x244] ss:$12 sps:$4 sm:$0xff]   ;;  %v2761_v8 = vld [vmem:[%s3487_s29 + $0x240] ss:$12 sps:$4 sm:$0xff]   ;;  %v2780_v19 = vld [vmem:[%s3487_s29 + $0x37c] ss:$12 sps:$4 sm:$0xff]  }
  0xcd   : > { %1716 = vmatprep.subr.bf16.mxu1 %v2704_v32  ;;  %v2770_v9 = vld [vmem:[%s3487_s29 + $0x3ac] ss:$12 sps:$4 sm:$0xff]   ;;  %v2771_v12 = vld [vmem:[%s3487_s29 + $0x170] ss:$12 sps:$4 sm:$0xff]   ;;  %v2775_v15 = vld [vmem:[%s3487_s29 + $0x394] ss:$12 sps:$4 sm:$0xff]  }
  0xce   : > { %v2772_v14 = vld [vmem:[%s3487_s29 + $0xb0] ss:$12 sps:$4 sm:$0xff]   ;;  %v2776_v16 = vld [vmem:[%s3487_s29 + $0x158] ss:$12 sps:$4 sm:$0xff]   ;;  %v2781_v20 = vld [vmem:[%s3487_s29 + $0x140] ss:$12 sps:$4 sm:$0xff]  }
  0xcf   : > { %1674 = vmatpush1.bf16.msra.mxu0 %v2706_v33  ;;  %v2773_v17 = vld [vmem:[%s3487_s29 + $0x390] ss:$12 sps:$4 sm:$0xff]   ;;  %v2777_v18 = vld [vmem:[%s3487_s29 + $0x98] ss:$12 sps:$4 sm:$0xff]   ;;  %v2782_v22 = vld [vmem:[%s3487_s29 + $0x80] ss:$12 sps:$4 sm:$0xff]  }
  0xd0   : > { %1717 = vmatpush1.bf16.msra.mxu1 %v2707_v34  ;;  %1675 = vmatprep.subr.bf16.mxu0 %v2708_v35  ;;  %v2778_v21 = vld [vmem:[%s3487_s29 + $0x378] ss:$12 sps:$4 sm:$0xff]   ;;  %v2786_v24 = vld [vmem:[%s3487_s29 + $0x128] ss:$12 sps:$4 sm:$0xff]   ;;  %v2783_v25 = vld [vmem:[%s3487_s29 + $0x360] ss:$12 sps:$4 sm:$0xff]  }
  0xd1   : > { %1718 = vmatprep.subr.bf16.mxu1 %v2710_v36  ;;  %v2785_v23 = vld [vmem:[%s3487_s29 + $0x364] ss:$12 sps:$4 sm:$0xff]   ;;  %v2787_v26 = vld [vmem:[%s3487_s29 + $0x68] ss:$12 sps:$4 sm:$0xff]   ;;  %v2790_v27 = vld [vmem:[%s3487_s29 + $0x34c] ss:$12 sps:$4 sm:$0xff]  }
  0xd2   : > { %v2791_v28 = vld [vmem:[%s3487_s29 + $0x110] ss:$12 sps:$4 sm:$0xff]   ;;  %v2788_v29 = vld [vmem:[%s3487_s29 + $0x348] ss:$12 sps:$4 sm:$0xff]   ;;  %v2796_v32 = vld [vmem:[%s3487_s29 + $0xf8] ss:$12 sps:$4 sm:$0xff]  }
  0xd3   : > { %1676 = vmatpush1.bf16.msra.mxu0 %v2712_v37  ;;  %v2792_v30 = vld [vmem:[%s3487_s29 + $0x50] ss:$12 sps:$4 sm:$0xff]   ;;  %v2795_v31 = vld [vmem:[%s3487_s29 + $0x334] ss:$12 sps:$4 sm:$0xff]   ;;  %v2797_v34 = vld [vmem:[%s3487_s29 + $0x38] ss:$12 sps:$4 sm:$0xff]  }
  0xd4   : > { %1719 = vmatpush1.bf16.msra.mxu1 %v2713_v38  ;;  %1677 = vmatprep.subr.bf16.mxu0 %v2714_v39  ;;  %v2793_v33 = vld [vmem:[%s3487_s29 + $0x330] ss:$12 sps:$4 sm:$0xff]   ;;  %v2801_v36 = vld [vmem:[%s3487_s29 + $0xe0] ss:$12 sps:$4 sm:$0xff]   ;;  %v2798_v37 = vld [vmem:[%s3487_s29 + $0x318] ss:$12 sps:$4 sm:$0xff]  }
  0xd5   : > { %1720 = vmatprep.subr.bf16.mxu1 %v2716_v40  ;;  %v2800_v35 = vld [vmem:[%s3487_s29 + $0x31c] ss:$12 sps:$4 sm:$0xff]   ;;  %v2802_v38 = vld [vmem:[%s3487_s29 + $0x20] ss:$12 sps:$4 sm:$0xff]   ;;  %v2805_v39 = vld [vmem:[%s3487_s29 + $0x304] ss:$12 sps:$4 sm:$0xff]  }
  0xd6   : > { %v2806_v40 = vld [vmem:[%s3487_s29 + $0xc8] ss:$12 sps:$4 sm:$0xff]  }
  0xd7   : > { %1678 = vmatpush2.bf16.msra.mxu0 %v2718_v41  ;;  %v2803_v41 = vld [vmem:[%s3487_s29 + $0x300] ss:$12 sps:$4 sm:$0xff]  }
  0xd8   : > { %1721 = vmatpush2.bf16.msra.mxu1 %v2719_v42  ;;  %1679 = vmatprep.subr.bf16.mxu0 %v2720_v43  ;;  %v2807_v42 = vld [vmem:[%s3487_s29 + $0x8] ss:$12 sps:$4 sm:$0xff]   ;;  %v2810_v43 = vld [vmem:[%s3487_s29 + $0x46c] ss:$12 sps:$4 sm:$0xff]  }
  0xd9   : > { %1722 = vmatprep.subr.bf16.mxu1 %v2722_v44  ;;  %v2811_v44 = vld [vmem:[%s3487_s29 + $0x2f0] ss:$12 sps:$4 sm:$0xff]  }
  0xdb   : > { %1680 = vmatpush2.bf16.msra.mxu0 %v2724_v45  ;;  %v2808_v45 = vld [vmem:[%s3487_s29 + $0x468] ss:$12 sps:$4 sm:$0xff]  }
  0xdc   : > { %1723 = vmatpush2.bf16.msra.mxu1 %v2725_v46  ;;  %1681 = vmatprep.subr.bf16.mxu0 %v2726_v47  ;;  %v2812_v46 = vld [vmem:[%s3487_s29 + $0x230] ss:$12 sps:$4 sm:$0xff]   ;;  %v2815_v47 = vld [vmem:[%s3487_s29 + $0x454] ss:$12 sps:$4 sm:$0xff]  }
  0xdd   : > { %1724 = vmatprep.subr.bf16.mxu1 %v2728_v48  ;;  %v2816_v48 = vld [vmem:[%s3487_s29 + $0x2d8] ss:$12 sps:$4 sm:$0xff]  }
  0xdf   : > { %1682 = vmatpush2.bf16.msra.mxu0 %v2730_v49  ;;  %v2813_v49 = vld [vmem:[%s3487_s29 + $0x450] ss:$12 sps:$4 sm:$0xff]  }
  0xe0   : > { %1725 = vmatpush2.bf16.msra.mxu1 %v2731_v50  ;;  %1683 = vmatprep.subr.bf16.mxu0 %v2732_v51  ;;  %v2817_v50 = vld [vmem:[%s3487_s29 + $0x218] ss:$12 sps:$4 sm:$0xff]  }
  0xe1   : > { %1726 = vmatprep.subr.bf16.mxu1 %v2734_v52  ;;  %v3611_v51 = vld [vmem:[%s3485_s27 + $0x14] ss:$24 sps:$4 sm:$0xff]  }
  0xe2   : > { %v2820_v52 = vld [vmem:[%s3487_s29 + $0x43c] ss:$12 sps:$4 sm:$0xff]  }
  0xe3   : > { %1684 = vmatpush2.bf16.msra.mxu0 %v2736_v53  ;;  %v2821_v53 = vld [vmem:[%s3487_s29 + $0x2c0] ss:$12 sps:$4 sm:$0xff]  }
  0xe4   : > { %1727 = vmatpush2.bf16.msra.mxu1 %v2737_v54  ;;  %1685 = vmatprep.subr.bf16.mxu0 %v2738_v55  ;;  %v2818_v54 = vld [vmem:[%s3487_s29 + $0x438] ss:$12 sps:$4 sm:$0xff]   ;;  %v2822_v55 = vld [vmem:[%s3487_s29 + $0x200] ss:$12 sps:$4 sm:$0xff]  }
  0xe5   : > { %1728 = vmatprep.subr.bf16.mxu1 %v2740_v57  ;;  %v2826_v57 = vld [vmem:[%s3487_s29 + $0x2a8] ss:$12 sps:$4 sm:$0xff]  }
  0xe7   : > { %1686 = vmatpush2.bf16.msra.mxu0 %v2742_v59  ;;  %v2823_v59 = vld [vmem:[%s3487_s29 + $0x420] ss:$12 sps:$4 sm:$0xff]  }
  0xe8   : > { %1729 = vmatpush2.bf16.msra.mxu1 %v2743_v60  ;;  %1687 = vmatprep.subr.bf16.mxu0 %v2744_v61  ;;  %v2827_v60 = vld [vmem:[%s3487_s29 + $0x1e8] ss:$12 sps:$4 sm:$0xff]   ;;  %v2830_v61 = vld [vmem:[%s3487_s29 + $0x40c] ss:$12 sps:$4 sm:$0xff]  }
  0xe9   : > { %1730 = vmatprep.subr.bf16.mxu1 %v2746_v62  ;;  %v2828_v62 = vld [vmem:[%s3487_s29 + $0x408] ss:$12 sps:$4 sm:$0xff]  }
  0xeb   : > { %1688 = vmatpush2.bf16.msra.mxu0 %v2748_v63  ;;  %v2832_v63 = vld [vmem:[%s3487_s29 + $0x1d0] ss:$12 sps:$4 sm:$0xff]  }
  0xec   : > { %1731 = vmatpush2.bf16.msra.mxu1 %v2749_v0  ;;  %1689 = vmatprep.subr.bf16.mxu0 %v2750_v1  ;;  %v2835_v0 = vld [vmem:[%s3487_s29 + $0x3f4] ss:$12 sps:$4 sm:$0xff]   ;;  %v2836_v1 = vld [vmem:[%s3487_s29 + $0x278] ss:$12 sps:$4 sm:$0xff]  }
  0xed   : > { %1732 = vmatprep.subr.bf16.mxu1 %v2752_v2  ;;  %v2833_v2 = vld [vmem:[%s3487_s29 + $0x3f0] ss:$12 sps:$4 sm:$0xff]  }
  0xef   : > { %1690 = vmatpush2.bf16.msra.mxu0 %v2754_v3  ;;  %v2837_v3 = vld [vmem:[%s3487_s29 + $0x1b8] ss:$12 sps:$4 sm:$0xff]  }
  0xf0   : > { %1733 = vmatpush2.bf16.msra.mxu1 %v2755_v4  ;;  %1691 = vmatprep.subr.bf16.mxu0 %v2756_v5  ;;  %v2840_v4 = vld [vmem:[%s3487_s29 + $0x3dc] ss:$12 sps:$4 sm:$0xff]   ;;  %v2841_v5 = vld [vmem:[%s3487_s29 + $0x260] ss:$12 sps:$4 sm:$0xff]  }
  0xf1   : > { %1734 = vmatprep.subr.bf16.mxu1 %v2758_v6  ;;  %v2838_v6 = vld [vmem:[%s3487_s29 + $0x3d8] ss:$12 sps:$4 sm:$0xff]  }
  0xf3   : > { %1692 = vmatpush2.bf16.msra.mxu0 %v2760_v7  ;;  %v2842_v7 = vld [vmem:[%s3487_s29 + $0x1a0] ss:$12 sps:$4 sm:$0xff]  }
  0xf4   : > { %1735 = vmatpush2.bf16.msra.mxu1 %v2761_v8  ;;  %1747 = vmatprep.subr.bf16.mxu0 %v2770_v9  ;;  %v2845_v8 = vld [vmem:[%s3487_s29 + $0x3c4] ss:$12 sps:$4 sm:$0xff]   ;;  %v2846_v9 = vld [vmem:[%s3487_s29 + $0x248] ss:$12 sps:$4 sm:$0xff]  }
  0xf5   : > { %2503 = vmatprep.subr.bf16.mxu1 %v2771_v12  ;;  %v2847_v12 = vld [vmem:[%s3487_s29 + $0x188] ss:$12 sps:$4 sm:$0xff]  }
  0xf6   : > { %1694 = vmatmul.mubr.bf16.vlgmr.msra.gmra.mxu0 %v3563_v10 }
  0xf7   : > { %1737 = vmatmul.mubr.bf16.vlgmr.msra.gmra.mxu1 %v3566_v11  ;;  %1748 = vmatpush1.bf16.msra.mxu0 %v2768_v13  ;;  %v2851_v13 = vld [vmem:[%s3487_s29 + $0x470] ss:$12 sps:$4 sm:$0xff]  }
  0xf8   : > { %2504 = vmatpush3.bf16.msra.mxu1 %v2772_v14  ;;  %1749 = vmatprep.subr.bf16.mxu0 %v2775_v15  ;;  %v2848_v14 = vld [vmem:[%s3485_s27 + $0x10] ss:$24 sps:$4 sm:$0xff]  }
  0xf9   : > { %2505 = vmatprep.subr.bf16.mxu1 %v2776_v16  ;;  %1822 = vmatprep.mubr.bf16.mxu1 %v2764_v56  ;;  %v2825_v56 = vld [vmem:[%s3487_s29 + $0x424] ss:$12 sps:$4 sm:$0xff]  }
  0xfa   : > { %1779 = vmatprep.mubr.bf16.mxu0 %v3611_v51  ;;  %v2852_v15 = vld [vmem:[%s3487_s29 + $0x3b0] ss:$12 sps:$4 sm:$0xff]   ;;  %v2853_v16 = vld [vmem:[%s3487_s29 + $0x458] ss:$12 sps:$4 sm:$0xff]  }
  0xfb   : > { %1750 = vmatpush1.bf16.msra.mxu0 %v2773_v17  ;;  %v2854_v17 = vld [vmem:[%s3487_s29 + $0x398] ss:$12 sps:$4 sm:$0xff]  }
  0xfc   : > { %2506 = vmatpush3.bf16.msra.mxu1 %v2777_v18  ;;  %1751 = vmatprep.subr.bf16.mxu0 %v2780_v19  ;;  %v2855_v18 = vld [vmem:[%s3487_s29 + $0x440] ss:$12 sps:$4 sm:$0xff]  }
  0xfd   : > { %2507 = vmatprep.subr.bf16.mxu1 %v2781_v20  ;;  %v2856_v19 = vld [vmem:[%s3487_s29 + $0x380] ss:$12 sps:$4 sm:$0xff]   ;;  %v2857_v20 = vld [vmem:[%s3487_s29 + $0x428] ss:$12 sps:$4 sm:$0xff]  }
  0xff   : > { %1752 = vmatpush1.bf16.msra.mxu0 %v2778_v21  ;;  %v2858_v21 = vld [vmem:[%s3487_s29 + $0x368] ss:$12 sps:$4 sm:$0xff]  }
 0x100   : > { %2508 = vmatpush3.bf16.msra.mxu1 %v2782_v22  ;;  %1753 = vmatprep.subr.bf16.mxu0 %v2785_v23  ;;  %v2860_v22 = vld [vmem:[%s3487_s29 + $0x350] ss:$12 sps:$4 sm:$0xff]   ;;  %v2861_v23 = vld [vmem:[%s3487_s29 + $0x3f8] ss:$12 sps:$4 sm:$0xff]  }
 0x101   : > { %2509 = vmatprep.subr.bf16.mxu1 %v2786_v24  ;;  %v2862_v24 = vld [vmem:[%s3487_s29 + $0x338] ss:$12 sps:$4 sm:$0xff]  }
 0x103   : > { %1754 = vmatpush1.bf16.msra.mxu0 %v2783_v25  ;;  %v2863_v25 = vld [vmem:[%s3487_s29 + $0x3e0] ss:$12 sps:$4 sm:$0xff]  }
 0x104   : > { %2510 = vmatpush3.bf16.msra.mxu1 %v2787_v26  ;;  %1755 = vmatprep.subr.bf16.mxu0 %v2790_v27  ;;  %v2864_v26 = vld [vmem:[%s3487_s29 + $0x320] ss:$12 sps:$4 sm:$0xff]   ;;  %v2865_v27 = vld [vmem:[%s3487_s29 + $0x3c8] ss:$12 sps:$4 sm:$0xff]  }
 0x105   : > { %2511 = vmatprep.subr.bf16.mxu1 %v2791_v28  ;;  %v2866_v28 = vld [vmem:[%s3487_s29 + $0x308] ss:$12 sps:$4 sm:$0xff]  }
 0x107   : > { %1756 = vmatpush1.bf16.msra.mxu0 %v2788_v29 }
 0x108   : > { %2512 = vmatpush3.bf16.msra.mxu1 %v2792_v30  ;;  %1757 = vmatprep.subr.bf16.mxu0 %v2795_v31 }
 0x109   : > { %2513 = vmatprep.subr.bf16.mxu1 %v2796_v32 }
 0x10b   : > { %1758 = vmatpush1.bf16.msra.mxu0 %v2793_v33 }
 0x10c   : > { %2514 = vmatpush3.bf16.msra.mxu1 %v2797_v34  ;;  %1759 = vmatprep.subr.bf16.mxu0 %v2800_v35 }
 0x10d   : > { %2515 = vmatprep.subr.bf16.mxu1 %v2801_v36 }
 0x10f   : > { %1760 = vmatpush1.bf16.msra.mxu0 %v2798_v37  ;;  %v659_v37 = vld [vmem:[#allocation2 + $0x28] sm:$0xff] }
 0x110   : > { %2516 = vmatpush3.bf16.msra.mxu1 %v2802_v38  ;;  %1761 = vmatprep.subr.bf16.mxu0 %v2805_v39 }
 0x111   : > { %2517 = vmatprep.subr.bf16.mxu1 %v2806_v40 }
 0x113   : > { %1762 = vmatpush1.bf16.msra.mxu0 %v2803_v41 }
 0x114   : > { %2518 = vmatpush3.bf16.msra.mxu1 %v2807_v42  ;;  %1763 = vmatprep.subr.bf16.mxu0 %v2810_v43  ;;  %v660_v42 = vld [vmem:[#allocation2 + $0x10] sm:$0xff] }
 0x115   : > { %2525 = vmatprep.subr.bf16.mxu1 %v2811_v44 }
 0x117   : > { %1823 = vmatmul.mubr.bf16.vlgmr.msra.gmra.mxu1 %v3563_v10  ;;  %1764 = vmatpush2.bf16.msra.mxu0 %v2808_v45  ;;  %v2843_v10 = vld [vmem:[%s3487_s29 + $0x3c0] ss:$12 sps:$4 sm:$0xff]  }
 0x118   : > { %2526 = vmatpush3.bf16.msra.mxu1 %v2812_v46  ;;  %1765 = vmatprep.subr.bf16.mxu0 %v2815_v47 }
 0x119   : > { %2527 = vmatprep.subr.bf16.mxu1 %v2816_v48  ;;  %1863 = vmatprep.mubr.bf16.mxu1 %v3544_v58  ;;  %v2831_v58 = vld [vmem:[%s3487_s29 + $0x290] ss:$12 sps:$4 sm:$0xff]  }
 0x11a   : > { %v662_v48 = vld [vmem:[#allocation2] sm:$0xff] }
 0x11b   : > { %1766 = vmatpush2.bf16.msra.mxu0 %v2813_v49 }
 0x11c   : > { %2528 = vmatpush3.bf16.msra.mxu1 %v2817_v50  ;;  %1767 = vmatprep.subr.bf16.mxu0 %v2820_v52 }
 0x11d   : > { %2529 = vmatprep.subr.bf16.mxu1 %v2821_v53  ;;  %v663_v53 = vld [vmem:[#allocation2 + $0x18] sm:$0xff] }
 0x11f   : > { %1768 = vmatpush2.bf16.msra.mxu0 %v2818_v54 }
 0x120   : > { %2530 = vmatpush3.bf16.msra.mxu1 %v2822_v55  ;;  %1769 = vmatprep.subr.bf16.mxu0 %v2825_v56 }
 0x121   : > { %2531 = vmatprep.subr.bf16.mxu1 %v2826_v57 }
 0x123   : > { %1770 = vmatpush2.bf16.msra.mxu0 %v2823_v59 }
 0x124   : > { %2532 = vmatpush3.bf16.msra.mxu1 %v2827_v60  ;;  %1771 = vmatprep.subr.bf16.mxu0 %v2830_v61 }
 0x125   : > { %2533 = vmatprep.subr.bf16.mxu1 %v2831_v58 }
 0x127   : > { %1772 = vmatpush2.bf16.msra.mxu0 %v2828_v62 }
 0x128   : > { %2534 = vmatpush3.bf16.msra.mxu1 %v2832_v63  ;;  %1773 = vmatprep.subr.bf16.mxu0 %v2835_v0 }
 0x129   : > { %2535 = vmatprep.subr.bf16.mxu1 %v2836_v1 }
 0x12b   : > { %1774 = vmatpush2.bf16.msra.mxu0 %v2833_v2 }
 0x12c   : > { %2536 = vmatpush3.bf16.msra.mxu1 %v2837_v3  ;;  %1775 = vmatprep.subr.bf16.mxu0 %v2840_v4 }
 0x12d   : > { %2537 = vmatprep.subr.bf16.mxu1 %v2841_v5 }
 0x12f   : > { %1776 = vmatpush2.bf16.msra.mxu0 %v2838_v6 }
 0x130   : > { %2538 = vmatpush3.bf16.msra.mxu1 %v2842_v7  ;;  %1777 = vmatprep.subr.bf16.mxu0 %v2845_v8  ;;  %v661_v8 = vld [vmem:[#allocation2 + $0x8] sm:$0xff] }
 0x131   : > { %2539 = vmatprep.subr.bf16.mxu1 %v2846_v9 }
 0x133   : > { %1778 = vmatpush2.bf16.msra.mxu0 %v2843_v10 }
 0x134   : > { %2540 = vmatpush3.bf16.msra.mxu1 %v2847_v12  ;;  %2547 = vmatprep.subr.bf16.mxu0 %v2851_v13 }
 0x136   : > { %1780 = vmatmul.mubr.bf16.vlgmr.msra.gmra.mxu0 %v2848_v14 }
 0x137   : > { %1864 = vmatmul.mubr.bf16.vlgmr.msra.gmra.mxu1 %v3566_v11  ;;  %2548 = vmatpush3.bf16.msra.mxu0 %v2852_v15  ;;  %v2859_v11 = vld [vmem:[%s3487_s29 + $0x410] ss:$12 sps:$4 sm:$0xff]  }
 0x138   : > { %1904 = vmatprep.mubr.bf16.mxu0 %v3611_v51  ;;  %2549 = vmatprep.subr.bf16.mxu0 %v2853_v16 }
 0x13b   : > { %2550 = vmatpush3.bf16.msra.mxu0 %v2854_v17  ;;  %v664_v17 = vld [vmem:[#allocation2 + $0x20] sm:$0xff] }
 0x13c   : > { %2551 = vmatprep.subr.bf16.mxu0 %v2855_v18 }
 0x13f   : > { %2552 = vmatpush3.bf16.msra.mxu0 %v2856_v19 }
 0x140   : > { %2553 = vmatprep.subr.bf16.mxu0 %v2857_v20 }
 0x143   : > { %2554 = vmatpush3.bf16.msra.mxu0 %v2858_v21 }
 0x144   : > { %2555 = vmatprep.subr.bf16.mxu0 %v2859_v11 }
 0x147   : > { %2556 = vmatpush3.bf16.msra.mxu0 %v2860_v22 }
 0x148   : > { %2557 = vmatprep.subr.bf16.mxu0 %v2861_v23 }
 0x14b   : > { %2558 = vmatpush3.bf16.msra.mxu0 %v2862_v24 }
 0x14c   : > { %2559 = vmatprep.subr.bf16.mxu0 %v2863_v25 }
 0x14f   : > { %2560 = vmatpush3.bf16.msra.mxu0 %v2864_v26 }
 0x150   : > { %2561 = vmatprep.subr.bf16.mxu0 %v2865_v27 }
 0x153   : > { %2562 = vmatpush3.bf16.msra.mxu0 %v2866_v28 }
 0x156   : > { %1905 = vmatmul.mubr.bf16.vlgmr.msra.gmra.mxu0 %v2848_v14 }
 0x1b6   : > { %v1695_v29 = vpop.f32.mrf.mxu0 }
 0x1b7   : > { %v1738_v30 = vpop.f32.mrf.mxu1 }
 0x1b8   : > { %v1697_v31 = vpop.f32.mrf.mxu0  ;;  %v1739_v36 = vadd.f32 %v1738_v30, %v1695_v29 }
 0x1b9   : > { %v1740_v32 = vpop.f32.mrf.mxu1 }
 0x1ba   : > { %v1699_v33 = vpop.f32.mrf.mxu0  ;;  %v1741_v39 = vadd.f32 %v1740_v32, %v1697_v31 }
 0x1bb   : > { %v1742_v34 = vpop.f32.mrf.mxu1 }
 0x1bc   : > { %v1701_v35 = vpop.f32.mrf.mxu0  ;;  %v1743_v44 = vadd.f32 %v1742_v34, %v1699_v33 }
 0x1bd   : > { %v1744_v41 = vpop.f32.mrf.mxu1 }
 0x1be   : > { %v1745_v50 = vadd.f32 %v1744_v41, %v1701_v35 }
 0x1d7   : > { %v2519_v47 = vpop.f32.mrf.mxu1 }
 0x1d9   : > { %v2520_v57 = vpop.f32.mrf.mxu1 }
 0x1da   : > { %v2521_v3 = vadd.f32 %v2520_v57, %v2519_v47 }
 0x1db   : > { %v2522_v60 = vpop.f32.mrf.mxu1 }
 0x1dd   : > { %v2523_v61 = vpop.f32.mrf.mxu1 }
 0x1de   : > { %v2524_v10 = vadd.f32 %v2523_v61, %v2522_v60 }
 0x1f6   : > { %v1781_v38 = vpop.f32.mrf.mxu0 }
 0x1f7   : > { %v1782_v40 = vadd.f32 %v1781_v38, %v1739_v36  ;;  %v2541_v58 = vpop.f32.mrf.mxu1 }
 0x1f8   : > { %v1783_v43 = vpop.f32.mrf.mxu0 }
 0x1f9   : > { %v1913_v45 = vadd.f32 %v1782_v40, %v659_v37  ;;  %v1784_v46 = vadd.f32 %v1783_v43, %v1741_v39  ;;  %v2542_v62 = vpop.f32.mrf.mxu1 }
 0x1fa   : > { %v1785_v49 = vpop.f32.mrf.mxu0  ;;  %v2543_v0 = vadd.f32 %v2542_v62, %v2541_v58 }
 0x1fb   : > { %1919 = vst [vmem:[#allocation2 + $0x28] sm:$0xff] %v1913_v45  ;;  %v1914_v51 = vadd.f32 %v1784_v46, %v660_v42  ;;  %v1786_v52 = vadd.f32 %v1785_v49, %v1743_v44  ;;  %v2544_v63 = vpop.f32.mrf.mxu1 }
 0x1fc   : > { %v1787_v54 = vpop.f32.mrf.mxu0  ;;  %v1866_v5 = vadd.f32 %v2543_v0, %v2521_v3 }
 0x1fd   : > { %1920 = vst [vmem:[#allocation2 + $0x10] sm:$0xff] %v1914_v51  ;;  %v1916_v55 = vadd.f32 %v1786_v52, %v662_v48  ;;  %v1788_v56 = vadd.f32 %v1787_v54, %v1745_v50  ;;  %v2545_v1 = vpop.f32.mrf.mxu1 }
 0x1fe   : > { %v2546_v6 = vadd.f32 %v2545_v1, %v2544_v63 }
 0x1ff   : > { %1922 = vst [vmem:[#allocation2] sm:$0xff] %v1916_v55  ;;  %v1917_v59 = vadd.f32 %v1788_v56, %v663_v53 }
 0x200   : > { %v1869_v14 = vadd.f32 %v2546_v6, %v2524_v10 }
 0x201   : > { %1923 = vst [vmem:[#allocation2 + $0x18] sm:$0xff] %v1917_v59 }
 0x216   : > { %v2563_v2 = vpop.f32.mrf.mxu0 }
 0x218   : > { %v2564_v4 = vpop.f32.mrf.mxu0 }
 0x219   : > { %v2565_v7 = vadd.f32 %v2564_v4, %v2563_v2 }
 0x21a   : > { %v2566_v9 = vpop.f32.mrf.mxu0 }
 0x21b   : > { %v1907_v12 = vadd.f32 %v2565_v7, %v1866_v5 }
 0x21c   : > { %v2567_v13 = vpop.f32.mrf.mxu0 }
 0x21d   : > { %v1915_v15 = vadd.f32 %v1907_v12, %v661_v8  ;;  %v2568_v16 = vadd.f32 %v2567_v13, %v2566_v9 }
 0x21f   : > { %1921 = vst [vmem:[#allocation2 + $0x8] sm:$0xff] %v1915_v15  ;;  %v1910_v18 = vadd.f32 %v2568_v16, %v1869_v14  ;;  %1928 = sbr.rel (%p2485_p4) target bundleno = 688 (0x2b0), region = 89 }
 0x221   : > { %v1918_v19 = vadd.f32 %v1910_v18, %v664_v17 }
 0x223   : > { %1924 = vst [vmem:[#allocation2 + $0x20] sm:$0xff] %v1918_v19 }
 0x224   : > { %v1935_v20 = vld [vmem:[%s3714_s2] sm:$0xff]  ;;  %v2957_v21 = vmov 0   ;;  %v1936_v11 = vld [vmem:[%s3714_s2 + $0x8] sm:$0xff]  ;;  %v1930_v23 = vld [vmem:[#allocation2 + $0x10] sm:$0xff] }
 0x225   : > { %2867 = vset.pattern.permute.xlu0 %v2957_v21  ;;  %v1929_v22 = vld [vmem:[#allocation2 + $0x28] sm:$0xff]  ;;  %v1932_v29 = vld [vmem:[#allocation2] sm:$0xff]  ;;  %v1933_v30 = vld [vmem:[#allocation2 + $0x18] sm:$0xff] }
 0x226   : > { %1939 = vperm.xlu0 %2867, %v1935_v20   ;;  %v1931_v24 = vld [vmem:[#allocation2 + $0x8] sm:$0xff] }
 0x22a   : > { %1944 = vperm.xlu0 %2867, %v1936_v11   ;;  %v1934_v31 = vld [vmem:[#allocation2 + $0x20] sm:$0xff] }
 0x2a1   : > { %v1940_v25 = vpop.permute.xlu0 %1939 }
 0x2a2   : > { %v1947_v26 = vadd.f32 %v1940_v25, %v1929_v22  ;;  %v1948_v27 = vadd.f32 %v1940_v25, %v1930_v23  ;;  %v1949_v28 = vadd.f32 %v1940_v25, %v1931_v24 }
 0x2a4   : > { %vm1953_vm0 = vcmp.gt.f32.partialorder %v1947_v26, 0.0  ;;  %vm1954_vm1 = vcmp.gt.f32.partialorder %v1948_v27, 0.0  ;;  %vm1955_vm2 = vcmp.gt.f32.partialorder %v1949_v28, 0.0  ;;  %v1959_v32 = vmul.f32 0.01, %v1947_v26 }
 0x2a5   : > { %v1960_v33 = vmul.f32 0.01, %v1948_v27  ;;  %v1961_v34 = vmul.f32 0.01, %v1949_v28  ;;  %v1945_v35 = vpop.permute.xlu0 %1944 }
 0x2a6   : > { %v1965_v36 = vsel %vm1953_vm0, %v1947_v26, %v1959_v32  ;;  %v1950_v37 = vadd.f32 %v1945_v35, %v1932_v29  ;;  %v1951_v38 = vadd.f32 %v1945_v35, %v1933_v30  ;;  %v1952_v39 = vadd.f32 %v1945_v35, %v1934_v31 }
 0x2a7   : > { %v1966_v40 = vsel %vm1954_vm1, %v1948_v27, %v1960_v33  ;;  %v1967_v41 = vsel %vm1955_vm2, %v1949_v28, %v1961_v34 }
 0x2a8   : > { %v2498_v42 = vpack.c.bf16 %v1966_v40, %v1965_v36  ;;  %v2499_v43 = vpack.c.bf16 %v1967_v41, %v1967_v41  ;;  %vm1956_vm3 = vcmp.gt.f32.partialorder %v1950_v37, 0.0  ;;  %vm1957_vm4 = vcmp.gt.f32.partialorder %v1951_v38, 0.0 }
 0x2a9   : > { %vm1958_vm5 = vcmp.gt.f32.partialorder %v1952_v39, 0.0  ;;  %v1962_v44 = vmul.f32 0.01, %v1950_v37  ;;  %v1963_v45 = vmul.f32 0.01, %v1951_v38 }
 0x2aa   : > { %1991 = vst [vmem:[%s3489_s4] sm:$0xff] %v2498_v42  ;;  %1992 = vst [vmem:[%s3489_s4 + $0x8] sm:$0xf] %v2499_v43  ;;  %v1964_v46 = vmul.f32 0.01, %v1952_v39 }
 0x2ab   : > { %v1968_v47 = vsel %vm1956_vm3, %v1950_v37, %v1962_v44  ;;  %v1969_v48 = vsel %vm1957_vm4, %v1951_v38, %v1963_v45 }
 0x2ac   : > { %v1970_v49 = vsel %vm1958_vm5, %v1952_v39, %v1964_v46  ;;  %v2500_v50 = vpack.c.bf16 %v1969_v48, %v1968_v47 }
 0x2ad   : > { %v2501_v51 = vpack.c.bf16 %v1970_v49, %v1970_v49 }
 0x2ae   : > { %1993 = vst [vmem:[%s3489_s4 + $0xc] sm:$0xff] %v2500_v50 }
 0x2af   : > { %1994 = vst [vmem:[%s3489_s4 + $0x14] sm:$0xf] %v2501_v51 }
 0x2b0 PF: > { %2001 = sbr.rel (!%p3072_p12) target bundleno = 696 (0x2b8), region = 93 }
 0x2b1   : > { %s2502_s18 = smul.u32 (%p3072_p12), 12, %s2942_s19  ;;  %v2019_v52 = vld [vmem:[%s3489_s4] sm:$0xff] (%p3072_p12)  ;;  %v2491_v54 = vld [vmem:[%s3489_s4 + $0x8] sm:$0xf] (%p3072_p12) }
 0x2b3   : > { %s2004_s23 = scalar_lea.vmem (%p3072_p12), %s3715_s3, %s2502_s18 }
 0x2b4   : > { %2020 = vst [vmem:[%s2004_s23] sm:$0xff] (%p3072_p12), %v2019_v52  ;;  %2492 = vst [vmem:[%s2004_s23 + $0x8] sm:$0xf] (%p3072_p12), %v2491_v54 }
 0x2b5   : > { %v2021_v53 = vld [vmem:[%s3489_s4 + $0xc] sm:$0xff] }
 0x2b6   : > { %v2493_v55 = vld [vmem:[%s3489_s4 + $0x14] sm:$0xf]  ;;  %2022 = vst [vmem:[%s2004_s23 + $0x18] sm:$0xff] %v2021_v53 }
 0x2b7   : > { %2494 = vst [vmem:[%s2004_s23 + $0x20] sm:$0xf] %v2493_v55 }
 0x2b8 PF: > { %s13_s22 = sadd.s32 1, %s2954_s22   ;;  %s3721_s12 = smov %s2918_s13 }
 0x2b9   : > { %p10_p5 = scmp.ge.s32.totalorder %s13_s22, 6   ;;  %s3722_s13 = smov %s3070_s9 }
 0x2ba   : > { %s3723_s14 = smov %s2926_s15  ;;  %s3724_s15 = smov %s3067_s8 }
 0x2bb   : > { %s3725_s16 = smov %s2934_s17  ;;  %s3726_s17 = smov %s3053_s30 }
 0x2bc   : > { %s3727_s18 = smov %s2946_s20  ;;  %s3728_s19 = smov %s2950_s21 }
 0x2bd   : > { %s3729_s20 = smov %s3732_s24  ;;  %s3730_s21 = smov %s3736_s25 }
 0x2be   :  { %12 = sbr.rel (!%p10_p5) target bundleno = 8 (0x8), region = 170 }

// kernel: a_call__.35
= control target key start
LH: loop header
LB: loop body
LE: loop exit
PB: predicated region body
PF: predicated region fallthrough
CT: control target
= control target key end

     0   :  { %s2380_s12 = smov 0   ;;  %s2382_s13 = smov 0   ;;  %s2974_s0 = inlined_call_operand.vmem [shape: bf16[16,288], index: 0, kind: input, shape index: {}]   ;;  %s2975_s1 = inlined_call_operand.vmem [shape: bf16[288,6144], index: 1, kind: input, shape index: {}]   ;;  %s2976_s2 = inlined_call_operand.vmem [shape: f32[16,1], index: 2, kind: input, shape index: {}]   ;;  %s2977_s3 = inlined_call_operand.vmem [shape: bf16[16,6144], index: 3, kind: output, shape index: {}]  }
   0x1   :  { %s2384_s14 = smov 0   ;;  %s2386_s15 = smov 0  }
   0x2   :  { %s2388_s16 = smov 0  }
   0x3 LB: > { %s25_s17 = sadd.s32 1, %s2353_s15  ;;  %s2088_s18 = sadd.s32 4294967295, %s2357_s16   ;;  %s2357_s16 = sphi %s2388_s16, %s13_s16   ;;  %s2353_s15 = sphi %s2386_s15, %s2982_s15   ;;  %s2349_s14 = sphi %s2384_s14, %s2981_s14   ;;  %s2345_s13 = sphi %s2382_s13, %s2980_s13   ;;  %s2341_s12 = sphi %s2380_s12, %s2979_s12  }
   0x4   : > { %p27_p0 = scmp.ge.s32.totalorder %s25_s17, 6  ;;  %p67_p1 = scmp.ne.s32.totalorder %s2345_s13, %s2341_s12 }
   0x5   : > { %p68_p2 = scmp.eq.s32.totalorder %s2357_s16, 0  ;;  %p118_p4 = scmp.eq.s32.totalorder %s2088_s18, 5 }
   0x6   : > { %s2984_s17 = smov (%p27_p0, %s25_s17), 0  ;;  %s60_s20 = sadd.s32 1, %s2345_s13 }
   0x7   : > { %p69_p3 = por %p68_p2, %p67_p1  ;;  %s56_s19 = ssub.s32 %s2353_s15, %s2984_s17 }
   0x8   : > { %p58_p5 = scmp.eq.s32.totalorder %s56_s19, 0  ;;  %p2415_p6 = por %p118_p4, %p67_p1 }
   0x9   : > { %p2092_p7 = scmp.ge.s32.totalorder %s2357_s16, 6 }
   0xa   : > { %s2420_s22 = scalar_select %p58_p5, %s2345_s13, %s60_s20  }
   0xb   : > { %152 = sbr.rel (%p2092_p7) target bundleno = 93 (0x5d), region = 24 }
  0x10   : > { %155 = sbr.rel (!%p69_p3) target bundleno = 93 (0x5d), region = 28  ;;  %s157_s23 = sand.u32 (%p69_p3), 1, %s2345_s13  }
  0x11   : > { %s2261_s24 = sshll.u32 (%p69_p3), %s2353_s15, 5  ;;  %s2271_s25 = smul.u32 (%p69_p3), 1152, %s157_s23 }
  0x12   : > { %s2428_s28 = scalar_lea.vmem (%p69_p3), %s2975_s1, %s2261_s24 }
  0x13   : > { %v178_v0 = vld [vmem:[%s2428_s28] sm:$0xff] (%p69_p3)  ;;  %v180_v1 = vld [vmem:[%s2428_s28 + $0x8] sm:$0xff] (%p69_p3)  ;;  %v182_v2 = vld [vmem:[%s2428_s28 + $0x10] sm:$0xff] (%p69_p3)  ;;  %s2436_s29 = scalar_lea.vmem (%p69_p3), [#allocation3], %s2271_s25 }
  0x14   : > { %v184_v3 = vld [vmem:[%s2428_s28 + $0x18] sm:$0xff] (%p69_p3)  ;;  %v186_v4 = vld [vmem:[%s2428_s28 + $0xc0] sm:$0xff] (%p69_p3)  ;;  %v188_v5 = vld [vmem:[%s2428_s28 + $0xc8] sm:$0xff] (%p69_p3)  ;;  %179 = vst [vmem:[%s2436_s29] sm:$0xff] (%p69_p3), %v178_v0 }
  0x15   : > { %181 = vst [vmem:[%s2436_s29 + $0x8] sm:$0xff] %v180_v1  ;;  %183 = vst [vmem:[%s2436_s29 + $0x10] sm:$0xff] %v182_v2  ;;  %v190_v6 = vld [vmem:[%s2428_s28 + $0xd0] sm:$0xff]  ;;  %v192_v7 = vld [vmem:[%s2428_s28 + $0xd8] sm:$0xff] }
  0x16   : > { %185 = vst [vmem:[%s2436_s29 + $0x18] sm:$0xff] %v184_v3  ;;  %187 = vst [vmem:[%s2436_s29 + $0x20] sm:$0xff] %v186_v4  ;;  %v194_v8 = vld [vmem:[%s2428_s28 + $0x180] sm:$0xff]  ;;  %v196_v9 = vld [vmem:[%s2428_s28 + $0x188] sm:$0xff] }
  0x17   : > { %189 = vst [vmem:[%s2436_s29 + $0x28] sm:$0xff] %v188_v5  ;;  %191 = vst [vmem:[%s2436_s29 + $0x30] sm:$0xff] %v190_v6  ;;  %v198_v10 = vld [vmem:[%s2428_s28 + $0x190] sm:$0xff]  ;;  %v200_v11 = vld [vmem:[%s2428_s28 + $0x198] sm:$0xff] }
  0x18   : > { %193 = vst [vmem:[%s2436_s29 + $0x38] sm:$0xff] %v192_v7  ;;  %195 = vst [vmem:[%s2436_s29 + $0x40] sm:$0xff] %v194_v8  ;;  %v202_v12 = vld [vmem:[%s2428_s28 + $0x240] sm:$0xff]  ;;  %v204_v13 = vld [vmem:[%s2428_s28 + $0x248] sm:$0xff] }
  0x19   : > { %197 = vst [vmem:[%s2436_s29 + $0x48] sm:$0xff] %v196_v9  ;;  %199 = vst [vmem:[%s2436_s29 + $0x50] sm:$0xff] %v198_v10  ;;  %v206_v14 = vld [vmem:[%s2428_s28 + $0x250] sm:$0xff]  ;;  %v208_v15 = vld [vmem:[%s2428_s28 + $0x258] sm:$0xff] }
  0x1a   : > { %201 = vst [vmem:[%s2436_s29 + $0x58] sm:$0xff] %v200_v11  ;;  %203 = vst [vmem:[%s2436_s29 + $0x60] sm:$0xff] %v202_v12  ;;  %v210_v16 = vld [vmem:[%s2428_s28 + $0x300] sm:$0xff]  ;;  %v212_v17 = vld [vmem:[%s2428_s28 + $0x308] sm:$0xff] }
  0x1b   : > { %205 = vst [vmem:[%s2436_s29 + $0x68] sm:$0xff] %v204_v13  ;;  %207 = vst [vmem:[%s2436_s29 + $0x70] sm:$0xff] %v206_v14  ;;  %v214_v18 = vld [vmem:[%s2428_s28 + $0x310] sm:$0xff]  ;;  %v216_v19 = vld [vmem:[%s2428_s28 + $0x318] sm:$0xff] }
  0x1c   : > { %209 = vst [vmem:[%s2436_s29 + $0x78] sm:$0xff] %v208_v15  ;;  %211 = vst [vmem:[%s2436_s29 + $0x80] sm:$0xff] %v210_v16  ;;  %v218_v20 = vld [vmem:[%s2428_s28 + $0x3c0] sm:$0xff]  ;;  %v220_v21 = vld [vmem:[%s2428_s28 + $0x3c8] sm:$0xff] }
  0x1d   : > { %213 = vst [vmem:[%s2436_s29 + $0x88] sm:$0xff] %v212_v17  ;;  %215 = vst [vmem:[%s2436_s29 + $0x90] sm:$0xff] %v214_v18  ;;  %v222_v22 = vld [vmem:[%s2428_s28 + $0x3d0] sm:$0xff]  ;;  %v224_v23 = vld [vmem:[%s2428_s28 + $0x3d8] sm:$0xff] }
  0x1e   : > { %217 = vst [vmem:[%s2436_s29 + $0x98] sm:$0xff] %v216_v19  ;;  %219 = vst [vmem:[%s2436_s29 + $0xa0] sm:$0xff] %v218_v20  ;;  %v226_v24 = vld [vmem:[%s2428_s28 + $0x480] sm:$0xff]  ;;  %v228_v25 = vld [vmem:[%s2428_s28 + $0x488] sm:$0xff] }
  0x1f   : > { %221 = vst [vmem:[%s2436_s29 + $0xa8] sm:$0xff] %v220_v21  ;;  %223 = vst [vmem:[%s2436_s29 + $0xb0] sm:$0xff] %v222_v22  ;;  %v230_v26 = vld [vmem:[%s2428_s28 + $0x490] sm:$0xff]  ;;  %v232_v27 = vld [vmem:[%s2428_s28 + $0x498] sm:$0xff] }
  0x20   : > { %225 = vst [vmem:[%s2436_s29 + $0xb8] sm:$0xff] %v224_v23  ;;  %227 = vst [vmem:[%s2436_s29 + $0xc0] sm:$0xff] %v226_v24  ;;  %v234_v28 = vld [vmem:[%s2428_s28 + $0x540] sm:$0xff]  ;;  %v236_v29 = vld [vmem:[%s2428_s28 + $0x548] sm:$0xff] }
  0x21   : > { %229 = vst [vmem:[%s2436_s29 + $0xc8] sm:$0xff] %v228_v25  ;;  %231 = vst [vmem:[%s2436_s29 + $0xd0] sm:$0xff] %v230_v26  ;;  %v238_v30 = vld [vmem:[%s2428_s28 + $0x550] sm:$0xff]  ;;  %v240_v31 = vld [vmem:[%s2428_s28 + $0x558] sm:$0xff] }
  0x22   : > { %233 = vst [vmem:[%s2436_s29 + $0xd8] sm:$0xff] %v232_v27  ;;  %235 = vst [vmem:[%s2436_s29 + $0xe0] sm:$0xff] %v234_v28  ;;  %v242_v32 = vld [vmem:[%s2428_s28 + $0x600] sm:$0xff]  ;;  %v244_v33 = vld [vmem:[%s2428_s28 + $0x608] sm:$0xff] }
  0x23   : > { %237 = vst [vmem:[%s2436_s29 + $0xe8] sm:$0xff] %v236_v29  ;;  %239 = vst [vmem:[%s2436_s29 + $0xf0] sm:$0xff] %v238_v30  ;;  %v246_v34 = vld [vmem:[%s2428_s28 + $0x610] sm:$0xff]  ;;  %v248_v35 = vld [vmem:[%s2428_s28 + $0x618] sm:$0xff] }
  0x24   : > { %241 = vst [vmem:[%s2436_s29 + $0xf8] sm:$0xff] %v240_v31  ;;  %243 = vst [vmem:[%s2436_s29 + $0x100] sm:$0xff] %v242_v32  ;;  %v250_v36 = vld [vmem:[%s2428_s28 + $0x6c0] sm:$0xff]  ;;  %v252_v37 = vld [vmem:[%s2428_s28 + $0x6c8] sm:$0xff] }
  0x25   : > { %245 = vst [vmem:[%s2436_s29 + $0x108] sm:$0xff] %v244_v33  ;;  %247 = vst [vmem:[%s2436_s29 + $0x110] sm:$0xff] %v246_v34  ;;  %v254_v38 = vld [vmem:[%s2428_s28 + $0x6d0] sm:$0xff]  ;;  %v256_v39 = vld [vmem:[%s2428_s28 + $0x6d8] sm:$0xff] }
  0x26   : > { %249 = vst [vmem:[%s2436_s29 + $0x118] sm:$0xff] %v248_v35  ;;  %251 = vst [vmem:[%s2436_s29 + $0x120] sm:$0xff] %v250_v36  ;;  %v258_v40 = vld [vmem:[%s2428_s28 + $0x780] sm:$0xff]  ;;  %v260_v41 = vld [vmem:[%s2428_s28 + $0x788] sm:$0xff] }
  0x27   : > { %253 = vst [vmem:[%s2436_s29 + $0x128] sm:$0xff] %v252_v37  ;;  %255 = vst [vmem:[%s2436_s29 + $0x130] sm:$0xff] %v254_v38  ;;  %v262_v42 = vld [vmem:[%s2428_s28 + $0x790] sm:$0xff]  ;;  %v264_v43 = vld [vmem:[%s2428_s28 + $0x798] sm:$0xff] }
  0x28   : > { %257 = vst [vmem:[%s2436_s29 + $0x138] sm:$0xff] %v256_v39  ;;  %259 = vst [vmem:[%s2436_s29 + $0x140] sm:$0xff] %v258_v40  ;;  %v266_v44 = vld [vmem:[%s2428_s28 + $0x840] sm:$0xff]  ;;  %v268_v45 = vld [vmem:[%s2428_s28 + $0x848] sm:$0xff] }
  0x29   : > { %261 = vst [vmem:[%s2436_s29 + $0x148] sm:$0xff] %v260_v41  ;;  %263 = vst [vmem:[%s2436_s29 + $0x150] sm:$0xff] %v262_v42  ;;  %v270_v46 = vld [vmem:[%s2428_s28 + $0x850] sm:$0xff]  ;;  %v272_v47 = vld [vmem:[%s2428_s28 + $0x858] sm:$0xff] }
  0x2a   : > { %265 = vst [vmem:[%s2436_s29 + $0x158] sm:$0xff] %v264_v43  ;;  %267 = vst [vmem:[%s2436_s29 + $0x160] sm:$0xff] %v266_v44  ;;  %v274_v48 = vld [vmem:[%s2428_s28 + $0x900] sm:$0xff]  ;;  %v276_v49 = vld [vmem:[%s2428_s28 + $0x908] sm:$0xff] }
  0x2b   : > { %269 = vst [vmem:[%s2436_s29 + $0x168] sm:$0xff] %v268_v45  ;;  %271 = vst [vmem:[%s2436_s29 + $0x170] sm:$0xff] %v270_v46  ;;  %v278_v50 = vld [vmem:[%s2428_s28 + $0x910] sm:$0xff]  ;;  %v280_v51 = vld [vmem:[%s2428_s28 + $0x918] sm:$0xff] }
  0x2c   : > { %273 = vst [vmem:[%s2436_s29 + $0x178] sm:$0xff] %v272_v47  ;;  %275 = vst [vmem:[%s2436_s29 + $0x180] sm:$0xff] %v274_v48  ;;  %v282_v52 = vld [vmem:[%s2428_s28 + $0x9c0] sm:$0xff]  ;;  %v284_v53 = vld [vmem:[%s2428_s28 + $0x9c8] sm:$0xff] }
  0x2d   : > { %277 = vst [vmem:[%s2436_s29 + $0x188] sm:$0xff] %v276_v49  ;;  %279 = vst [vmem:[%s2436_s29 + $0x190] sm:$0xff] %v278_v50  ;;  %v286_v54 = vld [vmem:[%s2428_s28 + $0x9d0] sm:$0xff]  ;;  %v288_v55 = vld [vmem:[%s2428_s28 + $0x9d8] sm:$0xff] }
  0x2e   : > { %281 = vst [vmem:[%s2436_s29 + $0x198] sm:$0xff] %v280_v51  ;;  %283 = vst [vmem:[%s2436_s29 + $0x1a0] sm:$0xff] %v282_v52  ;;  %v290_v56 = vld [vmem:[%s2428_s28 + $0xa80] sm:$0xff]  ;;  %v292_v57 = vld [vmem:[%s2428_s28 + $0xa88] sm:$0xff] }
  0x2f   : > { %285 = vst [vmem:[%s2436_s29 + $0x1a8] sm:$0xff] %v284_v53  ;;  %287 = vst [vmem:[%s2436_s29 + $0x1b0] sm:$0xff] %v286_v54  ;;  %v294_v58 = vld [vmem:[%s2428_s28 + $0xa90] sm:$0xff]  ;;  %v296_v59 = vld [vmem:[%s2428_s28 + $0xa98] sm:$0xff] }
  0x30   : > { %289 = vst [vmem:[%s2436_s29 + $0x1b8] sm:$0xff] %v288_v55  ;;  %291 = vst [vmem:[%s2436_s29 + $0x1c0] sm:$0xff] %v290_v56  ;;  %v298_v60 = vld [vmem:[%s2428_s28 + $0xb40] sm:$0xff]  ;;  %v300_v61 = vld [vmem:[%s2428_s28 + $0xb48] sm:$0xff] }
  0x31   : > { %293 = vst [vmem:[%s2436_s29 + $0x1c8] sm:$0xff] %v292_v57  ;;  %295 = vst [vmem:[%s2436_s29 + $0x1d0] sm:$0xff] %v294_v58  ;;  %v302_v62 = vld [vmem:[%s2428_s28 + $0xb50] sm:$0xff]  ;;  %v304_v63 = vld [vmem:[%s2428_s28 + $0xb58] sm:$0xff] }
  0x32   : > { %297 = vst [vmem:[%s2436_s29 + $0x1d8] sm:$0xff] %v296_v59  ;;  %299 = vst [vmem:[%s2436_s29 + $0x1e0] sm:$0xff] %v298_v60  ;;  %v306_v0 = vld [vmem:[%s2428_s28 + $0xc00] sm:$0xff]  ;;  %v308_v1 = vld [vmem:[%s2428_s28 + $0xc08] sm:$0xff] }
  0x33   : > { %301 = vst [vmem:[%s2436_s29 + $0x1e8] sm:$0xff] %v300_v61  ;;  %303 = vst [vmem:[%s2436_s29 + $0x1f0] sm:$0xff] %v302_v62  ;;  %v310_v2 = vld [vmem:[%s2428_s28 + $0xc10] sm:$0xff]  ;;  %v312_v3 = vld [vmem:[%s2428_s28 + $0xc18] sm:$0xff] }
  0x34   : > { %305 = vst [vmem:[%s2436_s29 + $0x1f8] sm:$0xff] %v304_v63  ;;  %307 = vst [vmem:[%s2436_s29 + $0x200] sm:$0xff] %v306_v0  ;;  %v314_v4 = vld [vmem:[%s2428_s28 + $0xcc0] sm:$0xff]  ;;  %v316_v5 = vld [vmem:[%s2428_s28 + $0xcc8] sm:$0xff] }
  0x35   : > { %309 = vst [vmem:[%s2436_s29 + $0x208] sm:$0xff] %v308_v1  ;;  %311 = vst [vmem:[%s2436_s29 + $0x210] sm:$0xff] %v310_v2  ;;  %v318_v6 = vld [vmem:[%s2428_s28 + $0xcd0] sm:$0xff]  ;;  %v320_v7 = vld [vmem:[%s2428_s28 + $0xcd8] sm:$0xff] }
  0x36   : > { %313 = vst [vmem:[%s2436_s29 + $0x218] sm:$0xff] %v312_v3  ;;  %315 = vst [vmem:[%s2436_s29 + $0x220] sm:$0xff] %v314_v4  ;;  %v322_v8 = vld [vmem:[%s2428_s28 + $0xd80] sm:$0xff]  ;;  %v324_v9 = vld [vmem:[%s2428_s28 + $0xd88] sm:$0xff] }
  0x37   : > { %317 = vst [vmem:[%s2436_s29 + $0x228] sm:$0xff] %v316_v5  ;;  %319 = vst [vmem:[%s2436_s29 + $0x230] sm:$0xff] %v318_v6  ;;  %v326_v10 = vld [vmem:[%s2428_s28 + $0xd90] sm:$0xff]  ;;  %v328_v11 = vld [vmem:[%s2428_s28 + $0xd98] sm:$0xff] }
  0x38   : > { %321 = vst [vmem:[%s2436_s29 + $0x238] sm:$0xff] %v320_v7  ;;  %323 = vst [vmem:[%s2436_s29 + $0x240] sm:$0xff] %v322_v8  ;;  %v330_v12 = vld [vmem:[%s2428_s28 + $0xe40] sm:$0xff]  ;;  %v332_v13 = vld [vmem:[%s2428_s28 + $0xe48] sm:$0xff] }
  0x39   : > { %325 = vst [vmem:[%s2436_s29 + $0x248] sm:$0xff] %v324_v9  ;;  %327 = vst [vmem:[%s2436_s29 + $0x250] sm:$0xff] %v326_v10  ;;  %v334_v14 = vld [vmem:[%s2428_s28 + $0xe50] sm:$0xff]  ;;  %v336_v15 = vld [vmem:[%s2428_s28 + $0xe58] sm:$0xff] }
  0x3a   : > { %329 = vst [vmem:[%s2436_s29 + $0x258] sm:$0xff] %v328_v11  ;;  %331 = vst [vmem:[%s2436_s29 + $0x260] sm:$0xff] %v330_v12  ;;  %v338_v16 = vld [vmem:[%s2428_s28 + $0xf00] sm:$0xff]  ;;  %v340_v17 = vld [vmem:[%s2428_s28 + $0xf08] sm:$0xff] }
  0x3b   : > { %333 = vst [vmem:[%s2436_s29 + $0x268] sm:$0xff] %v332_v13  ;;  %335 = vst [vmem:[%s2436_s29 + $0x270] sm:$0xff] %v334_v14  ;;  %v342_v18 = vld [vmem:[%s2428_s28 + $0xf10] sm:$0xff]  ;;  %v344_v19 = vld [vmem:[%s2428_s28 + $0xf18] sm:$0xff] }
  0x3c   : > { %337 = vst [vmem:[%s2436_s29 + $0x278] sm:$0xff] %v336_v15  ;;  %339 = vst [vmem:[%s2436_s29 + $0x280] sm:$0xff] %v338_v16  ;;  %v346_v20 = vld [vmem:[%s2428_s28 + $0xfc0] sm:$0xff]  ;;  %v348_v21 = vld [vmem:[%s2428_s28 + $0xfc8] sm:$0xff] }
  0x3d   : > { %341 = vst [vmem:[%s2436_s29 + $0x288] sm:$0xff] %v340_v17  ;;  %343 = vst [vmem:[%s2436_s29 + $0x290] sm:$0xff] %v342_v18  ;;  %v350_v22 = vld [vmem:[%s2428_s28 + $0xfd0] sm:$0xff]  ;;  %v352_v23 = vld [vmem:[%s2428_s28 + $0xfd8] sm:$0xff] }
  0x3e   : > { %345 = vst [vmem:[%s2436_s29 + $0x298] sm:$0xff] %v344_v19  ;;  %347 = vst [vmem:[%s2436_s29 + $0x2a0] sm:$0xff] %v346_v20  ;;  %v354_v24 = vld [vmem:[%s2428_s28 + $0x1080] sm:$0xff]  ;;  %v356_v25 = vld [vmem:[%s2428_s28 + $0x1088] sm:$0xff] }
  0x3f   : > { %349 = vst [vmem:[%s2436_s29 + $0x2a8] sm:$0xff] %v348_v21  ;;  %351 = vst [vmem:[%s2436_s29 + $0x2b0] sm:$0xff] %v350_v22  ;;  %v358_v26 = vld [vmem:[%s2428_s28 + $0x1090] sm:$0xff]  ;;  %v360_v27 = vld [vmem:[%s2428_s28 + $0x1098] sm:$0xff] }
  0x40   : > { %353 = vst [vmem:[%s2436_s29 + $0x2b8] sm:$0xff] %v352_v23  ;;  %355 = vst [vmem:[%s2436_s29 + $0x2c0] sm:$0xff] %v354_v24  ;;  %v362_v28 = vld [vmem:[%s2428_s28 + $0x1140] sm:$0xff]  ;;  %v364_v29 = vld [vmem:[%s2428_s28 + $0x1148] sm:$0xff] }
  0x41   : > { %357 = vst [vmem:[%s2436_s29 + $0x2c8] sm:$0xff] %v356_v25  ;;  %359 = vst [vmem:[%s2436_s29 + $0x2d0] sm:$0xff] %v358_v26  ;;  %v366_v30 = vld [vmem:[%s2428_s28 + $0x1150] sm:$0xff]  ;;  %v368_v31 = vld [vmem:[%s2428_s28 + $0x1158] sm:$0xff] }
  0x42   : > { %361 = vst [vmem:[%s2436_s29 + $0x2d8] sm:$0xff] %v360_v27  ;;  %363 = vst [vmem:[%s2436_s29 + $0x2e0] sm:$0xff] %v362_v28  ;;  %v370_v32 = vld [vmem:[%s2428_s28 + $0x1200] sm:$0xff]  ;;  %v372_v33 = vld [vmem:[%s2428_s28 + $0x1208] sm:$0xff] }
  0x43   : > { %365 = vst [vmem:[%s2436_s29 + $0x2e8] sm:$0xff] %v364_v29  ;;  %367 = vst [vmem:[%s2436_s29 + $0x2f0] sm:$0xff] %v366_v30  ;;  %v374_v34 = vld [vmem:[%s2428_s28 + $0x1210] sm:$0xff]  ;;  %v376_v35 = vld [vmem:[%s2428_s28 + $0x1218] sm:$0xff] }
  0x44   : > { %369 = vst [vmem:[%s2436_s29 + $0x2f8] sm:$0xff] %v368_v31  ;;  %371 = vst [vmem:[%s2436_s29 + $0x300] sm:$0xff] %v370_v32  ;;  %v378_v36 = vld [vmem:[%s2428_s28 + $0x12c0] sm:$0xff]  ;;  %v380_v37 = vld [vmem:[%s2428_s28 + $0x12c8] sm:$0xff] }
  0x45   : > { %373 = vst [vmem:[%s2436_s29 + $0x308] sm:$0xff] %v372_v33  ;;  %375 = vst [vmem:[%s2436_s29 + $0x310] sm:$0xff] %v374_v34  ;;  %v382_v38 = vld [vmem:[%s2428_s28 + $0x12d0] sm:$0xff]  ;;  %v384_v39 = vld [vmem:[%s2428_s28 + $0x12d8] sm:$0xff] }
  0x46   : > { %377 = vst [vmem:[%s2436_s29 + $0x318] sm:$0xff] %v376_v35  ;;  %379 = vst [vmem:[%s2436_s29 + $0x320] sm:$0xff] %v378_v36  ;;  %v386_v40 = vld [vmem:[%s2428_s28 + $0x1380] sm:$0xff]  ;;  %v388_v41 = vld [vmem:[%s2428_s28 + $0x1388] sm:$0xff] }
  0x47   : > { %381 = vst [vmem:[%s2436_s29 + $0x328] sm:$0xff] %v380_v37  ;;  %383 = vst [vmem:[%s2436_s29 + $0x330] sm:$0xff] %v382_v38  ;;  %v390_v42 = vld [vmem:[%s2428_s28 + $0x1390] sm:$0xff]  ;;  %v392_v43 = vld [vmem:[%s2428_s28 + $0x1398] sm:$0xff] }
  0x48   : > { %385 = vst [vmem:[%s2436_s29 + $0x338] sm:$0xff] %v384_v39  ;;  %387 = vst [vmem:[%s2436_s29 + $0x340] sm:$0xff] %v386_v40  ;;  %v394_v44 = vld [vmem:[%s2428_s28 + $0x1440] sm:$0xff]  ;;  %v396_v45 = vld [vmem:[%s2428_s28 + $0x1448] sm:$0xff] }
  0x49   : > { %389 = vst [vmem:[%s2436_s29 + $0x348] sm:$0xff] %v388_v41  ;;  %391 = vst [vmem:[%s2436_s29 + $0x350] sm:$0xff] %v390_v42  ;;  %v398_v46 = vld [vmem:[%s2428_s28 + $0x1450] sm:$0xff]  ;;  %v400_v47 = vld [vmem:[%s2428_s28 + $0x1458] sm:$0xff] }
  0x4a   : > { %393 = vst [vmem:[%s2436_s29 + $0x358] sm:$0xff] %v392_v43  ;;  %395 = vst [vmem:[%s2436_s29 + $0x360] sm:$0xff] %v394_v44  ;;  %v402_v48 = vld [vmem:[%s2428_s28 + $0x1500] sm:$0xff]  ;;  %v404_v49 = vld [vmem:[%s2428_s28 + $0x1508] sm:$0xff] }
  0x4b   : > { %397 = vst [vmem:[%s2436_s29 + $0x368] sm:$0xff] %v396_v45  ;;  %399 = vst [vmem:[%s2436_s29 + $0x370] sm:$0xff] %v398_v46  ;;  %v406_v50 = vld [vmem:[%s2428_s28 + $0x1510] sm:$0xff]  ;;  %v408_v51 = vld [vmem:[%s2428_s28 + $0x1518] sm:$0xff] }
  0x4c   : > { %401 = vst [vmem:[%s2436_s29 + $0x378] sm:$0xff] %v400_v47  ;;  %403 = vst [vmem:[%s2436_s29 + $0x380] sm:$0xff] %v402_v48  ;;  %v410_v52 = vld [vmem:[%s2428_s28 + $0x15c0] sm:$0xff]  ;;  %v412_v53 = vld [vmem:[%s2428_s28 + $0x15c8] sm:$0xff] }
  0x4d   : > { %405 = vst [vmem:[%s2436_s29 + $0x388] sm:$0xff] %v404_v49  ;;  %407 = vst [vmem:[%s2436_s29 + $0x390] sm:$0xff] %v406_v50  ;;  %v414_v54 = vld [vmem:[%s2428_s28 + $0x15d0] sm:$0xff]  ;;  %v416_v55 = vld [vmem:[%s2428_s28 + $0x15d8] sm:$0xff] }
  0x4e   : > { %409 = vst [vmem:[%s2436_s29 + $0x398] sm:$0xff] %v408_v51  ;;  %411 = vst [vmem:[%s2436_s29 + $0x3a0] sm:$0xff] %v410_v52  ;;  %v418_v56 = vld [vmem:[%s2428_s28 + $0x1680] sm:$0xff]  ;;  %v420_v57 = vld [vmem:[%s2428_s28 + $0x1688] sm:$0xff] }
  0x4f   : > { %413 = vst [vmem:[%s2436_s29 + $0x3a8] sm:$0xff] %v412_v53  ;;  %415 = vst [vmem:[%s2436_s29 + $0x3b0] sm:$0xff] %v414_v54  ;;  %v422_v58 = vld [vmem:[%s2428_s28 + $0x1690] sm:$0xff]  ;;  %v424_v59 = vld [vmem:[%s2428_s28 + $0x1698] sm:$0xff] }
  0x50   : > { %417 = vst [vmem:[%s2436_s29 + $0x3b8] sm:$0xff] %v416_v55  ;;  %419 = vst [vmem:[%s2436_s29 + $0x3c0] sm:$0xff] %v418_v56  ;;  %v426_v60 = vld [vmem:[%s2428_s28 + $0x1740] sm:$0xff]  ;;  %v428_v61 = vld [vmem:[%s2428_s28 + $0x1748] sm:$0xff] }
  0x51   : > { %421 = vst [vmem:[%s2436_s29 + $0x3c8] sm:$0xff] %v420_v57  ;;  %423 = vst [vmem:[%s2436_s29 + $0x3d0] sm:$0xff] %v422_v58  ;;  %v430_v62 = vld [vmem:[%s2428_s28 + $0x1750] sm:$0xff]  ;;  %v432_v63 = vld [vmem:[%s2428_s28 + $0x1758] sm:$0xff] }
  0x52   : > { %425 = vst [vmem:[%s2436_s29 + $0x3d8] sm:$0xff] %v424_v59  ;;  %427 = vst [vmem:[%s2436_s29 + $0x3e0] sm:$0xff] %v426_v60  ;;  %v434_v0 = vld [vmem:[%s2428_s28 + $0x1800] sm:$0xff]  ;;  %v436_v1 = vld [vmem:[%s2428_s28 + $0x1808] sm:$0xff] }
  0x53   : > { %429 = vst [vmem:[%s2436_s29 + $0x3e8] sm:$0xff] %v428_v61  ;;  %431 = vst [vmem:[%s2436_s29 + $0x3f0] sm:$0xff] %v430_v62  ;;  %v438_v2 = vld [vmem:[%s2428_s28 + $0x1810] sm:$0xff]  ;;  %v440_v3 = vld [vmem:[%s2428_s28 + $0x1818] sm:$0xff] }
  0x54   : > { %433 = vst [vmem:[%s2436_s29 + $0x3f8] sm:$0xff] %v432_v63  ;;  %435 = vst [vmem:[%s2436_s29 + $0x400] sm:$0xff] %v434_v0  ;;  %v442_v4 = vld [vmem:[%s2428_s28 + $0x18c0] sm:$0xff]  ;;  %v444_v5 = vld [vmem:[%s2428_s28 + $0x18c8] sm:$0xff] }
  0x55   : > { %437 = vst [vmem:[%s2436_s29 + $0x408] sm:$0xff] %v436_v1  ;;  %439 = vst [vmem:[%s2436_s29 + $0x410] sm:$0xff] %v438_v2  ;;  %v446_v6 = vld [vmem:[%s2428_s28 + $0x18d0] sm:$0xff]  ;;  %v448_v7 = vld [vmem:[%s2428_s28 + $0x18d8] sm:$0xff] }
  0x56   : > { %441 = vst [vmem:[%s2436_s29 + $0x418] sm:$0xff] %v440_v3  ;;  %443 = vst [vmem:[%s2436_s29 + $0x420] sm:$0xff] %v442_v4  ;;  %v450_v8 = vld [vmem:[%s2428_s28 + $0x1980] sm:$0xff]  ;;  %v452_v9 = vld [vmem:[%s2428_s28 + $0x1988] sm:$0xff] }
  0x57   : > { %445 = vst [vmem:[%s2436_s29 + $0x428] sm:$0xff] %v444_v5  ;;  %447 = vst [vmem:[%s2436_s29 + $0x430] sm:$0xff] %v446_v6  ;;  %v454_v10 = vld [vmem:[%s2428_s28 + $0x1990] sm:$0xff]  ;;  %v456_v11 = vld [vmem:[%s2428_s28 + $0x1998] sm:$0xff] }
  0x58   : > { %449 = vst [vmem:[%s2436_s29 + $0x438] sm:$0xff] %v448_v7  ;;  %451 = vst [vmem:[%s2436_s29 + $0x440] sm:$0xff] %v450_v8  ;;  %v458_v12 = vld [vmem:[%s2428_s28 + $0x1a40] sm:$0xff]  ;;  %v460_v13 = vld [vmem:[%s2428_s28 + $0x1a48] sm:$0xff] }
  0x59   : > { %453 = vst [vmem:[%s2436_s29 + $0x448] sm:$0xff] %v452_v9  ;;  %455 = vst [vmem:[%s2436_s29 + $0x450] sm:$0xff] %v454_v10  ;;  %v462_v14 = vld [vmem:[%s2428_s28 + $0x1a50] sm:$0xff]  ;;  %v464_v15 = vld [vmem:[%s2428_s28 + $0x1a58] sm:$0xff] }
  0x5a   : > { %457 = vst [vmem:[%s2436_s29 + $0x458] sm:$0xff] %v456_v11  ;;  %459 = vst [vmem:[%s2436_s29 + $0x460] sm:$0xff] %v458_v12 }
  0x5b   : > { %461 = vst [vmem:[%s2436_s29 + $0x468] sm:$0xff] %v460_v13  ;;  %463 = vst [vmem:[%s2436_s29 + $0x470] sm:$0xff] %v462_v14 }
  0x5c   : > { %465 = vst [vmem:[%s2436_s29 + $0x478] sm:$0xff] %v464_v15 }
  0x5d PF: > { %p2095_p8 = scmp.ge.s32.totalorder %s2357_s16, 1  ;;  %p470_p9 = scmp.lt.s32.totalorder %s2357_s16, 7 }
  0x5f   : > { %p471_p10 = pnand %p2095_p8, %p470_p9 }
  0x60   : > { %s477_s30 = sand.u32 (!%p471_p10), 1, %s2341_s12  }
  0x61   : > { %474 = sbr.rel (%p471_p10) target bundleno = 470 (0x1d6), region = 51  ;;  %s2096_s24 = sshll.u32 (!%p471_p10), %s477_s30, 6 }
  0x62   : > { %s2272_s4 = smul.u32 (!%p471_p10), 1152, %s477_s30  ;;  %s2923_s12 = scalar_lea.vmem (!%p471_p10), [#allocation4], %s2096_s24 }
  0x64   : > { %s2732_s7 = scalar_lea.vmem (!%p471_p10), [#allocation3], %s2272_s4 }
  0x66   : > { %v2359_v16 = vmov 0   ;;  %v2730_v17 = vld [vmem:[%s2974_s0 + $0x4] ss:$12 sps:$4 sm:$0xff]   ;;  %v611_v34 = vld [vmem:[%s2732_s7 + $0x1c8] sm:$0xff]  ;;  %vm1433_vm0 = vcmask 261120   ;;  %s2270_s25 = sshll.u32 (%p2415_p6), %s2349_s14, 5 }
  0x67   : > { %1512 = vmatprep.mubr.bf16.mxu1 %v2359_v16  ;;  %2314 = vset.pattern.permute.xlu0 %v2359_v16  ;;  %v610_v18 = vld [vmem:[%s2732_s7 + $0x1c0] sm:$0xff]  ;;  %v615_v35 = vld [vmem:[%s2732_s7 + $0x1e8] sm:$0xff]  ;;  %s1973_s28 = scalar_lea.vmem (%p2415_p6), %s2977_s3, %s2270_s25 }
  0x68   : > { %v614_v19 = vld [vmem:[%s2732_s7 + $0x1e0] sm:$0xff]  ;;  %1469 = vmatprep.mubr.bf16.mxu0 %v2730_v17  ;;  %v2159_v39 = vcombine.high %v611_v34, %v615_v35  ;;  %v603_v42 = vld [vmem:[%s2732_s7 + $0x188] sm:$0xff]  ;;  %v2158_v46 = vcombine.low %v611_v34, %v615_v35 }
  0x69   : > { %v690_v20 = vld [vmem:[%s2732_s7 + $0x440] sm:$0xff]  ;;  %v2157_v21 = vcombine.high %v610_v18, %v614_v19  ;;  %v2156_v23 = vcombine.low %v610_v18, %v614_v19  ;;  %v607_v43 = vld [vmem:[%s2732_s7 + $0x1a8] sm:$0xff] }
  0x6a   : > { %v694_v22 = vld [vmem:[%s2732_s7 + $0x460] sm:$0xff]  ;;  %v2754_v44 = vld [vmem:[%s2974_s0 + $0x8] ss:$12 sps:$4 sm:$0xff]   ;;  %v2151_v48 = vcombine.high %v603_v42, %v607_v43  ;;  %v2150_v54 = vcombine.low %v603_v42, %v607_v43 }
  0x6b   : > { %v602_v24 = vld [vmem:[%s2732_s7 + $0x180] sm:$0xff]  ;;  %v2237_v26 = vcombine.high %v690_v20, %v694_v22  ;;  %v2236_v27 = vcombine.low %v690_v20, %v694_v22  ;;  %1437 = vmatprep.subr.bf16.mxu0 %v2157_v21  ;;  %v595_v51 = vld [vmem:[%s2732_s7 + $0x148] sm:$0xff] }
  0x6c   : > { %v606_v25 = vld [vmem:[%s2732_s7 + $0x1a0] sm:$0xff]  ;;  %1438 = vmatpush1.bf16.msra.mxu0 %v2156_v23  ;;  %v599_v52 = vld [vmem:[%s2732_s7 + $0x168] sm:$0xff] }
  0x6d   : > { %v2149_v28 = vcombine.high %v602_v24, %v606_v25  ;;  %v682_v29 = vld [vmem:[%s2732_s7 + $0x400] sm:$0xff]  ;;  %1492 = vmatprep.subr.bf16.mxu1 %v2237_v26  ;;  %v2148_v36 = vcombine.low %v602_v24, %v606_v25  ;;  %v2143_v56 = vcombine.high %v595_v51, %v599_v52  ;;  %v587_v59 = vld [vmem:[%s2732_s7 + $0x108] sm:$0xff]  ;;  %v2142_v62 = vcombine.low %v595_v51, %v599_v52 }
  0x6e   : > { %v686_v30 = vld [vmem:[%s2732_s7 + $0x420] sm:$0xff]  ;;  %1493 = vmatpush1.bf16.msra.mxu1 %v2236_v27  ;;  %v591_v60 = vld [vmem:[%s2732_s7 + $0x128] sm:$0xff] }
  0x6f   : > { %v594_v31 = vld [vmem:[%s2732_s7 + $0x140] sm:$0xff]  ;;  %v2229_v32 = vcombine.high %v682_v29, %v686_v30  ;;  %1439 = vmatprep.subr.bf16.mxu0 %v2149_v28  ;;  %v2228_v37 = vcombine.low %v682_v29, %v686_v30  ;;  %v2135_v0 = vcombine.high %v587_v59, %v591_v60  ;;  %v579_v3 = vld [vmem:[%s2732_s7 + $0xc8] sm:$0xff]  ;;  %v2134_v6 = vcombine.low %v587_v59, %v591_v60 }
  0x70   : > { %v598_v33 = vld [vmem:[%s2732_s7 + $0x160] sm:$0xff]  ;;  %1440 = vmatpush1.bf16.msra.mxu0 %v2148_v36  ;;  %v583_v4 = vld [vmem:[%s2732_s7 + $0xe8] sm:$0xff] }
  0x71   : > { %v2141_v38 = vcombine.high %v594_v31, %v598_v33  ;;  %1494 = vmatprep.subr.bf16.mxu1 %v2229_v32  ;;  %v586_v40 = vld [vmem:[%s2732_s7 + $0x100] sm:$0xff]  ;;  %v2140_v45 = vcombine.low %v594_v31, %v598_v33  ;;  %v2127_v8 = vcombine.high %v579_v3, %v583_v4  ;;  %v571_v11 = vld [vmem:[%s2732_s7 + $0x88] sm:$0xff]  ;;  %v2126_v14 = vcombine.low %v579_v3, %v583_v4 }
  0x72   : > { %v590_v41 = vld [vmem:[%s2732_s7 + $0x120] sm:$0xff]  ;;  %1495 = vmatpush1.bf16.msra.mxu1 %v2228_v37  ;;  %v575_v12 = vld [vmem:[%s2732_s7 + $0xa8] sm:$0xff] }
  0x73   : > { %1441 = vmatprep.subr.bf16.mxu0 %v2141_v38  ;;  %v2133_v47 = vcombine.high %v586_v40, %v590_v41  ;;  %1523 = vmatprep.subr.bf16.mxu1 %v2159_v39  ;;  %v578_v49 = vld [vmem:[%s2732_s7 + $0xc0] sm:$0xff]  ;;  %v2132_v53 = vcombine.low %v586_v40, %v590_v41  ;;  %v2119_v18 = vcombine.high %v571_v11, %v575_v12  ;;  %v563_v21 = vld [vmem:[%s2732_s7 + $0x48] sm:$0xff] }
  0x74   : > { %v582_v50 = vld [vmem:[%s2732_s7 + $0xe0] sm:$0xff]  ;;  %1442 = vmatpush1.bf16.msra.mxu0 %v2140_v45  ;;  %v567_v22 = vld [vmem:[%s2732_s7 + $0x68] sm:$0xff]  ;;  %v2118_v24 = vcombine.low %v571_v11, %v575_v12 }
  0x75   : > { %2244 = vmatmul.mubr.msk.bf16.vlgmr.msra.gmra.mxu1 %vm1433_vm0, %v2754_v44  ;;  %1443 = vmatprep.subr.bf16.mxu0 %v2133_v47  ;;  %v2125_v55 = vcombine.high %v578_v49, %v582_v50  ;;  %v570_v57 = vld [vmem:[%s2732_s7 + $0x80] sm:$0xff]  ;;  %v2124_v61 = vcombine.low %v578_v49, %v582_v50  ;;  %v2111_v26 = vcombine.high %v563_v21, %v567_v22  ;;  %v555_v29 = vld [vmem:[%s2732_s7 + $0x8] sm:$0xff] }
  0x76   : > { %1524 = vmatpush1.bf16.msra.mxu1 %v2158_v46  ;;  %v574_v58 = vld [vmem:[%s2732_s7 + $0xa0] sm:$0xff]  ;;  %1555 = vmatprep.mubr.bf16.mxu1 %v2730_v17  ;;  %v559_v30 = vld [vmem:[%s2732_s7 + $0x28] sm:$0xff]  ;;  %v2110_v32 = vcombine.low %v563_v21, %v567_v22 }
  0x77   : > { %1525 = vmatprep.subr.bf16.mxu1 %v2151_v48  ;;  %v2117_v63 = vcombine.high %v570_v57, %v574_v58  ;;  %v562_v1 = vld [vmem:[%s2732_s7 + $0x40] sm:$0xff]  ;;  %v2116_v5 = vcombine.low %v570_v57, %v574_v58  ;;  %v2103_v34 = vcombine.high %v555_v29, %v559_v30  ;;  %v675_v37 = vld [vmem:[%s2732_s7 + $0x3c8] sm:$0xff]  ;;  %v2102_v40 = vcombine.low %v555_v29, %v559_v30 }
  0x78   : > { %1444 = vmatpush1.bf16.msra.mxu0 %v2132_v53  ;;  %v566_v2 = vld [vmem:[%s2732_s7 + $0x60] sm:$0xff]  ;;  %v679_v38 = vld [vmem:[%s2732_s7 + $0x3e8] sm:$0xff] }
  0x79   : > { %1445 = vmatprep.subr.bf16.mxu0 %v2125_v55  ;;  %v2109_v7 = vcombine.high %v562_v1, %v566_v2  ;;  %v554_v9 = vld [vmem:[%s2732_s7] sm:$0xff]  ;;  %v2108_v13 = vcombine.low %v562_v1, %v566_v2  ;;  %v2223_v42 = vcombine.high %v675_v37, %v679_v38  ;;  %v667_v46 = vld [vmem:[%s2732_s7 + $0x388] sm:$0xff]  ;;  %v2222_v49 = vcombine.low %v675_v37, %v679_v38 }
  0x7a   : > { %1526 = vmatpush1.bf16.msra.mxu1 %v2150_v54  ;;  %v558_v10 = vld [vmem:[%s2732_s7 + $0x20] sm:$0xff]  ;;  %v671_v47 = vld [vmem:[%s2732_s7 + $0x3a8] sm:$0xff] }
  0x7b   : > { %1527 = vmatprep.subr.bf16.mxu1 %v2143_v56  ;;  %v2101_v15 = vcombine.high %v554_v9, %v558_v10  ;;  %v674_v19 = vld [vmem:[%s2732_s7 + $0x3c0] sm:$0xff]  ;;  %v2100_v23 = vcombine.low %v554_v9, %v558_v10  ;;  %v2215_v51 = vcombine.high %v667_v46, %v671_v47  ;;  %v659_v54 = vld [vmem:[%s2732_s7 + $0x348] sm:$0xff]  ;;  %v2214_v57 = vcombine.low %v667_v46, %v671_v47 }
  0x7c   : > { %1446 = vmatpush1.bf16.msra.mxu0 %v2124_v61  ;;  %v678_v20 = vld [vmem:[%s2732_s7 + $0x3e0] sm:$0xff]  ;;  %v663_v55 = vld [vmem:[%s2732_s7 + $0x368] sm:$0xff] }
  0x7d   : > { %1447 = vmatprep.subr.bf16.mxu0 %v2117_v63  ;;  %v2221_v25 = vcombine.high %v674_v19, %v678_v20  ;;  %v666_v27 = vld [vmem:[%s2732_s7 + $0x380] sm:$0xff]  ;;  %v2220_v31 = vcombine.low %v674_v19, %v678_v20  ;;  %v2207_v60 = vcombine.high %v659_v54, %v663_v55  ;;  %v651_v63 = vld [vmem:[%s2732_s7 + $0x308] sm:$0xff]  ;;  %v2206_v3 = vcombine.low %v659_v54, %v663_v55 }
  0x7e   : > { %1528 = vmatpush1.bf16.msra.mxu1 %v2142_v62  ;;  %v670_v28 = vld [vmem:[%s2732_s7 + $0x3a0] sm:$0xff]  ;;  %v1833_v1 = vld [vmem:[%s2976_s2 + $0x8] sm:$0xff] }
  0x7f   : > { %1529 = vmatprep.subr.bf16.mxu1 %v2135_v0  ;;  %v2213_v33 = vcombine.high %v666_v27, %v670_v28  ;;  %v658_v35 = vld [vmem:[%s2732_s7 + $0x340] sm:$0xff]  ;;  %v2212_v39 = vcombine.low %v666_v27, %v670_v28  ;;  %v655_v0 = vld [vmem:[%s2732_s7 + $0x328] sm:$0xff] }
  0x80   : > { %1448 = vmatpush1.bf16.msra.mxu0 %v2116_v5  ;;  %v662_v36 = vld [vmem:[%s2732_s7 + $0x360] sm:$0xff]  ;;  %v2199_v5 = vcombine.high %v651_v63, %v655_v0  ;;  %v647_v9 = vld [vmem:[%s2732_s7 + $0x2e8] sm:$0xff]  ;;  %v2198_v11 = vcombine.low %v651_v63, %v655_v0 }
  0x81   : > { %1449 = vmatprep.subr.bf16.mxu0 %v2109_v7  ;;  %v2205_v41 = vcombine.high %v658_v35, %v662_v36  ;;  %v650_v43 = vld [vmem:[%s2732_s7 + $0x300] sm:$0xff]  ;;  %v2204_v48 = vcombine.low %v658_v35, %v662_v36  ;;  %v639_v19 = vld [vmem:[%s2732_s7 + $0x2a8] sm:$0xff] }
  0x82   : > { %1530 = vmatpush1.bf16.msra.mxu1 %v2134_v6  ;;  %v654_v45 = vld [vmem:[%s2732_s7 + $0x320] sm:$0xff]  ;;  %v631_v27 = vld [vmem:[%s2732_s7 + $0x268] sm:$0xff] }
  0x83   : > { %1531 = vmatprep.subr.bf16.mxu1 %v2127_v8  ;;  %v2197_v50 = vcombine.high %v650_v43, %v654_v45  ;;  %v642_v52 = vld [vmem:[%s2732_s7 + $0x2c0] sm:$0xff]  ;;  %v2196_v56 = vcombine.low %v650_v43, %v654_v45  ;;  %v643_v8 = vld [vmem:[%s2732_s7 + $0x2c8] sm:$0xff]  ;;  %v692_v43 = vld [vmem:[%s2732_s7 + $0x450] sm:$0xff] }
  0x84   : > { %1450 = vmatpush1.bf16.msra.mxu0 %v2108_v13  ;;  %v646_v53 = vld [vmem:[%s2732_s7 + $0x2e0] sm:$0xff]  ;;  %v2191_v13 = vcombine.high %v643_v8, %v647_v9  ;;  %v2190_v21 = vcombine.low %v643_v8, %v647_v9  ;;  %v619_v35 = vld [vmem:[%s2732_s7 + $0x208] sm:$0xff]  ;;  %v696_v45 = vld [vmem:[%s2732_s7 + $0x470] sm:$0xff] }
  0x85   : > { %1451 = vmatprep.subr.bf16.mxu0 %v2101_v15  ;;  %v2189_v58 = vcombine.high %v642_v52, %v646_v53  ;;  %v1832_v59 = vld [vmem:[%s2976_s2] sm:$0xff]  ;;  %v2188_v2 = vcombine.low %v642_v52, %v646_v53  ;;  %v623_v36 = vld [vmem:[%s2732_s7 + $0x228] sm:$0xff]  ;;  %v684_v52 = vld [vmem:[%s2732_s7 + $0x410] sm:$0xff]  ;;  %v2240_v55 = vcombine.low %v692_v43, %v696_v45 }
  0x86   : > { %1532 = vmatpush1.bf16.msra.mxu1 %v2126_v14  ;;  %v634_v61 = vld [vmem:[%s2732_s7 + $0x280] sm:$0xff]  ;;  %1836 = vperm.xlu0 %2314, %v1832_v59   ;;  %v2166_v47 = vcombine.low %v619_v35, %v623_v36  ;;  %v688_v53 = vld [vmem:[%s2732_s7 + $0x430] sm:$0xff] }
  0x87   : > { %1533 = vmatprep.subr.bf16.mxu1 %v2119_v18  ;;  %v638_v62 = vld [vmem:[%s2732_s7 + $0x2a0] sm:$0xff]  ;;  %v635_v18 = vld [vmem:[%s2732_s7 + $0x288] sm:$0xff]  ;;  %v600_v59 = vld [vmem:[%s2732_s7 + $0x170] sm:$0xff]  ;;  %v2232_v63 = vcombine.low %v684_v52, %v688_v53 }
  0x88   : > { %1452 = vmatpush1.bf16.msra.mxu0 %v2100_v23  ;;  %v2181_v4 = vcombine.high %v634_v61, %v638_v62  ;;  %v626_v6 = vld [vmem:[%s2732_s7 + $0x240] sm:$0xff]  ;;  %v2180_v10 = vcombine.low %v634_v61, %v638_v62  ;;  %v2183_v23 = vcombine.high %v635_v18, %v639_v19  ;;  %v2182_v29 = vcombine.low %v635_v18, %v639_v19  ;;  %v617_v61 = vld [vmem:[%s2732_s7 + $0x1f8] sm:$0xff] }
  0x89   : > { %1453 = vmatprep.subr.bf16.mxu0 %v2221_v25  ;;  %v630_v7 = vld [vmem:[%s2732_s7 + $0x260] sm:$0xff]  ;;  %v695_v25 = vld [vmem:[%s2732_s7 + $0x468] sm:$0xff] }
  0x8a   : > { %1534 = vmatpush1.bf16.msra.mxu1 %v2118_v24  ;;  %1841 = vperm.xlu0 %2314, %v1833_v1   ;;  %v2173_v12 = vcombine.high %v626_v6, %v630_v7  ;;  %v618_v14 = vld [vmem:[%s2732_s7 + $0x200] sm:$0xff]  ;;  %v2172_v20 = vcombine.low %v626_v6, %v630_v7  ;;  %v691_v24 = vld [vmem:[%s2732_s7 + $0x448] sm:$0xff] }
  0x8b   : > { %1535 = vmatprep.subr.bf16.mxu1 %v2111_v26  ;;  %v622_v15 = vld [vmem:[%s2732_s7 + $0x220] sm:$0xff]  ;;  %v627_v26 = vld [vmem:[%s2732_s7 + $0x248] sm:$0xff]  ;;  %v2239_v30 = vcombine.high %v691_v24, %v695_v25  ;;  %v2238_v37 = vcombine.low %v691_v24, %v695_v25 }
  0x8c   : > { %1454 = vmatpush2.bf16.msra.mxu0 %v2220_v31  ;;  %v2165_v22 = vcombine.high %v618_v14, %v622_v15  ;;  %v2164_v28 = vcombine.low %v618_v14, %v622_v15  ;;  %v2175_v31 = vcombine.high %v627_v26, %v631_v27  ;;  %v2174_v38 = vcombine.low %v627_v26, %v631_v27 }
  0x8d   : > { %1455 = vmatprep.subr.bf16.mxu0 %v2213_v33  ;;  %v687_v33 = vld [vmem:[%s2732_s7 + $0x428] sm:$0xff] }
  0x8e   : > { %1536 = vmatpush1.bf16.msra.mxu1 %v2110_v32  ;;  %v683_v32 = vld [vmem:[%s2732_s7 + $0x408] sm:$0xff] }
  0x8f   : > { %1537 = vmatprep.subr.bf16.mxu1 %v2103_v34  ;;  %v2822_v34 = vld [vmem:[%s2974_s0] ss:$12 sps:$4 sm:$0xff]   ;;  %v2230_v46 = vcombine.low %v683_v32, %v687_v33 }
  0x90   : > { %1456 = vmatpush2.bf16.msra.mxu0 %v2212_v39  ;;  %v2231_v39 = vcombine.high %v683_v32, %v687_v33 }
  0x91   : > { %1457 = vmatprep.subr.bf16.mxu0 %v2205_v41  ;;  %v612_v41 = vld [vmem:[%s2732_s7 + $0x1d0] sm:$0xff] }
  0x92   : > { %1538 = vmatpush1.bf16.msra.mxu1 %v2102_v40  ;;  %v2167_v40 = vcombine.high %v619_v35, %v623_v36  ;;  %v556_v36 = vld [vmem:[%s2732_s7 + $0x10] sm:$0xff] }
  0x93   : > { %1539 = vmatprep.subr.bf16.mxu1 %v2223_v42  ;;  %v616_v42 = vld [vmem:[%s2732_s7 + $0x1f0] sm:$0xff] }
  0x94   : > { %1458 = vmatpush2.bf16.msra.mxu0 %v2204_v48  ;;  %v2161_v48 = vcombine.high %v612_v41, %v616_v42  ;;  %v2160_v54 = vcombine.low %v612_v41, %v616_v42 }
  0x95   : > { %1459 = vmatprep.subr.bf16.mxu0 %v2197_v50  ;;  %v604_v50 = vld [vmem:[%s2732_s7 + $0x190] sm:$0xff] }
  0x96   : > { %1540 = vmatpush2.bf16.msra.mxu1 %v2222_v49  ;;  %v2241_v49 = vcombine.high %v692_v43, %v696_v45  ;;  %v676_v45 = vld [vmem:[%s2732_s7 + $0x3d0] sm:$0xff] }
  0x97   : > { %1541 = vmatprep.subr.bf16.mxu1 %v2215_v51  ;;  %v608_v51 = vld [vmem:[%s2732_s7 + $0x1b0] sm:$0xff] }
  0x98   : > { %1460 = vmatpush2.bf16.msra.mxu0 %v2196_v56  ;;  %v2153_v56 = vcombine.high %v604_v50, %v608_v51  ;;  %v2152_v62 = vcombine.low %v604_v50, %v608_v51 }
  0x99   : > { %1461 = vmatprep.subr.bf16.mxu0 %v2189_v58  ;;  %v596_v58 = vld [vmem:[%s2732_s7 + $0x150] sm:$0xff] }
  0x9a   : > { %1542 = vmatpush2.bf16.msra.mxu1 %v2214_v57  ;;  %v2233_v57 = vcombine.high %v684_v52, %v688_v53  ;;  %v2145_v0 = vcombine.high %v596_v58, %v600_v59  ;;  %v2144_v6 = vcombine.low %v596_v58, %v600_v59  ;;  %v668_v53 = vld [vmem:[%s2732_s7 + $0x390] sm:$0xff] }
  0x9b   : > { %1543 = vmatprep.subr.bf16.mxu1 %v2207_v60  ;;  %v613_v60 = vld [vmem:[%s2732_s7 + $0x1d8] sm:$0xff] }
  0x9c   : > { %1462 = vmatpush2.bf16.msra.mxu0 %v2188_v2  ;;  %v2163_v1 = vcombine.high %v613_v60, %v617_v61  ;;  %v588_v2 = vld [vmem:[%s2732_s7 + $0x110] sm:$0xff]  ;;  %v2162_v7 = vcombine.low %v613_v60, %v617_v61 }
  0x9d   : > { %1463 = vmatprep.subr.bf16.mxu0 %v2181_v4  ;;  %v605_v4 = vld [vmem:[%s2732_s7 + $0x198] sm:$0xff]  ;;  %v660_v61 = vld [vmem:[%s2732_s7 + $0x350] sm:$0xff] }
  0x9e   : > { %1544 = vmatpush2.bf16.msra.mxu1 %v2206_v3  ;;  %v592_v3 = vld [vmem:[%s2732_s7 + $0x130] sm:$0xff] }
  0x9f   : > { %1545 = vmatprep.subr.bf16.mxu1 %v2199_v5  ;;  %v609_v5 = vld [vmem:[%s2732_s7 + $0x1b8] sm:$0xff]  ;;  %v2137_v8 = vcombine.high %v588_v2, %v592_v3  ;;  %v2136_v14 = vcombine.low %v588_v2, %v592_v3 }
  0xa0   : > { %1464 = vmatpush2.bf16.msra.mxu0 %v2180_v10  ;;  %v2155_v9 = vcombine.high %v605_v4, %v609_v5  ;;  %v580_v10 = vld [vmem:[%s2732_s7 + $0xd0] sm:$0xff]  ;;  %v2154_v15 = vcombine.low %v605_v4, %v609_v5 }
  0xa1   : > { %1465 = vmatprep.subr.bf16.mxu0 %v2173_v12  ;;  %v597_v12 = vld [vmem:[%s2732_s7 + $0x158] sm:$0xff]  ;;  %v652_v5 = vld [vmem:[%s2732_s7 + $0x310] sm:$0xff] }
  0xa2   : > { %1546 = vmatpush2.bf16.msra.mxu1 %v2198_v11  ;;  %v584_v11 = vld [vmem:[%s2732_s7 + $0xf0] sm:$0xff] }
  0xa3   : > { %1547 = vmatprep.subr.bf16.mxu1 %v2191_v13  ;;  %v601_v13 = vld [vmem:[%s2732_s7 + $0x178] sm:$0xff]  ;;  %v2129_v18 = vcombine.high %v580_v10, %v584_v11  ;;  %v2128_v24 = vcombine.low %v580_v10, %v584_v11 }
  0xa4   : > { %1466 = vmatpush2.bf16.msra.mxu0 %v2172_v20  ;;  %v2147_v19 = vcombine.high %v597_v12, %v601_v13  ;;  %v572_v20 = vld [vmem:[%s2732_s7 + $0x90] sm:$0xff]  ;;  %v2146_v25 = vcombine.low %v597_v12, %v601_v13 }
  0xa5   : > { %1467 = vmatprep.subr.bf16.mxu0 %v2165_v22  ;;  %v589_v22 = vld [vmem:[%s2732_s7 + $0x118] sm:$0xff]  ;;  %v644_v13 = vld [vmem:[%s2732_s7 + $0x2d0] sm:$0xff] }
  0xa6   : > { %1548 = vmatpush2.bf16.msra.mxu1 %v2190_v21  ;;  %v576_v21 = vld [vmem:[%s2732_s7 + $0xb0] sm:$0xff] }
  0xa7   : > { %1549 = vmatprep.subr.bf16.mxu1 %v2183_v23  ;;  %v593_v23 = vld [vmem:[%s2732_s7 + $0x138] sm:$0xff]  ;;  %v2121_v26 = vcombine.high %v572_v20, %v576_v21 }
  0xa8   : > { %1468 = vmatpush2.bf16.msra.mxu0 %v2164_v28  ;;  %v2139_v27 = vcombine.high %v589_v22, %v593_v23  ;;  %v564_v28 = vld [vmem:[%s2732_s7 + $0x50] sm:$0xff]  ;;  %v2138_v32 = vcombine.low %v589_v22, %v593_v23 }
  0xa9   : > { %1578 = vmatprep.subr.bf16.mxu0 %v2239_v30  ;;  %v581_v30 = vld [vmem:[%s2732_s7 + $0xd8] sm:$0xff]  ;;  %v636_v23 = vld [vmem:[%s2732_s7 + $0x290] sm:$0xff] }
  0xaa   : > { %1550 = vmatpush2.bf16.msra.mxu1 %v2182_v29  ;;  %v568_v29 = vld [vmem:[%s2732_s7 + $0x70] sm:$0xff] }
  0xab   : > { %1551 = vmatprep.subr.bf16.mxu1 %v2175_v31  ;;  %1470 = vmatmul.mubr.bf16.vlgmr.msra.gmra.mxu0 %v2822_v34  ;;  %v585_v31 = vld [vmem:[%s2732_s7 + $0xf8] sm:$0xff]  ;;  %v2113_v33 = vcombine.high %v564_v28, %v568_v29 }
  0xac   : > { %1579 = vmatpush1.bf16.msra.mxu0 %v2238_v37  ;;  %1598 = vmatprep.mubr.bf16.mxu0 %v2359_v16  ;;  %v2131_v35 = vcombine.high %v581_v30, %v585_v31  ;;  %v560_v37 = vld [vmem:[%s2732_s7 + $0x30] sm:$0xff]  ;;  %v2130_v41 = vcombine.low %v581_v30, %v585_v31 }
  0xad   : > { %1580 = vmatprep.subr.bf16.mxu0 %v2231_v39  ;;  %v577_v39 = vld [vmem:[%s2732_s7 + $0xb8] sm:$0xff]  ;;  %v2105_v42 = vcombine.high %v556_v36, %v560_v37  ;;  %v628_v31 = vld [vmem:[%s2732_s7 + $0x250] sm:$0xff] }
  0xae   : > { %1552 = vmatpush2.bf16.msra.mxu1 %v2174_v38  ;;  %v573_v38 = vld [vmem:[%s2732_s7 + $0x98] sm:$0xff] }
  0xaf   : > { %1553 = vmatprep.subr.bf16.mxu1 %v2167_v40  ;;  %v2112_v40 = vcombine.low %v564_v28, %v568_v29  ;;  %v2123_v43 = vcombine.high %v573_v38, %v577_v39  ;;  %v2122_v50 = vcombine.low %v573_v38, %v577_v39  ;;  %v620_v39 = vld [vmem:[%s2732_s7 + $0x210] sm:$0xff] }
  0xb0   : > { %1581 = vmatpush1.bf16.msra.mxu0 %v2230_v46  ;;  %v680_v46 = vld [vmem:[%s2732_s7 + $0x3f0] sm:$0xff] }
  0xb1   : > { %1609 = vmatprep.subr.bf16.mxu0 %v2161_v48  ;;  %v569_v48 = vld [vmem:[%s2732_s7 + $0x78] sm:$0xff]  ;;  %v2225_v51 = vcombine.high %v676_v45, %v680_v46 }
  0xb2   : > { %1554 = vmatpush2.bf16.msra.mxu1 %v2166_v47  ;;  %v565_v47 = vld [vmem:[%s2732_s7 + $0x58] sm:$0xff] }
  0xb3   : > { %1664 = vmatprep.subr.bf16.mxu1 %v2241_v49  ;;  %2245 = vmatmul.mubr.msk.bf16.vlgmr.msra.gmra.mxu0 %vm1433_vm0, %v2754_v44  ;;  %v2104_v49 = vcombine.low %v556_v36, %v560_v37  ;;  %v2115_v52 = vcombine.high %v565_v47, %v569_v48  ;;  %v2114_v58 = vcombine.low %v565_v47, %v569_v48  ;;  %v693_v48 = vld [vmem:[%s2732_s7 + $0x458] sm:$0xff] }
  0xb4   : > { %1610 = vmatpush1.bf16.msra.mxu0 %v2160_v54  ;;  %1641 = vmatprep.mubr.bf16.mxu0 %v2730_v17  ;;  %v672_v54 = vld [vmem:[%s2732_s7 + $0x3b0] sm:$0xff] }
  0xb5   : > { %1556 = vmatmul.mubr.bf16.vlgmr.msra.gmra.mxu1 %v2822_v34  ;;  %1611 = vmatprep.subr.bf16.mxu0 %v2153_v56  ;;  %v561_v56 = vld [vmem:[%s2732_s7 + $0x38] sm:$0xff]  ;;  %v2217_v59 = vcombine.high %v668_v53, %v672_v54 }
  0xb6   : > { %1665 = vmatpush1.bf16.msra.mxu1 %v2240_v55  ;;  %1684 = vmatprep.mubr.bf16.mxu1 %v2359_v16  ;;  %v557_v55 = vld [vmem:[%s2732_s7 + $0x18] sm:$0xff] }
  0xb7   : > { %1666 = vmatprep.subr.bf16.mxu1 %v2233_v57  ;;  %v2224_v57 = vcombine.low %v676_v45, %v680_v46  ;;  %v2107_v60 = vcombine.high %v557_v55, %v561_v56  ;;  %v2106_v2 = vcombine.low %v557_v55, %v561_v56  ;;  %v685_v56 = vld [vmem:[%s2732_s7 + $0x418] sm:$0xff] }
  0xb8   : > { %1612 = vmatpush1.bf16.msra.mxu0 %v2152_v62  ;;  %v664_v62 = vld [vmem:[%s2732_s7 + $0x370] sm:$0xff] }
  0xb9   : > { %1613 = vmatprep.subr.bf16.mxu0 %v2145_v0  ;;  %v681_v0 = vld [vmem:[%s2732_s7 + $0x3f8] sm:$0xff]  ;;  %v2209_v3 = vcombine.high %v660_v61, %v664_v62 }
  0xba   : > { %1667 = vmatpush1.bf16.msra.mxu1 %v2232_v63  ;;  %v677_v63 = vld [vmem:[%s2732_s7 + $0x3d8] sm:$0xff] }
  0xbb   : > { %1695 = vmatprep.subr.bf16.mxu1 %v2163_v1  ;;  %v2216_v1 = vcombine.low %v668_v53, %v672_v54  ;;  %v2227_v4 = vcombine.high %v677_v63, %v681_v0  ;;  %v2226_v10 = vcombine.low %v677_v63, %v681_v0 }
  0xbc   : > { %1614 = vmatpush1.bf16.msra.mxu0 %v2144_v6  ;;  %v656_v6 = vld [vmem:[%s2732_s7 + $0x330] sm:$0xff] }
  0xbd   : > { %2246 = vmatmul.mubr.msk.bf16.vlgmr.msra.gmra.mxu1 %vm1433_vm0, %v2754_v44  ;;  %1615 = vmatprep.subr.bf16.mxu0 %v2137_v8  ;;  %v673_v8 = vld [vmem:[%s2732_s7 + $0x3b8] sm:$0xff]  ;;  %v2201_v11 = vcombine.high %v652_v5, %v656_v6 }
  0xbe   : > { %1696 = vmatpush1.bf16.msra.mxu1 %v2162_v7  ;;  %1727 = vmatprep.mubr.bf16.mxu1 %v2730_v17  ;;  %v2120_v17 = vcombine.low %v572_v20, %v576_v21  ;;  %v669_v7 = vld [vmem:[%s2732_s7 + $0x398] sm:$0xff] }
  0xbf   : > { %1697 = vmatprep.subr.bf16.mxu1 %v2155_v9  ;;  %v2208_v9 = vcombine.low %v660_v61, %v664_v62  ;;  %v2219_v12 = vcombine.high %v669_v7, %v673_v8  ;;  %v2218_v20 = vcombine.low %v669_v7, %v673_v8 }
  0xc0   : > { %1616 = vmatpush1.bf16.msra.mxu0 %v2136_v14  ;;  %v648_v14 = vld [vmem:[%s2732_s7 + $0x2f0] sm:$0xff] }
  0xc1   : > { %1617 = vmatprep.subr.bf16.mxu0 %v2129_v18  ;;  %v665_v18 = vld [vmem:[%s2732_s7 + $0x378] sm:$0xff]  ;;  %v2193_v21 = vcombine.high %v644_v13, %v648_v14 }
  0xc2   : > { %1698 = vmatpush1.bf16.msra.mxu1 %v2154_v15  ;;  %v661_v15 = vld [vmem:[%s2732_s7 + $0x358] sm:$0xff] }
  0xc3   : > { %1699 = vmatprep.subr.bf16.mxu1 %v2147_v19  ;;  %v2200_v19 = vcombine.low %v652_v5, %v656_v6  ;;  %v2211_v22 = vcombine.high %v661_v15, %v665_v18  ;;  %v2210_v28 = vcombine.low %v661_v15, %v665_v18 }
  0xc4   : > { %1618 = vmatpush1.bf16.msra.mxu0 %v2128_v24  ;;  %v640_v24 = vld [vmem:[%s2732_s7 + $0x2b0] sm:$0xff] }
  0xc5   : > { %1619 = vmatprep.subr.bf16.mxu0 %v2121_v26  ;;  %v657_v26 = vld [vmem:[%s2732_s7 + $0x338] sm:$0xff]  ;;  %v2185_v29 = vcombine.high %v636_v23, %v640_v24 }
  0xc6   : > { %1700 = vmatpush1.bf16.msra.mxu1 %v2146_v25  ;;  %v653_v25 = vld [vmem:[%s2732_s7 + $0x318] sm:$0xff] }
  0xc7   : > { %1701 = vmatprep.subr.bf16.mxu1 %v2139_v27  ;;  %v2192_v27 = vcombine.low %v644_v13, %v648_v14  ;;  %v2203_v30 = vcombine.high %v653_v25, %v657_v26  ;;  %v2202_v36 = vcombine.low %v653_v25, %v657_v26 }
  0xc8   : > { %1620 = vmatpush1.bf16.msra.mxu0 %v2120_v17  ;;  %v632_v17 = vld [vmem:[%s2732_s7 + $0x270] sm:$0xff] }
  0xc9   : > { %1621 = vmatprep.subr.bf16.mxu0 %v2113_v33  ;;  %v649_v33 = vld [vmem:[%s2732_s7 + $0x2f8] sm:$0xff]  ;;  %v2177_v37 = vcombine.high %v628_v31, %v632_v17 }
  0xca   : > { %1702 = vmatpush1.bf16.msra.mxu1 %v2138_v32  ;;  %v645_v32 = vld [vmem:[%s2732_s7 + $0x2d8] sm:$0xff] }
  0xcb   : > { %1703 = vmatprep.subr.bf16.mxu1 %v2131_v35  ;;  %v2184_v35 = vcombine.low %v636_v23, %v640_v24  ;;  %v2195_v38 = vcombine.high %v645_v32, %v649_v33  ;;  %v2194_v45 = vcombine.low %v645_v32, %v649_v33 }
  0xcc   : > { %1622 = vmatpush1.bf16.msra.mxu0 %v2112_v40  ;;  %v624_v40 = vld [vmem:[%s2732_s7 + $0x230] sm:$0xff] }
  0xcd   : > { %1623 = vmatprep.subr.bf16.mxu0 %v2105_v42  ;;  %v641_v42 = vld [vmem:[%s2732_s7 + $0x2b8] sm:$0xff]  ;;  %v2169_v46 = vcombine.high %v620_v39, %v624_v40 }
  0xce   : > { %1704 = vmatpush1.bf16.msra.mxu1 %v2130_v41  ;;  %v637_v41 = vld [vmem:[%s2732_s7 + $0x298] sm:$0xff] }
  0xcf   : > { %1705 = vmatprep.subr.bf16.mxu1 %v2123_v43  ;;  %v2176_v43 = vcombine.low %v628_v31, %v632_v17  ;;  %v2187_v47 = vcombine.high %v637_v41, %v641_v42  ;;  %v2186_v53 = vcombine.low %v637_v41, %v641_v42 }
  0xd0   : > { %1624 = vmatpush1.bf16.msra.mxu0 %v2104_v49  ;;  %v697_v49 = vld [vmem:[%s2732_s7 + $0x478] sm:$0xff] }
  0xd1   : > { %1625 = vmatprep.subr.bf16.mxu0 %v2225_v51  ;;  %v633_v51 = vld [vmem:[%s2732_s7 + $0x278] sm:$0xff]  ;;  %v2243_v54 = vcombine.high %v693_v48, %v697_v49 }
  0xd2   : > { %1706 = vmatpush1.bf16.msra.mxu1 %v2122_v50  ;;  %v629_v50 = vld [vmem:[%s2732_s7 + $0x258] sm:$0xff] }
  0xd3   : > { %1707 = vmatprep.subr.bf16.mxu1 %v2115_v52  ;;  %v2168_v52 = vcombine.low %v620_v39, %v624_v40  ;;  %v2179_v55 = vcombine.high %v629_v50, %v633_v51  ;;  %v2178_v61 = vcombine.low %v629_v50, %v633_v51 }
  0xd4   : > { %1626 = vmatpush2.bf16.msra.mxu0 %v2224_v57  ;;  %v689_v57 = vld [vmem:[%s2732_s7 + $0x438] sm:$0xff] }
  0xd5   : > { %1627 = vmatprep.subr.bf16.mxu0 %v2217_v59  ;;  %v625_v59 = vld [vmem:[%s2732_s7 + $0x238] sm:$0xff]  ;;  %v2235_v62 = vcombine.high %v685_v56, %v689_v57  ;;  %v2234_v0 = vcombine.low %v685_v56, %v689_v57 }
  0xd6   : > { %1708 = vmatpush1.bf16.msra.mxu1 %v2114_v58  ;;  %v621_v58 = vld [vmem:[%s2732_s7 + $0x218] sm:$0xff] }
  0xd7   : > { %1709 = vmatprep.subr.bf16.mxu1 %v2107_v60  ;;  %v2242_v60 = vcombine.low %v693_v48, %v697_v49  ;;  %v2171_v63 = vcombine.high %v621_v58, %v625_v59 }
  0xd8   : > { %1628 = vmatpush2.bf16.msra.mxu0 %v2216_v1  ;;  %v2170_v1 = vcombine.low %v621_v58, %v625_v59 }
  0xd9   : > { %1629 = vmatprep.subr.bf16.mxu0 %v2209_v3 }
  0xda   : > { %1710 = vmatpush1.bf16.msra.mxu1 %v2106_v2 }
  0xdb   : > { %1711 = vmatprep.subr.bf16.mxu1 %v2227_v4 }
  0xdc   : > { %1630 = vmatpush2.bf16.msra.mxu0 %v2208_v9 }
  0xdd   : > { %1631 = vmatprep.subr.bf16.mxu0 %v2201_v11 }
  0xde   : > { %1712 = vmatpush2.bf16.msra.mxu1 %v2226_v10 }
  0xdf   : > { %1713 = vmatprep.subr.bf16.mxu1 %v2219_v12 }
  0xe0   : > { %1632 = vmatpush2.bf16.msra.mxu0 %v2200_v19 }
  0xe1   : > { %1633 = vmatprep.subr.bf16.mxu0 %v2193_v21 }
  0xe2   : > { %1714 = vmatpush2.bf16.msra.mxu1 %v2218_v20 }
  0xe3   : > { %1715 = vmatprep.subr.bf16.mxu1 %v2211_v22 }
  0xe4   : > { %1634 = vmatpush2.bf16.msra.mxu0 %v2192_v27 }
  0xe5   : > { %1635 = vmatprep.subr.bf16.mxu0 %v2185_v29 }
  0xe6   : > { %1716 = vmatpush2.bf16.msra.mxu1 %v2210_v28 }
  0xe7   : > { %1717 = vmatprep.subr.bf16.mxu1 %v2203_v30 }
  0xe8   : > { %1636 = vmatpush2.bf16.msra.mxu0 %v2184_v35 }
  0xe9   : > { %1637 = vmatprep.subr.bf16.mxu0 %v2177_v37 }
  0xea   : > { %1718 = vmatpush2.bf16.msra.mxu1 %v2202_v36 }
  0xeb   : > { %1719 = vmatprep.subr.bf16.mxu1 %v2195_v38 }
  0xec   : > { %1638 = vmatpush2.bf16.msra.mxu0 %v2176_v43 }
  0xed   : > { %1639 = vmatprep.subr.bf16.mxu0 %v2169_v46 }
  0xee   : > { %1720 = vmatpush2.bf16.msra.mxu1 %v2194_v45 }
  0xef   : > { %1721 = vmatprep.subr.bf16.mxu1 %v2187_v47 }
  0xf0   : > { %1640 = vmatpush2.bf16.msra.mxu0 %v2168_v52 }
  0xf1   : > { %1750 = vmatprep.subr.bf16.mxu0 %v2243_v54 }
  0xf2   : > { %1722 = vmatpush2.bf16.msra.mxu1 %v2186_v53 }
  0xf3   : > { %1723 = vmatprep.subr.bf16.mxu1 %v2179_v55  ;;  %1642 = vmatmul.mubr.bf16.vlgmr.msra.gmra.mxu0 %v2822_v34 }
  0xf4   : > { %1751 = vmatpush1.bf16.msra.mxu0 %v2242_v60  ;;  %1770 = vmatprep.mubr.bf16.mxu0 %v2359_v16 }
  0xf5   : > { %1752 = vmatprep.subr.bf16.mxu0 %v2235_v62 }
  0xf6   : > { %1724 = vmatpush2.bf16.msra.mxu1 %v2178_v61 }
  0xf7   : > { %1725 = vmatprep.subr.bf16.mxu1 %v2171_v63 }
  0xf8   : > { %1753 = vmatpush1.bf16.msra.mxu0 %v2234_v0 }
  0xfa   : > { %1726 = vmatpush2.bf16.msra.mxu1 %v2170_v1 }
  0xfb   : > { %2247 = vmatmul.mubr.msk.bf16.vlgmr.msra.gmra.mxu0 %vm1433_vm0, %v2754_v44 }
  0xfd   : > { %1728 = vmatmul.mubr.bf16.vlgmr.msra.gmra.mxu1 %v2822_v34 }
 0x101   : > { %v2913_v4 = vpop.permute.xlu0 %1836 }
 0x105   : > { %v2917_v44 = vpop.permute.xlu0 %1841 }
 0x135   : > { %v1514_v2 = vpop.f32.mrf.mxu1 }
 0x137   : > { %v1516_v3 = vpop.f32.mrf.mxu1 }
 0x139   : > { %v1518_v7 = vpop.f32.mrf.mxu1 }
 0x13b   : > { %v1520_v34 = vpop.f32.mrf.mxu1 }
 0x16b   : > { %v1471_v5 = vpop.f32.mrf.mxu0 }
 0x16c   : > { %v1515_v6 = vadd.f32 %v1514_v2, %v1471_v5 }
 0x16d   : > { %v1473_v16 = vpop.f32.mrf.mxu0 }
 0x16e   : > { %v1517_v8 = vadd.f32 %v1516_v3, %v1473_v16  ;;  %v1844_v9 = vadd.f32 %v2913_v4, %v1515_v6 }
 0x16f   : > { %v1475_v10 = vpop.f32.mrf.mxu0 }
 0x170   : > { %v1845_v11 = vadd.f32 %v2913_v4, %v1517_v8  ;;  %v1876_v12 = vmul.f32 0.01, %v1844_v9  ;;  %v1519_v13 = vadd.f32 %v1518_v7, %v1475_v10  ;;  %vm1860_vm1 = vcmp.gt.f32.partialorder %v1844_v9, 0.0 }
 0x171   : > { %v1477_v14 = vpop.f32.mrf.mxu0 }
 0x172   : > { %vm1861_vm2 = vcmp.gt.f32.partialorder %v1845_v11, 0.0  ;;  %v1877_v15 = vmul.f32 0.01, %v1845_v11  ;;  %v1521_v18 = vadd.f32 %v1520_v34, %v1477_v14  ;;  %v1852_v19 = vadd.f32 %v2917_v44, %v1519_v13 }
 0x173   : > { %v1600_v20 = vpop.f32.mrf.mxu0  ;;  %v1892_v21 = vsel %vm1860_vm1, %v1844_v9, %v1876_v12 }
 0x174   : > { %v1893_v22 = vsel %vm1861_vm2, %v1845_v11, %v1877_v15  ;;  %v1853_v23 = vadd.f32 %v2917_v44, %v1521_v18  ;;  %vm1868_vm3 = vcmp.gt.f32.partialorder %v1852_v19, 0.0  ;;  %v1884_v26 = vmul.f32 0.01, %v1852_v19 }
 0x175   : > { %v1557_v24 = vpop.f32.mrf.mxu1  ;;  %v2262_v25 = vpack.c.bf16 %v1893_v22, %v1892_v21  ;;  %v1602_v28 = vpop.f32.mrf.mxu0 }
 0x176   : > { %v1601_v27 = vadd.f32 %v1600_v20, %v1557_v24  ;;  %vm1869_vm4 = vcmp.gt.f32.partialorder %v1853_v23, 0.0  ;;  %v1885_v29 = vmul.f32 0.01, %v1853_v23  ;;  %v1900_v33 = vsel %vm1868_vm3, %v1852_v19, %v1884_v26 }
 0x177   : > { %v1559_v30 = vpop.f32.mrf.mxu1  ;;  %1956 = vst [vmem:[%s2923_s12] sm:$0xff] %v2262_v25  ;;  %v1604_v32 = vpop.f32.mrf.mxu0 }
 0x178   : > { %v1846_v31 = vadd.f32 %v2913_v4, %v1601_v27  ;;  %v1603_v17 = vadd.f32 %v1602_v28, %v1559_v30  ;;  %v1901_v35 = vsel %vm1869_vm4, %v1853_v23, %v1885_v29 }
 0x179   : > { %v1561_v36 = vpop.f32.mrf.mxu1  ;;  %v2266_v37 = vpack.c.bf16 %v1901_v35, %v1900_v33  ;;  %v1606_v40 = vpop.f32.mrf.mxu0 }
 0x17a   : > { %v1878_v38 = vmul.f32 0.01, %v1846_v31  ;;  %v1847_v39 = vadd.f32 %v2913_v4, %v1603_v17  ;;  %vm1862_vm5 = vcmp.gt.f32.partialorder %v1846_v31, 0.0  ;;  %v1605_v41 = vadd.f32 %v1604_v32, %v1561_v36 }
 0x17b   : > { %v1563_v42 = vpop.f32.mrf.mxu1  ;;  %1960 = vst [vmem:[%s2923_s12 + $0x20] sm:$0xff] %v2266_v37 }
 0x17c   : > { %vm1863_vm6 = vcmp.gt.f32.partialorder %v1847_v39, 0.0  ;;  %v1879_v43 = vmul.f32 0.01, %v1847_v39  ;;  %v1607_v45 = vadd.f32 %v1606_v40, %v1563_v42  ;;  %v1854_v46 = vadd.f32 %v2917_v44, %v1605_v41 }
 0x17d   : > { %v1894_v47 = vsel %vm1862_vm5, %v1846_v31, %v1878_v38  ;;  %v1686_v56 = vpop.f32.mrf.mxu1 }
 0x17e   : > { %v1895_v48 = vsel %vm1863_vm6, %v1847_v39, %v1879_v43  ;;  %v1855_v49 = vadd.f32 %v2917_v44, %v1607_v45  ;;  %vm1870_vm7 = vcmp.gt.f32.partialorder %v1854_v46, 0.0  ;;  %v1886_v51 = vmul.f32 0.01, %v1854_v46 }
 0x17f   : > { %v2263_v50 = vpack.c.bf16 %v1895_v48, %v1894_v47  ;;  %v1688_v57 = vpop.f32.mrf.mxu1 }
 0x180   : > { %vm1871_vm8 = vcmp.gt.f32.partialorder %v1855_v49, 0.0  ;;  %v1887_v52 = vmul.f32 0.01, %v1855_v49  ;;  %v1902_v53 = vsel %vm1870_vm7, %v1854_v46, %v1886_v51 }
 0x181   : > { %1957 = vst [vmem:[%s2923_s12 + $0x8] sm:$0xff] %v2263_v50  ;;  %v1690_v61 = vpop.f32.mrf.mxu1 }
 0x182   : > { %v1903_v54 = vsel %vm1871_vm8, %v1855_v49, %v1887_v52  ;;  %v1994_v48 = vld [vmem:[%s2923_s12 + $0x20] sm:$0xff] (%p2415_p6) }
 0x183   : > { %v2267_v55 = vpack.c.bf16 %v1903_v54, %v1902_v53  ;;  %v1692_v6 = vpop.f32.mrf.mxu1  ;;  %1995 = vst [vmem:[%s1973_s28 + $0xc0] sm:$0xff] (%p2415_p6), %v1994_v48 }
 0x185   : > { %1961 = vst [vmem:[%s2923_s12 + $0x28] sm:$0xff] %v2267_v55 }
 0x188   : > { %v1988_v45 = vld [vmem:[%s2923_s12 + $0x8] sm:$0xff] (%p2415_p6) }
 0x189   : > { %1989 = vst [vmem:[%s1973_s28 + $0x8] sm:$0xff] (%p2415_p6), %v1988_v45 }
 0x18c   : > { %v1996_v49 = vld [vmem:[%s2923_s12 + $0x28] sm:$0xff] (%p2415_p6) }
 0x18d   : > { %1997 = vst [vmem:[%s1973_s28 + $0xc8] sm:$0xff] (%p2415_p6), %v1996_v49 }
 0x1b3   : > { %v1643_v58 = vpop.f32.mrf.mxu0 }
 0x1b4   : > { %v1687_v59 = vadd.f32 %v1686_v56, %v1643_v58 }
 0x1b5   : > { %v1645_v60 = vpop.f32.mrf.mxu0 }
 0x1b6   : > { %v1848_v62 = vadd.f32 %v2913_v4, %v1687_v59  ;;  %v1689_v63 = vadd.f32 %v1688_v57, %v1645_v60 }
 0x1b7   : > { %v1647_v0 = vpop.f32.mrf.mxu0 }
 0x1b8   : > { %v1880_v1 = vmul.f32 0.01, %v1848_v62  ;;  %v1849_v2 = vadd.f32 %v2913_v4, %v1689_v63  ;;  %v1691_v3 = vadd.f32 %v1690_v61, %v1647_v0  ;;  %vm1864_vm9 = vcmp.gt.f32.partialorder %v1848_v62, 0.0 }
 0x1b9   : > { %v1649_v5 = vpop.f32.mrf.mxu0 }
 0x1ba   : > { %vm1865_vm10 = vcmp.gt.f32.partialorder %v1849_v2, 0.0  ;;  %v1881_v7 = vmul.f32 0.01, %v1849_v2  ;;  %v1856_v16 = vadd.f32 %v2917_v44, %v1691_v3  ;;  %v1693_v8 = vadd.f32 %v1692_v6, %v1649_v5 }
 0x1bb   : > { %v1772_v9 = vpop.f32.mrf.mxu0  ;;  %v1896_v10 = vsel %vm1864_vm9, %v1848_v62, %v1880_v1 }
 0x1bc   : > { %v1897_v11 = vsel %vm1865_vm10, %v1849_v2, %v1881_v7  ;;  %v1888_v34 = vmul.f32 0.01, %v1856_v16  ;;  %v1857_v14 = vadd.f32 %v2917_v44, %v1693_v8  ;;  %vm1872_vm11 = vcmp.gt.f32.partialorder %v1856_v16, 0.0 }
 0x1bd   : > { %v1729_v12 = vpop.f32.mrf.mxu1  ;;  %v2264_v13 = vpack.c.bf16 %v1897_v11, %v1896_v10  ;;  %v1774_v18 = vpop.f32.mrf.mxu0 }
 0x1be   : > { %v1773_v15 = vadd.f32 %v1772_v9, %v1729_v12  ;;  %vm1873_vm12 = vcmp.gt.f32.partialorder %v1857_v14, 0.0  ;;  %v1889_v20 = vmul.f32 0.01, %v1857_v14  ;;  %v1904_v25 = vsel %vm1872_vm11, %v1856_v16, %v1888_v34 }
 0x1bf   : > { %v1731_v19 = vpop.f32.mrf.mxu1  ;;  %1958 = vst [vmem:[%s2923_s12 + $0x10] sm:$0xff] %v2264_v13  ;;  %v1776_v23 = vpop.f32.mrf.mxu0 }
 0x1c0   : > { %v1850_v21 = vadd.f32 %v2913_v4, %v1773_v15  ;;  %v1775_v22 = vadd.f32 %v1774_v18, %v1731_v19  ;;  %v1905_v26 = vsel %vm1873_vm12, %v1857_v14, %v1889_v20 }
 0x1c1   : > { %v1733_v24 = vpop.f32.mrf.mxu1  ;;  %v1778_v29 = vpop.f32.mrf.mxu0  ;;  %v2268_v30 = vpack.c.bf16 %v1905_v26, %v1904_v25 }
 0x1c2   : > { %v1882_v27 = vmul.f32 0.01, %v1850_v21  ;;  %v1851_v28 = vadd.f32 %v2913_v4, %v1775_v22  ;;  %vm1866_vm13 = vcmp.gt.f32.partialorder %v1850_v21, 0.0  ;;  %v1777_v31 = vadd.f32 %v1776_v23, %v1733_v24 }
 0x1c3   : > { %v1735_v17 = vpop.f32.mrf.mxu1  ;;  %1962 = vst [vmem:[%s2923_s12 + $0x30] sm:$0xff] %v2268_v30 }
 0x1c4   : > { %vm1867_vm14 = vcmp.gt.f32.partialorder %v1851_v28, 0.0  ;;  %v1883_v32 = vmul.f32 0.01, %v1851_v28  ;;  %v1779_v33 = vadd.f32 %v1778_v29, %v1735_v17  ;;  %v1858_v35 = vadd.f32 %v2917_v44, %v1777_v31 }
 0x1c5   : > { %v1898_v36 = vsel %vm1866_vm13, %v1850_v21, %v1882_v27 }
 0x1c6   : > { %v1899_v37 = vsel %vm1867_vm14, %v1851_v28, %v1883_v32  ;;  %v1859_v38 = vadd.f32 %v2917_v44, %v1779_v33  ;;  %vm1874_vm15 = vcmp.gt.f32.partialorder %v1858_v35, 0.0  ;;  %v1890_v4 = vmul.f32 0.01, %v1858_v35  ;;  %v1986_v44 = vld [vmem:[%s2923_s12] sm:$0xff] (%p2415_p6)  ;;  %v1990_v46 = vld [vmem:[%s2923_s12 + $0x10] sm:$0xff] (%p2415_p6) }
 0x1c7   : > { %v2265_v39 = vpack.c.bf16 %v1899_v37, %v1898_v36  ;;  %1987 = vst [vmem:[%s1973_s28] sm:$0xff] (%p2415_p6), %v1986_v44  ;;  %1991 = vst [vmem:[%s1973_s28 + $0x10] sm:$0xff] (%p2415_p6), %v1990_v46 }
 0x1c8   : > { %vm1875_vm0 = vcmp.gt.f32.partialorder %v1859_v38, 0.0  ;;  %v1891_v40 = vmul.f32 0.01, %v1859_v38  ;;  %v1906_v41 = vsel %vm1874_vm15, %v1858_v35, %v1890_v4 }
 0x1c9   : > { %1959 = vst [vmem:[%s2923_s12 + $0x18] sm:$0xff] %v2265_v39  ;;  %1970 = sbr.rel (!%p2415_p6) target bundleno = 470 (0x1d6), region = 67 }
 0x1ca   : > { %v1907_v42 = vsel %vm1875_vm0, %v1859_v38, %v1891_v40  ;;  %v1998_v50 = vld [vmem:[%s2923_s12 + $0x30] sm:$0xff] (%p2415_p6) }
 0x1cb   : > { %v2269_v43 = vpack.c.bf16 %v1907_v42, %v1906_v41  ;;  %1999 = vst [vmem:[%s1973_s28 + $0xd0] sm:$0xff] (%p2415_p6), %v1998_v50 }
 0x1cd   : > { %1963 = vst [vmem:[%s2923_s12 + $0x38] sm:$0xff] %v2269_v43 }
 0x1d0   : > { %v1992_v47 = vld [vmem:[%s2923_s12 + $0x18] sm:$0xff] }
 0x1d1   : > { %1993 = vst [vmem:[%s1973_s28 + $0x18] sm:$0xff] %v1992_v47 }
 0x1d4   : > { %v2000_v51 = vld [vmem:[%s2923_s12 + $0x38] sm:$0xff] }
 0x1d5   : > { %2001 = vst [vmem:[%s1973_s28 + $0xd8] sm:$0xff] %v2000_v51 }
 0x1d6 PF: > { %s13_s16 = sadd.s32 1, %s2357_s16   ;;  %s2979_s12 = smov %s2345_s13 }
 0x1d7   : > { %p10_p11 = scmp.ge.s32.totalorder %s13_s16, 8   ;;  %s2980_s13 = smov %s2420_s22 }
 0x1d8   : > { %s2981_s14 = smov %s2353_s15  ;;  %s2982_s15 = smov %s2984_s17 }
 0x1d9   :  { %12 = sbr.rel (!%p10_p11) target bundleno = 3 (0x3), region = 124 }

</bundles_post_ra>
